<compile_context>
chip_gen: v6e
topology: v6e:2x2x1
jax: 0.10.0
libtpu: 0.0.40
codegen_flags: <defaults>
</compile_context>

<pallas_src>
import functools

import jax
import jax.numpy as jnp
import numpy as np
from jax.experimental import pallas as pl
from jax.experimental.pallas import tpu as pltpu


def _round_up(x, m):
    return ((x + m - 1) // m) * m


def _vmem_capacity_bytes():
    """Per-core VMEM capacity; conservative 64 MiB (v7x-sized) fallback."""
    try:
        info = pltpu.get_tpu_info()
        cap = int(getattr(info, "vmem_capacity_bytes", 0) or 0)
        if cap > 0:
            return cap
    except Exception:
        pass
    return 64 * 1024 * 1024


def _pick_attention_tile(np_, budget):
    """Largest row-tile tm_a dividing Np whose working set fits the budget."""
    cands = sorted({c for c in (np_, 1024, 512, 256, 128) if c <= np_ and np_ % c == 0},
                   reverse=True)
    for tm in cands:
        # adj f32 (2 bufs) + U bf16 (2 bufs) + ~3 f32 [tm, Np] temporaries + f2t row
        need = tm * np_ * (2 * 4 + 2 * 2 + 3 * 4) + 2 * np_ * 4 + (1 << 20)
        if need <= budget:
            return tm
    # TODO(synk): very large N needs column tiling of the softmax (online softmax).
    return 128


def _pick_hop_tiles(np_, fp, budget):
    """(tm, tk, resident_update) for the hop matmul, preferring a resident update."""
    cands = sorted({c for c in (np_, 1024, 512, 256, 128) if c <= np_ and np_ % c == 0},
                   reverse=True)
    for resident in (True, False):
        for tm in cands:
            for tk in cands:
                upd = 2 * np_ * fp * 4 if resident else 2 * tk * fp * 4
                need = (2 * tm * tk * 2          # U tile, bf16, double-buffered
                        + upd                    # update input
                        + 2 * tm * fp * 4 * 2    # feature + prev prime inputs
                        + 2 * tm * fp * 4 * 2    # update / prime outputs (f32)
                        + 2 * tm * 4             # rowsum
                        + (1 << 20))             # headroom for internal scratch
                if need <= budget:
                    return tm, tk, resident
    return 128, 128, False


# --------------------------- attention + masked softmax ----------------------------
def _attention_kernel(f1_ref, f2t_ref, adj_ref, u_ref, rowsum_ref, *, leaky_slope):
    """Row-tiled attention: each program owns a [tm, Np] slab of e/U/adj.

    U_ij     = softmax over the nonzero pattern of adj (torch.sparse.softmax, dim=1)
    rowsum_i = 0.5 * sum_j adj_ij * U_ij      (P = 0.5*U folded in)
    """
    f1 = f1_ref[...]                                   # [tm, 1]
    f2t = f2t_ref[...]                                 # [1, Np]
    adj = adj_ref[...]                                 # [tm, Np]

    e = f1 + f2t                                       # [tm, Np]
    e = jnp.where(e > 0, e, leaky_slope * e)           # LeakyReLU(0.2)

    mask = adj != 0.0
    e_m = jnp.where(mask, e, -1e30)                    # Python literal -> no captured const
    row_max = jnp.max(e_m, axis=1, keepdims=True)      # [tm, 1]
    # For rows with >= 1 edge, masked entries underflow to exactly 0 in exp(),
    # so no extra NxN select is needed after the exponential.
    p = jnp.exp(e_m - row_max)
    denom = jnp.sum(p, axis=1, keepdims=True)          # [tm, 1]

    inv = pl.reciprocal(denom, approx=True)            # EUP
    inv = inv * (2.0 - denom * inv)                    # one Newton step ([tm,1] only)
    # Empty rows (N-padding / isolated nodes): torch's sparse softmax has no values
    # there -> force the whole U row to 0 instead of a uniform 1/N row.
    inv = jnp.where(row_max > -1e29, inv, 0.0)

    # rowsum in f32 (before the bf16 cast of U):  0.5 * sum_j adj * (p*inv)
    rowsum_ref[...] = (0.5 * inv) * jnp.sum(adj * p, axis=1, keepdims=True)
    u_ref[...] = (p * inv).astype(u_ref.dtype)         # bf16 store (lane-dense)


# --------------------------------- one hop step -------------------------------------
def _hop_step_kernel(scal_ref, u_ref, upd_ref, feat_ref, prime_ref, rowsum_ref,
                     upd_out_ref, prime_out_ref, *, tk, resident_update):
    """update' = U @ update (bf16 MXU, f32 accumulation into the resident output block)
    + fused even/odd/cheb/coe combination at the last k step.

    scal_ref : SMEM f32[4] = [coe0, coe1, coe2, cumulative cheb scale for this step]
    """
    k = pl.program_id(1)

    @pl.when(k == 0)
    def _init():
        upd_out_ref[...] = jnp.zeros_like(upd_out_ref)

    if resident_update:
        # update is a single resident (Np, Fp) block; slice the current k panel.
        off = pl.multiple_of(k * tk, 128)
        upd_blk = upd_ref[pl.ds(off, tk), :]
    else:
        upd_blk = upd_ref[...]

    upd_out_ref[...] += jnp.dot(u_ref[...], upd_blk.astype(jnp.bfloat16),
                                preferred_element_type=jnp.float32)

    @pl.when(k == pl.num_programs(1) - 1)
    def _finalize():
        coe0 = scal_ref[0]
        coe1 = scal_ref[1]
        coe2 = scal_ref[2]
        rs_scale = scal_ref[3]
        update = upd_out_ref[...]                      # [tm, Fp] f32
        feat = feat_ref[...]                           # [tm, Fp]
        rowsum = rowsum_ref[...] * rs_scale            # [tm, 1]
        feat_even = coe0 * feat + update
        feat_odd = update - feat_even * rowsum         # einsum('ij,i->ij', even, rowsum)
        feat_fuse = coe1 * feat_even + (1.0 - coe1) * feat_odd
        prime_out_ref[...] = coe2 * prime_ref[...] + (1.0 - coe2) * feat_fuse


# ------------------------------------ wrapper ---------------------------------------
def noflayer_forward(feature, adj_dense, a, temp, cheb, *, hop, leaky_slope=0.2):
    f32 = jnp.float32
    N, F = feature.shape
    Np = _round_up(max(N, 8), 128)
    Fp = _round_up(max(F, 1), 128)

    feature = feature.astype(f32)
    adj_dense = adj_dense.astype(f32)
    a = a.astype(f32)

    # ---- pad to lane-dense shapes (sliced back at the end) -------------------------
    feat_p = jnp.zeros((Np, Fp), f32).at[:N, :F].set(feature)
    adj_p = jnp.zeros((Np, Np), f32).at[:N, :N].set(adj_dense)

    # ---- tiny parameter glue --------------------------------------------------------
    coe = jax.nn.sigmoid(temp).astype(f32)
    cheb_coe = jax.nn.sigmoid(cheb).astype(f32)
    if hop > 1:   # cumulative cheb scaling of rowsum: step s uses prod(cheb_coe[:s])
        rs_scales = jnp.concatenate(
            [jnp.ones((1,), f32), jnp.cumprod(cheb_coe[:hop - 1])])
    else:
        rs_scales = jnp.ones((1,), f32)

    # stacked attention vector -> one matmul pass gives both projections
    a12 = jnp.zeros((Fp, 2), f32).at[:F, 0].set(a[:F, 0]).at[:F, 1].set(a[F:2 * F, 0])
    f12 = jnp.dot(feat_p, a12, precision=jax.lax.Precision.HIGHEST)   # [Np, 2]
    f1 = f12[:, 0:1]                                                  # [Np, 1]
    f2t = f12[:, 1].reshape(1, Np)                                    # [1, Np]

    # ---- generation-aware VMEM budgeting --------------------------------------------
    cap = _vmem_capacity_bytes()
    vmem_limit = min(int(cap * 0.85), 112 * 1024 * 1024)
    budget = int(cap * 0.55)

    # ---- attention / masked softmax (row-tiled, megacore-parallel) ------------------
    tm_a = _pick_attention_tile(Np, budget)
    attn = pl.pallas_call(
        functools.partial(_attention_kernel, leaky_slope=leaky_slope),
        out_shape=(jax.ShapeDtypeStruct((Np, Np), jnp.bfloat16),      # U (bf16)
                   jax.ShapeDtypeStruct((Np, 1), f32)),               # rowsum (f32)
        grid_spec=pltpu.PrefetchScalarGridSpec(
            num_scalar_prefetch=0,
            grid=(Np // tm_a,),
            in_specs=[
                pl.BlockSpec((tm_a, 1), lambda i: (i, 0)),      # f1 rows
                pl.BlockSpec((1, Np), lambda i: (0, 0)),        # f2^T (all columns)
                pl.BlockSpec((tm_a, Np), lambda i: (i, 0)),     # adj rows
            ],
            out_specs=(
                pl.BlockSpec((tm_a, Np), lambda i: (i, 0)),     # U rows
                pl.BlockSpec((tm_a, 1), lambda i: (i, 0)),      # rowsum
            ),
        ),
        compiler_params=pltpu.CompilerParams(
            dimension_semantics=("parallel",),
            vmem_limit_bytes=vmem_limit),
    )
    # TODO(synk): adj could also be streamed as bf16 (mask + rowsum only) for another
    # ~1.3x on the attention kernel if weighted graphs tolerate the rounding.
    U, rowsum = attn(f1, f2t, adj_p)

    # ---- hop lifting loop: one tiled-matmul pallas_call per (sequential) hop step ---
    tm, tk, resident = _pick_hop_tiles(Np, Fp, budget)
    if resident:
        upd_spec = pl.BlockSpec((Np, Fp), lambda i, k: (0, 0))   # DMA'd once per step
    else:
        upd_spec = pl.BlockSpec((tk, Fp), lambda i, k: (k, 0))   # streamed fallback

    hop_call = pl.pallas_call(
        functools.partial(_hop_step_kernel, tk=tk, resident_update=resident),
        out_shape=(jax.ShapeDtypeStruct((Np, Fp), f32),          # new update
                   jax.ShapeDtypeStruct((Np, Fp), f32)),         # new feat_prime
        grid_spec=pltpu.PrefetchScalarGridSpec(
            num_scalar_prefetch=0,
            grid=(Np // tm, Np // tk),
            in_specs=[
                pl.BlockSpec(memory_space=pltpu.MemorySpace.SMEM),   # [coe0..2, rs_scale]
                pl.BlockSpec((tm, tk), lambda i, k: (i, k)),         # U (bf16)
                upd_spec,                                            # update
                pl.BlockSpec((tm, Fp), lambda i, k: (i, 0)),         # feature
                pl.BlockSpec((tm, Fp), lambda i, k: (i, 0)),         # feat_prime (prev)
                pl.BlockSpec((tm, 1), lambda i, k: (i, 0)),          # rowsum
            ],
            out_specs=(
                pl.BlockSpec((tm, Fp), lambda i, k: (i, 0)),
                pl.BlockSpec((tm, Fp), lambda i, k: (i, 0)),
            ),
        ),
        compiler_params=pltpu.CompilerParams(
            dimension_semantics=("parallel", "arbitrary"),
            vmem_limit_bytes=vmem_limit),
    )

    update = feat_p
    prime = feat_p
    # TODO(synk): for tiny/latency-bound graphs the hop loop could be fused into a
    # single pallas_call (hop as a leading arbitrary grid axis + ping-pong buffers).
    for step in range(hop):       # hop is small & static -> Python loop over calls
        scal = jnp.stack([coe[0], coe[1], coe[2], rs_scales[step]]).astype(f32)
        update, prime = hop_call(scal, U, update, feat_p, prime, rowsum)

    return prime[:N, :F]


# ----------------------------- pure-JAX reference -----------------------------------
def ref_forward(feature, adj, a, temp, cheb, *, hop, slope=0.2):
    hp = jax.lax.Precision.HIGHEST
    F_ = feature.shape[1]
    f1 = jnp.dot(feature, a[:F_, :], precision=hp)
    f2 = jnp.dot(feature, a[F_:, :], precision=hp)
    e = f1 + f2.T
    e = jnp.where(e > 0, e, slope * e)
    mask = adj != 0.0
    e_m = jnp.where(mask, e, -1e30)
    p = jnp.exp(e_m - jnp.max(e_m, axis=1, keepdims=True))
    p = jnp.where(mask, p, 0.0)
    U = p / jnp.sum(p, axis=1, keepdims=True)
    rowsum = 0.5 * jnp.sum(adj * U, axis=1, keepdims=True)
    coe = jax.nn.sigmoid(temp)
    cheb_coe = jax.nn.sigmoid(cheb)
    update, feat_prime = feature, feature
    for step in range(hop):
        update = jnp.dot(U, update, precision=hp)
        feat_even = coe[0] * feature + update
        if step >= 1:
            rowsum = cheb_coe[step - 1] * rowsum
        feat_odd = update - feat_even * rowsum
        feat_fuse = coe[1] * feat_even + (1 - coe[1]) * feat_odd
        if step == 0:
            feat_prime = coe[2] * feature + (1 - coe[2]) * feat_fuse
        else:
            feat_prime = coe[2] * feat_prime + (1 - coe[2]) * feat_fuse
    return feat_prime


if __name__ == "__main__":
    # Small synthetic instance: nnode=300, in_features=32, hop=3, alpha_=None
    # (N=300 pads to 384 -> exercises padding, empty-row guard, multi-hop loop.)
    N, F, HOP, ALP = 300, 32, 3, 0.9
    key = jax.random.PRNGKey(0)
    k_feat, k_adj, k_a = jax.random.split(key, 3)

    feature = jax.random.normal(k_feat, (N, F), dtype=jnp.float32)
    h0 = feature  # TODO(synk): h0 is accepted by forward() but never used downstream.

    # random sparse-pattern adjacency (dense values, 0 == no edge) + self loops
    adj = (jax.random.uniform(k_adj, (N, N)) < 0.3).astype(jnp.float32)
    adj = adj + jnp.eye(N, dtype=jnp.float32)        # every row has >= 1 entry

    # parameter `a`: xavier_uniform(gain=1.414) on shape (2F, 1)
    bound = 1.414 * float(np.sqrt(6.0 / (2 * F + 1)))
    a = jax.random.uniform(k_a, (2 * F, 1), minval=-bound, maxval=bound,
                           dtype=jnp.float32)

    # temp: filled with 0.0 ; cheb: alp*(1-alp)^k, last entry (1-alp)^2
    temp = jnp.zeros((HOP + 1,), dtype=jnp.float32)
    cheb_np = np.array([ALP * (1 - ALP) ** k for k in range(HOP + 1)],
                       dtype=np.float32)
    cheb_np[-1] = (1 - ALP) ** 2
    cheb = jnp.asarray(cheb_np)

    fwd = jax.jit(functools.partial(noflayer_forward, hop=HOP))
    out = jax.block_until_ready(fwd(feature, adj, a, temp, cheb))

    ref = ref_forward(feature, adj, a, temp, cheb, hop=HOP)
    # bf16 U / bf16 matmul operands (f32 accumulation) -> relaxed tolerance vs f32 ref.
    np.testing.assert_allclose(np.asarray(out), np.asarray(ref),
                               rtol=2e-2, atol=2e-2)
    print("KERNEL_OK")
</pallas_src>

<mosaic_0001>
module attributes {stable_mosaic.version = 11 : i64} {
  func.func @_attention_kernel(%arg0: i32, %arg1: memref<384x1xf32, #tpu.memory_space<vmem>>, %arg2: memref<1x384xf32, #tpu.memory_space<vmem>>, %arg3: memref<384x384xf32, #tpu.memory_space<vmem>>, %arg4: memref<384x384xbf16, #tpu.memory_space<vmem>>, %arg5: memref<384x1xf32, #tpu.memory_space<vmem>>) attributes {dimension_semantics = [#tpu.dimension_semantics<parallel>], iteration_bounds = array<i64: 1>, scalar_prefetch = 0 : i64, scratch_operands = 0 : i64, tpu.core_type = #tpu.core_type<tc>, window_params = [{transform_indices = @transform_0, window_bounds = array<i64: 384, 1>}, {pipeline_mode = #tpu.pipeline_mode<synchronous>, transform_indices = @transform_1, window_bounds = array<i64: 1, 384>}, {transform_indices = @transform_2, window_bounds = array<i64: 384, 384>}, {transform_indices = @transform_3, window_bounds = array<i64: 384, 384>}, {transform_indices = @transform_4, window_bounds = array<i64: 384, 1>}]} {
    %c0 = arith.constant 0 : index
    %c0_0 = arith.constant 0 : index
    %0 = vector.load %arg1[%c0, %c0_0] : memref<384x1xf32, #tpu.memory_space<vmem>>, vector<384x1xf32>
    %c0_1 = arith.constant 0 : index
    %c0_2 = arith.constant 0 : index
    %1 = vector.load %arg2[%c0_1, %c0_2] : memref<1x384xf32, #tpu.memory_space<vmem>>, vector<1x384xf32>
    %c0_3 = arith.constant 0 : index
    %c0_4 = arith.constant 0 : index
    %2 = vector.load %arg3[%c0_3, %c0_4] : memref<384x384xf32, #tpu.memory_space<vmem>>, vector<384x384xf32>
    %3 = vector.broadcast %0 : vector<384x1xf32> to vector<384x384xf32>
    %4 = vector.broadcast %1 : vector<1x384xf32> to vector<384x384xf32>
    %5 = arith.addf %3, %4 : vector<384x384xf32>
    %cst = arith.constant 0.000000e+00 : f32
    %6 = vector.broadcast %cst : f32 to vector<384x384xf32>
    %7 = arith.cmpf ogt, %5, %6 : vector<384x384xf32>
    %cst_5 = arith.constant 2.000000e-01 : f32
    %8 = vector.broadcast %cst_5 : f32 to vector<384x384xf32>
    %9 = arith.mulf %8, %5 : vector<384x384xf32>
    %10 = arith.select %7, %5, %9 : vector<384x384xi1>, vector<384x384xf32>
    %cst_6 = arith.constant 0.000000e+00 : f32
    %11 = vector.broadcast %cst_6 : f32 to vector<384x384xf32>
    %12 = arith.cmpf one, %2, %11 : vector<384x384xf32>
    %cst_7 = arith.constant -1.000000e+30 : f32
    %13 = vector.broadcast %cst_7 : f32 to vector<384x384xf32>
    %14 = arith.select %12, %10, %13 : vector<384x384xi1>, vector<384x384xf32>
    %cst_8 = arith.constant dense<0xFF800000> : vector<384xf32>
    %15 = vector.multi_reduction <maximumf>, %14, %cst_8 [1] : vector<384x384xf32> to vector<384xf32>
    %16 = vector.shape_cast %15 : vector<384xf32> to vector<384x1xf32>
    %17 = vector.broadcast %16 : vector<384x1xf32> to vector<384x384xf32>
    %18 = arith.subf %14, %17 : vector<384x384xf32>
    %19 = math.exp %18 : vector<384x384xf32>
    %cst_9 = arith.constant dense<0.000000e+00> : vector<384xf32>
    %20 = vector.multi_reduction <add>, %19, %cst_9 [1] : vector<384x384xf32> to vector<384xf32>
    %21 = vector.shape_cast %20 : vector<384xf32> to vector<384x1xf32>
    %22 = tpu.reciprocal %21 {approx = true} : vector<384x1xf32> -> vector<384x1xf32>
    %23 = arith.mulf %21, %22 : vector<384x1xf32>
    %cst_10 = arith.constant 2.000000e+00 : f32
    %24 = vector.broadcast %cst_10 : f32 to vector<384x1xf32>
    %25 = arith.subf %24, %23 : vector<384x1xf32>
    %26 = arith.mulf %22, %25 : vector<384x1xf32>
    %cst_11 = arith.constant -1.000000e+29 : f32
    %27 = vector.broadcast %cst_11 : f32 to vector<384x1xf32>
    %28 = arith.cmpf ogt, %16, %27 : vector<384x1xf32>
    %cst_12 = arith.constant 0.000000e+00 : f32
    %29 = vector.broadcast %cst_12 : f32 to vector<384x1xf32>
    %30 = arith.select %28, %26, %29 : vector<384x1xi1>, vector<384x1xf32>
    %cst_13 = arith.constant 5.000000e-01 : f32
    %31 = vector.broadcast %cst_13 : f32 to vector<384x1xf32>
    %32 = arith.mulf %31, %30 : vector<384x1xf32>
    %33 = arith.mulf %2, %19 : vector<384x384xf32>
    %cst_14 = arith.constant dense<0.000000e+00> : vector<384xf32>
    %34 = vector.multi_reduction <add>, %33, %cst_14 [1] : vector<384x384xf32> to vector<384xf32>
    %35 = vector.shape_cast %34 : vector<384xf32> to vector<384x1xf32>
    %36 = arith.mulf %32, %35 : vector<384x1xf32>
    %c0_15 = arith.constant 0 : index
    %c0_16 = arith.constant 0 : index
    %37 = vector.load %arg5[%c0_15, %c0_16] : memref<384x1xf32, #tpu.memory_space<vmem>>, vector<384x1xf32>
    tpu.vector_store %arg5[%c0_15, %c0_16], %36 {strides = array<i32>} : memref<384x1xf32, #tpu.memory_space<vmem>>, vector<384x1xf32>,
    %38 = vector.broadcast %30 : vector<384x1xf32> to vector<384x384xf32>
    %39 = arith.mulf %19, %38 : vector<384x384xf32>
    %40 = arith.truncf %39 : vector<384x384xf32> to vector<384x384xbf16>
    %c0_17 = arith.constant 0 : index
    %c0_18 = arith.constant 0 : index
    %41 = vector.load %arg4[%c0_17, %c0_18] : memref<384x384xbf16, #tpu.memory_space<vmem>>, vector<384x384xbf16>
    tpu.vector_store %arg4[%c0_17, %c0_18], %40 {strides = array<i32>} : memref<384x384xbf16, #tpu.memory_space<vmem>>, vector<384x384xbf16>,
    return
  }
  func.func @transform_0(%arg0: i32) -> (i32, i32) {
    %c0_i32 = arith.constant 0 : i32
    %c0_i32_0 = arith.constant 0 : i32
    return %arg0, %c0_i32 : i32, i32
  }
  func.func @transform_1(%arg0: i32) -> (i32, i32) {
    %c0_i32 = arith.constant 0 : i32
    %c0_i32_0 = arith.constant 0 : i32
    %c0_i32_1 = arith.constant 0 : i32
    return %c0_i32, %c0_i32_0 : i32, i32
  }
  func.func @transform_2(%arg0: i32) -> (i32, i32) {
    %c0_i32 = arith.constant 0 : i32
    %c0_i32_0 = arith.constant 0 : i32
    return %arg0, %c0_i32 : i32, i32
  }
  func.func @transform_3(%arg0: i32) -> (i32, i32) {
    %c0_i32 = arith.constant 0 : i32
    %c0_i32_0 = arith.constant 0 : i32
    return %arg0, %c0_i32 : i32, i32
  }
  func.func @transform_4(%arg0: i32) -> (i32, i32) {
    %c0_i32 = arith.constant 0 : i32
    %c0_i32_0 = arith.constant 0 : i32
    return %arg0, %c0_i32 : i32, i32
  }
}

module attributes {stable_mosaic.version = 11 : i64} {
  func.func @_hop_step_kernel(%arg0: i32, %arg1: i32, %arg2: memref<4xf32, #tpu.memory_space<smem>>, %arg3: memref<384x384xbf16, #tpu.memory_space<vmem>>, %arg4: memref<384x128xf32, #tpu.memory_space<vmem>>, %arg5: memref<384x128xf32, #tpu.memory_space<vmem>>, %arg6: memref<384x128xf32, #tpu.memory_space<vmem>>, %arg7: memref<384x1xf32, #tpu.memory_space<vmem>>, %arg8: memref<384x128xf32, #tpu.memory_space<vmem>>, %arg9: memref<384x128xf32, #tpu.memory_space<vmem>>) attributes {dimension_semantics = [#tpu.dimension_semantics<parallel>, #tpu.dimension_semantics<arbitrary>], iteration_bounds = array<i64: 1, 1>, scalar_prefetch = 0 : i64, scratch_operands = 0 : i64, tpu.core_type = #tpu.core_type<tc>, window_params = [{transform_indices = @transform_0, window_bounds = array<i64: 4>}, {transform_indices = @transform_1, window_bounds = array<i64: 384, 384>}, {pipeline_mode = #tpu.pipeline_mode<synchronous>, transform_indices = @transform_2, window_bounds = array<i64: 384, 128>}, {transform_indices = @transform_3, window_bounds = array<i64: 384, 128>}, {transform_indices = @transform_4, window_bounds = array<i64: 384, 128>}, {transform_indices = @transform_5, window_bounds = array<i64: 384, 1>}, {transform_indices = @transform_6, window_bounds = array<i64: 384, 128>}, {transform_indices = @transform_7, window_bounds = array<i64: 384, 128>}]} {
    %c0_i32 = arith.constant 0 : i32
    %0 = arith.cmpi eq, %arg1, %c0_i32 : i32
    %1 = arith.extui %0 : i1 to i32
    %c0_i32_0 = arith.constant 0 : i32
    %2 = arith.cmpi ne, %1, %c0_i32_0 : i32
    scf.if %2 {
      %cst_9 = arith.constant 0.000000e+00 : f32
      %16 = vector.broadcast %cst_9 : f32 to vector<384x128xf32>
      %c0_10 = arith.constant 0 : index
      %c0_11 = arith.constant 0 : index
      %17 = vector.load %arg8[%c0_10, %c0_11] : memref<384x128xf32, #tpu.memory_space<vmem>>, vector<384x128xf32>
      tpu.vector_store %arg8[%c0_10, %c0_11], %16 {strides = array<i32>} : memref<384x128xf32, #tpu.memory_space<vmem>>, vector<384x128xf32>,
    } else {
    }
    %c384_i32 = arith.constant 384 : i32
    %3 = arith.muli %arg1, %c384_i32 : i32
    %4 = tpu.assume_multiple %3, 128 : i32
    %5 = arith.index_cast %4 : i32 to index
    %c0 = arith.constant 0 : index
    %6 = vector.load %arg4[%5, %c0] : memref<384x128xf32, #tpu.memory_space<vmem>>, vector<384x128xf32>
    %c0_1 = arith.constant 0 : index
    %c0_2 = arith.constant 0 : index
    %7 = vector.load %arg8[%c0_1, %c0_2] : memref<384x128xf32, #tpu.memory_space<vmem>>, vector<384x128xf32>
    %c0_3 = arith.constant 0 : index
    %c0_4 = arith.constant 0 : index
    %8 = vector.load %arg3[%c0_3, %c0_4] : memref<384x384xbf16, #tpu.memory_space<vmem>>, vector<384x384xbf16>
    %9 = arith.truncf %6 : vector<384x128xf32> to vector<384x128xbf16>
    %cst = arith.constant dense<0.000000e+00> : vector<384x128xf32>
    %10 = tpu.matmul %8, %9, %cst {dimension_numbers = #tpu.dot_dimension_numbers<[1], [0], [0], [1], [0, 0, 1, 1], [], []>} : vector<384x384xbf16>, vector<384x128xbf16>, vector<384x128xf32> -> vector<384x128xf32>
    %11 = arith.addf %7, %10 : vector<384x128xf32>
    %c0_5 = arith.constant 0 : index
    %c0_6 = arith.constant 0 : index
    %12 = vector.load %arg8[%c0_5, %c0_6] : memref<384x128xf32, #tpu.memory_space<vmem>>, vector<384x128xf32>
    tpu.vector_store %arg8[%c0_5, %c0_6], %11 {strides = array<i32>} : memref<384x128xf32, #tpu.memory_space<vmem>>, vector<384x128xf32>,
    %c0_i32_7 = arith.constant 0 : i32
    %13 = arith.cmpi eq, %arg1, %c0_i32_7 : i32
    %14 = arith.extui %13 : i1 to i32
    %c0_i32_8 = arith.constant 0 : i32
    %15 = arith.cmpi ne, %14, %c0_i32_8 : i32
    scf.if %15 {
      %c0_9 = arith.constant 0 : index
      %16 = memref.load %arg2[%c0_9] : memref<4xf32, #tpu.memory_space<smem>>
      %c1 = arith.constant 1 : index
      %17 = memref.load %arg2[%c1] : memref<4xf32, #tpu.memory_space<smem>>
      %c2 = arith.constant 2 : index
      %18 = memref.load %arg2[%c2] : memref<4xf32, #tpu.memory_space<smem>>
      %c3 = arith.constant 3 : index
      %19 = memref.load %arg2[%c3] : memref<4xf32, #tpu.memory_space<smem>>
      %c0_10 = arith.constant 0 : index
      %c0_11 = arith.constant 0 : index
      %20 = vector.load %arg8[%c0_10, %c0_11] : memref<384x128xf32, #tpu.memory_space<vmem>>, vector<384x128xf32>
      %c0_12 = arith.constant 0 : index
      %c0_13 = arith.constant 0 : index
      %21 = vector.load %arg5[%c0_12, %c0_13] : memref<384x128xf32, #tpu.memory_space<vmem>>, vector<384x128xf32>
      %c0_14 = arith.constant 0 : index
      %c0_15 = arith.constant 0 : index
      %22 = vector.load %arg7[%c0_14, %c0_15] : memref<384x1xf32, #tpu.memory_space<vmem>>, vector<384x1xf32>
      %23 = vector.broadcast %19 : f32 to vector<384x1xf32>
      %24 = arith.mulf %22, %23 : vector<384x1xf32>
      %25 = vector.broadcast %16 : f32 to vector<384x128xf32>
      %26 = arith.mulf %25, %21 : vector<384x128xf32>
      %27 = arith.addf %26, %20 : vector<384x128xf32>
      %28 = vector.broadcast %24 : vector<384x1xf32> to vector<384x128xf32>
      %29 = arith.mulf %27, %28 : vector<384x128xf32>
      %30 = arith.subf %20, %29 : vector<384x128xf32>
      %31 = vector.broadcast %17 : f32 to vector<384x128xf32>
      %32 = arith.mulf %31, %27 : vector<384x128xf32>
      %cst_16 = arith.constant 1.000000e+00 : f32
      %33 = arith.subf %cst_16, %17 : f32
      %34 = vector.broadcast %33 : f32 to vector<384x128xf32>
      %35 = arith.mulf %34, %30 : vector<384x128xf32>
      %36 = arith.addf %32, %35 : vector<384x128xf32>
      %c0_17 = arith.constant 0 : index
      %c0_18 = arith.constant 0 : index
      %37 = vector.load %arg6[%c0_17, %c0_18] : memref<384x128xf32, #tpu.memory_space<vmem>>, vector<384x128xf32>
      %38 = vector.broadcast %18 : f32 to vector<384x128xf32>
      %39 = arith.mulf %38, %37 : vector<384x128xf32>
      %cst_19 = arith.constant 1.000000e+00 : f32
      %40 = arith.subf %cst_19, %18 : f32
      %41 = vector.broadcast %40 : f32 to vector<384x128xf32>
      %42 = arith.mulf %41, %36 : vector<384x128xf32>
      %43 = arith.addf %39, %42 : vector<384x128xf32>
      %c0_20 = arith.constant 0 : index
      %c0_21 = arith.constant 0 : index
      %44 = vector.load %arg9[%c0_20, %c0_21] : memref<384x128xf32, #tpu.memory_space<vmem>>, vector<384x128xf32>
      tpu.vector_store %arg9[%c0_20, %c0_21], %43 {strides = array<i32>} : memref<384x128xf32, #tpu.memory_space<vmem>>, vector<384x128xf32>,
    } else {
    }
    return
  }
  func.func @transform_0(%arg0: i32, %arg1: i32) -> i32 {
    %c0_i32 = arith.constant 0 : i32
    %c0_i32_0 = arith.constant 0 : i32
    return %c0_i32 : i32
  }
  func.func @transform_1(%arg0: i32, %arg1: i32) -> (i32, i32) {
    %c0_i32 = arith.constant 0 : i32
    return %arg0, %arg1 : i32, i32
  }
  func.func @transform_2(%arg0: i32, %arg1: i32) -> (i32, i32) {
    %c0_i32 = arith.constant 0 : i32
    %c0_i32_0 = arith.constant 0 : i32
    %c0_i32_1 = arith.constant 0 : i32
    return %c0_i32, %c0_i32_0 : i32, i32
  }
  func.func @transform_3(%arg0: i32, %arg1: i32) -> (i32, i32) {
    %c0_i32 = arith.constant 0 : i32
    %c0_i32_0 = arith.constant 0 : i32
    return %arg0, %c0_i32 : i32, i32
  }
  func.func @transform_4(%arg0: i32, %arg1: i32) -> (i32, i32) {
    %c0_i32 = arith.constant 0 : i32
    %c0_i32_0 = arith.constant 0 : i32
    return %arg0, %c0_i32 : i32, i32
  }
  func.func @transform_5(%arg0: i32, %arg1: i32) -> (i32, i32) {
    %c0_i32 = arith.constant 0 : i32
    %c0_i32_0 = arith.constant 0 : i32
    return %arg0, %c0_i32 : i32, i32
  }
  func.func @transform_6(%arg0: i32, %arg1: i32) -> (i32, i32) {
    %c0_i32 = arith.constant 0 : i32
    %c0_i32_0 = arith.constant 0 : i32
    return %arg0, %c0_i32 : i32, i32
  }
  func.func @transform_7(%arg0: i32, %arg1: i32) -> (i32, i32) {
    %c0_i32 = arith.constant 0 : i32
    %c0_i32_0 = arith.constant 0 : i32
    return %arg0, %c0_i32 : i32, i32
  }
}

module attributes {stable_mosaic.version = 11 : i64} {
  func.func @_hop_step_kernel(%arg0: i32, %arg1: i32, %arg2: memref<4xf32, #tpu.memory_space<smem>>, %arg3: memref<384x384xbf16, #tpu.memory_space<vmem>>, %arg4: memref<384x128xf32, #tpu.memory_space<vmem>>, %arg5: memref<384x128xf32, #tpu.memory_space<vmem>>, %arg6: memref<384x128xf32, #tpu.memory_space<vmem>>, %arg7: memref<384x1xf32, #tpu.memory_space<vmem>>, %arg8: memref<384x128xf32, #tpu.memory_space<vmem>>, %arg9: memref<384x128xf32, #tpu.memory_space<vmem>>) attributes {dimension_semantics = [#tpu.dimension_semantics<parallel>, #tpu.dimension_semantics<arbitrary>], iteration_bounds = array<i64: 1, 1>, scalar_prefetch = 0 : i64, scratch_operands = 0 : i64, tpu.core_type = #tpu.core_type<tc>, window_params = [{transform_indices = @transform_0, window_bounds = array<i64: 4>}, {transform_indices = @transform_1, window_bounds = array<i64: 384, 384>}, {pipeline_mode = #tpu.pipeline_mode<synchronous>, transform_indices = @transform_2, window_bounds = array<i64: 384, 128>}, {transform_indices = @transform_3, window_bounds = array<i64: 384, 128>}, {transform_indices = @transform_4, window_bounds = array<i64: 384, 128>}, {transform_indices = @transform_5, window_bounds = array<i64: 384, 1>}, {transform_indices = @transform_6, window_bounds = array<i64: 384, 128>}, {transform_indices = @transform_7, window_bounds = array<i64: 384, 128>}]} {
    %c0_i32 = arith.constant 0 : i32
    %0 = arith.cmpi eq, %arg1, %c0_i32 : i32
    %1 = arith.extui %0 : i1 to i32
    %c0_i32_0 = arith.constant 0 : i32
    %2 = arith.cmpi ne, %1, %c0_i32_0 : i32
    scf.if %2 {
      %cst_9 = arith.constant 0.000000e+00 : f32
      %16 = vector.broadcast %cst_9 : f32 to vector<384x128xf32>
      %c0_10 = arith.constant 0 : index
      %c0_11 = arith.constant 0 : index
      %17 = vector.load %arg8[%c0_10, %c0_11] : memref<384x128xf32, #tpu.memory_space<vmem>>, vector<384x128xf32>
      tpu.vector_store %arg8[%c0_10, %c0_11], %16 {strides = array<i32>} : memref<384x128xf32, #tpu.memory_space<vmem>>, vector<384x128xf32>,
    } else {
    }
    %c384_i32 = arith.constant 384 : i32
    %3 = arith.muli %arg1, %c384_i32 : i32
    %4 = tpu.assume_multiple %3, 128 : i32
    %5 = arith.index_cast %4 : i32 to index
    %c0 = arith.constant 0 : index
    %6 = vector.load %arg4[%5, %c0] : memref<384x128xf32, #tpu.memory_space<vmem>>, vector<384x128xf32>
    %c0_1 = arith.constant 0 : index
    %c0_2 = arith.constant 0 : index
    %7 = vector.load %arg8[%c0_1, %c0_2] : memref<384x128xf32, #tpu.memory_space<vmem>>, vector<384x128xf32>
    %c0_3 = arith.constant 0 : index
    %c0_4 = arith.constant 0 : index
    %8 = vector.load %arg3[%c0_3, %c0_4] : memref<384x384xbf16, #tpu.memory_space<vmem>>, vector<384x384xbf16>
    %9 = arith.truncf %6 : vector<384x128xf32> to vector<384x128xbf16>
    %cst = arith.constant dense<0.000000e+00> : vector<384x128xf32>
    %10 = tpu.matmul %8, %9, %cst {dimension_numbers = #tpu.dot_dimension_numbers<[1], [0], [0], [1], [0, 0, 1, 1], [], []>} : vector<384x384xbf16>, vector<384x128xbf16>, vector<384x128xf32> -> vector<384x128xf32>
    %11 = arith.addf %7, %10 : vector<384x128xf32>
    %c0_5 = arith.constant 0 : index
    %c0_6 = arith.constant 0 : index
    %12 = vector.load %arg8[%c0_5, %c0_6] : memref<384x128xf32, #tpu.memory_space<vmem>>, vector<384x128xf32>
    tpu.vector_store %arg8[%c0_5, %c0_6], %11 {strides = array<i32>} : memref<384x128xf32, #tpu.memory_space<vmem>>, vector<384x128xf32>,
    %c0_i32_7 = arith.constant 0 : i32
    %13 = arith.cmpi eq, %arg1, %c0_i32_7 : i32
    %14 = arith.extui %13 : i1 to i32
    %c0_i32_8 = arith.constant 0 : i32
    %15 = arith.cmpi ne, %14, %c0_i32_8 : i32
    scf.if %15 {
      %c0_9 = arith.constant 0 : index
      %16 = memref.load %arg2[%c0_9] : memref<4xf32, #tpu.memory_space<smem>>
      %c1 = arith.constant 1 : index
      %17 = memref.load %arg2[%c1] : memref<4xf32, #tpu.memory_space<smem>>
      %c2 = arith.constant 2 : index
      %18 = memref.load %arg2[%c2] : memref<4xf32, #tpu.memory_space<smem>>
      %c3 = arith.constant 3 : index
      %19 = memref.load %arg2[%c3] : memref<4xf32, #tpu.memory_space<smem>>
      %c0_10 = arith.constant 0 : index
      %c0_11 = arith.constant 0 : index
      %20 = vector.load %arg8[%c0_10, %c0_11] : memref<384x128xf32, #tpu.memory_space<vmem>>, vector<384x128xf32>
      %c0_12 = arith.constant 0 : index
      %c0_13 = arith.constant 0 : index
      %21 = vector.load %arg5[%c0_12, %c0_13] : memref<384x128xf32, #tpu.memory_space<vmem>>, vector<384x128xf32>
      %c0_14 = arith.constant 0 : index
      %c0_15 = arith.constant 0 : index
      %22 = vector.load %arg7[%c0_14, %c0_15] : memref<384x1xf32, #tpu.memory_space<vmem>>, vector<384x1xf32>
      %23 = vector.broadcast %19 : f32 to vector<384x1xf32>
      %24 = arith.mulf %22, %23 : vector<384x1xf32>
      %25 = vector.broadcast %16 : f32 to vector<384x128xf32>
      %26 = arith.mulf %25, %21 : vector<384x128xf32>
      %27 = arith.addf %26, %20 : vector<384x128xf32>
      %28 = vector.broadcast %24 : vector<384x1xf32> to vector<384x128xf32>
      %29 = arith.mulf %27, %28 : vector<384x128xf32>
      %30 = arith.subf %20, %29 : vector<384x128xf32>
      %31 = vector.broadcast %17 : f32 to vector<384x128xf32>
      %32 = arith.mulf %31, %27 : vector<384x128xf32>
      %cst_16 = arith.constant 1.000000e+00 : f32
      %33 = arith.subf %cst_16, %17 : f32
      %34 = vector.broadcast %33 : f32 to vector<384x128xf32>
      %35 = arith.mulf %34, %30 : vector<384x128xf32>
      %36 = arith.addf %32, %35 : vector<384x128xf32>
      %c0_17 = arith.constant 0 : index
      %c0_18 = arith.constant 0 : index
      %37 = vector.load %arg6[%c0_17, %c0_18] : memref<384x128xf32, #tpu.memory_space<vmem>>, vector<384x128xf32>
      %38 = vector.broadcast %18 : f32 to vector<384x128xf32>
      %39 = arith.mulf %38, %37 : vector<384x128xf32>
      %cst_19 = arith.constant 1.000000e+00 : f32
      %40 = arith.subf %cst_19, %18 : f32
      %41 = vector.broadcast %40 : f32 to vector<384x128xf32>
      %42 = arith.mulf %41, %36 : vector<384x128xf32>
      %43 = arith.addf %39, %42 : vector<384x128xf32>
      %c0_20 = arith.constant 0 : index
      %c0_21 = arith.constant 0 : index
      %44 = vector.load %arg9[%c0_20, %c0_21] : memref<384x128xf32, #tpu.memory_space<vmem>>, vector<384x128xf32>
      tpu.vector_store %arg9[%c0_20, %c0_21], %43 {strides = array<i32>} : memref<384x128xf32, #tpu.memory_space<vmem>>, vector<384x128xf32>,
    } else {
    }
    return
  }
  func.func @transform_0(%arg0: i32, %arg1: i32) -> i32 {
    %c0_i32 = arith.constant 0 : i32
    %c0_i32_0 = arith.constant 0 : i32
    return %c0_i32 : i32
  }
  func.func @transform_1(%arg0: i32, %arg1: i32) -> (i32, i32) {
    %c0_i32 = arith.constant 0 : i32
    return %arg0, %arg1 : i32, i32
  }
  func.func @transform_2(%arg0: i32, %arg1: i32) -> (i32, i32) {
    %c0_i32 = arith.constant 0 : i32
    %c0_i32_0 = arith.constant 0 : i32
    %c0_i32_1 = arith.constant 0 : i32
    return %c0_i32, %c0_i32_0 : i32, i32
  }
  func.func @transform_3(%arg0: i32, %arg1: i32) -> (i32, i32) {
    %c0_i32 = arith.constant 0 : i32
    %c0_i32_0 = arith.constant 0 : i32
    return %arg0, %c0_i32 : i32, i32
  }
  func.func @transform_4(%arg0: i32, %arg1: i32) -> (i32, i32) {
    %c0_i32 = arith.constant 0 : i32
    %c0_i32_0 = arith.constant 0 : i32
    return %arg0, %c0_i32 : i32, i32
  }
  func.func @transform_5(%arg0: i32, %arg1: i32) -> (i32, i32) {
    %c0_i32 = arith.constant 0 : i32
    %c0_i32_0 = arith.constant 0 : i32
    return %arg0, %c0_i32 : i32, i32
  }
  func.func @transform_6(%arg0: i32, %arg1: i32) -> (i32, i32) {
    %c0_i32 = arith.constant 0 : i32
    %c0_i32_0 = arith.constant 0 : i32
    return %arg0, %c0_i32 : i32, i32
  }
  func.func @transform_7(%arg0: i32, %arg1: i32) -> (i32, i32) {
    %c0_i32 = arith.constant 0 : i32
    %c0_i32_0 = arith.constant 0 : i32
    return %arg0, %c0_i32 : i32, i32
  }
}

</mosaic_0001>

<bundles_post_ra>
// kernel: noflayer_forward.5
= control target key start
LH: loop header
LB: loop body
LE: loop exit
PB: predicated region body
PF: predicated region fallthrough
CT: control target
= control target key end

     0   :  { %13 = vsyncpa [#allocation3], 0  ;;  %s4665_s0 = inlined_call_operand.vmem [shape: f32[4], index: 0, kind: input, shape index: {}]   ;;  %s4666_s1 = inlined_call_operand.vmem [shape: bf16[384,384], index: 1, kind: input, shape index: {}]   ;;  %s4667_s2 = inlined_call_operand.vmem [shape: f32[384,128], index: 2, kind: input, shape index: {}, may-alias: {2,3,4}]   ;;  %s4668_s3 = inlined_call_operand.vmem [shape: f32[384,128], index: 3, kind: input, shape index: {}, may-alias: {2,3,4}]   ;;  %s4669_s4 = inlined_call_operand.vmem [shape: f32[384,128], index: 4, kind: input, shape index: {}, may-alias: {2,3,4}]   ;;  %s4670_s5 = inlined_call_operand.vmem [shape: f32[384,1], index: 5, kind: input, shape index: {}]   ;;  %s4671_s6 = inlined_call_operand.vmem [shape: f32[384,128], index: 6, kind: output, shape index: {0}]   ;;  %s4672_s7 = inlined_call_operand.vmem [shape: f32[384,128], index: 7, kind: output, shape index: {1}]  }
   0x1   :  { %s20_s26 = sshll.u32 %s4665_s0, 4  ;;  %s21_s26 = int_to_ptr.vmem [resolvable:$true] %s20_s26 }
   0x2   :  { %s2575_s27 = scalar_lea.vmem %s21_s26, 16  ;;  %p2580_p1 = scmp.lt.s32.totalorder %s21_s26, %s21_s26 }
   0x3   :  { %p2576_p0 = scmp.ne.s32.totalorder %s21_s26, %s2575_s27  ;;  %p2581_p2 = scmp.lt.s32.totalorder %s2575_s27, %s2575_s27 }
   0x5   :  { %p2582_p3 = por %p2581_p2, %p2580_p1 }
   0x7   :  { %p2583_p4 = pnand %p2582_p3, %p2576_p0 }
   0x9   :  { %2586 = shalt.err (!%p2583_p4)
}
   0xa   :  { %s2589_s28 = smov [#allocation2]  }
   0xb   :  { %23 = dma.vmem_to_smem %s21_s26, 16, %s2589_s28, [#allocation3]  }
   0xc   :  { %2587 = dma.done.wait [#allocation3], 16  }
   0xd   :  { %2588 = vsyncadd [#allocation3], 4294967280 }
   0xe   :  { %37 = sfence }
   0xf   :  { %v107_v0 = vld [vmem:[%s4667_s2 + $0x70] sm:$0xff]  ;;  %v108_v1 = vld [vmem:[%s4667_s2 + $0x78] sm:$0xff]  ;;  %v105_v2 = vld [vmem:[%s4667_s2 + $0x60] sm:$0xff]  ;;  %v2590_v3 = vmov 0   ;;  %s2345_s13 = sld [smem:[#allocation2 + $0x3]] }
  0x10   :  { %693 = vmatprep.subr.bf16.mxu0 %v2590_v3  ;;  %2442 = vmatprep.subr.bf16.mxu1 %v2590_v3  ;;  %v292_v4 = vpack.c.bf16 %v108_v1, %v107_v0  ;;  %v106_v5 = vld [vmem:[%s4667_s2 + $0x68] sm:$0xff]  ;;  %v103_v7 = vld [vmem:[%s4667_s2 + $0x50] sm:$0xff]  ;;  %v104_v8 = vld [vmem:[%s4667_s2 + $0x58] sm:$0xff]  ;;  %s3248_s21 = sld [smem:[#allocation2 + $0x2]] }
  0x11   :  { %2478 = vset.pattern.permute.xlu1 %v2590_v3  ;;  %2477 = vset.pattern.permute.xlu0 %v2590_v3  ;;  %v291_v6 = vpack.c.bf16 %v106_v5, %v105_v2  ;;  %v290_v9 = vpack.c.bf16 %v104_v8, %v103_v7  ;;  %v101_v10 = vld [vmem:[%s4667_s2 + $0x40] sm:$0xff]  ;;  %v102_v11 = vld [vmem:[%s4667_s2 + $0x48] sm:$0xff]  ;;  %v99_v13 = vld [vmem:[%s4667_s2 + $0x30] sm:$0xff]  ;;  %s3252_s22 = sld [smem:[#allocation2 + $0x1]] }
  0x12   :  { %694 = vmatpush1.bf16.msra.mxu0 %v292_v4  ;;  %2458 = vmatpush1.bf16.msra.mxu1 %v292_v4  ;;  %v289_v12 = vpack.c.bf16 %v102_v11, %v101_v10  ;;  %v2481_v14 = vld [vmem:[%s4666_s1 + $0x4] ss:$12 sps:$4 sm:$0xff]   ;;  %v100_v15 = vld [vmem:[%s4667_s2 + $0x38] sm:$0xff]  ;;  %v2484_v16 = vld [vmem:[%s4666_s1 + $0x1b4] ss:$12 sps:$4 sm:$0xff]  }
  0x13   :  { %695 = vmatprep.subr.bf16.mxu0 %v2590_v3  ;;  %2443 = vmatprep.subr.bf16.mxu1 %v2590_v3  ;;  %v288_v17 = vpack.c.bf16 %v100_v15, %v99_v13  ;;  %v97_v18 = vld [vmem:[%s4667_s2 + $0x20] sm:$0xff]  ;;  %v98_v19 = vld [vmem:[%s4667_s2 + $0x28] sm:$0xff]  ;;  %v95_v21 = vld [vmem:[%s4667_s2 + $0x10] sm:$0xff] }
  0x14   :  { %725 = vmatprep.mubr.bf16.mxu0 %v2481_v14  ;;  %869 = vmatprep.mubr.bf16.mxu1 %v2484_v16  ;;  %v287_v20 = vpack.c.bf16 %v98_v19, %v97_v18  ;;  %v96_v22 = vld [vmem:[%s4667_s2 + $0x18] sm:$0xff]  ;;  %v93_v24 = vld [vmem:[%s4667_s2] sm:$0xff]  ;;  %v94_v25 = vld [vmem:[%s4667_s2 + $0x8] sm:$0xff] }
  0x15   :  { %v286_v23 = vpack.c.bf16 %v96_v22, %v95_v21  ;;  %v285_v26 = vpack.c.bf16 %v94_v25, %v93_v24  ;;  %v123_v27 = vld [vmem:[%s4667_s2 + $0xf0] sm:$0xff]  ;;  %v124_v28 = vld [vmem:[%s4667_s2 + $0xf8] sm:$0xff]  ;;  %v2712_v29 = vstv %s2345_s13  ;;  %v1342_v32 = vld [vmem:[%s4670_s5] sm:$0xff] }
  0x16   :  { %696 = vmatpush1.bf16.msra.mxu0 %v291_v6  ;;  %2459 = vmatpush1.bf16.msra.mxu1 %v291_v6  ;;  %v300_v30 = vpack.c.bf16 %v124_v28, %v123_v27  ;;  %v1344_v31 = vld [vmem:[%s4670_s5 + $0x10] sm:$0xff]  ;;  %v121_v33 = vld [vmem:[%s4667_s2 + $0xe0] sm:$0xff]  ;;  %v122_v34 = vld [vmem:[%s4667_s2 + $0xe8] sm:$0xff]  ;;  %v1391_v36 = vmul.f32 %v2712_v29, %v1342_v32  ;;  %s2116_s16 = ssub.f32 1.0, %s3248_s21 }
  0x17   :  { %697 = vmatprep.subr.bf16.mxu0 %v2590_v3  ;;  %2444 = vmatprep.subr.bf16.mxu1 %v2590_v3  ;;  %v1393_v35 = vmul.f32 %v2712_v29, %v1344_v31  ;;  %v1345_v37 = vld [vmem:[%s4670_s5 + $0x18] sm:$0xff]  ;;  %v1343_v38 = vld [vmem:[%s4670_s5 + $0x8] sm:$0xff]  ;;  %v299_v41 = vpack.c.bf16 %v122_v34, %v121_v33  ;;  %v119_v42 = vld [vmem:[%s4667_s2 + $0xd0] sm:$0xff]  ;;  %s1921_s0 = ssub.f32 1.0, %s3252_s22 }
  0x18   :  { %1538 = vperm.xlu0 %2477, %v1391_v36   ;;  %v1394_v39 = vmul.f32 %v2712_v29, %v1345_v37  ;;  %v1392_v40 = vmul.f32 %v2712_v29, %v1343_v38  ;;  %v120_v43 = vld [vmem:[%s4667_s2 + $0xd8] sm:$0xff]  ;;  %v1347_v44 = vld [vmem:[%s4670_s5 + $0x28] sm:$0xff]  ;;  %v1346_v45 = vld [vmem:[%s4670_s5 + $0x20] sm:$0xff] }
  0x19   :  { %1548 = vperm.xlu1 %2478, %v1393_v35   ;;  %v117_v46 = vld [vmem:[%s4667_s2 + $0xc0] sm:$0xff]  ;;  %v1396_v47 = vmul.f32 %v2712_v29, %v1347_v44  ;;  %v1395_v48 = vmul.f32 %v2712_v29, %v1346_v45  ;;  %v1349_v49 = vld [vmem:[%s4670_s5 + $0x38] sm:$0xff]  ;;  %v298_v50 = vpack.c.bf16 %v120_v43, %v119_v42  ;;  %v1348_v51 = vld [vmem:[%s4670_s5 + $0x30] sm:$0xff] }
  0x1a   :  { %698 = vmatpush1.bf16.msra.mxu0 %v290_v9  ;;  %2460 = vmatpush1.bf16.msra.mxu1 %v290_v9  ;;  %v118_v52 = vld [vmem:[%s4667_s2 + $0xc8] sm:$0xff]  ;;  %v1398_v53 = vmul.f32 %v2712_v29, %v1349_v49  ;;  %v1397_v54 = vmul.f32 %v2712_v29, %v1348_v51  ;;  %v1350_v57 = vld [vmem:[%s4670_s5 + $0x40] sm:$0xff]  ;;  %v115_v58 = vld [vmem:[%s4667_s2 + $0xb0] sm:$0xff] }
  0x1b   :  { %699 = vmatprep.subr.bf16.mxu0 %v2590_v3  ;;  %2445 = vmatprep.subr.bf16.mxu1 %v2590_v3  ;;  %v1351_v55 = vld [vmem:[%s4670_s5 + $0x48] sm:$0xff]  ;;  %v297_v56 = vpack.c.bf16 %v118_v52, %v117_v46  ;;  %v116_v59 = vld [vmem:[%s4667_s2 + $0xb8] sm:$0xff]  ;;  %v113_v60 = vld [vmem:[%s4667_s2 + $0xa0] sm:$0xff]  ;;  %v1399_v62 = vmul.f32 %v2712_v29, %v1350_v57 }
  0x1c   :  { %1543 = vperm.xlu0 %2477, %v1392_v40   ;;  %v1400_v61 = vmul.f32 %v2712_v29, %v1351_v55  ;;  %v1353_v63 = vld [vmem:[%s4670_s5 + $0x58] sm:$0xff]  ;;  %v296_v0 = vpack.c.bf16 %v116_v59, %v115_v58  ;;  %v1352_v1 = vld [vmem:[%s4670_s5 + $0x50] sm:$0xff]  ;;  %v114_v2 = vld [vmem:[%s4667_s2 + $0xa8] sm:$0xff] }
  0x1d   :  { %1553 = vperm.xlu1 %2478, %v1394_v39   ;;  %v1402_v4 = vmul.f32 %v2712_v29, %v1353_v63  ;;  %v1401_v5 = vmul.f32 %v2712_v29, %v1352_v1  ;;  %v295_v6 = vpack.c.bf16 %v114_v2, %v113_v60  ;;  %v111_v7 = vld [vmem:[%s4667_s2 + $0x90] sm:$0xff]  ;;  %v1355_v8 = vld [vmem:[%s4670_s5 + $0x68] sm:$0xff]  ;;  %v1354_v9 = vld [vmem:[%s4670_s5 + $0x60] sm:$0xff] }
  0x1e   :  { %700 = vmatpush1.bf16.msra.mxu0 %v289_v12  ;;  %2461 = vmatpush1.bf16.msra.mxu1 %v289_v12  ;;  %v112_v10 = vld [vmem:[%s4667_s2 + $0x98] sm:$0xff]  ;;  %v1404_v11 = vmul.f32 %v2712_v29, %v1355_v8  ;;  %v1403_v12 = vmul.f32 %v2712_v29, %v1354_v9  ;;  %v109_v14 = vld [vmem:[%s4667_s2 + $0x80] sm:$0xff]  ;;  %v1356_v16 = vld [vmem:[%s4670_s5 + $0x70] sm:$0xff] }
  0x1f   :  { %701 = vmatprep.subr.bf16.mxu0 %v2590_v3  ;;  %2446 = vmatprep.subr.bf16.mxu1 %v2590_v3  ;;  %v294_v13 = vpack.c.bf16 %v112_v10, %v111_v7  ;;  %v1357_v15 = vld [vmem:[%s4670_s5 + $0x78] sm:$0xff]  ;;  %v139_v18 = vld [vmem:[%s4667_s2 + $0x170] sm:$0xff]  ;;  %v1405_v21 = vmul.f32 %v2712_v29, %v1356_v16  ;;  %v138_v27 = vld [vmem:[%s4667_s2 + $0x168] sm:$0xff] }
  0x20   :  { %1558 = vperm.xlu0 %2477, %v1395_v48   ;;  %v140_v19 = vld [vmem:[%s4667_s2 + $0x178] sm:$0xff]  ;;  %v1358_v28 = vld [vmem:[%s4670_s5 + $0x80] sm:$0xff]  ;;  %v135_v33 = vld [vmem:[%s4667_s2 + $0x150] sm:$0xff] }
  0x21   :  { %1563 = vperm.xlu1 %2478, %v1396_v47   ;;  %v2482_v24 = vld [vmem:[%s4666_s1 + $0x1b0] ss:$12 sps:$4 sm:$0xff]   ;;  %v308_v25 = vpack.c.bf16 %v140_v19, %v139_v18  ;;  %v2487_v32 = vld [vmem:[%s4666_s1 + $0x1cc] ss:$12 sps:$4 sm:$0xff]   ;;  %v1407_v36 = vmul.f32 %v2712_v29, %v1358_v28  ;;  %v133_v42 = vld [vmem:[%s4667_s2 + $0x140] sm:$0xff] }
  0x22   :  { %702 = vmatpush1.bf16.msra.mxu0 %v288_v17  ;;  %2462 = vmatpush1.bf16.msra.mxu1 %v288_v17  ;;  %v110_v17 = vld [vmem:[%s4667_s2 + $0x88] sm:$0xff]  ;;  %v136_v34 = vld [vmem:[%s4667_s2 + $0x158] sm:$0xff]  ;;  %v1360_v38 = vld [vmem:[%s4670_s5 + $0x90] sm:$0xff] }
  0x23   :  { %703 = vmatprep.subr.bf16.mxu0 %v2590_v3  ;;  %2447 = vmatprep.subr.bf16.mxu1 %v2590_v3  ;;  %v293_v22 = vpack.c.bf16 %v110_v17, %v109_v14  ;;  %v1361_v37 = vld [vmem:[%s4670_s5 + $0x98] sm:$0xff]  ;;  %v306_v40 = vpack.c.bf16 %v136_v34, %v135_v33  ;;  %v134_v43 = vld [vmem:[%s4667_s2 + $0x148] sm:$0xff]  ;;  %v1409_v45 = vmul.f32 %v2712_v29, %v1360_v38  ;;  %v1362_v47 = vld [vmem:[%s4670_s5 + $0xa0] sm:$0xff] }
  0x24   :  { %1568 = vperm.xlu0 %2477, %v1397_v54   ;;  %v2489_v39 = vld [vmem:[%s4666_s1 + $0x18] ss:$12 sps:$4 sm:$0xff]   ;;  %v1410_v44 = vmul.f32 %v2712_v29, %v1361_v37  ;;  %v1363_v46 = vld [vmem:[%s4670_s5 + $0xa8] sm:$0xff]  ;;  %v2491_v48 = vld [vmem:[%s4666_s1 + $0x34] ss:$12 sps:$4 sm:$0xff]   ;;  %v1411_v54 = vmul.f32 %v2712_v29, %v1362_v47 }
  0x25   :  { %1573 = vperm.xlu1 %2478, %v1398_v53   ;;  %v2493_v49 = vld [vmem:[%s4666_s1 + $0x1e4] ss:$12 sps:$4 sm:$0xff]   ;;  %v132_v52 = vld [vmem:[%s4667_s2 + $0x138] sm:$0xff]  ;;  %v1412_v53 = vmul.f32 %v2712_v29, %v1363_v46  ;;  %v2496_v59 = vld [vmem:[%s4666_s1 + $0x1e0] ss:$12 sps:$4 sm:$0xff]  }
  0x26   :  { %704 = vmatpush1.bf16.msra.mxu0 %v287_v20  ;;  %2463 = vmatpush1.bf16.msra.mxu1 %v287_v20  ;;  %v1406_v20 = vmul.f32 %v2712_v29, %v1357_v15  ;;  %v131_v51 = vld [vmem:[%s4667_s2 + $0x130] sm:$0xff]  ;;  %v1365_v55 = vld [vmem:[%s4670_s5 + $0xb8] sm:$0xff]  ;;  %v129_v60 = vld [vmem:[%s4667_s2 + $0x120] sm:$0xff] }
  0x27   :  { %705 = vmatprep.subr.bf16.mxu0 %v2590_v3  ;;  %2448 = vmatprep.subr.bf16.mxu1 %v2590_v3  ;;  %v2495_v57 = vld [vmem:[%s4666_s1 + $0x30] ss:$12 sps:$4 sm:$0xff]   ;;  %v304_v58 = vpack.c.bf16 %v132_v52, %v131_v51  ;;  %v130_v63 = vld [vmem:[%s4667_s2 + $0x128] sm:$0xff] }
  0x28   :  { %1578 = vperm.xlu0 %2477, %v1399_v62   ;;  %v2497_v1 = vld [vmem:[%s4666_s1 + $0x4c] ss:$12 sps:$4 sm:$0xff]   ;;  %v2499_v2 = vld [vmem:[%s4666_s1 + $0x1fc] ss:$12 sps:$4 sm:$0xff]   ;;  %v2503_v14 = vld [vmem:[%s4666_s1 + $0x64] ss:$12 sps:$4 sm:$0xff]  }
  0x29   :  { %1583 = vperm.xlu1 %2478, %v1400_v61   ;;  %v1414_v61 = vmul.f32 %v2712_v29, %v1365_v55  ;;  %v128_v7 = vld [vmem:[%s4667_s2 + $0x118] sm:$0xff]  ;;  %v1368_v17 = vld [vmem:[%s4670_s5 + $0xd0] sm:$0xff]  ;;  %v126_v18 = vld [vmem:[%s4667_s2 + $0x108] sm:$0xff] }
  0x2a   :  { %706 = vmatpush1.bf16.msra.mxu0 %v286_v23  ;;  %2464 = vmatpush1.bf16.msra.mxu1 %v286_v23  ;;  %v2479_v23 = vld [vmem:[%s4666_s1] ss:$12 sps:$4 sm:$0xff]   ;;  %v1369_v10 = vld [vmem:[%s4670_s5 + $0xd8] sm:$0xff]  ;;  %v1380_v52 = vld [vmem:[%s4670_s5 + $0x130] sm:$0xff] }
  0x2b   :  { %707 = vmatprep.subr.bf16.mxu0 %v2590_v3  ;;  %2449 = vmatprep.subr.bf16.mxu1 %v2590_v3  ;;  %v1418_v16 = vmul.f32 %v2712_v29, %v1369_v10  ;;  %v1371_v19 = vld [vmem:[%s4670_s5 + $0xe8] sm:$0xff]  ;;  %v1377_v37 = vld [vmem:[%s4670_s5 + $0x118] sm:$0xff] }
  0x2c   :  { %1588 = vperm.xlu0 %2477, %v1401_v5   ;;  %v127_v5 = vld [vmem:[%s4667_s2 + $0x110] sm:$0xff]  ;;  %v2507_v28 = vld [vmem:[%s4666_s1 + $0x60] ss:$12 sps:$4 sm:$0xff]   ;;  %v1389_v10 = vld [vmem:[%s4670_s5 + $0x178] sm:$0xff] }
  0x2d   :  { %1593 = vperm.xlu1 %2478, %v1402_v4   ;;  %v1366_v4 = vld [vmem:[%s4670_s5 + $0xc0] sm:$0xff]  ;;  %v302_v15 = vpack.c.bf16 %v128_v7, %v127_v5  ;;  %v2511_v33 = vld [vmem:[%s4666_s1 + $0x22c] ss:$12 sps:$4 sm:$0xff]  }
  0x2e   :  { %708 = vmatpush1.bf16.msra.mxu0 %v285_v26  ;;  %2465 = vmatpush1.bf16.msra.mxu1 %v285_v26  ;;  %v137_v26 = vld [vmem:[%s4667_s2 + $0x160] sm:$0xff]  ;;  %v1415_v9 = vmul.f32 %v2712_v29, %v1366_v4  ;;  %v1383_v55 = vld [vmem:[%s4670_s5 + $0x148] sm:$0xff] }
  0x2f   :  { %709 = vmatprep.subr.bf16.mxu0 %v2590_v3  ;;  %2450 = vmatprep.subr.bf16.mxu1 %v2590_v3  ;;  %v307_v31 = vpack.c.bf16 %v138_v27, %v137_v26  ;;  %v1387_v4 = vld [vmem:[%s4670_s5 + $0x168] sm:$0xff]  ;;  %v2525_v5 = vld [vmem:[%s4666_s1 + $0xc4] ss:$12 sps:$4 sm:$0xff]  }
  0x30   :  { %1598 = vperm.xlu0 %2477, %v1403_v12   ;;  %v2502_v12 = vld [vmem:[%s4666_s1 + $0x1f8] ss:$12 sps:$4 sm:$0xff]  }
  0x31   :  { %1603 = vperm.xlu1 %2478, %v1404_v11   ;;  %v2501_v11 = vld [vmem:[%s4666_s1 + $0x48] ss:$12 sps:$4 sm:$0xff]  }
  0x32   :  { %710 = vmatpush2.bf16.msra.mxu0 %v300_v30  ;;  %2466 = vmatpush2.bf16.msra.mxu1 %v300_v30  ;;  %v2485_v30 = vld [vmem:[%s4666_s1 + $0x1c] ss:$12 sps:$4 sm:$0xff]  }
  0x33   :  { %711 = vmatprep.subr.bf16.mxu0 %v2590_v3  ;;  %2451 = vmatprep.subr.bf16.mxu1 %v2590_v3 }
  0x34   :  { %1608 = vperm.xlu0 %2477, %v1405_v21   ;;  %v1417_v21 = vmul.f32 %v2712_v29, %v1368_v17  ;;  %v2532_v17 = vld [vmem:[%s4666_s1 + $0x98] ss:$12 sps:$4 sm:$0xff]  }
  0x35   :  { %1613 = vperm.xlu1 %2478, %v1406_v20   ;;  %v2505_v20 = vld [vmem:[%s4666_s1 + $0x214] ss:$12 sps:$4 sm:$0xff]  }
  0x36   :  { %712 = vmatpush2.bf16.msra.mxu0 %v299_v41  ;;  %2467 = vmatpush2.bf16.msra.mxu1 %v299_v41  ;;  %v2490_v41 = vld [vmem:[%s4666_s1 + $0x1c8] ss:$12 sps:$4 sm:$0xff]  }
  0x37   :  { %713 = vmatprep.subr.bf16.mxu0 %v2590_v3  ;;  %2452 = vmatprep.subr.bf16.mxu1 %v2590_v3 }
  0x38   :  { %1618 = vperm.xlu0 %2477, %v1407_v36   ;;  %v1374_v36 = vld [vmem:[%s4670_s5 + $0x100] sm:$0xff] }
  0x39   :  { %v1423_v38 = vmul.f32 %v2712_v29, %v1374_v36  ;;  %v2555_v36 = vld [vmem:[%s4666_s1 + $0x154] ss:$12 sps:$4 sm:$0xff]  }
  0x3a   :  { %714 = vmatpush2.bf16.msra.mxu0 %v298_v50  ;;  %2468 = vmatpush2.bf16.msra.mxu1 %v298_v50  ;;  %v305_v50 = vpack.c.bf16 %v134_v43, %v133_v42  ;;  %v2514_v42 = vld [vmem:[%s4666_s1 + $0x228] ss:$12 sps:$4 sm:$0xff]  }
  0x3b   :  { %715 = vmatprep.subr.bf16.mxu0 %v2590_v3  ;;  %2453 = vmatprep.subr.bf16.mxu1 %v2590_v3  ;;  %v1379_v43 = vld [vmem:[%s4670_s5 + $0x128] sm:$0xff] }
  0x3c   :  { %1628 = vperm.xlu0 %2477, %v1409_v45   ;;  %v2517_v45 = vld [vmem:[%s4666_s1 + $0x8] ss:$12 sps:$4 sm:$0xff]   ;;  %v1428_v47 = vmul.f32 %v2712_v29, %v1379_v43  ;;  %v2564_v43 = vld [vmem:[%s4666_s1 + $0x1d0] ss:$12 sps:$4 sm:$0xff]  }
  0x3e   :  { %716 = vmatpush2.bf16.msra.mxu0 %v297_v56  ;;  %2469 = vmatpush2.bf16.msra.mxu1 %v297_v56  ;;  %v1364_v56 = vld [vmem:[%s4670_s5 + $0xb0] sm:$0xff] }
  0x3f   :  { %717 = vmatprep.subr.bf16.mxu0 %v2590_v3  ;;  %2454 = vmatprep.subr.bf16.mxu1 %v2590_v3  ;;  %v1413_v62 = vmul.f32 %v2712_v29, %v1364_v56  ;;  %v2520_v56 = vld [vmem:[%s4666_s1 + $0xac] ss:$12 sps:$4 sm:$0xff]  }
  0x40   :  { %1638 = vperm.xlu0 %2477, %v1411_v54   ;;  %v2519_v54 = vld [vmem:[%s4666_s1 + $0x20] ss:$12 sps:$4 sm:$0xff]  }
  0x42   :  { %718 = vmatpush2.bf16.msra.mxu0 %v296_v0  ;;  %2470 = vmatpush2.bf16.msra.mxu1 %v296_v0  ;;  %v1367_v0 = vld [vmem:[%s4670_s5 + $0xc8] sm:$0xff] }
  0x43   :  { %719 = vmatprep.subr.bf16.mxu0 %v2590_v3  ;;  %2455 = vmatprep.subr.bf16.mxu1 %v2590_v3  ;;  %v1416_v8 = vmul.f32 %v2712_v29, %v1367_v0  ;;  %v1384_v0 = vld [vmem:[%s4670_s5 + $0x150] sm:$0xff] }
  0x44   :  { %1648 = vperm.xlu0 %2477, %v1413_v62   ;;  %v1433_v7 = vmul.f32 %v2712_v29, %v1384_v0 }
  0x46   :  { %720 = vmatpush2.bf16.msra.mxu0 %v295_v6  ;;  %2471 = vmatpush2.bf16.msra.mxu1 %v295_v6  ;;  %v303_v6 = vpack.c.bf16 %v130_v63, %v129_v60  ;;  %v1382_v60 = vld [vmem:[%s4670_s5 + $0x140] sm:$0xff] }
  0x47   :  { %721 = vmatprep.subr.bf16.mxu0 %v2590_v3  ;;  %2456 = vmatprep.subr.bf16.mxu1 %v2590_v3  ;;  %v1431_v62 = vmul.f32 %v2712_v29, %v1382_v60 }
  0x48   :  { %1658 = vperm.xlu0 %2477, %v1415_v9   ;;  %v1386_v9 = vld [vmem:[%s4670_s5 + $0x160] sm:$0xff] }
  0x4a   :  { %722 = vmatpush2.bf16.msra.mxu0 %v294_v13  ;;  %2472 = vmatpush2.bf16.msra.mxu1 %v294_v13  ;;  %v125_v13 = vld [vmem:[%s4667_s2 + $0x100] sm:$0xff] }
  0x4b   :  { %723 = vmatprep.subr.bf16.mxu0 %v2590_v3  ;;  %2457 = vmatprep.subr.bf16.mxu1 %v2590_v3  ;;  %v1359_v3 = vld [vmem:[%s4670_s5 + $0x88] sm:$0xff] }
  0x4c   :  { %v1408_v35 = vmul.f32 %v2712_v29, %v1359_v3  ;;  %1668 = vperm.xlu0 %2477, %v1417_v21   ;;  %v1372_v3 = vld [vmem:[%s4670_s5 + $0xf0] sm:$0xff] }
  0x4d   :  { %v1421_v34 = vmul.f32 %v2712_v29, %v1372_v3  ;;  %v2535_v21 = vld [vmem:[%s4666_s1 + $0xf4] ss:$12 sps:$4 sm:$0xff]   ;;  %v2545_v3 = vld [vmem:[%s4666_s1 + $0x124] ss:$12 sps:$4 sm:$0xff]  }
  0x4e   :  { %724 = vmatpush2.bf16.msra.mxu0 %v293_v22  ;;  %2473 = vmatpush2.bf16.msra.mxu1 %v293_v22  ;;  %v301_v22 = vpack.c.bf16 %v126_v18, %v125_v13  ;;  %v1388_v13 = vld [vmem:[%s4670_s5 + $0x170] sm:$0xff] }
  0x4f   :  { %2378 = vmatprep.subr.bf16.mxu1 %v308_v25  ;;  %1623 = vperm.xlu1 %2478, %v1408_v35   ;;  %v1437_v18 = vmul.f32 %v2712_v29, %v1388_v13 }
  0x51   :  { %726 = vmatmul.mubr.bf16.vlgmr.msra.gmra.mxu0 %v2479_v23  ;;  %870 = vmatmul.mubr.bf16.vlgmr.msra.gmra.mxu1 %v2482_v24  ;;  %v1420_v23 = vmul.f32 %v2712_v29, %v1371_v19  ;;  %v1370_v24 = vld [vmem:[%s4670_s5 + $0xe0] sm:$0xff] }
  0x52   :  { %2379 = vmatpush3.bf16.msra.mxu1 %v308_v25  ;;  %733 = vmatprep.mubr.bf16.mxu0 %v2485_v30  ;;  %v1373_v25 = vld [vmem:[%s4670_s5 + $0xf8] sm:$0xff]  ;;  %v1419_v26 = vmul.f32 %v2712_v29, %v1370_v24 }
  0x53   :  { %2380 = vmatprep.subr.bf16.mxu1 %v307_v31  ;;  %877 = vmatprep.mubr.bf16.mxu1 %v2487_v32  ;;  %v1422_v27 = vmul.f32 %v2712_v29, %v1373_v25  ;;  %v2508_v30 = vld [vmem:[%s4666_s1 + $0x210] ss:$12 sps:$4 sm:$0xff]   ;;  %v2533_v19 = vld [vmem:[%s4666_s1 + $0xd8] ss:$12 sps:$4 sm:$0xff]  }
  0x54   :  { %1633 = vperm.xlu1 %2478, %v1410_v44   ;;  %v2509_v32 = vld [vmem:[%s4666_s1 + $0x7c] ss:$12 sps:$4 sm:$0xff]   ;;  %1678 = vperm.xlu0 %2477, %v1419_v26   ;;  %v2515_v44 = vld [vmem:[%s4666_s1 + $0x94] ss:$12 sps:$4 sm:$0xff]   ;;  %v2540_v24 = vld [vmem:[%s4666_s1 + $0x10c] ss:$12 sps:$4 sm:$0xff]  }
  0x55   :  { %v2542_v25 = vld [vmem:[%s4666_s1 + $0xf8] ss:$12 sps:$4 sm:$0xff]   ;;  %v2543_v26 = vld [vmem:[%s4666_s1 + $0x108] ss:$12 sps:$4 sm:$0xff]  }
  0x56   :  { %2381 = vmatpush3.bf16.msra.mxu1 %v307_v31  ;;  %v1375_v31 = vld [vmem:[%s4670_s5 + $0x108] sm:$0xff] }
  0x57   :  { %2382 = vmatprep.subr.bf16.mxu1 %v306_v40  ;;  %v1424_v35 = vmul.f32 %v2712_v29, %v1375_v31  ;;  %v2549_v31 = vld [vmem:[%s4666_s1 + $0x140] ss:$12 sps:$4 sm:$0xff]  }
  0x58   :  { %1643 = vperm.xlu1 %2478, %v1412_v53   ;;  %1688 = vperm.xlu0 %2477, %v1421_v34   ;;  %v2518_v53 = vld [vmem:[%s4666_s1 + $0x90] ss:$12 sps:$4 sm:$0xff]   ;;  %v2553_v34 = vld [vmem:[%s4666_s1 + $0x138] ss:$12 sps:$4 sm:$0xff]  }
  0x59   :  { %734 = vmatmul.mubr.bf16.gmra.mxu0 %v2489_v39  ;;  %878 = vmatmul.mubr.bf16.gmra.mxu1 %v2490_v41  ;;  %v1426_v39 = vmul.f32 %v2712_v29, %v1377_v37  ;;  %v2513_v41 = vld [vmem:[%s4666_s1 + $0x78] ss:$12 sps:$4 sm:$0xff]   ;;  %v2557_v37 = vld [vmem:[%s4666_s1 + $0x188] ss:$12 sps:$4 sm:$0xff]  }
  0x5a   :  { %2383 = vmatpush3.bf16.msra.mxu1 %v306_v40  ;;  %741 = vmatprep.mubr.bf16.mxu0 %v2491_v48  ;;  %v1376_v40 = vld [vmem:[%s4670_s5 + $0x110] sm:$0xff]  ;;  %v1378_v48 = vld [vmem:[%s4670_s5 + $0x120] sm:$0xff] }
  0x5b   :  { %885 = vmatprep.mubr.bf16.mxu1 %v2493_v49  ;;  %2384 = vmatprep.subr.bf16.mxu1 %v305_v50  ;;  %v1425_v46 = vmul.f32 %v2712_v29, %v1376_v40  ;;  %v1381_v49 = vld [vmem:[%s4670_s5 + $0x138] sm:$0xff] }
  0x5c   :  { %1653 = vperm.xlu1 %2478, %v1414_v61   ;;  %1698 = vperm.xlu0 %2477, %v1423_v38   ;;  %v1430_v51 = vmul.f32 %v2712_v29, %v1381_v49  ;;  %v1385_v61 = vld [vmem:[%s4670_s5 + $0x158] sm:$0xff] }
  0x5d   :  { %v1434_v63 = vmul.f32 %v2712_v29, %v1385_v61  ;;  %v2558_v38 = vld [vmem:[%s4666_s1 + $0x150] ss:$12 sps:$4 sm:$0xff]   ;;  %v2560_v40 = vld [vmem:[%s4666_s1 + $0x16c] ss:$12 sps:$4 sm:$0xff]  }
  0x5e   :  { %2385 = vmatpush3.bf16.msra.mxu1 %v305_v50  ;;  %v1427_v50 = vmul.f32 %v2712_v29, %v1378_v48  ;;  %v2570_v48 = vld [vmem:[%s4666_s1 + $0x19c] ss:$12 sps:$4 sm:$0xff]   ;;  %v2572_v49 = vld [vmem:[%s4666_s1 + $0x218] ss:$12 sps:$4 sm:$0xff]  }
  0x5f   :  { %2386 = vmatprep.subr.bf16.mxu1 %v304_v58 }
  0x60   :  { %1663 = vperm.xlu1 %2478, %v1416_v8   ;;  %1708 = vperm.xlu0 %2477, %v1425_v46   ;;  %v1436_v8 = vmul.f32 %v2712_v29, %v1387_v4  ;;  %v2568_v46 = vld [vmem:[%s4666_s1 + $0x180] ss:$12 sps:$4 sm:$0xff]  }
  0x61   :  { %742 = vmatmul.mubr.bf16.gmra.mxu0 %v2495_v57  ;;  %886 = vmatmul.mubr.bf16.gmra.mxu1 %v2496_v59  ;;  %v2522_v57 = vld [vmem:[%s4666_s1 + $0x38] ss:$12 sps:$4 sm:$0xff]   ;;  %v1432_v59 = vmul.f32 %v2712_v29, %v1383_v55 }
  0x62   :  { %749 = vmatprep.mubr.bf16.mxu0 %v2497_v1  ;;  %893 = vmatprep.mubr.bf16.mxu1 %v2499_v2  ;;  %v2523_v1 = vld [vmem:[%s4666_s1 + $0xa8] ss:$12 sps:$4 sm:$0xff]   ;;  %v2524_v2 = vld [vmem:[%s4666_s1 + $0x50] ss:$12 sps:$4 sm:$0xff]  }
  0x63   :  { %2387 = vmatpush3.bf16.msra.mxu1 %v304_v58  ;;  %v1429_v58 = vmul.f32 %v2712_v29, %v1380_v52 }
  0x64   :  { %2388 = vmatprep.subr.bf16.mxu1 %v303_v6  ;;  %1673 = vperm.xlu1 %2478, %v1418_v16   ;;  %v2530_v16 = vld [vmem:[%s4666_s1 + $0xdc] ss:$12 sps:$4 sm:$0xff]  }
  0x65   :  { %1718 = vperm.xlu0 %2477, %v1427_v50   ;;  %v2573_v50 = vld [vmem:[%s4666_s1 + $0x198] ss:$12 sps:$4 sm:$0xff]  }
  0x67   :  { %2389 = vmatpush3.bf16.msra.mxu1 %v303_v6  ;;  %v2527_v6 = vld [vmem:[%s4666_s1 + $0x68] ss:$12 sps:$4 sm:$0xff]  }
  0x68   :  { %2390 = vmatprep.subr.bf16.mxu1 %v302_v15  ;;  %1683 = vperm.xlu1 %2478, %v1420_v23   ;;  %v2539_v23 = vld [vmem:[%s4666_s1 + $0xe0] ss:$12 sps:$4 sm:$0xff]  }
  0x69   :  { %750 = vmatmul.mubr.bf16.gmra.mxu0 %v2501_v11  ;;  %894 = vmatmul.mubr.bf16.gmra.mxu1 %v2502_v12  ;;  %v1435_v11 = vmul.f32 %v2712_v29, %v1386_v9  ;;  %v1438_v12 = vmul.f32 %v2712_v29, %v1389_v10  ;;  %v2537_v29 = vld [vmem:[%s4666_s1 + $0xc8] ss:$12 sps:$4 sm:$0xff]  }
  0x6a   :  { %757 = vmatprep.mubr.bf16.mxu0 %v2503_v14  ;;  %901 = vmatprep.mubr.bf16.mxu1 %v2505_v20  ;;  %v2528_v14 = vld [vmem:[%s4666_s1 + $0xc0] ss:$12 sps:$4 sm:$0xff]   ;;  %v2534_v20 = vld [vmem:[%s4666_s1 + $0xb0] ss:$12 sps:$4 sm:$0xff]  }
  0x6b   :  { %2391 = vmatpush3.bf16.msra.mxu1 %v302_v15  ;;  %1728 = vperm.xlu0 %2477, %v1429_v58   ;;  %v2529_v15 = vld [vmem:[%s4666_s1 + $0x80] ss:$12 sps:$4 sm:$0xff]  }
  0x6c   :  { %2392 = vmatprep.subr.bf16.mxu1 %v301_v22  ;;  %1693 = vperm.xlu1 %2478, %v1422_v27   ;;  %v2544_v27 = vld [vmem:[%s4666_s1 + $0x110] ss:$12 sps:$4 sm:$0xff]  }
  0x6f   :  { %2393 = vmatpush3.bf16.msra.mxu1 %v301_v22  ;;  %1738 = vperm.xlu0 %2477, %v1431_v62   ;;  %v2538_v22 = vld [vmem:[%s4666_s1 + $0xf0] ss:$12 sps:$4 sm:$0xff]  }
  0x70   :  { %1703 = vperm.xlu1 %2478, %v1424_v35   ;;  %v2554_v35 = vld [vmem:[%s4666_s1 + $0x170] ss:$12 sps:$4 sm:$0xff]  }
  0x71   :  { %758 = vmatmul.mubr.bf16.gmra.mxu0 %v2507_v28  ;;  %902 = vmatmul.mubr.bf16.gmra.mxu1 %v2508_v30  ;;  %v2547_v28 = vld [vmem:[%s4666_s1 + $0x128] ss:$12 sps:$4 sm:$0xff]   ;;  %v2548_v30 = vld [vmem:[%s4666_s1 + $0x120] ss:$12 sps:$4 sm:$0xff]  }
  0x72   :  { %765 = vmatprep.mubr.bf16.mxu0 %v2509_v32  ;;  %909 = vmatprep.mubr.bf16.mxu1 %v2511_v33  ;;  %v2550_v32 = vld [vmem:[%s4666_s1 + $0x13c] ss:$12 sps:$4 sm:$0xff]   ;;  %v2552_v33 = vld [vmem:[%s4666_s1 + $0x158] ss:$12 sps:$4 sm:$0xff]  }
  0x73   :  { %1748 = vperm.xlu0 %2477, %v1433_v7  }
  0x74   :  { %1713 = vperm.xlu1 %2478, %v1426_v39   ;;  %v2559_v39 = vld [vmem:[%s4666_s1 + $0x1a0] ss:$12 sps:$4 sm:$0xff]  }
  0x77   :  { %1758 = vperm.xlu0 %2477, %v1435_v11  }
  0x78   :  { %1723 = vperm.xlu1 %2478, %v1428_v47   ;;  %v2569_v47 = vld [vmem:[%s4666_s1 + $0x200] ss:$12 sps:$4 sm:$0xff]  }
  0x79   :  { %766 = vmatmul.mubr.bf16.gmra.mxu0 %v2513_v41  ;;  %910 = vmatmul.mubr.bf16.gmra.mxu1 %v2514_v42  ;;  %v2562_v41 = vld [vmem:[%s4666_s1 + $0x1b8] ss:$12 sps:$4 sm:$0xff]   ;;  %v2563_v42 = vld [vmem:[%s4666_s1 + $0x168] ss:$12 sps:$4 sm:$0xff]  }
  0x7a   :  { %773 = vmatprep.mubr.bf16.mxu0 %v2515_v44  ;;  %2394 = vmatprep.mubr.bf16.mxu1 %v2517_v45  ;;  %v2565_v44 = vld [vmem:[%s4666_s1 + $0x184] ss:$12 sps:$4 sm:$0xff]   ;;  %v2567_v45 = vld [vmem:[%s4666_s1 + $0x1e8] ss:$12 sps:$4 sm:$0xff]  }
  0x7b   :  { %1768 = vperm.xlu0 %2477, %v1437_v18  }
  0x7c   :  { %1733 = vperm.xlu1 %2478, %v1430_v51   ;;  %v2574_v51 = vld [vmem:[%s4666_s1 + $0x230] ss:$12 sps:$4 sm:$0xff]   ;;  %s1242_s1 = sld [smem:[#allocation2]] }
  0x80   :  { %1743 = vperm.xlu1 %2478, %v1432_v59  }
  0x81   :  { %774 = vmatmul.mubr.bf16.gmra.mxu0 %v2518_v53  ;;  %2395 = vmatmul.mubr.bf16.vlgmr.msra.gmra.mxu1 %v2519_v54 }
  0x82   :  { %781 = vmatprep.mubr.bf16.mxu0 %v2520_v56  ;;  %2398 = vmatprep.mubr.bf16.mxu1 %v2522_v57 }
  0x84   :  { %1753 = vperm.xlu1 %2478, %v1434_v63  }
  0x88   :  { %1763 = vperm.xlu1 %2478, %v1436_v8  }
  0x89   :  { %782 = vmatmul.mubr.bf16.gmra.mxu0 %v2523_v1  ;;  %2399 = vmatmul.mubr.bf16.gmra.mxu1 %v2524_v2 }
  0x8a   :  { %789 = vmatprep.mubr.bf16.mxu0 %v2525_v5  ;;  %2402 = vmatprep.mubr.bf16.mxu1 %v2527_v6 }
  0x8c   :  { %1773 = vperm.xlu1 %2478, %v1438_v12  }
  0x91   :  { %790 = vmatmul.mubr.bf16.gmra.mxu0 %v2528_v14  ;;  %2403 = vmatmul.mubr.bf16.gmra.mxu1 %v2529_v15 }
  0x92   :  { %797 = vmatprep.mubr.bf16.mxu0 %v2530_v16  ;;  %2406 = vmatprep.mubr.bf16.mxu1 %v2532_v17 }
  0x93   :  { %v3242_v7 = vpop.permute.xlu0 %1538 }
  0x94   :  { %v3258_v17 = vpop.permute.xlu1 %1548 }
  0x97   :  { %v3250_v14 = vpop.permute.xlu0 %1543 }
  0x99   :  { %798 = vmatmul.mubr.bf16.gmra.mxu0 %v2533_v19  ;;  %2407 = vmatmul.mubr.bf16.gmra.mxu1 %v2534_v20  ;;  %v1296_v20 = vld [vmem:[%s4668_s3 + $0x10] sm:$0xff] }
  0x9a   :  { %805 = vmatprep.mubr.bf16.mxu0 %v2535_v21  ;;  %2410 = vmatprep.mubr.bf16.mxu1 %v2537_v29  ;;  %v1294_v21 = vld [vmem:[%s4668_s3] sm:$0xff]  ;;  %v1297_v29 = vld [vmem:[%s4668_s3 + $0x18] sm:$0xff] }
  0xa1   :  { %806 = vmatmul.mubr.bf16.gmra.mxu0 %v2538_v22  ;;  %2411 = vmatmul.mubr.bf16.gmra.mxu1 %v2539_v23 }
  0xa2   :  { %813 = vmatprep.mubr.bf16.mxu0 %v2540_v24  ;;  %2414 = vmatprep.mubr.bf16.mxu1 %v2542_v25  ;;  %v2021_v24 = vld [vmem:[%s4669_s4 + $0x10] sm:$0xff]  ;;  %v1295_v25 = vld [vmem:[%s4668_s3 + $0x8] sm:$0xff] }
  0xa9   :  { %814 = vmatmul.mubr.bf16.gmra.mxu0 %v2543_v26  ;;  %2415 = vmatmul.mubr.bf16.gmra.mxu1 %v2544_v27  ;;  %v1300_v26 = vld [vmem:[%s4668_s3 + $0x30] sm:$0xff]  ;;  %v3282_v27 = vpop.permute.xlu0 %1558 }
  0xaa   :  { %821 = vmatprep.mubr.bf16.mxu0 %v2545_v3  ;;  %2418 = vmatprep.mubr.bf16.mxu1 %v2547_v28  ;;  %v3284_v3 = vstv %s1242_s1  ;;  %v2019_v28 = vld [vmem:[%s4669_s4] sm:$0xff] }
  0xb1   :  { %822 = vmatmul.mubr.bf16.gmra.mxu0 %v2548_v30  ;;  %2419 = vmatmul.mubr.bf16.gmra.mxu1 %v2549_v31  ;;  %v1298_v30 = vld [vmem:[%s4668_s3 + $0x20] sm:$0xff]  ;;  %v1301_v31 = vld [vmem:[%s4668_s3 + $0x38] sm:$0xff] }
  0xb2   :  { %829 = vmatprep.mubr.bf16.mxu0 %v2550_v32  ;;  %2422 = vmatprep.mubr.bf16.mxu1 %v2552_v33 }
  0xb9   :  { %830 = vmatmul.mubr.bf16.gmra.mxu0 %v2553_v34  ;;  %2423 = vmatmul.mubr.bf16.gmra.mxu1 %v2554_v35  ;;  %v3297_v34 = vstv %s3248_s21  ;;  %v2022_v35 = vld [vmem:[%s4669_s4 + $0x18] sm:$0xff] }
  0xba   :  { %837 = vmatprep.mubr.bf16.mxu0 %v2555_v36  ;;  %2426 = vmatprep.mubr.bf16.mxu1 %v2557_v37  ;;  %v2020_v36 = vld [vmem:[%s4669_s4 + $0x8] sm:$0xff]  ;;  %v2025_v37 = vld [vmem:[%s4669_s4 + $0x30] sm:$0xff] }
  0xc1   :  { %838 = vmatmul.mubr.bf16.gmra.mxu0 %v2558_v38  ;;  %2427 = vmatmul.mubr.bf16.gmra.mxu1 %v2559_v39  ;;  %v1299_v38 = vld [vmem:[%s4668_s3 + $0x28] sm:$0xff]  ;;  %v3312_v39 = vpop.permute.xlu1 %1553 }
  0xc2   :  { %845 = vmatprep.mubr.bf16.mxu0 %v2560_v40  ;;  %2430 = vmatprep.mubr.bf16.mxu1 %v2562_v41  ;;  %v2023_v40 = vld [vmem:[%s4669_s4 + $0x20] sm:$0xff]  ;;  %v2026_v41 = vld [vmem:[%s4669_s4 + $0x38] sm:$0xff] }
  0xc9   :  { %846 = vmatmul.mubr.bf16.gmra.mxu0 %v2563_v42  ;;  %2431 = vmatmul.mubr.bf16.gmra.mxu1 %v2564_v43  ;;  %v1304_v42 = vld [vmem:[%s4668_s3 + $0x50] sm:$0xff]  ;;  %v1302_v43 = vld [vmem:[%s4668_s3 + $0x40] sm:$0xff] }
  0xca   :  { %853 = vmatprep.mubr.bf16.mxu0 %v2565_v44  ;;  %2434 = vmatprep.mubr.bf16.mxu1 %v2567_v45 }
  0xd1   :  { %854 = vmatmul.mubr.bf16.gmra.mxu0 %v2568_v46  ;;  %2435 = vmatmul.mubr.bf16.gmra.mxu1 %v2569_v47  ;;  %v3331_v46 = vmul.f32 %v3284_v3, %v1296_v20  ;;  %v3334_v47 = vstv %s3252_s22  ;;  %v3383_v20 = vmul.f32 %v3284_v3, %v1298_v30  ;;  %v3403_v30 = vmul.f32 %v3297_v34, %v2022_v35  ;;  %v1310_v35 = vld [vmem:[%s4668_s3 + $0x80] sm:$0xff] }
  0xd2   :  { %861 = vmatprep.mubr.bf16.mxu0 %v2570_v48  ;;  %2438 = vmatprep.mubr.bf16.mxu1 %v2572_v49  ;;  %v3337_v48 = vmul.f32 %v3284_v3, %v1294_v21  ;;  %v3340_v49 = vmul.f32 %v3284_v3, %v1297_v29  ;;  %v3386_v21 = vmul.f32 %v3284_v3, %v1301_v31  ;;  %v2030_v29 = vld [vmem:[%s4669_s4 + $0x58] sm:$0xff] }
  0xd3   :  { %v3406_v31 = vmul.f32 %v3297_v34, %v2020_v36  ;;  %v1313_v36 = vld [vmem:[%s4668_s3 + $0x98] sm:$0xff] }
  0xd9   :  { %862 = vmatmul.mubr.bf16.gmra.mxu0 %v2573_v50  ;;  %2439 = vmatmul.mubr.bf16.gmra.mxu1 %v2574_v51  ;;  %v2024_v50 = vld [vmem:[%s4669_s4 + $0x28] sm:$0xff]  ;;  %v1305_v51 = vld [vmem:[%s4668_s3 + $0x58] sm:$0xff] }
 0x111   :  { %v3222_v52 = vpop.f32.mrf.mxu0  ;;  %v3224_v53 = vpop.f32.mrf.mxu1 }
 0x112   :  { %4673 = vst [vmem:[#allocation5_spill] sm:$0xff] %v3224_v53 }
 0x113   :  { %v729_v54 = vpop.f32.mrf.mxu0  ;;  %v873_v55 = vpop.f32.mrf.mxu1 }
 0x114   :  { %v1303_v54 = vld [vmem:[%s4668_s3 + $0x48] sm:$0xff]  ;;  %v1308_v55 = vld [vmem:[%s4668_s3 + $0x70] sm:$0xff] }
 0x115   :  { %v3226_v56 = vpop.f32.mrf.mxu0  ;;  %v3228_v57 = vpop.f32.mrf.mxu1  ;;  %v3466_v53 = vmul.f32 %v3284_v3, %v1308_v55 }
 0x116   :  { %4674 = vst [vmem:[#allocation6_spill] sm:$0xff] %v3228_v57  ;;  %v3460_v57 = vmul.f32 %v3284_v3, %v1305_v51  ;;  %v1317_v51 = vld [vmem:[%s4668_s3 + $0xb8] sm:$0xff] }
 0x117   :  { %v732_v58 = vpop.f32.mrf.mxu0  ;;  %v876_v59 = vpop.f32.mrf.mxu1  ;;  %4688 = vst [vmem:[#allocation20_spill] sm:$0xff] %v3466_v53 }
 0x118   :  { %v3354_v58 = vstv %s1921_s0  ;;  %v3357_v59 = vmul.f32 %v3297_v34, %v2021_v24  ;;  %v2028_v24 = vld [vmem:[%s4669_s4 + $0x48] sm:$0xff]  ;;  %4686 = vst [vmem:[#allocation18_spill] sm:$0xff] %v3460_v57  ;;  %v2038_v57 = vld [vmem:[%s4669_s4 + $0x98] sm:$0xff] }
 0x119   :  { %v3230_v60 = vpop.f32.mrf.mxu0  ;;  %v3232_v61 = vpop.f32.mrf.mxu1 }
 0x11a   :  { %4675 = vst [vmem:[#allocation7_spill] sm:$0xff] %v3232_v61  ;;  %v2037_v61 = vld [vmem:[%s4669_s4 + $0x90] sm:$0xff] }
 0x11b   :  { %v737_v62 = vpop.f32.mrf.mxu0  ;;  %v881_v63 = vpop.f32.mrf.mxu1 }
 0x11c   :  { %v3360_v62 = vmul.f32 %v3284_v3, %v1295_v25  ;;  %v3363_v63 = vmul.f32 %v3284_v3, %v1300_v26  ;;  %v1307_v25 = vld [vmem:[%s4668_s3 + $0x68] sm:$0xff]  ;;  %v1312_v26 = vld [vmem:[%s4668_s3 + $0x90] sm:$0xff] }
 0x11d   :  { %v3234_v0 = vpop.f32.mrf.mxu0  ;;  %v3236_v1 = vpop.f32.mrf.mxu1 }
 0x11e   :  { %4676 = vst [vmem:[#allocation8_spill] sm:$0xff] %v3236_v1  ;;  %v3463_v1 = vmul.f32 %v3284_v3, %v1303_v54 }
 0x11f   :  { %v740_v2 = vpop.f32.mrf.mxu0  ;;  %v884_v4 = vpop.f32.mrf.mxu1 }
 0x120   :  { %v2029_v2 = vld [vmem:[%s4669_s4 + $0x50] sm:$0xff]  ;;  %v2027_v4 = vld [vmem:[%s4669_s4 + $0x40] sm:$0xff]  ;;  %4687 = vst [vmem:[#allocation19_spill] sm:$0xff] %v3463_v1 }
 0x121   :  { %v3238_v5 = vpop.f32.mrf.mxu0  ;;  %v3240_v6 = vpop.f32.mrf.mxu1  ;;  %v3481_v55 = vmul.f32 %v3297_v34, %v2029_v2  ;;  %v3484_v53 = vmul.f32 %v3297_v34, %v2027_v4  ;;  %v2041_v2 = vld [vmem:[%s4669_s4 + $0xb0] sm:$0xff]  ;;  %v1315_v4 = vld [vmem:[%s4668_s3 + $0xa8] sm:$0xff] }
 0x122   :  { %4677 = vst [vmem:[#allocation9_spill] sm:$0xff] %v3240_v6  ;;  %v3440_v6 = vmul.f32 %v3284_v3, %v1302_v43  ;;  %v3457_v43 = vmul.f32 %v3297_v34, %v2024_v50  ;;  %v1314_v50 = vld [vmem:[%s4668_s3 + $0xa0] sm:$0xff] }
 0x123   :  { %v745_v8 = vpop.f32.mrf.mxu0  ;;  %v889_v9 = vpop.f32.mrf.mxu1  ;;  %4689 = vst [vmem:[#allocation21_spill] sm:$0xff] %v3484_v53  ;;  %v2042_v53 = vld [vmem:[%s4669_s4 + $0xb8] sm:$0xff] }
 0x124   :  { %v1306_v8 = vld [vmem:[%s4668_s3 + $0x60] sm:$0xff]  ;;  %v1309_v9 = vld [vmem:[%s4668_s3 + $0x78] sm:$0xff]  ;;  %4685 = vst [vmem:[#allocation17_spill] sm:$0xff] %v3457_v43 }
 0x125   :  { %v3244_v10 = vpop.f32.mrf.mxu0  ;;  %v3246_v11 = vpop.f32.mrf.mxu1  ;;  %v3487_v1 = vmul.f32 %v3284_v3, %v1306_v8  ;;  %v3505_v8 = vmul.f32 %v3297_v34, %v2030_v29  ;;  %v1318_v29 = vld [vmem:[%s4668_s3 + $0xc0] sm:$0xff] }
 0x126   :  { %4678 = vst [vmem:[#allocation10_spill] sm:$0xff] %v3246_v11  ;;  %v3434_v11 = vmul.f32 %v3297_v34, %v2026_v41  ;;  %v1316_v41 = vld [vmem:[%s4668_s3 + $0xb0] sm:$0xff] }
 0x127   :  { %v748_v12 = vpop.f32.mrf.mxu0  ;;  %v892_v13 = vpop.f32.mrf.mxu1  ;;  %4690 = vst [vmem:[#allocation22_spill] sm:$0xff] %v3487_v1  ;;  %4692 = vst [vmem:[#allocation24_spill] sm:$0xff] %v3505_v8  ;;  %v2039_v1 = vld [vmem:[%s4669_s4 + $0xa0] sm:$0xff]  ;;  %v2040_v8 = vld [vmem:[%s4669_s4 + $0xa8] sm:$0xff] }
 0x128   :  { %4684 = vst [vmem:[#allocation16_spill] sm:$0xff] %v3434_v11  ;;  %v3490_v11 = vmul.f32 %v3284_v3, %v1309_v9  ;;  %v3508_v9 = vmul.f32 %v3297_v34, %v2028_v24 }
 0x129   :  { %v3254_v15 = vpop.f32.mrf.mxu0  ;;  %v3256_v16 = vpop.f32.mrf.mxu1 }
 0x12a   :  { %4679 = vst [vmem:[#allocation11_spill] sm:$0xff] %v3256_v16  ;;  %v2034_v16 = vld [vmem:[%s4669_s4 + $0x78] sm:$0xff]  ;;  %4691 = vst [vmem:[#allocation23_spill] sm:$0xff] %v3490_v11  ;;  %v3514_v11 = vmul.f32 %v3284_v3, %v1312_v26 }
 0x12b   :  { %v753_v18 = vpop.f32.mrf.mxu0  ;;  %v897_v19 = vpop.f32.mrf.mxu1  ;;  %4693 = vst [vmem:[#allocation25_spill] sm:$0xff] %v3508_v9 }
 0x12c   :  { %v3377_v18 = vstv %s2116_s16  ;;  %v3380_v19 = vmul.f32 %v3297_v34, %v2019_v28  ;;  %v3400_v28 = vpop.permute.xlu0 %1568  ;;  %4695 = vst [vmem:[#allocation27_spill] sm:$0xff] %v3514_v11  ;;  %v3536_v11 = vmul.f32 %v3284_v3, %v1310_v35  ;;  %v3553_v35 = vmul.f32 %v3297_v34, %v2034_v16  ;;  %v1321_v16 = vld [vmem:[%s4668_s3 + $0xd8] sm:$0xff] }
 0x12d   :  { %v3269_v22 = vpop.f32.mrf.mxu0  ;;  %v3271_v23 = vpop.f32.mrf.mxu1 }
 0x12e   :  { %4680 = vst [vmem:[#allocation12_spill] sm:$0xff] %v3271_v23  ;;  %v3437_v23 = vmul.f32 %v3284_v3, %v1304_v42  ;;  %v3454_v42 = vpop.permute.xlu1 %1563  ;;  %4699 = vst [vmem:[#allocation31_spill] sm:$0xff] %v3536_v11  ;;  %v2043_v11 = vld [vmem:[%s4669_s4 + $0xc0] sm:$0xff] }
 0x12f   :  { %v756_v32 = vpop.f32.mrf.mxu0  ;;  %v900_v33 = vpop.f32.mrf.mxu1  ;;  %4701 = vst [vmem:[#allocation33_spill] sm:$0xff] %v3553_v35  ;;  %v2045_v35 = vld [vmem:[%s4669_s4 + $0xd0] sm:$0xff] }
 0x130   :  { %v3409_v32 = vmul.f32 %v3297_v34, %v2025_v37  ;;  %v3412_v33 = vmul.f32 %v3284_v3, %v1299_v38 }
 0x131   :  { %v3326_v44 = vpop.f32.mrf.mxu0  ;;  %v3328_v45 = vpop.f32.mrf.mxu1 }
 0x132   :  { %4681 = vst [vmem:[#allocation13_spill] sm:$0xff] %v3328_v45  ;;  %v3431_v45 = vmul.f32 %v3297_v34, %v2023_v40  ;;  %v1311_v40 = vld [vmem:[%s4668_s3 + $0x88] sm:$0xff] }
 0x133   :  { %v761_v12 = vpop.f32.mrf.mxu0  ;;  %v905_v13 = vpop.f32.mrf.mxu1 }
 0x134   :  { %v2033_v12 = vld [vmem:[%s4669_s4 + $0x70] sm:$0xff]  ;;  %v2031_v13 = vld [vmem:[%s4669_s4 + $0x60] sm:$0xff] }
 0x135   :  { %v3426_v37 = vpop.f32.mrf.mxu0  ;;  %v3428_v38 = vpop.f32.mrf.mxu1  ;;  %v3533_v26 = vmul.f32 %v3297_v34, %v2031_v13 }
 0x136   :  { %4682 = vst [vmem:[#allocation14_spill] sm:$0xff] %v3426_v37  ;;  %4683 = vst [vmem:[#allocation15_spill] sm:$0xff] %v3428_v38  ;;  %v2032_v38 = vld [vmem:[%s4669_s4 + $0x68] sm:$0xff]  ;;  %v2035_v37 = vld [vmem:[%s4669_s4 + $0x80] sm:$0xff]  ;;  %v3550_v13 = vpop.permute.xlu0 %1578 }
 0x137   :  { %v764_v54 = vpop.f32.mrf.mxu0  ;;  %v908_v43 = vpop.f32.mrf.mxu1  ;;  %4698 = vst [vmem:[#allocation30_spill] sm:$0xff] %v3533_v26  ;;  %v3559_v26 = vmul.f32 %v3284_v3, %v1311_v40  ;;  %v3574_v40 = vmul.f32 %v3297_v34, %v2037_v61  ;;  %v1322_v61 = vld [vmem:[%s4668_s3 + $0xe0] sm:$0xff] }
 0x138   :  { %v2036_v43 = vld [vmem:[%s4669_s4 + $0x88] sm:$0xff]  ;;  %v3511_v54 = vmul.f32 %v3284_v3, %v1307_v25  ;;  %v3530_v25 = vmul.f32 %v3297_v34, %v2033_v12  ;;  %v1320_v12 = vld [vmem:[%s4668_s3 + $0xd0] sm:$0xff] }
 0x139   :  { %v3525_v24 = vpop.f32.mrf.mxu0  ;;  %v3527_v9 = vpop.f32.mrf.mxu1  ;;  %4703 = vst [vmem:[#allocation35_spill] sm:$0xff] %v3559_v26  ;;  %v3583_v26 = vmul.f32 %v3284_v3, %v1317_v51  ;;  %v3600_v51 = vmul.f32 %v3297_v34, %v2036_v43 }
 0x13a   :  { %4694 = vst [vmem:[#allocation26_spill] sm:$0xff] %v3511_v54  ;;  %4696 = vst [vmem:[#allocation28_spill] sm:$0xff] %v3527_v9  ;;  %v3539_v54 = vmul.f32 %v3284_v3, %v1313_v36  ;;  %v1319_v9 = vld [vmem:[%s4668_s3 + $0xc8] sm:$0xff]  ;;  %v3556_v36 = vmul.f32 %v3297_v34, %v2032_v38 }
 0x13b   :  { %4697 = vst [vmem:[#allocation29_spill] sm:$0xff] %v3530_v25  ;;  %v2044_v25 = vld [vmem:[%s4669_s4 + $0xc8] sm:$0xff]  ;;  %v769_v38 = vpop.f32.mrf.mxu0  ;;  %4707 = vst [vmem:[#allocation39_spill] sm:$0xff] %v3583_v26 }
 0x13c   :  { %4700 = vst [vmem:[#allocation32_spill] sm:$0xff] %v3539_v54  ;;  %4702 = vst [vmem:[#allocation34_spill] sm:$0xff] %v3556_v36  ;;  %v3562_v54 = vmul.f32 %v3284_v3, %v1316_v41  ;;  %v913_v36 = vpop.f32.mrf.mxu1  ;;  %v3577_v41 = vmul.f32 %v3297_v34, %v2035_v37  ;;  %v3594_v37 = vpop.permute.xlu1 %1573  ;;  %v3603_v38 = vmul.f32 %v3297_v34, %v2041_v2  ;;  %v1323_v26 = vld [vmem:[%s4668_s3 + $0xe8] sm:$0xff] }
 0x13d   :  { %v2046_v36 = vld [vmem:[%s4669_s4 + $0xd8] sm:$0xff]  ;;  %4709 = vst [vmem:[#allocation41_spill] sm:$0xff] %v3600_v51  ;;  %v3617_v43 = vpop.f32.mrf.mxu0  ;;  %v3622_v2 = vmul.f32 %v3297_v34, %v2039_v1  ;;  %v1330_v1 = vld [vmem:[%s4668_s3 + $0x120] sm:$0xff] }
 0x13e   :  { %4704 = vst [vmem:[#allocation36_spill] sm:$0xff] %v3562_v54  ;;  %4705 = vst [vmem:[#allocation37_spill] sm:$0xff] %v3577_v41  ;;  %v3580_v54 = vmul.f32 %v3284_v3, %v1314_v50  ;;  %v3597_v50 = vmul.f32 %v3297_v34, %v2038_v57  ;;  %v3606_v41 = vmul.f32 %v3284_v3, %v1315_v4  ;;  %v1332_v57 = vld [vmem:[%s4668_s3 + $0x130] sm:$0xff]  ;;  %v3619_v51 = vpop.f32.mrf.mxu1 }
 0x13f   :  { %4710 = vst [vmem:[#allocation42_spill] sm:$0xff] %v3603_v38  ;;  %4712 = vst [vmem:[#allocation44_spill] sm:$0xff] %v3619_v51  ;;  %v3625_v4 = vmul.f32 %v3297_v34, %v2042_v53  ;;  %v3628_v38 = vmul.f32 %v3284_v3, %v1318_v29  ;;  %v2048_v51 = vld [vmem:[%s4669_s4 + $0xe8] sm:$0xff]  ;;  %v3643_v53 = vmul.f32 %v3297_v34, %v2040_v8  ;;  %v1333_v8 = vld [vmem:[%s4668_s3 + $0x138] sm:$0xff] }
 0x140   :  { %4706 = vst [vmem:[#allocation38_spill] sm:$0xff] %v3580_v54  ;;  %4708 = vst [vmem:[#allocation40_spill] sm:$0xff] %v3597_v50  ;;  %v1324_v54 = vld [vmem:[%s4668_s3 + $0xf0] sm:$0xff]  ;;  %v2047_v50 = vld [vmem:[%s4669_s4 + $0xe0] sm:$0xff]  ;;  %v3646_v29 = vmul.f32 %v3297_v34, %v2043_v11  ;;  %v772_v11 = vpop.f32.mrf.mxu0 }
 0x141   :  { %4711 = vst [vmem:[#allocation43_spill] sm:$0xff] %v3606_v41  ;;  %4713 = vst [vmem:[#allocation45_spill] sm:$0xff] %v3622_v2  ;;  %v3631_v41 = vmul.f32 %v3284_v3, %v1319_v9  ;;  %v3649_v9 = vmul.f32 %v3284_v3, %v1320_v12  ;;  %v2049_v2 = vld [vmem:[%s4669_s4 + $0xf0] sm:$0xff]  ;;  %v3664_v12 = vmul.f32 %v3297_v34, %v2044_v25  ;;  %v1326_v25 = vld [vmem:[%s4668_s3 + $0x100] sm:$0xff] }
 0x142   :  { %4714 = vst [vmem:[#allocation46_spill] sm:$0xff] %v3625_v4  ;;  %4715 = vst [vmem:[#allocation47_spill] sm:$0xff] %v3628_v38  ;;  %v3652_v4 = vmul.f32 %v3284_v3, %v1321_v16  ;;  %v3667_v16 = vmul.f32 %v3297_v34, %v2045_v35  ;;  %v3684_v35 = vpop.permute.xlu0 %1588  ;;  %v3693_v11 = vmul.f32 %v3284_v3, %v1324_v54 }
 0x143   :  { %4716 = vst [vmem:[#allocation48_spill] sm:$0xff] %v3631_v41  ;;  %4717 = vst [vmem:[#allocation49_spill] sm:$0xff] %v3643_v53  ;;  %v1325_v41 = vld [vmem:[%s4668_s3 + $0xf8] sm:$0xff]  ;;  %v3670_v53 = vmul.f32 %v3297_v34, %v2046_v36  ;;  %v3687_v36 = vmul.f32 %v3297_v34, %v2047_v50  ;;  %v1336_v50 = vld [vmem:[%s4668_s3 + $0x150] sm:$0xff]  ;;  %v3710_v54 = vmul.f32 %v3297_v34, %v2048_v51 }
 0x144   :  { %4718 = vst [vmem:[#allocation50_spill] sm:$0xff] %v3646_v29  ;;  %4719 = vst [vmem:[#allocation51_spill] sm:$0xff] %v3649_v9  ;;  %v916_v29 = vpop.f32.mrf.mxu1  ;;  %v2057_v9 = vld [vmem:[%s4669_s4 + $0x130] sm:$0xff]  ;;  %v1337_v51 = vld [vmem:[%s4668_s3 + $0x158] sm:$0xff] }
 0x145   :  { %4720 = vst [vmem:[#allocation52_spill] sm:$0xff] %v3652_v4  ;;  %4721 = vst [vmem:[#allocation53_spill] sm:$0xff] %v3664_v12  ;;  %v3673_v4 = vmul.f32 %v3284_v3, %v1322_v61  ;;  %v1331_v29 = vld [vmem:[%s4668_s3 + $0x128] sm:$0xff]  ;;  %v3690_v61 = vmul.f32 %v3284_v3, %v1323_v26  ;;  %v2050_v12 = vld [vmem:[%s4669_s4 + $0xf8] sm:$0xff]  ;;  %v3707_v26 = vpop.f32.mrf.mxu0 }
 0x146   :  { %4722 = vst [vmem:[#allocation54_spill] sm:$0xff] %v3667_v16  ;;  %4723 = vst [vmem:[#allocation55_spill] sm:$0xff] %v3670_v53  ;;  %v3696_v53 = vmul.f32 %v3284_v3, %v1332_v57  ;;  %v2055_v16 = vld [vmem:[%s4669_s4 + $0x120] sm:$0xff]  ;;  %v3713_v57 = vmul.f32 %v3284_v3, %v1330_v1  ;;  %v3730_v1 = vpop.permute.xlu1 %1583 }
 0x147   :  { %4724 = vst [vmem:[#allocation56_spill] sm:$0xff] %v3673_v4  ;;  %4725 = vst [vmem:[#allocation57_spill] sm:$0xff] %v3687_v36  ;;  %v2396_v36 = vpop.f32.mrf.mxu1  ;;  %v1327_v4 = vld [vmem:[%s4668_s3 + $0x108] sm:$0xff] }
 0x148   :  { %4726 = vst [vmem:[#allocation58_spill] sm:$0xff] %v3690_v61  ;;  %4727 = vst [vmem:[#allocation59_spill] sm:$0xff] %v3693_v11  ;;  %v3719_v11 = vmul.f32 %v3284_v3, %v1333_v8  ;;  %v1334_v61 = vld [vmem:[%s4668_s3 + $0x140] sm:$0xff]  ;;  %v3736_v8 = vmul.f32 %v3297_v34, %v2049_v2  ;;  %v777_v2 = vpop.f32.mrf.mxu0 }
 0x149   :  { %4728 = vst [vmem:[#allocation60_spill] sm:$0xff] %v3696_v53  ;;  %4729 = vst [vmem:[#allocation61_spill] sm:$0xff] %v3710_v54  ;;  %v3716_v53 = vmul.f32 %v3284_v3, %v1325_v41  ;;  %v3733_v41 = vadd.f32 %v2396_v36, %v3230_v60  ;;  %v2058_v54 = vld [vmem:[%s4669_s4 + $0x138] sm:$0xff]  ;;  %v1335_v60 = vld [vmem:[%s4668_s3 + $0x148] sm:$0xff]  ;;  %v952_v36 = vpop.f32.mrf.mxu1 }
 0x14a   :  { %4730 = vst [vmem:[#allocation62_spill] sm:$0xff] %v3713_v57  ;;  %4732 = vst [vmem:[#allocation64_spill] sm:$0xff] %v3719_v11  ;;  %v3739_v11 = vmul.f32 %v3297_v34, %v2057_v9  ;;  %v2056_v57 = vld [vmem:[%s4669_s4 + $0x128] sm:$0xff]  ;;  %v3754_v9 = vmul.f32 %v3297_v34, %v2055_v16  ;;  %v2061_v2 = vld [vmem:[%s4669_s4 + $0x150] sm:$0xff]  ;;  %v3772_v16 = vadd.f32 %v952_v36, %v3222_v52  ;;  %v3789_v52 = vpop.f32.mrf.mxu0  ;;  %v3842_v38 = vpop.permute.xlu1 %1593 }
 0x14b   :  { %4731 = vst [vmem:[#allocation63_spill] sm:$0xff] %v3716_v53  ;;  %4733 = vst [vmem:[#allocation65_spill] sm:$0xff] %v3736_v8  ;;  %v3745_v53 = vmul.f32 %v3284_v3, %v1331_v29  ;;  %v3760_v8 = vmul.f32 %v3284_v3, %v1326_v25  ;;  %v2051_v29 = vld [vmem:[%s4669_s4 + $0x100] sm:$0xff]  ;;  %v2397_v36 = vpop.f32.mrf.mxu1 }
 0x14c   :  { %4734 = vst [vmem:[#allocation66_spill] sm:$0xff] %v3739_v11  ;;  %4736 = vst [vmem:[#allocation68_spill] sm:$0xff] %v3754_v9  ;;  %v3757_v11 = vmul.f32 %v3297_v34, %v2050_v12  ;;  %v3775_v12 = vmul.f32 %v3284_v3, %v1334_v61  ;;  %v2059_v25 = vld [vmem:[%s4669_s4 + $0x140] sm:$0xff]  ;;  %v3792_v61 = vmul.f32 %v3297_v34, %v2058_v54 }
 0x14d   :  { %4735 = vst [vmem:[#allocation67_spill] sm:$0xff] %v3745_v53  ;;  %4738 = vst [vmem:[#allocation70_spill] sm:$0xff] %v3760_v8  ;;  %v3766_v53 = vmul.f32 %v3284_v3, %v1336_v50  ;;  %v1328_v50 = vld [vmem:[%s4668_s3 + $0x110] sm:$0xff]  ;;  %v3804_v9 = vmul.f32 %v3284_v3, %v1335_v60  ;;  %v3806_v8 = vpop.permute.xlu0 %1598  ;;  %v1490_v54 = vadd.f32 %v3331_v46, %v3733_v41  ;;  %v1338_v60 = vld [vmem:[%s4668_s3 + $0x160] sm:$0xff] }
 0x14e   :  { %4737 = vst [vmem:[#allocation69_spill] sm:$0xff] %v3757_v11  ;;  %4740 = vst [vmem:[#allocation72_spill] sm:$0xff] %v3775_v12  ;;  %v3781_v11 = vmul.f32 %v3284_v3, %v1327_v4  ;;  %v3795_v12 = vmul.f32 %v3297_v34, %v2056_v57  ;;  %v2052_v4 = vld [vmem:[%s4669_s4 + $0x108] sm:$0xff]  ;;  %v964_v57 = vadd.f32 %v2397_v36, %v3234_v0 }
 0x14f   :  { %4739 = vst [vmem:[#allocation71_spill] sm:$0xff] %v3766_v53  ;;  %v1340_v53 = vld [vmem:[%s4668_s3 + $0x170] sm:$0xff]  ;;  %4742 = vst [vmem:[#allocation74_spill] sm:$0xff] %v3792_v61  ;;  %v955_v61 = vpop.f32.mrf.mxu1  ;;  %v3828_v46 = vmul.f32 %v3297_v34, %v2061_v2  ;;  %v3831_v0 = vmul.f32 %v3297_v34, %v2059_v25  ;;  %v3837_v36 = vmul.f32 %v3284_v3, %v1328_v50 }
 0x150   :  { %4741 = vst [vmem:[#allocation73_spill] sm:$0xff] %v3781_v11  ;;  %4743 = vst [vmem:[#allocation75_spill] sm:$0xff] %v3795_v12  ;;  %v3801_v11 = vmul.f32 %v3284_v3, %v1337_v51  ;;  %v3816_v12 = vmul.f32 %v3297_v34, %v2051_v29  ;;  %v2062_v51 = vld [vmem:[%s4669_s4 + $0x158] sm:$0xff]  ;;  %v2060_v29 = vld [vmem:[%s4669_s4 + $0x148] sm:$0xff]  ;;  %v1488_v2 = vadd.f32 %v3337_v48, %v3772_v16 }
 0x151   :  { %4745 = vst [vmem:[#allocation77_spill] sm:$0xff] %v3804_v9  ;;  %1193 = vst [vmem:[%s4671_s6 + $0x10] sm:$0xff] %v3733_v41  ;;  %v1329_v9 = vld [vmem:[%s4668_s3 + $0x118] sm:$0xff]  ;;  %v3852_v25 = vmul.f32 %v3297_v34, %v2052_v4  ;;  %v956_v50 = vadd.f32 %v955_v61, %v3226_v56  ;;  %v1491_v56 = vadd.f32 %v3340_v49, %v964_v57 }
 0x152   :  { %4744 = vst [vmem:[#allocation76_spill] sm:$0xff] %v3801_v11  ;;  %4746 = vst [vmem:[#allocation78_spill] sm:$0xff] %v3816_v12  ;;  %v780_v11 = vpop.f32.mrf.mxu0  ;;  %v3840_v12 = vmul.f32 %v3284_v3, %v1340_v53  ;;  %v1341_v53 = vld [vmem:[%s4668_s3 + $0x178] sm:$0xff]  ;;  %v3867_v48 = vmul.f32 %v3284_v3, %v1329_v9  ;;  %v3876_v61 = vmul.f32 %v3297_v34, %v2060_v29 }
 0x153   :  { %4747 = vst [vmem:[#allocation79_spill] sm:$0xff] %v3831_v0  ;;  %4748 = vst [vmem:[#allocation80_spill] sm:$0xff] %v3837_v36  ;;  %v1778_v11 = vmul.f32 %v3258_v17, %v1490_v54  ;;  %v2400_v17 = vpop.f32.mrf.mxu1  ;;  %v3861_v0 = vmul.f32 %v3297_v34, %v2062_v51  ;;  %v3864_v36 = vmul.f32 %v3284_v3, %v1338_v60 }
 0x154   :  { %4749 = vst [vmem:[#allocation81_spill] sm:$0xff] %v3840_v12  ;;  %1191 = vst [vmem:[%s4671_s6] sm:$0xff] %v3772_v16  ;;  %v3858_v12 = vpop.f32.mrf.mxu0  ;;  %v1875_v51 = vmul.f32 %v3334_v47, %v1490_v54  ;;  %v977_v60 = vadd.f32 %v2400_v17, %v3254_v15  ;;  %v1873_v49 = vmul.f32 %v3334_v47, %v1488_v2  ;;  %v3897_v17 = vpop.permute.xlu1 %1603 }
 0x155   :  { %4750 = vst [vmem:[#allocation82_spill] sm:$0xff] %v3852_v25  ;;  %4751 = vst [vmem:[#allocation83_spill] sm:$0xff] %v3861_v0  ;;  %v1826_v4 = vsub.f32 %v3733_v41, %v1778_v11  ;;  %v1776_v25 = vmul.f32 %v3242_v7, %v1488_v2  ;;  %v968_v9 = vpop.f32.mrf.mxu1  ;;  %v3883_v41 = vpop.permute.xlu0 %1608  ;;  %v1779_v29 = vmul.f32 %v3312_v39, %v1491_v56 }
 0x156   :  { %4752 = vst [vmem:[#allocation84_spill] sm:$0xff] %v3867_v48  ;;  %1194 = vst [vmem:[%s4671_s6 + $0x18] sm:$0xff] %v964_v57  ;;  %v785_v0 = vpop.f32.mrf.mxu0  ;;  %v3881_v48 = vmul.f32 %v3284_v3, %v1341_v53  ;;  %v1489_v15 = vadd.f32 %v3360_v62, %v956_v50  ;;  %v969_v54 = vadd.f32 %v968_v9, %v3238_v5 }
 0x157   :  { %4753 = vst [vmem:[#allocation85_spill] sm:$0xff] %v3876_v61  ;;  %v1925_v7 = vmul.f32 %v3354_v58, %v1826_v4  ;;  %v1824_v11 = vsub.f32 %v3772_v16, %v1776_v25  ;;  %v1876_v61 = vmul.f32 %v3334_v47, %v1491_v56  ;;  %1192 = vst [vmem:[%s4671_s6 + $0x8] sm:$0xff] %v956_v50  ;;  %v2401_v53 = vpop.f32.mrf.mxu1 }
 0x158   :  { %4754 = vst [vmem:[#allocation86_spill] sm:$0xff] %v3881_v48  ;;  %v3895_v0 = vpop.f32.mrf.mxu0  ;;  %v1827_v25 = vsub.f32 %v964_v57, %v1779_v29  ;;  %v980_v39 = vadd.f32 %v2401_v53, %v3269_v22  ;;  %v1777_v4 = vmul.f32 %v3250_v14, %v1489_v15  ;;  %v1874_v56 = vmul.f32 %v3334_v47, %v1489_v15 }
 0x159   :  { %v1973_v16 = vadd.f32 %v1925_v7, %v1875_v51  ;;  %v1923_v2 = vmul.f32 %v3354_v58, %v1824_v11  ;;  %1197 = vst [vmem:[%s4671_s6 + $0x30] sm:$0xff] %v977_v60  ;;  %v1494_v5 = vadd.f32 %v3363_v63, %v977_v60  ;;  %v971_v9 = vpop.f32.mrf.mxu1  ;;  %1195 = vst [vmem:[%s4671_s6 + $0x20] sm:$0xff] %v969_v54  ;;  %v3917_v15 = vpop.permute.xlu0 %1618 }
 0x15a   :  { %v788_v62 = vpop.f32.mrf.mxu0  ;;  %v1926_v7 = vmul.f32 %v3354_v58, %v1827_v25  ;;  %v1825_v57 = vsub.f32 %v956_v50, %v1777_v4  ;;  %v1492_v11 = vadd.f32 %v3383_v20, %v969_v54  ;;  %1198 = vst [vmem:[%s4671_s6 + $0x38] sm:$0xff] %v980_v39 }
 0x15b   :  { %v2120_v48 = vmul.f32 %v3377_v18, %v1973_v16  ;;  %v1971_v51 = vadd.f32 %v1923_v2, %v1873_v49  ;;  %v1782_v22 = vmul.f32 %v3400_v28, %v1494_v5  ;;  %v1879_v14 = vmul.f32 %v3334_v47, %v1494_v5  ;;  %v2404_v63 = vpop.f32.mrf.mxu1  ;;  %v3928_v62 = vpop.permute.xlu1 %1613 }
 0x15c   :  { %v3915_v29 = vpop.f32.mrf.mxu0  ;;  %v1974_v50 = vadd.f32 %v1926_v7, %v1876_v61  ;;  %v1495_v28 = vadd.f32 %v3386_v21, %v980_v39  ;;  %v1924_v16 = vmul.f32 %v3354_v58, %v1825_v57  ;;  %v1780_v20 = vmul.f32 %v3282_v27, %v1492_v11 }
 0x15d   :  { %v2168_v49 = vadd.f32 %v2120_v48, %v3357_v59  ;;  %v2118_v53 = vmul.f32 %v3377_v18, %v1971_v51  ;;  %v1830_v2 = vsub.f32 %v977_v60, %v1782_v22  ;;  %v1877_v25 = vmul.f32 %v3334_v47, %v1492_v11  ;;  %v984_v5 = vpop.f32.mrf.mxu1 }
 0x15e   :  { %v793_v4 = vpop.f32.mrf.mxu0  ;;  %v2121_v48 = vmul.f32 %v3377_v18, %v1974_v50  ;;  %v1783_v21 = vmul.f32 %v3594_v37, %v1495_v28  ;;  %v1880_v61 = vmul.f32 %v3334_v47, %v1495_v28  ;;  %v1972_v60 = vadd.f32 %v1924_v16, %v1874_v56  ;;  %v3949_v50 = vpop.permute.xlu0 %1628 }
 0x15f   :  { %2216 = vst [vmem:[%s4672_s7 + $0x10] sm:$0xff] %v2168_v49  ;;  %v2166_v59 = vadd.f32 %v2118_v53, %v3380_v19  ;;  %v1929_v27 = vmul.f32 %v3354_v58, %v1830_v2  ;;  %v1828_v51 = vsub.f32 %v969_v54, %v1780_v20  ;;  %v972_v7 = vadd.f32 %v971_v9, %v3244_v10  ;;  %v2405_v22 = vpop.f32.mrf.mxu1  ;;  %v3964_v2 = vpop.permute.xlu1 %1623 }
 0x160   :  { %v3939_v57 = vpop.f32.mrf.mxu0  ;;  %v2169_v19 = vadd.f32 %v2121_v48, %v3403_v30  ;;  %v1831_v11 = vsub.f32 %v980_v39, %v1783_v21  ;;  %v993_v37 = vadd.f32 %v2404_v63, %v3525_v24  ;;  %v985_v49 = vadd.f32 %v984_v5, %v3326_v44 }
 0x161   :  { %2214 = vst [vmem:[%s4672_s7] sm:$0xff] %v2166_v59  ;;  %v2119_v56 = vmul.f32 %v3377_v18, %v1972_v60  ;;  %v1977_v53 = vadd.f32 %v1929_v27, %v1879_v14  ;;  %v1927_v54 = vmul.f32 %v3354_v58, %v1828_v51  ;;  %v987_v9 = vpop.f32.mrf.mxu1  ;;  %v996_v39 = vadd.f32 %v2405_v22, %v3617_v43  ;;  %v4755_v27 = vld [vmem:[#allocation18_spill] sm:$0xff] }
 0x162   :  { %v796_v10 = vpop.f32.mrf.mxu0  ;;  %2217 = vst [vmem:[%s4672_s7 + $0x18] sm:$0xff] %v2169_v19  ;;  %v1930_v30 = vmul.f32 %v3354_v58, %v1831_v11  ;;  %1196 = vst [vmem:[%s4671_s6 + $0x28] sm:$0xff] %v972_v7  ;;  %v1493_v14 = vadd.f32 %v3412_v33, %v972_v7  ;;  %v1496_v43 = vadd.f32 %v3440_v6, %v985_v49  ;;  %v3996_v19 = vpop.permute.xlu0 %1638 }
 0x163   :  { %v2167_v24 = vadd.f32 %v2119_v56, %v3406_v31  ;;  %v2124_v44 = vmul.f32 %v3377_v18, %v1977_v53  ;;  %v1975_v63 = vadd.f32 %v1927_v54, %v1877_v25  ;;  %v2408_v16 = vpop.f32.mrf.mxu1  ;;  %1201 = vst [vmem:[%s4671_s6 + $0x50] sm:$0xff] %v993_v37  ;;  %v1498_v31 = vadd.f32 %v3437_v23, %v993_v37  ;;  %v4757_v54 = vld [vmem:[#allocation14_spill] sm:$0xff] }
 0x164   :  { %v3962_v28 = vpop.f32.mrf.mxu0  ;;  %v1978_v20 = vadd.f32 %v1930_v30, %v1880_v61  ;;  %1199 = vst [vmem:[%s4671_s6 + $0x40] sm:$0xff] %v985_v49  ;;  %v1781_v4 = vmul.f32 %v3454_v42, %v1493_v14  ;;  %v1878_v5 = vmul.f32 %v3334_v47, %v1493_v14  ;;  %v1784_v61 = vmul.f32 %v3550_v13, %v1496_v43  ;;  %v4756_v13 = vld [vmem:[#allocation16_spill] sm:$0xff]  ;;  %v4007_v14 = vpop.permute.xlu1 %1633 }
 0x165   :  { %2215 = vst [vmem:[%s4672_s7 + $0x8] sm:$0xff] %v2167_v24  ;;  %v2172_v33 = vadd.f32 %v2124_v44, %v3409_v32  ;;  %v2122_v25 = vmul.f32 %v3377_v18, %v1975_v63  ;;  %v1000_v23 = vpop.f32.mrf.mxu1  ;;  %v1786_v21 = vmul.f32 %v3684_v35, %v1498_v31  ;;  %v1883_v6 = vmul.f32 %v3334_v47, %v1498_v31 }
 0x166   :  { %v801_v59 = vpop.f32.mrf.mxu0  ;;  %v2125_v48 = vmul.f32 %v3377_v18, %v1978_v20  ;;  %1202 = vst [vmem:[%s4671_s6 + $0x58] sm:$0xff] %v996_v39  ;;  %v1829_v42 = vsub.f32 %v972_v7, %v1781_v4  ;;  %v1881_v60 = vmul.f32 %v3334_v47, %v1496_v43  ;;  %v1499_v51 = vadd.f32 %v4755_v27, %v996_v39 }
 0x167   :  { %2220 = vst [vmem:[%s4672_s7 + $0x30] sm:$0xff] %v2172_v33  ;;  %v2170_v32 = vadd.f32 %v2122_v25, %v3431_v45  ;;  %v2409_v22 = vpop.f32.mrf.mxu1  ;;  %v1834_v56 = vsub.f32 %v993_v37, %v1786_v21  ;;  %v1832_v53 = vsub.f32 %v985_v49, %v1784_v61  ;;  %v988_v10 = vadd.f32 %v987_v9, %v4757_v54  ;;  %v4758_v25 = vld [vmem:[#allocation19_spill] sm:$0xff] }
 0x168   :  { %v3994_v35 = vpop.f32.mrf.mxu0  ;;  %v2173_v11 = vadd.f32 %v2125_v48, %v4756_v13  ;;  %v1928_v45 = vmul.f32 %v3354_v58, %v1829_v42  ;;  %v1787_v7 = vmul.f32 %v3842_v38, %v1499_v51  ;;  %v1884_v30 = vmul.f32 %v3334_v47, %v1499_v51  ;;  %v4032_v48 = vpop.permute.xlu0 %1648  ;;  %v4760_v42 = vld [vmem:[#allocation17_spill] sm:$0xff] }
 0x169   :  { %2218 = vst [vmem:[%s4672_s7 + $0x20] sm:$0xff] %v2170_v32  ;;  %v1009_v24 = vadd.f32 %v2408_v16, %v3858_v12  ;;  %v1003_v63 = vpop.f32.mrf.mxu1  ;;  %v1933_v37 = vmul.f32 %v3354_v58, %v1834_v56  ;;  %v1931_v49 = vmul.f32 %v3354_v58, %v1832_v53  ;;  %v4015_v9 = vadd.f32 %v1000_v23, %v3707_v26  ;;  %v4761_v53 = vld [vmem:[#allocation21_spill] sm:$0xff] }
 0x16a   :  { %v804_v44 = vpop.f32.mrf.mxu0  ;;  %2221 = vst [vmem:[%s4672_s7 + $0x38] sm:$0xff] %v2173_v11  ;;  %v1976_v38 = vadd.f32 %v1928_v45, %v1878_v5  ;;  %v1835_v20 = vsub.f32 %v996_v39, %v1787_v7  ;;  %v4018_v31 = vadd.f32 %v2409_v22, %v3895_v0  ;;  %1200 = vst [vmem:[%s4671_s6 + $0x48] sm:$0xff] %v988_v10  ;;  %v4759_v0 = vld [vmem:[#allocation20_spill] sm:$0xff]  ;;  %v4051_v11 = vpop.permute.xlu1 %1643  ;;  %v4762_v7 = vld [vmem:[#allocation22_spill] sm:$0xff] }
 0x16b   :  { %v2412_v16 = vpop.f32.mrf.mxu1  ;;  %v1981_v43 = vadd.f32 %v1933_v37, %v1883_v6  ;;  %v1979_v33 = vadd.f32 %v1931_v49, %v1881_v60  ;;  %v1497_v4 = vadd.f32 %v4758_v25, %v988_v10  ;;  %1205 = vst [vmem:[%s4671_s6 + $0x70] sm:$0xff] %v1009_v24  ;;  %v1502_v39 = vadd.f32 %v4759_v0, %v1009_v24  ;;  %v4763_v37 = vld [vmem:[#allocation23_spill] sm:$0xff] }
 0x16c   :  { %v4020_v12 = vpop.f32.mrf.mxu0  ;;  %v2123_v59 = vmul.f32 %v3377_v18, %v1976_v38  ;;  %v1934_v26 = vmul.f32 %v3354_v58, %v1835_v20  ;;  %1203 = vst [vmem:[%s4671_s6 + $0x60] sm:$0xff] %v4015_v9  ;;  %1206 = vst [vmem:[%s4671_s6 + $0x78] sm:$0xff] %v4018_v31  ;;  %v1503_v49 = vadd.f32 %v4763_v37, %v4018_v31 }
 0x16d   :  { %v1016_v23 = vpop.f32.mrf.mxu1  ;;  %v2128_v21 = vmul.f32 %v3377_v18, %v1981_v43  ;;  %v2126_v6 = vmul.f32 %v3377_v18, %v1979_v33  ;;  %v1785_v61 = vmul.f32 %v3730_v1, %v1497_v4  ;;  %v1882_v32 = vmul.f32 %v3334_v47, %v1497_v4 }
 0x16e   :  { %v809_v5 = vpop.f32.mrf.mxu0  ;;  %v2171_v60 = vadd.f32 %v2123_v59, %v4760_v42  ;;  %v1982_v27 = vadd.f32 %v1934_v26, %v1884_v30  ;;  %v1790_v51 = vmul.f32 %v3883_v41, %v1502_v39  ;;  %v1887_v22 = vmul.f32 %v3334_v47, %v1502_v39  ;;  %v4080_v39 = vpop.permute.xlu0 %1658 }
 0x16f   :  { %v2413_v13 = vpop.f32.mrf.mxu1  ;;  %v2176_v56 = vadd.f32 %v2128_v21, %v3481_v55  ;;  %v2174_v54 = vadd.f32 %v2126_v6, %v4761_v53  ;;  %v1833_v45 = vsub.f32 %v988_v10, %v1785_v61  ;;  %v1500_v41 = vadd.f32 %v4762_v7, %v4015_v9  ;;  %v4093_v42 = vpop.permute.xlu1 %1653  ;;  %v4768_v7 = vld [vmem:[#allocation29_spill] sm:$0xff] }
 0x170   :  { %v4049_v1 = vpop.f32.mrf.mxu0  ;;  %2219 = vst [vmem:[%s4672_s7 + $0x28] sm:$0xff] %v2171_v60  ;;  %v2129_v30 = vmul.f32 %v3377_v18, %v1982_v27  ;;  %v1838_v44 = vsub.f32 %v1009_v24, %v1790_v51  ;;  %v4064_v38 = vadd.f32 %v1003_v63, %v3789_v52  ;;  %v1025_v33 = vadd.f32 %v2412_v16, %v3962_v28  ;;  %v4764_v52 = vld [vmem:[#allocation24_spill] sm:$0xff] }
 0x171   :  { %v1019_v20 = vpop.f32.mrf.mxu1  ;;  %2224 = vst [vmem:[%s4672_s7 + $0x50] sm:$0xff] %v2176_v56  ;;  %2222 = vst [vmem:[%s4672_s7 + $0x40] sm:$0xff] %v2174_v54  ;;  %v1932_v10 = vmul.f32 %v3354_v58, %v1833_v45  ;;  %v1788_v24 = vmul.f32 %v3806_v8, %v1500_v41  ;;  %v1885_v43 = vmul.f32 %v3334_v47, %v1500_v41 }
 0x172   :  { %v812_v55 = vpop.f32.mrf.mxu0  ;;  %v2177_v63 = vadd.f32 %v2129_v30, %v4764_v52  ;;  %v1937_v25 = vmul.f32 %v3354_v58, %v1838_v44  ;;  %v1791_v4 = vmul.f32 %v3928_v62, %v1503_v49  ;;  %v1888_v59 = vmul.f32 %v3334_v47, %v1503_v49  ;;  %1204 = vst [vmem:[%s4671_s6 + $0x68] sm:$0xff] %v4064_v38  ;;  %v4770_v52 = vld [vmem:[#allocation32_spill] sm:$0xff] }
 0x173   :  { %v2416_v0 = vpop.f32.mrf.mxu1  ;;  %v1980_v5 = vadd.f32 %v1932_v10, %v1882_v32  ;;  %v1836_v21 = vsub.f32 %v4015_v9, %v1788_v24  ;;  %v4088_v16 = vadd.f32 %v1016_v23, %v3915_v29  ;;  %v4091_v62 = vadd.f32 %v2413_v13, %v3994_v35  ;;  %1209 = vst [vmem:[%s4671_s6 + $0x90] sm:$0xff] %v1025_v33  ;;  %v4766_v35 = vld [vmem:[#allocation27_spill] sm:$0xff]  ;;  %v4767_v13 = vld [vmem:[#allocation25_spill] sm:$0xff]  ;;  %v4125_v55 = vpop.permute.xlu0 %1668 }
 0x174   :  { %v815_v26 = vpop.f32.mrf.mxu0  ;;  %2225 = vst [vmem:[%s4672_s7 + $0x58] sm:$0xff] %v2177_v63  ;;  %v1985_v8 = vadd.f32 %v1937_v25, %v1887_v22  ;;  %v1839_v28 = vsub.f32 %v4018_v31, %v1791_v4  ;;  %v4765_v31 = vld [vmem:[#allocation26_spill] sm:$0xff]  ;;  %v1506_v23 = vadd.f32 %v4766_v35, %v1025_v33  ;;  %v4769_v24 = vld [vmem:[#allocation31_spill] sm:$0xff] }
 0x175   :  { %v1032_v61 = vpop.f32.mrf.mxu1  ;;  %v2127_v32 = vmul.f32 %v3377_v18, %v1980_v5  ;;  %v1935_v9 = vmul.f32 %v3354_v58, %v1836_v21  ;;  %v1501_v29 = vadd.f32 %v4765_v31, %v4064_v38  ;;  %1207 = vst [vmem:[%s4671_s6 + $0x80] sm:$0xff] %v4088_v16  ;;  %1210 = vst [vmem:[%s4671_s6 + $0x98] sm:$0xff] %v4091_v62 }
 0x176   :  { %v817_v6 = vpop.f32.mrf.mxu0  ;;  %v2132_v60 = vmul.f32 %v3377_v18, %v1985_v8  ;;  %v1938_v27 = vmul.f32 %v3354_v58, %v1839_v28  ;;  %v1794_v44 = vmul.f32 %v3949_v50, %v1506_v23  ;;  %v1891_v37 = vmul.f32 %v3334_v47, %v1506_v23  ;;  %v4147_v8 = vpop.permute.xlu1 %1663  ;;  %v4771_v28 = vld [vmem:[#allocation30_spill] sm:$0xff] }
 0x177   :  { %v2417_v22 = vpop.f32.mrf.mxu1  ;;  %v2175_v56 = vadd.f32 %v2127_v32, %v4767_v13  ;;  %v1983_v53 = vadd.f32 %v1935_v9, %v1885_v43  ;;  %v1789_v54 = vmul.f32 %v3897_v17, %v1501_v29  ;;  %v1886_v45 = vmul.f32 %v3334_v47, %v1501_v29  ;;  %v4772_v29 = vld [vmem:[#allocation33_spill] sm:$0xff] }
 0x178   :  { %v818_v51 = vpop.f32.mrf.mxu0  ;;  %v2180_v41 = vadd.f32 %v2132_v60, %v4768_v7  ;;  %v1986_v30 = vadd.f32 %v1938_v27, %v1888_v59  ;;  %v1504_v43 = vadd.f32 %v4769_v24, %v4088_v16  ;;  %v1507_v63 = vadd.f32 %v4770_v52, %v4091_v62 }
 0x179   :  { %v4123_v49 = vpop.f32.mrf.mxu1  ;;  %2223 = vst [vmem:[%s4672_s7 + $0x48] sm:$0xff] %v2175_v56  ;;  %v2130_v50 = vmul.f32 %v3377_v18, %v1983_v53  ;;  %v1837_v10 = vsub.f32 %v4064_v38, %v1789_v54  ;;  %v1842_v4 = vsub.f32 %v1025_v33, %v1794_v44  ;;  %v4141_v59 = vadd.f32 %v1019_v20, %v3939_v57  ;;  %v4172_v54 = vpop.permute.xlu0 %1678 }
 0x17a   :  { %v820_v17 = vpop.f32.mrf.mxu0  ;;  %2228 = vst [vmem:[%s4672_s7 + $0x70] sm:$0xff] %v2180_v41  ;;  %v2133_v25 = vmul.f32 %v3377_v18, %v1986_v30  ;;  %v4143_v5 = vadd.f32 %v2416_v0, %v815_v26  ;;  %v1792_v9 = vmul.f32 %v3917_v15, %v1504_v43  ;;  %v1889_v31 = vmul.f32 %v3334_v47, %v1504_v43  ;;  %v4190_v44 = vpop.permute.xlu1 %1673 }
 0x17b   :  { %v4145_v38 = vpop.f32.mrf.mxu1  ;;  %v2178_v6 = vadd.f32 %v2130_v50, %v4771_v28  ;;  %v1936_v32 = vmul.f32 %v3354_v58, %v1837_v10  ;;  %v1941_v57 = vmul.f32 %v3354_v58, %v1842_v4  ;;  %v1795_v20 = vmul.f32 %v4007_v14, %v1507_v63  ;;  %1208 = vst [vmem:[%s4671_s6 + $0x88] sm:$0xff] %v4141_v59  ;;  %v4776_v28 = vld [vmem:[#allocation38_spill] sm:$0xff] }
 0x17c   :  { %v823_v21 = vpop.f32.mrf.mxu0  ;;  %v2181_v33 = vadd.f32 %v2133_v25, %v4772_v29  ;;  %v1892_v26 = vmul.f32 %v3334_v47, %v1507_v63  ;;  %v1840_v60 = vsub.f32 %v4088_v16, %v1792_v9  ;;  %v4166_v14 = vadd.f32 %v1032_v61, %v4020_v12  ;;  %1213 = vst [vmem:[%s4671_s6 + $0xb0] sm:$0xff] %v4143_v5  ;;  %v4774_v61 = vld [vmem:[#allocation36_spill] sm:$0xff] }
 0x17d   :  { %v1048_v35 = vpop.f32.mrf.mxu1  ;;  %2226 = vst [vmem:[%s4672_s7 + $0x60] sm:$0xff] %v2178_v6  ;;  %v1984_v23 = vadd.f32 %v1936_v32, %v1886_v45  ;;  %v1989_v15 = vadd.f32 %v1941_v57, %v1891_v37  ;;  %v1843_v27 = vsub.f32 %v4091_v62, %v1795_v20  ;;  %v4168_v13 = vadd.f32 %v2417_v22, %v818_v51  ;;  %v4773_v62 = vld [vmem:[#allocation35_spill] sm:$0xff]  ;;  %v4775_v37 = vld [vmem:[#allocation34_spill] sm:$0xff] }
 0x17e   :  { %v825_v0 = vpop.f32.mrf.mxu0  ;;  %2229 = vst [vmem:[%s4672_s7 + $0x78] sm:$0xff] %v2181_v33  ;;  %v1939_v16 = vmul.f32 %v3354_v58, %v1840_v60  ;;  %v1505_v12 = vadd.f32 %v4773_v62, %v4141_v59  ;;  %v1510_v51 = vadd.f32 %v4774_v61, %v4143_v5  ;;  %1211 = vst [vmem:[%s4671_s6 + $0xa0] sm:$0xff] %v4166_v14  ;;  %v4777_v32 = vld [vmem:[#allocation39_spill] sm:$0xff]  ;;  %v4240_v62 = vpop.permute.xlu1 %1683 }
 0x17f   :  { %v4170_v53 = vpop.f32.mrf.mxu1  ;;  %v2131_v45 = vmul.f32 %v3377_v18, %v1984_v23  ;;  %v2136_v22 = vmul.f32 %v3377_v18, %v1989_v15  ;;  %v1942_v7 = vmul.f32 %v3354_v58, %v1843_v27  ;;  %1214 = vst [vmem:[%s4671_s6 + $0xb8] sm:$0xff] %v4168_v13  ;;  %v1508_v6 = vadd.f32 %v4776_v28, %v4166_v14  ;;  %v4778_v0 = vld [vmem:[#allocation37_spill] sm:$0xff]  ;;  %v4783_v28 = vld [vmem:[#allocation42_spill] sm:$0xff] }
 0x180   :  { %v826_v56 = vpop.f32.mrf.mxu0  ;;  %v1987_v50 = vadd.f32 %v1939_v16, %v1889_v31  ;;  %v1793_v10 = vmul.f32 %v3964_v2, %v1505_v12  ;;  %v1890_v24 = vmul.f32 %v3334_v47, %v1505_v12  ;;  %v1798_v63 = vmul.f32 %v4032_v48, %v1510_v51 }
 0x181   :  { %v1051_v30 = vpop.f32.mrf.mxu1  ;;  %v2179_v17 = vadd.f32 %v2131_v45, %v4775_v37  ;;  %v2184_v43 = vadd.f32 %v2136_v22, %v3574_v40  ;;  %v1990_v52 = vadd.f32 %v1942_v7, %v1892_v26  ;;  %v1895_v25 = vmul.f32 %v3334_v47, %v1510_v51  ;;  %v4228_v26 = vpop.permute.xlu0 %1688  ;;  %v4779_v45 = vld [vmem:[#allocation40_spill] sm:$0xff]  ;;  %v1339_v37 = vld [vmem:[%s4668_s3 + $0x168] sm:$0xff] }
 0x182   :  { %v828_v41 = vpop.f32.mrf.mxu0  ;;  %v2134_v40 = vmul.f32 %v3377_v18, %v1987_v50  ;;  %v1841_v48 = vsub.f32 %v4141_v59, %v1793_v10  ;;  %v1511_v9 = vadd.f32 %v4777_v32, %v4168_v13  ;;  %v1846_v29 = vsub.f32 %v4143_v5, %v1798_v63  ;;  %v4782_v63 = vld [vmem:[#allocation41_spill] sm:$0xff] }
 0x183   :  { %v4206_v4 = vpop.f32.mrf.mxu1  ;;  %2227 = vst [vmem:[%s4672_s7 + $0x68] sm:$0xff] %v2179_v17  ;;  %2232 = vst [vmem:[%s4672_s7 + $0x90] sm:$0xff] %v2184_v43  ;;  %v2137_v31 = vmul.f32 %v3377_v18, %v1990_v52  ;;  %v4224_v33 = vadd.f32 %v4123_v49, %v4049_v1  ;;  %v4226_v57 = vadd.f32 %v1048_v35, %v823_v21 }
 0x184   :  { %v831_v2 = vpop.f32.mrf.mxu0  ;;  %v2182_v23 = vadd.f32 %v2134_v40, %v4778_v0  ;;  %v1940_v60 = vmul.f32 %v3354_v58, %v1841_v48  ;;  %v1796_v15 = vmul.f32 %v3996_v19, %v1508_v6  ;;  %v1893_v27 = vmul.f32 %v3334_v47, %v1508_v6  ;;  %v4784_v0 = vld [vmem:[#allocation48_spill] sm:$0xff] }
 0x185   :  { %v1064_v20 = vpop.f32.mrf.mxu1  ;;  %v2185_v5 = vadd.f32 %v2137_v31, %v4779_v45  ;;  %v1945_v16 = vmul.f32 %v3354_v58, %v1846_v29  ;;  %v1799_v1 = vmul.f32 %v4093_v42, %v1511_v9  ;;  %v1896_v49 = vmul.f32 %v3334_v47, %v1511_v9  ;;  %1212 = vst [vmem:[%s4671_s6 + $0xa8] sm:$0xff] %v4224_v33  ;;  %v4276_v52 = vpop.permute.xlu0 %1698 }
 0x186   :  { %v833_v59 = vpop.f32.mrf.mxu0  ;;  %2230 = vst [vmem:[%s4672_s7 + $0x80] sm:$0xff] %v2182_v23  ;;  %v1988_v19 = vadd.f32 %v1940_v60, %v1890_v24  ;;  %v1844_v12 = vsub.f32 %v4166_v14, %v1796_v15  ;;  %v4250_v51 = vadd.f32 %v1051_v30, %v826_v56  ;;  %v4253_v22 = vadd.f32 %v4145_v38, %v831_v2  ;;  %v4781_v38 = vld [vmem:[#allocation47_spill] sm:$0xff]  ;;  %v4296_v29 = vpop.permute.xlu1 %1693 }
 0x187   :  { %v4238_v35 = vpop.f32.mrf.mxu1  ;;  %2233 = vst [vmem:[%s4672_s7 + $0x98] sm:$0xff] %v2185_v5  ;;  %v1993_v61 = vadd.f32 %v1945_v16, %v1895_v25  ;;  %v1847_v42 = vsub.f32 %v4168_v13, %v1799_v1  ;;  %v4780_v13 = vld [vmem:[#allocation43_spill] sm:$0xff]  ;;  %1215 = vst [vmem:[%s4671_s6 + $0xc0] sm:$0xff] %v4226_v57  ;;  %v1512_v30 = vadd.f32 %v4781_v38, %v4226_v57 }
 0x188   :  { %v834_v21 = vpop.f32.mrf.mxu0  ;;  %v2135_v14 = vmul.f32 %v3377_v18, %v1988_v19  ;;  %v1943_v17 = vmul.f32 %v3354_v58, %v1844_v12  ;;  %v1509_v56 = vadd.f32 %v4780_v13, %v4224_v33  ;;  %v4281_v48 = vmul.f32 %v3284_v3, %v1339_v37  ;;  %1216 = vst [vmem:[%s4671_s6 + $0xc8] sm:$0xff] %v4250_v51  ;;  %v4785_v60 = vld [vmem:[#allocation51_spill] sm:$0xff] }
 0x189   :  { %v1067_v41 = vpop.f32.mrf.mxu1  ;;  %v2140_v50 = vmul.f32 %v3377_v18, %v1993_v61  ;;  %v1946_v10 = vmul.f32 %v3354_v58, %v1847_v42  ;;  %v1800_v31 = vmul.f32 %v4080_v39, %v1512_v30  ;;  %1217 = vst [vmem:[%s4671_s6 + $0xd0] sm:$0xff] %v4253_v22  ;;  %v1513_v23 = vadd.f32 %v4784_v0, %v4250_v51 }
 0x18a   :  { %v836_v7 = vpop.f32.mrf.mxu0  ;;  %v2183_v25 = vadd.f32 %v2135_v14, %v4782_v63  ;;  %v1991_v2 = vadd.f32 %v1943_v17, %v1893_v27  ;;  %v1797_v40 = vmul.f32 %v4051_v11, %v1509_v56  ;;  %v1894_v9 = vmul.f32 %v3334_v47, %v1509_v56  ;;  %v4327_v17 = vpop.permute.xlu0 %1708 }
 0x18b   :  { %v4274_v43 = vpop.f32.mrf.mxu1  ;;  %v2188_v6 = vadd.f32 %v2140_v50, %v4783_v28  ;;  %v1994_v32 = vadd.f32 %v1946_v10, %v1896_v49  ;;  %v1514_v15 = vadd.f32 %v4785_v60, %v4253_v22  ;;  %v1848_v45 = vsub.f32 %v4226_v57, %v1800_v31  ;;  %v4786_v49 = vld [vmem:[#allocation45_spill] sm:$0xff]  ;;  %v4787_v7 = vld [vmem:[#allocation46_spill] sm:$0xff] }
 0x18c   :  { %v839_v24 = vpop.f32.mrf.mxu0  ;;  %2231 = vst [vmem:[%s4672_s7 + $0x88] sm:$0xff] %v2183_v25  ;;  %v2138_v39 = vmul.f32 %v3377_v18, %v1991_v2  ;;  %v1845_v59 = vsub.f32 %v4224_v33, %v1797_v40  ;;  %v1060_v5 = vadd.f32 %v4170_v53, %v834_v21  ;;  %v1897_v61 = vmul.f32 %v3334_v47, %v1512_v30  ;;  %v4790_v31 = vld [vmem:[#allocation49_spill] sm:$0xff] }
 0x18d   :  { %v4294_v3 = vpop.f32.mrf.mxu1  ;;  %2236 = vst [vmem:[%s4672_s7 + $0xb0] sm:$0xff] %v2188_v6  ;;  %v2141_v27 = vmul.f32 %v3377_v18, %v1994_v32  ;;  %v4313_v16 = vadd.f32 %v1064_v20, %v839_v24  ;;  %v1801_v42 = vmul.f32 %v4147_v8, %v1513_v23  ;;  %v1947_v14 = vmul.f32 %v3354_v58, %v1848_v45  ;;  %v4338_v24 = vpop.permute.xlu1 %1703 }
 0x18e   :  { %v841_v11 = vpop.f32.mrf.mxu0  ;;  %v2186_v19 = vadd.f32 %v2138_v39, %v4786_v49  ;;  %v1944_v12 = vmul.f32 %v3354_v58, %v1845_v59  ;;  %v1898_v57 = vmul.f32 %v3334_v47, %v1513_v23  ;;  %v1802_v53 = vmul.f32 %v4125_v55, %v1514_v15  ;;  %1218 = vst [vmem:[%s4671_s6 + $0xd8] sm:$0xff] %v1060_v5  ;;  %v4791_v23 = vld [vmem:[#allocation50_spill] sm:$0xff] }
 0x18f   :  { %v4315_v33 = vpop.f32.mrf.mxu1  ;;  %v2189_v37 = vadd.f32 %v2141_v27, %v4787_v7  ;;  %v1849_v8 = vsub.f32 %v4250_v51, %v1801_v42  ;;  %v1995_v56 = vadd.f32 %v1947_v14, %v1897_v61  ;;  %v1899_v55 = vmul.f32 %v3334_v47, %v1514_v15  ;;  %v4788_v51 = vld [vmem:[#allocation52_spill] sm:$0xff]  ;;  %1219 = vst [vmem:[%s4671_s6 + $0xe0] sm:$0xff] %v4313_v16  ;;  %v4793_v7 = vld [vmem:[#allocation7_spill] sm:$0xff]  ;;  %v4794_v14 = vld [vmem:[#allocation5_spill] sm:$0xff] }
 0x190   :  { %v842_v1 = vpop.f32.mrf.mxu0  ;;  %2234 = vst [vmem:[%s4672_s7 + $0xa0] sm:$0xff] %v2186_v19  ;;  %v1992_v13 = vadd.f32 %v1944_v12, %v1894_v9  ;;  %v1850_v38 = vsub.f32 %v4253_v22, %v1802_v53  ;;  %v1515_v2 = vadd.f32 %v4788_v51, %v1060_v5  ;;  %v4789_v22 = vld [vmem:[#allocation56_spill] sm:$0xff]  ;;  %v4792_v19 = vld [vmem:[#allocation58_spill] sm:$0xff] }
 0x191   :  { %v4325_v21 = vpop.f32.mrf.mxu1  ;;  %2237 = vst [vmem:[%s4672_s7 + $0xb8] sm:$0xff] %v2189_v37  ;;  %v1068_v30 = vadd.f32 %v1067_v41, %v842_v1  ;;  %v1948_v25 = vmul.f32 %v3354_v58, %v1849_v8  ;;  %v1516_v41 = vadd.f32 %v4789_v22, %v4313_v16  ;;  %v2142_v40 = vmul.f32 %v3377_v18, %v1995_v56  ;;  %v1719_v1 = vpop.permute.xlu0 %1718 }
 0x192   :  { %v844_v20 = vpop.f32.mrf.mxu0  ;;  %v2139_v63 = vmul.f32 %v3377_v18, %v1992_v13  ;;  %v1949_v28 = vmul.f32 %v3354_v58, %v1850_v38  ;;  %v1803_v59 = vmul.f32 %v4190_v44, %v1515_v2  ;;  %v1900_v0 = vmul.f32 %v3334_v47, %v1515_v2  ;;  %v4795_v13 = vld [vmem:[#allocation53_spill] sm:$0xff] }
 0x193   :  { %v2432_v10 = vpop.f32.mrf.mxu1  ;;  %v1996_v39 = vadd.f32 %v1948_v25, %v1898_v57  ;;  %v2190_v60 = vadd.f32 %v2142_v40, %v4791_v23  ;;  %v1804_v27 = vmul.f32 %v4172_v54, %v1516_v41  ;;  %v1901_v45 = vmul.f32 %v3334_v47, %v1516_v41  ;;  %1220 = vst [vmem:[%s4671_s6 + $0xe8] sm:$0xff] %v1068_v30  ;;  %v4378_v20 = vpop.permute.xlu1 %1713 }
 0x194   :  { %v847_v50 = vpop.f32.mrf.mxu0  ;;  %v2187_v11 = vadd.f32 %v2139_v63, %v4790_v31  ;;  %v1997_v15 = vadd.f32 %v1949_v28, %v1899_v55  ;;  %v1851_v49 = vsub.f32 %v1060_v5, %v1803_v59  ;;  %v1517_v12 = vadd.f32 %v4792_v19, %v1068_v30 }
 0x195   :  { %v4355_v6 = vadd.f32 %v4206_v4, %v847_v50  ;;  %v1096_v9 = vpop.f32.mrf.mxu1  ;;  %v2143_v44 = vmul.f32 %v3377_v18, %v1996_v39  ;;  %2238 = vst [vmem:[%s4672_s7 + $0xc0] sm:$0xff] %v2190_v60  ;;  %v1852_v42 = vsub.f32 %v4313_v16, %v1804_v27  ;;  %v1105_v37 = vadd.f32 %v2432_v10, %v4793_v7  ;;  %v4796_v16 = vld [vmem:[#allocation54_spill] sm:$0xff]  ;;  %v4797_v10 = vld [vmem:[#allocation59_spill] sm:$0xff]  ;;  %v1729_v31 = vpop.permute.xlu0 %1728 }
 0x196   :  { %v849_v32 = vpop.f32.mrf.mxu0  ;;  %2235 = vst [vmem:[%s4672_s7 + $0xa8] sm:$0xff] %v2187_v11  ;;  %v2144_v54 = vmul.f32 %v3377_v18, %v1997_v15  ;;  %v1097_v57 = vadd.f32 %v1096_v9, %v4794_v14  ;;  %v1950_v8 = vmul.f32 %v3354_v58, %v1851_v49  ;;  %v1805_v56 = vmul.f32 %v4240_v62, %v1517_v12  ;;  %v4799_v39 = vld [vmem:[#allocation62_spill] sm:$0xff]  ;;  %v4802_v14 = vld [vmem:[#allocation63_spill] sm:$0xff] }
 0x197   :  { %v2433_v61 = vpop.f32.mrf.mxu1  ;;  %v2191_v5 = vadd.f32 %v2143_v44, %v4795_v13  ;;  %v1902_v38 = vmul.f32 %v3334_v47, %v1517_v12  ;;  %1221 = vst [vmem:[%s4671_s6 + $0xf0] sm:$0xff] %v4355_v6  ;;  %v1951_v50 = vmul.f32 %v3354_v58, %v1852_v42  ;;  %v1518_v63 = vadd.f32 %v4797_v10, %v4355_v6  ;;  %v4798_v32 = vld [vmem:[#allocation60_spill] sm:$0xff]  ;;  %v1724_v27 = vpop.permute.xlu1 %1723 }
 0x198   :  { %v850_v4 = vpop.f32.mrf.mxu0  ;;  %v2192_v55 = vadd.f32 %v2144_v54, %v4796_v16  ;;  %v1998_v62 = vadd.f32 %v1950_v8, %v1900_v0  ;;  %v1853_v51 = vsub.f32 %v1068_v30, %v1805_v56  ;;  %1229 = vst [vmem:[%s4671_s6 + $0x130] sm:$0xff] %v1105_v37  ;;  %v1526_v9 = vadd.f32 %v4798_v32, %v1105_v37  ;;  %v4801_v54 = vld [vmem:[#allocation57_spill] sm:$0xff]  ;;  %v4803_v8 = vld [vmem:[#allocation8_spill] sm:$0xff] }
 0x199   :  { %2239 = vst [vmem:[%s4672_s7 + $0xc8] sm:$0xff] %v2191_v5  ;;  %v4396_v2 = vadd.f32 %v4238_v35, %v850_v4  ;;  %v1099_v22 = vpop.f32.mrf.mxu1  ;;  %v1999_v41 = vadd.f32 %v1951_v50, %v1901_v45  ;;  %v1806_v40 = vmul.f32 %v4228_v26, %v1518_v63  ;;  %v1903_v28 = vmul.f32 %v3334_v47, %v1518_v63  ;;  %v4800_v45 = vld [vmem:[#allocation55_spill] sm:$0xff] }
 0x19a   :  { %v852_v53 = vpop.f32.mrf.mxu0  ;;  %2240 = vst [vmem:[%s4672_s7 + $0xd0] sm:$0xff] %v2192_v55  ;;  %v2145_v35 = vmul.f32 %v3377_v18, %v1998_v62  ;;  %v1952_v11 = vmul.f32 %v3354_v58, %v1853_v51  ;;  %1227 = vst [vmem:[%s4671_s6 + $0x120] sm:$0xff] %v1097_v57  ;;  %v1524_v26 = vadd.f32 %v4799_v39, %v1097_v57  ;;  %v4805_v62 = vld [vmem:[#allocation61_spill] sm:$0xff]  ;;  %v1739_v39 = vpop.permute.xlu0 %1738 }
 0x19b   :  { %v2146_v59 = vmul.f32 %v3377_v18, %v1999_v41  ;;  %v1854_v0 = vsub.f32 %v4355_v6, %v1806_v40  ;;  %v1814_v23 = vmul.f32 %v1729_v31, %v1526_v9  ;;  %v1911_v60 = vmul.f32 %v3334_v47, %v1526_v9  ;;  %1222 = vst [vmem:[%s4671_s6 + $0xf8] sm:$0xff] %v4396_v2  ;;  %v2436_v12 = vpop.f32.mrf.mxu1  ;;  %v1734_v9 = vpop.permute.xlu1 %1733  ;;  %v4806_v31 = vld [vmem:[#allocation64_spill] sm:$0xff] }
 0x19c   :  { %v855_v25 = vpop.f32.mrf.mxu0  ;;  %v2193_v4 = vadd.f32 %v2145_v35, %v4800_v45  ;;  %v2000_v44 = vadd.f32 %v1952_v11, %v1902_v38  ;;  %v1812_v49 = vmul.f32 %v1719_v1, %v1524_v26  ;;  %v1909_v19 = vmul.f32 %v3334_v47, %v1524_v26  ;;  %v4804_v38 = vld [vmem:[#allocation6_spill] sm:$0xff]  ;;  %v4809_v26 = vld [vmem:[#allocation65_spill] sm:$0xff] }
 0x19d   :  { %v2194_v6 = vadd.f32 %v2146_v59, %v4801_v54  ;;  %v1953_v42 = vmul.f32 %v3354_v58, %v1854_v0  ;;  %v1862_v7 = vsub.f32 %v1105_v37, %v1814_v23  ;;  %v1519_v53 = vadd.f32 %v4802_v14, %v4396_v2 }
 0x19e   :  { %v857_v30 = vpop.f32.mrf.mxu0  ;;  %2241 = vst [vmem:[%s4672_s7 + $0xd8] sm:$0xff] %v2193_v4  ;;  %v2147_v1 = vmul.f32 %v3377_v18, %v2000_v44  ;;  %v1860_v5 = vsub.f32 %v1097_v57, %v1812_v49  ;;  %v1108_v56 = vadd.f32 %v2433_v61, %v4803_v8  ;;  %v1100_v16 = vadd.f32 %v1099_v22, %v4804_v38  ;;  %v1112_v61 = vpop.f32.mrf.mxu1 }
 0x19f   :  { %2242 = vst [vmem:[%s4672_s7 + $0xe0] sm:$0xff] %v2194_v6  ;;  %v2001_v37 = vadd.f32 %v1953_v42, %v1903_v28  ;;  %v1961_v55 = vmul.f32 %v3354_v58, %v1862_v7  ;;  %v1807_v50 = vmul.f32 %v4296_v29, %v1519_v53  ;;  %v1904_v10 = vmul.f32 %v3334_v47, %v1519_v53  ;;  %v2053_v29 = vld [vmem:[%s4669_s4 + $0x110] sm:$0xff]  ;;  %v4811_v7 = vld [vmem:[#allocation70_spill] sm:$0xff]  ;;  %v4812_v53 = vld [vmem:[#allocation68_spill] sm:$0xff] }
 0x1a0   :  { %v4416_v15 = vpop.f32.mrf.mxu0  ;;  %v2195_v51 = vadd.f32 %v2147_v1, %v4805_v62  ;;  %v1959_v57 = vmul.f32 %v3354_v58, %v1860_v5  ;;  %v1081_v28 = vadd.f32 %v4294_v3, %v855_v25  ;;  %1230 = vst [vmem:[%s4671_s6 + $0x138] sm:$0xff] %v1108_v56  ;;  %v1527_v35 = vadd.f32 %v4806_v31, %v1108_v56  ;;  %v4807_v3 = vld [vmem:[#allocation67_spill] sm:$0xff]  ;;  %v2437_v49 = vpop.f32.mrf.mxu1 }
 0x1a1   :  { %v2148_v22 = vmul.f32 %v3377_v18, %v2001_v37  ;;  %v2009_v41 = vadd.f32 %v1961_v55, %v1911_v60  ;;  %v1855_v40 = vsub.f32 %v4396_v2, %v1807_v50  ;;  %1228 = vst [vmem:[%s4671_s6 + $0x128] sm:$0xff] %v1100_v16  ;;  %v1525_v25 = vadd.f32 %v4807_v3, %v1100_v16  ;;  %v4808_v2 = vld [vmem:[#allocation11_spill] sm:$0xff]  ;;  %v4813_v55 = vld [vmem:[#allocation9_spill] sm:$0xff] }
 0x1a2   :  { %v860_v13 = vpop.f32.mrf.mxu0  ;;  %2243 = vst [vmem:[%s4672_s7 + $0xe8] sm:$0xff] %v2195_v51  ;;  %v2007_v30 = vadd.f32 %v1959_v57, %v1909_v19  ;;  %v1121_v11 = vadd.f32 %v2436_v12, %v4808_v2  ;;  %v1815_v4 = vmul.f32 %v1734_v9, %v1527_v35  ;;  %v4469_v19 = vmul.f32 %v3297_v34, %v2053_v29  ;;  %v4810_v12 = vld [vmem:[#allocation66_spill] sm:$0xff]  ;;  %v1744_v57 = vpop.permute.xlu1 %1743  ;;  %v4816_v29 = vld [vmem:[#allocation12_spill] sm:$0xff] }
 0x1a3   :  { %v2196_v59 = vadd.f32 %v2148_v22, %v4809_v26  ;;  %v2156_v0 = vmul.f32 %v3377_v18, %v2009_v41  ;;  %v1954_v23 = vmul.f32 %v3354_v58, %v1855_v40  ;;  %v1813_v44 = vmul.f32 %v1724_v27, %v1525_v25  ;;  %1223 = vst [vmem:[%s4671_s6 + $0x100] sm:$0xff] %v1081_v28  ;;  %v4815_v22 = vld [vmem:[#allocation69_spill] sm:$0xff]  ;;  %v4818_v26 = vld [vmem:[#allocation10_spill] sm:$0xff] }
 0x1a4   :  { %v4440_v63 = vpop.f32.mrf.mxu0  ;;  %v2154_v45 = vmul.f32 %v3377_v18, %v2007_v30  ;;  %v1912_v42 = vmul.f32 %v3334_v47, %v1527_v35  ;;  %v1520_v14 = vadd.f32 %v4811_v7, %v1081_v28  ;;  %v1863_v1 = vsub.f32 %v1108_v56, %v1815_v4  ;;  %1233 = vst [vmem:[%s4671_s6 + $0x150] sm:$0xff] %v1121_v11  ;;  %v4822_v7 = vld [vmem:[#allocation76_spill] sm:$0xff] }
 0x1a5   :  { %2244 = vst [vmem:[%s4672_s7 + $0xf0] sm:$0xff] %v2196_v59  ;;  %v2204_v54 = vadd.f32 %v2156_v0, %v4810_v12  ;;  %v2002_v6 = vadd.f32 %v1954_v23, %v1904_v10  ;;  %v1861_v5 = vsub.f32 %v1100_v16, %v1813_v44  ;;  %v1910_v38 = vmul.f32 %v3334_v47, %v1525_v25  ;;  %v4814_v16 = vld [vmem:[#allocation71_spill] sm:$0xff]  ;;  %v4819_v44 = vld [vmem:[#allocation73_spill] sm:$0xff]  ;;  %v4820_v12 = vld [vmem:[#allocation74_spill] sm:$0xff] }
 0x1a6   :  { %v865_v32 = vpop.f32.mrf.mxu0  ;;  %v2202_v13 = vadd.f32 %v2154_v45, %v4812_v53  ;;  %v1808_v37 = vmul.f32 %v4276_v52, %v1520_v14  ;;  %v1113_v50 = vadd.f32 %v1112_v61, %v4813_v55  ;;  %v1962_v10 = vmul.f32 %v3354_v58, %v1863_v1  ;;  %v1115_v52 = vpop.f32.mrf.mxu1  ;;  %v4823_v55 = vld [vmem:[#allocation78_spill] sm:$0xff] }
 0x1a7   :  { %2252 = vst [vmem:[%s4672_s7 + $0x130] sm:$0xff] %v2204_v54  ;;  %v2149_v8 = vmul.f32 %v3377_v18, %v2002_v6  ;;  %v1960_v56 = vmul.f32 %v3354_v58, %v1861_v5  ;;  %v1530_v62 = vadd.f32 %v4814_v16, %v1121_v11  ;;  %v1084_v51 = vadd.f32 %v4325_v21, %v4416_v15  ;;  %v1749_v61 = vpop.permute.xlu0 %1748  ;;  %v4817_v21 = vld [vmem:[#allocation72_spill] sm:$0xff] }
 0x1a8   :  { %v4465_v60 = vpop.f32.mrf.mxu0  ;;  %2250 = vst [vmem:[%s4672_s7 + $0x120] sm:$0xff] %v2202_v13  ;;  %v1856_v40 = vsub.f32 %v1081_v28, %v1808_v37  ;;  %v1124_v32 = vadd.f32 %v2437_v49, %v4816_v29  ;;  %v2010_v9 = vadd.f32 %v1962_v10, %v1912_v42  ;;  %v1905_v31 = vmul.f32 %v3334_v47, %v1520_v14  ;;  %v2440_v0 = vpop.f32.mrf.mxu1 }
 0x1a9   :  { %v2197_v41 = vadd.f32 %v2149_v8, %v4815_v22  ;;  %v2008_v30 = vadd.f32 %v1960_v56, %v1910_v38  ;;  %v1818_v35 = vmul.f32 %v1749_v61, %v1530_v62  ;;  %1231 = vst [vmem:[%s4671_s6 + $0x140] sm:$0xff] %v1113_v50  ;;  %v1528_v15 = vadd.f32 %v4817_v21, %v1113_v50  ;;  %v4825_v22 = vld [vmem:[#allocation28_spill] sm:$0xff] }
 0x1aa   :  { %v868_v27 = vpop.f32.mrf.mxu0  ;;  %v1955_v3 = vmul.f32 %v3354_v58, %v1856_v40  ;;  %v2157_v28 = vmul.f32 %v3377_v18, %v2010_v9  ;;  %v1116_v59 = vadd.f32 %v1115_v52, %v4818_v26  ;;  %v1915_v45 = vmul.f32 %v3334_v47, %v1530_v62  ;;  %1224 = vst [vmem:[%s4671_s6 + $0x108] sm:$0xff] %v1084_v51  ;;  %v1128_v37 = vpop.f32.mrf.mxu1  ;;  %v4824_v52 = vld [vmem:[#allocation77_spill] sm:$0xff]  ;;  %v4827_v21 = vld [vmem:[#allocation80_spill] sm:$0xff] }
 0x1ab   :  { %2245 = vst [vmem:[%s4672_s7 + $0xf8] sm:$0xff] %v2197_v41  ;;  %v2155_v25 = vmul.f32 %v3377_v18, %v2008_v30  ;;  %v1866_v2 = vsub.f32 %v1121_v11, %v1818_v35  ;;  %v1816_v4 = vmul.f32 %v1739_v39, %v1528_v15  ;;  %v1521_v49 = vadd.f32 %v4819_v44, %v1084_v51  ;;  %v4821_v11 = vld [vmem:[#allocation75_spill] sm:$0xff]  ;;  %v1754_v27 = vpop.permute.xlu1 %1753  ;;  %v1759_v40 = vpop.permute.xlu0 %1758 }
 0x1ac   :  { %v2003_v23 = vadd.f32 %v1955_v3, %v1905_v31  ;;  %1234 = vst [vmem:[%s4671_s6 + $0x158] sm:$0xff] %v1124_v32  ;;  %v2205_v54 = vadd.f32 %v2157_v28, %v4820_v12  ;;  %v1531_v14 = vadd.f32 %v4822_v7, %v1124_v32  ;;  %v1913_v13 = vmul.f32 %v3334_v47, %v1528_v15  ;;  %v2441_v28 = vpop.f32.mrf.mxu1 }
 0x1ad   :  { %v2203_v6 = vadd.f32 %v2155_v25, %v4821_v11  ;;  %v1965_v42 = vmul.f32 %v3354_v58, %v1866_v2  ;;  %v1864_v53 = vsub.f32 %v1113_v50, %v1816_v4  ;;  %v1809_v1 = vmul.f32 %v4338_v24, %v1521_v49  ;;  %1232 = vst [vmem:[%s4671_s6 + $0x148] sm:$0xff] %v1116_v59  ;;  %v2065_v4 = vld [vmem:[%s4669_s4 + $0x170] sm:$0xff] }
 0x1ae   :  { %v2150_v39 = vmul.f32 %v3377_v18, %v2003_v23  ;;  %2253 = vst [vmem:[%s4672_s7 + $0x138] sm:$0xff] %v2205_v54  ;;  %v1906_v8 = vmul.f32 %v3334_v47, %v1521_v49  ;;  %v1819_v38 = vmul.f32 %v1754_v27, %v1531_v14  ;;  %v1089_v24 = vadd.f32 %v4274_v43, %v4440_v63  ;;  %v4826_v43 = vld [vmem:[#allocation13_spill] sm:$0xff]  ;;  %v4830_v54 = vld [vmem:[#allocation82_spill] sm:$0xff]  ;;  %v4832_v27 = vld [vmem:[#allocation83_spill] sm:$0xff] }
 0x1af   :  { %2251 = vst [vmem:[%s4672_s7 + $0x128] sm:$0xff] %v2203_v6  ;;  %v2013_v5 = vadd.f32 %v1965_v42, %v1915_v45  ;;  %v1963_v50 = vmul.f32 %v3354_v58, %v1864_v53  ;;  %v1857_v56 = vsub.f32 %v1084_v51, %v1809_v1  ;;  %v1529_v61 = vadd.f32 %v4824_v52, %v1116_v59  ;;  %v1769_v12 = vpop.permute.xlu0 %1768  ;;  %v4831_v42 = vld [vmem:[#allocation44_spill] sm:$0xff]  ;;  %v2063_v52 = vld [vmem:[%s4669_s4 + $0x160] sm:$0xff] }
 0x1b0   :  { %v2198_v10 = vadd.f32 %v2150_v39, %v4823_v55  ;;  %v1867_v62 = vsub.f32 %v1124_v32, %v1819_v38  ;;  %v1137_v41 = vadd.f32 %v2440_v0, %v4825_v22  ;;  %v1129_v63 = vadd.f32 %v1128_v37, %v4826_v43  ;;  %1225 = vst [vmem:[%s4671_s6 + $0x110] sm:$0xff] %v1089_v24  ;;  %v4833_v38 = vld [vmem:[#allocation84_spill] sm:$0xff]  ;;  %v4835_v22 = vld [vmem:[#allocation85_spill] sm:$0xff] }
 0x1b1   :  { %v2160_v16 = vmul.f32 %v3377_v18, %v2013_v5  ;;  %v2011_v51 = vadd.f32 %v1963_v50, %v1913_v13  ;;  %v1956_v29 = vmul.f32 %v3354_v58, %v1857_v56  ;;  %v1916_v9 = vmul.f32 %v3334_v47, %v1531_v14  ;;  %v1131_v14 = vpop.f32.mrf.mxu1  ;;  %v4834_v50 = vld [vmem:[#allocation15_spill] sm:$0xff] }
 0x1b2   :  { %2246 = vst [vmem:[%s4672_s7 + $0x100] sm:$0xff] %v2198_v10  ;;  %v1966_v30 = vmul.f32 %v3354_v58, %v1867_v62  ;;  %v1817_v31 = vmul.f32 %v1744_v57, %v1529_v61  ;;  %v1522_v15 = vadd.f32 %v4827_v21, %v1089_v24  ;;  %v1092_v2 = vadd.f32 %v4315_v33, %v4465_v60  ;;  %v4828_v57 = vld [vmem:[#allocation79_spill] sm:$0xff]  ;;  %v4829_v60 = vld [vmem:[#allocation81_spill] sm:$0xff] }
 0x1b3   :  { %v2208_v32 = vadd.f32 %v2160_v16, %v3828_v46  ;;  %v2158_v35 = vmul.f32 %v3377_v18, %v2011_v51  ;;  %v2004_v3 = vadd.f32 %v1956_v29, %v1906_v8  ;;  %v1914_v23 = vmul.f32 %v3334_v47, %v1529_v61  ;;  %1237 = vst [vmem:[%s4671_s6 + $0x170] sm:$0xff] %v1137_v41 }
 0x1b4   :  { %v2014_v46 = vadd.f32 %v1966_v30, %v1916_v9  ;;  %v1865_v25 = vsub.f32 %v1116_v59, %v1817_v31  ;;  %v1810_v45 = vmul.f32 %v4327_v17, %v1522_v15  ;;  %v1764_v59 = vpop.permute.xlu1 %1763  ;;  %v1534_v49 = vadd.f32 %v4829_v60, %v1137_v41  ;;  %1235 = vst [vmem:[%s4671_s6 + $0x160] sm:$0xff] %v1129_v63 }
 0x1b5   :  { %2256 = vst [vmem:[%s4672_s7 + $0x150] sm:$0xff] %v2208_v32  ;;  %v2206_v26 = vadd.f32 %v2158_v35, %v4828_v57  ;;  %v2151_v0 = vmul.f32 %v3377_v18, %v2004_v3  ;;  %v1532_v17 = vadd.f32 %v3864_v36, %v1129_v63  ;;  %v1140_v7 = vadd.f32 %v2441_v28, %v4831_v42  ;;  %v2054_v35 = vld [vmem:[%s4669_s4 + $0x118] sm:$0xff] }
 0x1b6   :  { %v2161_v44 = vmul.f32 %v3377_v18, %v2014_v46  ;;  %v1964_v33 = vmul.f32 %v3354_v58, %v1865_v25  ;;  %v1858_v6 = vsub.f32 %v1089_v24, %v1810_v45  ;;  %v1822_v13 = vmul.f32 %v1769_v12, %v1534_v49  ;;  %1226 = vst [vmem:[%s4671_s6 + $0x118] sm:$0xff] %v1092_v2 }
 0x1b7   :  { %2254 = vst [vmem:[%s4672_s7 + $0x140] sm:$0xff] %v2206_v26  ;;  %v2199_v11 = vadd.f32 %v2151_v0, %v4830_v54  ;;  %v2114_v1 = vmul.f32 %v3297_v34, %v2065_v4  ;;  %v1907_v36 = vmul.f32 %v3334_v47, %v1522_v15  ;;  %v1820_v8 = vmul.f32 %v1759_v40, %v1532_v17 }
 0x1b8   :  { %v2209_v39 = vadd.f32 %v2161_v44, %v4832_v27  ;;  %v2012_v53 = vadd.f32 %v1964_v33, %v1914_v23  ;;  %v1957_v5 = vmul.f32 %v3354_v58, %v1858_v6  ;;  %v1523_v37 = vadd.f32 %v4833_v38, %v1092_v2  ;;  %1238 = vst [vmem:[%s4671_s6 + $0x178] sm:$0xff] %v1140_v7  ;;  %v1774_v43 = vpop.permute.xlu1 %1773 }
 0x1b9   :  { %2247 = vst [vmem:[%s4672_s7 + $0x108] sm:$0xff] %v2199_v11  ;;  %v1870_v10 = vsub.f32 %v1137_v41, %v1822_v13  ;;  %v1132_v56 = vadd.f32 %v1131_v14, %v4834_v50  ;;  %v1919_v16 = vmul.f32 %v3334_v47, %v1534_v49  ;;  %v1868_v62 = vsub.f32 %v1129_v63, %v1820_v8  ;;  %v4836_v41 = vld [vmem:[#allocation86_spill] sm:$0xff] }
 0x1ba   :  { %2257 = vst [vmem:[%s4672_s7 + $0x158] sm:$0xff] %v2209_v39  ;;  %v2159_v55 = vmul.f32 %v3377_v18, %v2012_v53  ;;  %v2005_v24 = vadd.f32 %v1957_v5, %v1907_v36  ;;  %v1811_v61 = vmul.f32 %v4378_v20, %v1523_v37  ;;  %v1535_v29 = vadd.f32 %v4836_v41, %v1140_v7  ;;  %v2064_v49 = vld [vmem:[%s4669_s4 + $0x168] sm:$0xff] }
 0x1bb   :  { %v1969_v51 = vmul.f32 %v3354_v58, %v1870_v10  ;;  %v1917_v63 = vmul.f32 %v3334_v47, %v1532_v17  ;;  %v1967_v9 = vmul.f32 %v3354_v58, %v1868_v62  ;;  %v2112_v31 = vmul.f32 %v3297_v34, %v2063_v52  ;;  %1236 = vst [vmem:[%s4671_s6 + $0x168] sm:$0xff] %v1132_v56 }
 0x1bc   :  { %v2207_v40 = vadd.f32 %v2159_v55, %v4835_v22  ;;  %v2152_v32 = vmul.f32 %v3377_v18, %v2005_v24  ;;  %v1859_v30 = vsub.f32 %v1092_v2, %v1811_v61  ;;  %v1823_v3 = vmul.f32 %v1774_v43, %v1535_v29 }
 0x1bd   :  { %v2017_v20 = vadd.f32 %v1969_v51, %v1919_v16  ;;  %v1533_v21 = vadd.f32 %v4281_v48, %v1132_v56  ;;  %v2015_v28 = vadd.f32 %v1967_v9, %v1917_v63  ;;  %v1908_v46 = vmul.f32 %v3334_v47, %v1523_v37 }
 0x1be   :  { %2255 = vst [vmem:[%s4672_s7 + $0x148] sm:$0xff] %v2207_v40  ;;  %v2200_v15 = vadd.f32 %v2152_v32, %v4469_v19  ;;  %v1958_v25 = vmul.f32 %v3354_v58, %v1859_v30  ;;  %v1871_v57 = vsub.f32 %v1140_v7, %v1823_v3  ;;  %v2103_v48 = vmul.f32 %v3297_v34, %v2054_v35  ;;  %v2066_v19 = vld [vmem:[%s4669_s4 + $0x178] sm:$0xff] }
 0x1bf   :  { %v2164_v2 = vmul.f32 %v3377_v18, %v2017_v20  ;;  %v1821_v26 = vmul.f32 %v1764_v59, %v1533_v21  ;;  %v2162_v0 = vmul.f32 %v3377_v18, %v2015_v28  ;;  %v1920_v4 = vmul.f32 %v3334_v47, %v1535_v29 }
 0x1c0   :  { %2248 = vst [vmem:[%s4672_s7 + $0x110] sm:$0xff] %v2200_v15  ;;  %v2006_v23 = vadd.f32 %v1958_v25, %v1908_v46  ;;  %v1970_v44 = vmul.f32 %v3354_v58, %v1871_v57  ;;  %v2115_v12 = vmul.f32 %v3297_v34, %v2066_v19  ;;  %v1918_v54 = vmul.f32 %v3334_v47, %v1533_v21 }
 0x1c1   :  { %v2212_v45 = vadd.f32 %v2164_v2, %v2114_v1  ;;  %v1869_v33 = vsub.f32 %v1132_v56, %v1821_v26  ;;  %v2210_v59 = vadd.f32 %v2162_v0, %v2112_v31  ;;  %v2113_v14 = vmul.f32 %v3297_v34, %v2064_v49 }
 0x1c2   :  { %v2153_v60 = vmul.f32 %v3377_v18, %v2006_v23  ;;  %v2018_v17 = vadd.f32 %v1970_v44, %v1920_v4 }
 0x1c3   :  { %2260 = vst [vmem:[%s4672_s7 + $0x170] sm:$0xff] %v2212_v45  ;;  %v1968_v11 = vmul.f32 %v3354_v58, %v1869_v33  ;;  %2258 = vst [vmem:[%s4672_s7 + $0x160] sm:$0xff] %v2210_v59 }
 0x1c4   :  { %v2201_v6 = vadd.f32 %v2153_v60, %v2103_v48  ;;  %v2165_v42 = vmul.f32 %v3377_v18, %v2018_v17 }
 0x1c5   :  { %v2016_v7 = vadd.f32 %v1968_v11, %v1918_v54 }
 0x1c6   :  { %2249 = vst [vmem:[%s4672_s7 + $0x118] sm:$0xff] %v2201_v6  ;;  %v2213_v27 = vadd.f32 %v2165_v42, %v2115_v12 }
 0x1c7   :  { %v2163_v39 = vmul.f32 %v3377_v18, %v2016_v7 }
 0x1c8   :  { %2261 = vst [vmem:[%s4672_s7 + $0x178] sm:$0xff] %v2213_v27 }
 0x1c9   :  { %v2211_v47 = vadd.f32 %v2163_v39, %v2113_v14 }
 0x1cb   :  { %2259 = vst [vmem:[%s4672_s7 + $0x168] sm:$0xff] %v2211_v47 }
 0x1cc   :  { %2270 = vsyncpa [#allocation3], 1 }

// kernel: noflayer_forward.7
= control target key start
LH: loop header
LB: loop body
LE: loop exit
PB: predicated region body
PF: predicated region fallthrough
CT: control target
= control target key end

     0   :  { %13 = vsyncpa [#allocation4], 0  ;;  %s4580_s0 = inlined_call_operand.vmem [shape: f32[4], index: 0, kind: input, shape index: {}]   ;;  %s4581_s1 = inlined_call_operand.vmem [shape: bf16[384,384], index: 1, kind: input, shape index: {}]   ;;  %s4582_s2 = inlined_call_operand.vmem [shape: f32[384,128], index: 2, kind: input, shape index: {}]   ;;  %s4583_s3 = inlined_call_operand.vmem [shape: f32[384,128], index: 3, kind: input, shape index: {}]   ;;  %s4584_s4 = inlined_call_operand.vmem [shape: f32[384,128], index: 4, kind: input, shape index: {}]   ;;  %s4585_s5 = inlined_call_operand.vmem [shape: f32[384,1], index: 5, kind: input, shape index: {}]   ;;  %s4586_s6 = inlined_call_operand.hbm [shape: f32[384,128], index: 6, kind: output, shape index: {0}]   ;;  %s4587_s7 = inlined_call_operand.vmem [shape: f32[384,128], index: 7, kind: output, shape index: {1}]  }
   0x1   :  { %14 = vsyncpa [#allocation3], 0  ;;  %s21_s26 = sshll.u32 %s4580_s0, 4  ;;  %s22_s26 = int_to_ptr.vmem [resolvable:$true] %s21_s26 }
   0x2   :  { %s2591_s27 = scalar_lea.vmem %s22_s26, 16  ;;  %p2596_p1 = scmp.lt.s32.totalorder %s22_s26, %s22_s26 }
   0x3   :  { %p2592_p0 = scmp.ne.s32.totalorder %s22_s26, %s2591_s27  ;;  %p2597_p2 = scmp.lt.s32.totalorder %s2591_s27, %s2591_s27 }
   0x5   :  { %p2598_p3 = por %p2597_p2, %p2596_p1 }
   0x7   :  { %p2599_p4 = pnand %p2598_p3, %p2592_p0 }
   0x9   :  { %2602 = shalt.err (!%p2599_p4)
}
   0xa   :  { %s2627_s28 = smov [#allocation2]  }
   0xb   :  { %24 = dma.vmem_to_smem %s22_s26, 16, %s2627_s28, [#allocation4]  }
   0xc   :  { %2623 = dma.done.wait [#allocation4], 16  }
   0xd   :  { %2624 = vsyncadd [#allocation4], 4294967280 }
   0xe   :  { %38 = sfence }
   0xf   :  { %v108_v0 = vld [vmem:[%s4582_s2 + $0x70] sm:$0xff]  ;;  %v109_v1 = vld [vmem:[%s4582_s2 + $0x78] sm:$0xff]  ;;  %v106_v2 = vld [vmem:[%s4582_s2 + $0x60] sm:$0xff]  ;;  %v2628_v3 = vmov 0   ;;  %s2358_s13 = sld [smem:[#allocation2 + $0x3]]  ;;  %s2629_s18 = smov [#allocation5]  }
  0x10   :  { %694 = vmatprep.subr.bf16.mxu0 %v2628_v3  ;;  %2455 = vmatprep.subr.bf16.mxu1 %v2628_v3  ;;  %v293_v4 = vpack.c.bf16 %v109_v1, %v108_v0  ;;  %v107_v5 = vld [vmem:[%s4582_s2 + $0x68] sm:$0xff]  ;;  %v104_v7 = vld [vmem:[%s4582_s2 + $0x50] sm:$0xff]  ;;  %v105_v8 = vld [vmem:[%s4582_s2 + $0x58] sm:$0xff]  ;;  %s3289_s21 = sld [smem:[#allocation2 + $0x2]]  ;;  %s2268_s19 = sshll.u32 %s2629_s18, 4  ;;  %s4513_s19 = int_to_ptr.vmem [resolvable:$true] %s2268_s19 }
  0x11   :  { %2494 = vset.pattern.permute.xlu1 %v2628_v3  ;;  %2493 = vset.pattern.permute.xlu0 %v2628_v3  ;;  %v292_v6 = vpack.c.bf16 %v107_v5, %v106_v2  ;;  %v291_v9 = vpack.c.bf16 %v105_v8, %v104_v7  ;;  %v102_v10 = vld [vmem:[%s4582_s2 + $0x40] sm:$0xff]  ;;  %v103_v11 = vld [vmem:[%s4582_s2 + $0x48] sm:$0xff]  ;;  %v100_v13 = vld [vmem:[%s4582_s2 + $0x30] sm:$0xff]  ;;  %s3293_s22 = sld [smem:[#allocation2 + $0x1]]  ;;  %p2608_p6 = scmp.lt.s32.totalorder %s4513_s19, %s4513_s19 }
  0x12   :  { %695 = vmatpush1.bf16.msra.mxu0 %v293_v4  ;;  %2471 = vmatpush1.bf16.msra.mxu1 %v293_v4  ;;  %v290_v12 = vpack.c.bf16 %v103_v11, %v102_v10  ;;  %v2497_v14 = vld [vmem:[%s4581_s1 + $0x4] ss:$12 sps:$4 sm:$0xff]   ;;  %v101_v15 = vld [vmem:[%s4582_s2 + $0x38] sm:$0xff]  ;;  %v2500_v16 = vld [vmem:[%s4581_s1 + $0x1b4] ss:$12 sps:$4 sm:$0xff]  }
  0x13   :  { %696 = vmatprep.subr.bf16.mxu0 %v2628_v3  ;;  %2456 = vmatprep.subr.bf16.mxu1 %v2628_v3  ;;  %v289_v17 = vpack.c.bf16 %v101_v15, %v100_v13  ;;  %v98_v18 = vld [vmem:[%s4582_s2 + $0x20] sm:$0xff]  ;;  %v99_v19 = vld [vmem:[%s4582_s2 + $0x28] sm:$0xff]  ;;  %v96_v21 = vld [vmem:[%s4582_s2 + $0x10] sm:$0xff] }
  0x14   :  { %726 = vmatprep.mubr.bf16.mxu0 %v2497_v14  ;;  %870 = vmatprep.mubr.bf16.mxu1 %v2500_v16  ;;  %v288_v20 = vpack.c.bf16 %v99_v19, %v98_v18  ;;  %v97_v22 = vld [vmem:[%s4582_s2 + $0x18] sm:$0xff]  ;;  %v94_v24 = vld [vmem:[%s4582_s2] sm:$0xff]  ;;  %v95_v25 = vld [vmem:[%s4582_s2 + $0x8] sm:$0xff] }
  0x15   :  { %v287_v23 = vpack.c.bf16 %v97_v22, %v96_v21  ;;  %v286_v26 = vpack.c.bf16 %v95_v25, %v94_v24  ;;  %v124_v27 = vld [vmem:[%s4582_s2 + $0xf0] sm:$0xff]  ;;  %v125_v28 = vld [vmem:[%s4582_s2 + $0xf8] sm:$0xff]  ;;  %v2753_v29 = vstv %s2358_s13  ;;  %v1343_v32 = vld [vmem:[%s4585_s5] sm:$0xff] }
  0x16   :  { %697 = vmatpush1.bf16.msra.mxu0 %v292_v6  ;;  %2472 = vmatpush1.bf16.msra.mxu1 %v292_v6  ;;  %v301_v30 = vpack.c.bf16 %v125_v28, %v124_v27  ;;  %v1345_v31 = vld [vmem:[%s4585_s5 + $0x10] sm:$0xff]  ;;  %v122_v33 = vld [vmem:[%s4582_s2 + $0xe0] sm:$0xff]  ;;  %v123_v34 = vld [vmem:[%s4582_s2 + $0xe8] sm:$0xff]  ;;  %v1392_v36 = vmul.f32 %v2753_v29, %v1343_v32  ;;  %s2117_s16 = ssub.f32 1.0, %s3289_s21 }
  0x17   :  { %698 = vmatprep.subr.bf16.mxu0 %v2628_v3  ;;  %2457 = vmatprep.subr.bf16.mxu1 %v2628_v3  ;;  %v1394_v35 = vmul.f32 %v2753_v29, %v1345_v31  ;;  %v1346_v37 = vld [vmem:[%s4585_s5 + $0x18] sm:$0xff]  ;;  %v1344_v38 = vld [vmem:[%s4585_s5 + $0x8] sm:$0xff]  ;;  %v300_v41 = vpack.c.bf16 %v123_v34, %v122_v33  ;;  %v120_v42 = vld [vmem:[%s4582_s2 + $0xd0] sm:$0xff]  ;;  %s1922_s0 = ssub.f32 1.0, %s3293_s22 }
  0x18   :  { %1539 = vperm.xlu0 %2493, %v1392_v36   ;;  %v1395_v39 = vmul.f32 %v2753_v29, %v1346_v37  ;;  %v1393_v40 = vmul.f32 %v2753_v29, %v1344_v38  ;;  %v121_v43 = vld [vmem:[%s4582_s2 + $0xd8] sm:$0xff]  ;;  %v1348_v44 = vld [vmem:[%s4585_s5 + $0x28] sm:$0xff]  ;;  %v1347_v45 = vld [vmem:[%s4585_s5 + $0x20] sm:$0xff] }
  0x19   :  { %1549 = vperm.xlu1 %2494, %v1394_v35   ;;  %v118_v46 = vld [vmem:[%s4582_s2 + $0xc0] sm:$0xff]  ;;  %v1397_v47 = vmul.f32 %v2753_v29, %v1348_v44  ;;  %v1396_v48 = vmul.f32 %v2753_v29, %v1347_v45  ;;  %v1350_v49 = vld [vmem:[%s4585_s5 + $0x38] sm:$0xff]  ;;  %v299_v50 = vpack.c.bf16 %v121_v43, %v120_v42  ;;  %v1349_v51 = vld [vmem:[%s4585_s5 + $0x30] sm:$0xff] }
  0x1a   :  { %699 = vmatpush1.bf16.msra.mxu0 %v291_v9  ;;  %2473 = vmatpush1.bf16.msra.mxu1 %v291_v9  ;;  %v119_v52 = vld [vmem:[%s4582_s2 + $0xc8] sm:$0xff]  ;;  %v1399_v53 = vmul.f32 %v2753_v29, %v1350_v49  ;;  %v1398_v54 = vmul.f32 %v2753_v29, %v1349_v51  ;;  %v1351_v57 = vld [vmem:[%s4585_s5 + $0x40] sm:$0xff]  ;;  %v116_v58 = vld [vmem:[%s4582_s2 + $0xb0] sm:$0xff] }
  0x1b   :  { %700 = vmatprep.subr.bf16.mxu0 %v2628_v3  ;;  %2458 = vmatprep.subr.bf16.mxu1 %v2628_v3  ;;  %v1352_v55 = vld [vmem:[%s4585_s5 + $0x48] sm:$0xff]  ;;  %v298_v56 = vpack.c.bf16 %v119_v52, %v118_v46  ;;  %v117_v59 = vld [vmem:[%s4582_s2 + $0xb8] sm:$0xff]  ;;  %v114_v60 = vld [vmem:[%s4582_s2 + $0xa0] sm:$0xff]  ;;  %v1400_v62 = vmul.f32 %v2753_v29, %v1351_v57 }
  0x1c   :  { %1544 = vperm.xlu0 %2493, %v1393_v40   ;;  %v1401_v61 = vmul.f32 %v2753_v29, %v1352_v55  ;;  %v1354_v63 = vld [vmem:[%s4585_s5 + $0x58] sm:$0xff]  ;;  %v297_v0 = vpack.c.bf16 %v117_v59, %v116_v58  ;;  %v1353_v1 = vld [vmem:[%s4585_s5 + $0x50] sm:$0xff]  ;;  %v115_v2 = vld [vmem:[%s4582_s2 + $0xa8] sm:$0xff] }
  0x1d   :  { %1554 = vperm.xlu1 %2494, %v1395_v39   ;;  %v1403_v4 = vmul.f32 %v2753_v29, %v1354_v63  ;;  %v1402_v5 = vmul.f32 %v2753_v29, %v1353_v1  ;;  %v296_v6 = vpack.c.bf16 %v115_v2, %v114_v60  ;;  %v112_v7 = vld [vmem:[%s4582_s2 + $0x90] sm:$0xff]  ;;  %v1356_v8 = vld [vmem:[%s4585_s5 + $0x68] sm:$0xff]  ;;  %v1355_v9 = vld [vmem:[%s4585_s5 + $0x60] sm:$0xff] }
  0x1e   :  { %701 = vmatpush1.bf16.msra.mxu0 %v290_v12  ;;  %2474 = vmatpush1.bf16.msra.mxu1 %v290_v12  ;;  %v113_v10 = vld [vmem:[%s4582_s2 + $0x98] sm:$0xff]  ;;  %v1405_v11 = vmul.f32 %v2753_v29, %v1356_v8  ;;  %v1404_v12 = vmul.f32 %v2753_v29, %v1355_v9  ;;  %v110_v14 = vld [vmem:[%s4582_s2 + $0x80] sm:$0xff]  ;;  %v1357_v16 = vld [vmem:[%s4585_s5 + $0x70] sm:$0xff] }
  0x1f   :  { %702 = vmatprep.subr.bf16.mxu0 %v2628_v3  ;;  %2459 = vmatprep.subr.bf16.mxu1 %v2628_v3  ;;  %v295_v13 = vpack.c.bf16 %v113_v10, %v112_v7  ;;  %v1358_v15 = vld [vmem:[%s4585_s5 + $0x78] sm:$0xff]  ;;  %v140_v18 = vld [vmem:[%s4582_s2 + $0x170] sm:$0xff]  ;;  %v1406_v21 = vmul.f32 %v2753_v29, %v1357_v16  ;;  %v139_v27 = vld [vmem:[%s4582_s2 + $0x168] sm:$0xff] }
  0x20   :  { %1559 = vperm.xlu0 %2493, %v1396_v48   ;;  %v141_v19 = vld [vmem:[%s4582_s2 + $0x178] sm:$0xff]  ;;  %v1359_v28 = vld [vmem:[%s4585_s5 + $0x80] sm:$0xff]  ;;  %v136_v33 = vld [vmem:[%s4582_s2 + $0x150] sm:$0xff] }
  0x21   :  { %1564 = vperm.xlu1 %2494, %v1397_v47   ;;  %v2498_v24 = vld [vmem:[%s4581_s1 + $0x1b0] ss:$12 sps:$4 sm:$0xff]   ;;  %v309_v25 = vpack.c.bf16 %v141_v19, %v140_v18  ;;  %v2503_v32 = vld [vmem:[%s4581_s1 + $0x1cc] ss:$12 sps:$4 sm:$0xff]   ;;  %v1408_v36 = vmul.f32 %v2753_v29, %v1359_v28  ;;  %v134_v42 = vld [vmem:[%s4582_s2 + $0x140] sm:$0xff] }
  0x22   :  { %703 = vmatpush1.bf16.msra.mxu0 %v289_v17  ;;  %2475 = vmatpush1.bf16.msra.mxu1 %v289_v17  ;;  %v111_v17 = vld [vmem:[%s4582_s2 + $0x88] sm:$0xff]  ;;  %v137_v34 = vld [vmem:[%s4582_s2 + $0x158] sm:$0xff]  ;;  %v1361_v38 = vld [vmem:[%s4585_s5 + $0x90] sm:$0xff] }
  0x23   :  { %704 = vmatprep.subr.bf16.mxu0 %v2628_v3  ;;  %2460 = vmatprep.subr.bf16.mxu1 %v2628_v3  ;;  %v294_v22 = vpack.c.bf16 %v111_v17, %v110_v14  ;;  %v1362_v37 = vld [vmem:[%s4585_s5 + $0x98] sm:$0xff]  ;;  %v307_v40 = vpack.c.bf16 %v137_v34, %v136_v33  ;;  %v135_v43 = vld [vmem:[%s4582_s2 + $0x148] sm:$0xff]  ;;  %v1410_v45 = vmul.f32 %v2753_v29, %v1361_v38  ;;  %v1363_v47 = vld [vmem:[%s4585_s5 + $0xa0] sm:$0xff] }
  0x24   :  { %1569 = vperm.xlu0 %2493, %v1398_v54   ;;  %v2505_v39 = vld [vmem:[%s4581_s1 + $0x18] ss:$12 sps:$4 sm:$0xff]   ;;  %v1411_v44 = vmul.f32 %v2753_v29, %v1362_v37  ;;  %v1364_v46 = vld [vmem:[%s4585_s5 + $0xa8] sm:$0xff]  ;;  %v2507_v48 = vld [vmem:[%s4581_s1 + $0x34] ss:$12 sps:$4 sm:$0xff]   ;;  %v1412_v54 = vmul.f32 %v2753_v29, %v1363_v47 }
  0x25   :  { %1574 = vperm.xlu1 %2494, %v1399_v53   ;;  %v2509_v49 = vld [vmem:[%s4581_s1 + $0x1e4] ss:$12 sps:$4 sm:$0xff]   ;;  %v133_v52 = vld [vmem:[%s4582_s2 + $0x138] sm:$0xff]  ;;  %v1413_v53 = vmul.f32 %v2753_v29, %v1364_v46  ;;  %v2512_v59 = vld [vmem:[%s4581_s1 + $0x1e0] ss:$12 sps:$4 sm:$0xff]  }
  0x26   :  { %705 = vmatpush1.bf16.msra.mxu0 %v288_v20  ;;  %2476 = vmatpush1.bf16.msra.mxu1 %v288_v20  ;;  %v1407_v20 = vmul.f32 %v2753_v29, %v1358_v15  ;;  %v132_v51 = vld [vmem:[%s4582_s2 + $0x130] sm:$0xff]  ;;  %v1366_v55 = vld [vmem:[%s4585_s5 + $0xb8] sm:$0xff]  ;;  %v130_v60 = vld [vmem:[%s4582_s2 + $0x120] sm:$0xff] }
  0x27   :  { %706 = vmatprep.subr.bf16.mxu0 %v2628_v3  ;;  %2461 = vmatprep.subr.bf16.mxu1 %v2628_v3  ;;  %v2511_v57 = vld [vmem:[%s4581_s1 + $0x30] ss:$12 sps:$4 sm:$0xff]   ;;  %v305_v58 = vpack.c.bf16 %v133_v52, %v132_v51  ;;  %v131_v63 = vld [vmem:[%s4582_s2 + $0x128] sm:$0xff] }
  0x28   :  { %1579 = vperm.xlu0 %2493, %v1400_v62   ;;  %v2513_v1 = vld [vmem:[%s4581_s1 + $0x4c] ss:$12 sps:$4 sm:$0xff]   ;;  %v2515_v2 = vld [vmem:[%s4581_s1 + $0x1fc] ss:$12 sps:$4 sm:$0xff]   ;;  %v2519_v14 = vld [vmem:[%s4581_s1 + $0x64] ss:$12 sps:$4 sm:$0xff]  }
  0x29   :  { %1584 = vperm.xlu1 %2494, %v1401_v61   ;;  %v1415_v61 = vmul.f32 %v2753_v29, %v1366_v55  ;;  %v129_v7 = vld [vmem:[%s4582_s2 + $0x118] sm:$0xff]  ;;  %v1369_v17 = vld [vmem:[%s4585_s5 + $0xd0] sm:$0xff]  ;;  %v127_v18 = vld [vmem:[%s4582_s2 + $0x108] sm:$0xff] }
  0x2a   :  { %707 = vmatpush1.bf16.msra.mxu0 %v287_v23  ;;  %2477 = vmatpush1.bf16.msra.mxu1 %v287_v23  ;;  %v2495_v23 = vld [vmem:[%s4581_s1] ss:$12 sps:$4 sm:$0xff]   ;;  %v1370_v10 = vld [vmem:[%s4585_s5 + $0xd8] sm:$0xff]  ;;  %v1381_v52 = vld [vmem:[%s4585_s5 + $0x130] sm:$0xff] }
  0x2b   :  { %708 = vmatprep.subr.bf16.mxu0 %v2628_v3  ;;  %2462 = vmatprep.subr.bf16.mxu1 %v2628_v3  ;;  %v1419_v16 = vmul.f32 %v2753_v29, %v1370_v10  ;;  %v1372_v19 = vld [vmem:[%s4585_s5 + $0xe8] sm:$0xff]  ;;  %v1378_v37 = vld [vmem:[%s4585_s5 + $0x118] sm:$0xff] }
  0x2c   :  { %1589 = vperm.xlu0 %2493, %v1402_v5   ;;  %v128_v5 = vld [vmem:[%s4582_s2 + $0x110] sm:$0xff]  ;;  %v2523_v28 = vld [vmem:[%s4581_s1 + $0x60] ss:$12 sps:$4 sm:$0xff]   ;;  %v1390_v10 = vld [vmem:[%s4585_s5 + $0x178] sm:$0xff] }
  0x2d   :  { %1594 = vperm.xlu1 %2494, %v1403_v4   ;;  %v1367_v4 = vld [vmem:[%s4585_s5 + $0xc0] sm:$0xff]  ;;  %v303_v15 = vpack.c.bf16 %v129_v7, %v128_v5  ;;  %v2527_v33 = vld [vmem:[%s4581_s1 + $0x22c] ss:$12 sps:$4 sm:$0xff]  }
  0x2e   :  { %709 = vmatpush1.bf16.msra.mxu0 %v286_v26  ;;  %2478 = vmatpush1.bf16.msra.mxu1 %v286_v26  ;;  %v138_v26 = vld [vmem:[%s4582_s2 + $0x160] sm:$0xff]  ;;  %v1416_v9 = vmul.f32 %v2753_v29, %v1367_v4  ;;  %v1384_v55 = vld [vmem:[%s4585_s5 + $0x148] sm:$0xff] }
  0x2f   :  { %710 = vmatprep.subr.bf16.mxu0 %v2628_v3  ;;  %2463 = vmatprep.subr.bf16.mxu1 %v2628_v3  ;;  %v308_v31 = vpack.c.bf16 %v139_v27, %v138_v26  ;;  %v1388_v4 = vld [vmem:[%s4585_s5 + $0x168] sm:$0xff]  ;;  %v2541_v5 = vld [vmem:[%s4581_s1 + $0xc4] ss:$12 sps:$4 sm:$0xff]  }
  0x30   :  { %1599 = vperm.xlu0 %2493, %v1404_v12   ;;  %v2518_v12 = vld [vmem:[%s4581_s1 + $0x1f8] ss:$12 sps:$4 sm:$0xff]  }
  0x31   :  { %1604 = vperm.xlu1 %2494, %v1405_v11   ;;  %v2517_v11 = vld [vmem:[%s4581_s1 + $0x48] ss:$12 sps:$4 sm:$0xff]  }
  0x32   :  { %711 = vmatpush2.bf16.msra.mxu0 %v301_v30  ;;  %2479 = vmatpush2.bf16.msra.mxu1 %v301_v30  ;;  %v2501_v30 = vld [vmem:[%s4581_s1 + $0x1c] ss:$12 sps:$4 sm:$0xff]  }
  0x33   :  { %712 = vmatprep.subr.bf16.mxu0 %v2628_v3  ;;  %2464 = vmatprep.subr.bf16.mxu1 %v2628_v3 }
  0x34   :  { %1609 = vperm.xlu0 %2493, %v1406_v21   ;;  %v1418_v21 = vmul.f32 %v2753_v29, %v1369_v17  ;;  %v2548_v17 = vld [vmem:[%s4581_s1 + $0x98] ss:$12 sps:$4 sm:$0xff]  }
  0x35   :  { %1614 = vperm.xlu1 %2494, %v1407_v20   ;;  %v2521_v20 = vld [vmem:[%s4581_s1 + $0x214] ss:$12 sps:$4 sm:$0xff]  }
  0x36   :  { %713 = vmatpush2.bf16.msra.mxu0 %v300_v41  ;;  %2480 = vmatpush2.bf16.msra.mxu1 %v300_v41  ;;  %v2506_v41 = vld [vmem:[%s4581_s1 + $0x1c8] ss:$12 sps:$4 sm:$0xff]  }
  0x37   :  { %714 = vmatprep.subr.bf16.mxu0 %v2628_v3  ;;  %2465 = vmatprep.subr.bf16.mxu1 %v2628_v3 }
  0x38   :  { %1619 = vperm.xlu0 %2493, %v1408_v36   ;;  %v1375_v36 = vld [vmem:[%s4585_s5 + $0x100] sm:$0xff] }
  0x39   :  { %v1424_v38 = vmul.f32 %v2753_v29, %v1375_v36  ;;  %v2571_v36 = vld [vmem:[%s4581_s1 + $0x154] ss:$12 sps:$4 sm:$0xff]  }
  0x3a   :  { %715 = vmatpush2.bf16.msra.mxu0 %v299_v50  ;;  %2481 = vmatpush2.bf16.msra.mxu1 %v299_v50  ;;  %v306_v50 = vpack.c.bf16 %v135_v43, %v134_v42  ;;  %v2530_v42 = vld [vmem:[%s4581_s1 + $0x228] ss:$12 sps:$4 sm:$0xff]  }
  0x3b   :  { %716 = vmatprep.subr.bf16.mxu0 %v2628_v3  ;;  %2466 = vmatprep.subr.bf16.mxu1 %v2628_v3  ;;  %v1380_v43 = vld [vmem:[%s4585_s5 + $0x128] sm:$0xff] }
  0x3c   :  { %1629 = vperm.xlu0 %2493, %v1410_v45   ;;  %v2533_v45 = vld [vmem:[%s4581_s1 + $0x8] ss:$12 sps:$4 sm:$0xff]   ;;  %v1429_v47 = vmul.f32 %v2753_v29, %v1380_v43  ;;  %v2580_v43 = vld [vmem:[%s4581_s1 + $0x1d0] ss:$12 sps:$4 sm:$0xff]  }
  0x3e   :  { %717 = vmatpush2.bf16.msra.mxu0 %v298_v56  ;;  %2482 = vmatpush2.bf16.msra.mxu1 %v298_v56  ;;  %v1365_v56 = vld [vmem:[%s4585_s5 + $0xb0] sm:$0xff] }
  0x3f   :  { %718 = vmatprep.subr.bf16.mxu0 %v2628_v3  ;;  %2467 = vmatprep.subr.bf16.mxu1 %v2628_v3  ;;  %v1414_v62 = vmul.f32 %v2753_v29, %v1365_v56  ;;  %v2536_v56 = vld [vmem:[%s4581_s1 + $0xac] ss:$12 sps:$4 sm:$0xff]  }
  0x40   :  { %1639 = vperm.xlu0 %2493, %v1412_v54   ;;  %v2535_v54 = vld [vmem:[%s4581_s1 + $0x20] ss:$12 sps:$4 sm:$0xff]  }
  0x42   :  { %719 = vmatpush2.bf16.msra.mxu0 %v297_v0  ;;  %2483 = vmatpush2.bf16.msra.mxu1 %v297_v0  ;;  %v1368_v0 = vld [vmem:[%s4585_s5 + $0xc8] sm:$0xff] }
  0x43   :  { %720 = vmatprep.subr.bf16.mxu0 %v2628_v3  ;;  %2468 = vmatprep.subr.bf16.mxu1 %v2628_v3  ;;  %v1417_v8 = vmul.f32 %v2753_v29, %v1368_v0  ;;  %v1385_v0 = vld [vmem:[%s4585_s5 + $0x150] sm:$0xff] }
  0x44   :  { %1649 = vperm.xlu0 %2493, %v1414_v62   ;;  %v1434_v7 = vmul.f32 %v2753_v29, %v1385_v0 }
  0x46   :  { %721 = vmatpush2.bf16.msra.mxu0 %v296_v6  ;;  %2484 = vmatpush2.bf16.msra.mxu1 %v296_v6  ;;  %v304_v6 = vpack.c.bf16 %v131_v63, %v130_v60  ;;  %v1383_v60 = vld [vmem:[%s4585_s5 + $0x140] sm:$0xff] }
  0x47   :  { %722 = vmatprep.subr.bf16.mxu0 %v2628_v3  ;;  %2469 = vmatprep.subr.bf16.mxu1 %v2628_v3  ;;  %v1432_v62 = vmul.f32 %v2753_v29, %v1383_v60 }
  0x48   :  { %1659 = vperm.xlu0 %2493, %v1416_v9   ;;  %v1387_v9 = vld [vmem:[%s4585_s5 + $0x160] sm:$0xff] }
  0x4a   :  { %723 = vmatpush2.bf16.msra.mxu0 %v295_v13  ;;  %2485 = vmatpush2.bf16.msra.mxu1 %v295_v13  ;;  %v126_v13 = vld [vmem:[%s4582_s2 + $0x100] sm:$0xff] }
  0x4b   :  { %724 = vmatprep.subr.bf16.mxu0 %v2628_v3  ;;  %2470 = vmatprep.subr.bf16.mxu1 %v2628_v3  ;;  %v1360_v3 = vld [vmem:[%s4585_s5 + $0x88] sm:$0xff] }
  0x4c   :  { %v1409_v35 = vmul.f32 %v2753_v29, %v1360_v3  ;;  %1669 = vperm.xlu0 %2493, %v1418_v21   ;;  %v1373_v3 = vld [vmem:[%s4585_s5 + $0xf0] sm:$0xff] }
  0x4d   :  { %v1422_v34 = vmul.f32 %v2753_v29, %v1373_v3  ;;  %v2551_v21 = vld [vmem:[%s4581_s1 + $0xf4] ss:$12 sps:$4 sm:$0xff]   ;;  %v2561_v3 = vld [vmem:[%s4581_s1 + $0x124] ss:$12 sps:$4 sm:$0xff]  }
  0x4e   :  { %725 = vmatpush2.bf16.msra.mxu0 %v294_v22  ;;  %2486 = vmatpush2.bf16.msra.mxu1 %v294_v22  ;;  %v302_v22 = vpack.c.bf16 %v127_v18, %v126_v13  ;;  %v1389_v13 = vld [vmem:[%s4585_s5 + $0x170] sm:$0xff] }
  0x4f   :  { %2391 = vmatprep.subr.bf16.mxu1 %v309_v25  ;;  %1624 = vperm.xlu1 %2494, %v1409_v35   ;;  %v1438_v18 = vmul.f32 %v2753_v29, %v1389_v13 }
  0x51   :  { %727 = vmatmul.mubr.bf16.vlgmr.msra.gmra.mxu0 %v2495_v23  ;;  %871 = vmatmul.mubr.bf16.vlgmr.msra.gmra.mxu1 %v2498_v24  ;;  %v1421_v23 = vmul.f32 %v2753_v29, %v1372_v19  ;;  %v1371_v24 = vld [vmem:[%s4585_s5 + $0xe0] sm:$0xff] }
  0x52   :  { %2392 = vmatpush3.bf16.msra.mxu1 %v309_v25  ;;  %734 = vmatprep.mubr.bf16.mxu0 %v2501_v30  ;;  %v1374_v25 = vld [vmem:[%s4585_s5 + $0xf8] sm:$0xff]  ;;  %v1420_v26 = vmul.f32 %v2753_v29, %v1371_v24 }
  0x53   :  { %2393 = vmatprep.subr.bf16.mxu1 %v308_v31  ;;  %878 = vmatprep.mubr.bf16.mxu1 %v2503_v32  ;;  %v1423_v27 = vmul.f32 %v2753_v29, %v1374_v25  ;;  %v2524_v30 = vld [vmem:[%s4581_s1 + $0x210] ss:$12 sps:$4 sm:$0xff]   ;;  %v2549_v19 = vld [vmem:[%s4581_s1 + $0xd8] ss:$12 sps:$4 sm:$0xff]  }
  0x54   :  { %1634 = vperm.xlu1 %2494, %v1411_v44   ;;  %v2525_v32 = vld [vmem:[%s4581_s1 + $0x7c] ss:$12 sps:$4 sm:$0xff]   ;;  %1679 = vperm.xlu0 %2493, %v1420_v26   ;;  %v2531_v44 = vld [vmem:[%s4581_s1 + $0x94] ss:$12 sps:$4 sm:$0xff]   ;;  %v2556_v24 = vld [vmem:[%s4581_s1 + $0x10c] ss:$12 sps:$4 sm:$0xff]  }
  0x55   :  { %v2558_v25 = vld [vmem:[%s4581_s1 + $0xf8] ss:$12 sps:$4 sm:$0xff]   ;;  %v2559_v26 = vld [vmem:[%s4581_s1 + $0x108] ss:$12 sps:$4 sm:$0xff]  }
  0x56   :  { %2394 = vmatpush3.bf16.msra.mxu1 %v308_v31  ;;  %v1376_v31 = vld [vmem:[%s4585_s5 + $0x108] sm:$0xff] }
  0x57   :  { %2395 = vmatprep.subr.bf16.mxu1 %v307_v40  ;;  %v1425_v35 = vmul.f32 %v2753_v29, %v1376_v31  ;;  %v2565_v31 = vld [vmem:[%s4581_s1 + $0x140] ss:$12 sps:$4 sm:$0xff]  }
  0x58   :  { %1644 = vperm.xlu1 %2494, %v1413_v53   ;;  %1689 = vperm.xlu0 %2493, %v1422_v34   ;;  %v2534_v53 = vld [vmem:[%s4581_s1 + $0x90] ss:$12 sps:$4 sm:$0xff]   ;;  %v2569_v34 = vld [vmem:[%s4581_s1 + $0x138] ss:$12 sps:$4 sm:$0xff]  }
  0x59   :  { %735 = vmatmul.mubr.bf16.gmra.mxu0 %v2505_v39  ;;  %879 = vmatmul.mubr.bf16.gmra.mxu1 %v2506_v41  ;;  %v1427_v39 = vmul.f32 %v2753_v29, %v1378_v37  ;;  %v2529_v41 = vld [vmem:[%s4581_s1 + $0x78] ss:$12 sps:$4 sm:$0xff]   ;;  %v2573_v37 = vld [vmem:[%s4581_s1 + $0x188] ss:$12 sps:$4 sm:$0xff]  }
  0x5a   :  { %2396 = vmatpush3.bf16.msra.mxu1 %v307_v40  ;;  %742 = vmatprep.mubr.bf16.mxu0 %v2507_v48  ;;  %v1377_v40 = vld [vmem:[%s4585_s5 + $0x110] sm:$0xff]  ;;  %v1379_v48 = vld [vmem:[%s4585_s5 + $0x120] sm:$0xff] }
  0x5b   :  { %886 = vmatprep.mubr.bf16.mxu1 %v2509_v49  ;;  %2397 = vmatprep.subr.bf16.mxu1 %v306_v50  ;;  %v1426_v46 = vmul.f32 %v2753_v29, %v1377_v40  ;;  %v1382_v49 = vld [vmem:[%s4585_s5 + $0x138] sm:$0xff] }
  0x5c   :  { %1654 = vperm.xlu1 %2494, %v1415_v61   ;;  %1699 = vperm.xlu0 %2493, %v1424_v38   ;;  %v1431_v51 = vmul.f32 %v2753_v29, %v1382_v49  ;;  %v1386_v61 = vld [vmem:[%s4585_s5 + $0x158] sm:$0xff] }
  0x5d   :  { %v1435_v63 = vmul.f32 %v2753_v29, %v1386_v61  ;;  %v2574_v38 = vld [vmem:[%s4581_s1 + $0x150] ss:$12 sps:$4 sm:$0xff]   ;;  %v2576_v40 = vld [vmem:[%s4581_s1 + $0x16c] ss:$12 sps:$4 sm:$0xff]  }
  0x5e   :  { %2398 = vmatpush3.bf16.msra.mxu1 %v306_v50  ;;  %v1428_v50 = vmul.f32 %v2753_v29, %v1379_v48  ;;  %v2586_v48 = vld [vmem:[%s4581_s1 + $0x19c] ss:$12 sps:$4 sm:$0xff]   ;;  %v2588_v49 = vld [vmem:[%s4581_s1 + $0x218] ss:$12 sps:$4 sm:$0xff]  }
  0x5f   :  { %2399 = vmatprep.subr.bf16.mxu1 %v305_v58 }
  0x60   :  { %1664 = vperm.xlu1 %2494, %v1417_v8   ;;  %1709 = vperm.xlu0 %2493, %v1426_v46   ;;  %v1437_v8 = vmul.f32 %v2753_v29, %v1388_v4  ;;  %v2584_v46 = vld [vmem:[%s4581_s1 + $0x180] ss:$12 sps:$4 sm:$0xff]  }
  0x61   :  { %743 = vmatmul.mubr.bf16.gmra.mxu0 %v2511_v57  ;;  %887 = vmatmul.mubr.bf16.gmra.mxu1 %v2512_v59  ;;  %v2538_v57 = vld [vmem:[%s4581_s1 + $0x38] ss:$12 sps:$4 sm:$0xff]   ;;  %v1433_v59 = vmul.f32 %v2753_v29, %v1384_v55 }
  0x62   :  { %750 = vmatprep.mubr.bf16.mxu0 %v2513_v1  ;;  %894 = vmatprep.mubr.bf16.mxu1 %v2515_v2  ;;  %v2539_v1 = vld [vmem:[%s4581_s1 + $0xa8] ss:$12 sps:$4 sm:$0xff]   ;;  %v2540_v2 = vld [vmem:[%s4581_s1 + $0x50] ss:$12 sps:$4 sm:$0xff]  }
  0x63   :  { %2400 = vmatpush3.bf16.msra.mxu1 %v305_v58  ;;  %v1430_v58 = vmul.f32 %v2753_v29, %v1381_v52 }
  0x64   :  { %2401 = vmatprep.subr.bf16.mxu1 %v304_v6  ;;  %1674 = vperm.xlu1 %2494, %v1419_v16   ;;  %v2546_v16 = vld [vmem:[%s4581_s1 + $0xdc] ss:$12 sps:$4 sm:$0xff]  }
  0x65   :  { %1719 = vperm.xlu0 %2493, %v1428_v50   ;;  %v2589_v50 = vld [vmem:[%s4581_s1 + $0x198] ss:$12 sps:$4 sm:$0xff]  }
  0x67   :  { %2402 = vmatpush3.bf16.msra.mxu1 %v304_v6  ;;  %v2543_v6 = vld [vmem:[%s4581_s1 + $0x68] ss:$12 sps:$4 sm:$0xff]  }
  0x68   :  { %2403 = vmatprep.subr.bf16.mxu1 %v303_v15  ;;  %1684 = vperm.xlu1 %2494, %v1421_v23   ;;  %v2555_v23 = vld [vmem:[%s4581_s1 + $0xe0] ss:$12 sps:$4 sm:$0xff]  }
  0x69   :  { %751 = vmatmul.mubr.bf16.gmra.mxu0 %v2517_v11  ;;  %895 = vmatmul.mubr.bf16.gmra.mxu1 %v2518_v12  ;;  %v1436_v11 = vmul.f32 %v2753_v29, %v1387_v9  ;;  %v1439_v12 = vmul.f32 %v2753_v29, %v1390_v10  ;;  %v2553_v29 = vld [vmem:[%s4581_s1 + $0xc8] ss:$12 sps:$4 sm:$0xff]  }
  0x6a   :  { %758 = vmatprep.mubr.bf16.mxu0 %v2519_v14  ;;  %902 = vmatprep.mubr.bf16.mxu1 %v2521_v20  ;;  %v2544_v14 = vld [vmem:[%s4581_s1 + $0xc0] ss:$12 sps:$4 sm:$0xff]   ;;  %v2550_v20 = vld [vmem:[%s4581_s1 + $0xb0] ss:$12 sps:$4 sm:$0xff]  }
  0x6b   :  { %2404 = vmatpush3.bf16.msra.mxu1 %v303_v15  ;;  %1729 = vperm.xlu0 %2493, %v1430_v58   ;;  %v2545_v15 = vld [vmem:[%s4581_s1 + $0x80] ss:$12 sps:$4 sm:$0xff]  }
  0x6c   :  { %2405 = vmatprep.subr.bf16.mxu1 %v302_v22  ;;  %1694 = vperm.xlu1 %2494, %v1423_v27   ;;  %v2560_v27 = vld [vmem:[%s4581_s1 + $0x110] ss:$12 sps:$4 sm:$0xff]  }
  0x6f   :  { %2406 = vmatpush3.bf16.msra.mxu1 %v302_v22  ;;  %1739 = vperm.xlu0 %2493, %v1432_v62   ;;  %v2554_v22 = vld [vmem:[%s4581_s1 + $0xf0] ss:$12 sps:$4 sm:$0xff]  }
  0x70   :  { %1704 = vperm.xlu1 %2494, %v1425_v35   ;;  %v2570_v35 = vld [vmem:[%s4581_s1 + $0x170] ss:$12 sps:$4 sm:$0xff]  }
  0x71   :  { %759 = vmatmul.mubr.bf16.gmra.mxu0 %v2523_v28  ;;  %903 = vmatmul.mubr.bf16.gmra.mxu1 %v2524_v30  ;;  %v2563_v28 = vld [vmem:[%s4581_s1 + $0x128] ss:$12 sps:$4 sm:$0xff]   ;;  %v2564_v30 = vld [vmem:[%s4581_s1 + $0x120] ss:$12 sps:$4 sm:$0xff]  }
  0x72   :  { %766 = vmatprep.mubr.bf16.mxu0 %v2525_v32  ;;  %910 = vmatprep.mubr.bf16.mxu1 %v2527_v33  ;;  %v2566_v32 = vld [vmem:[%s4581_s1 + $0x13c] ss:$12 sps:$4 sm:$0xff]   ;;  %v2568_v33 = vld [vmem:[%s4581_s1 + $0x158] ss:$12 sps:$4 sm:$0xff]  }
  0x73   :  { %1749 = vperm.xlu0 %2493, %v1434_v7  }
  0x74   :  { %1714 = vperm.xlu1 %2494, %v1427_v39   ;;  %v2575_v39 = vld [vmem:[%s4581_s1 + $0x1a0] ss:$12 sps:$4 sm:$0xff]  }
  0x77   :  { %1759 = vperm.xlu0 %2493, %v1436_v11  }
  0x78   :  { %1724 = vperm.xlu1 %2494, %v1429_v47   ;;  %v2585_v47 = vld [vmem:[%s4581_s1 + $0x200] ss:$12 sps:$4 sm:$0xff]  }
  0x79   :  { %767 = vmatmul.mubr.bf16.gmra.mxu0 %v2529_v41  ;;  %911 = vmatmul.mubr.bf16.gmra.mxu1 %v2530_v42  ;;  %v2578_v41 = vld [vmem:[%s4581_s1 + $0x1b8] ss:$12 sps:$4 sm:$0xff]   ;;  %v2579_v42 = vld [vmem:[%s4581_s1 + $0x168] ss:$12 sps:$4 sm:$0xff]  }
  0x7a   :  { %774 = vmatprep.mubr.bf16.mxu0 %v2531_v44  ;;  %2407 = vmatprep.mubr.bf16.mxu1 %v2533_v45  ;;  %v2581_v44 = vld [vmem:[%s4581_s1 + $0x184] ss:$12 sps:$4 sm:$0xff]   ;;  %v2583_v45 = vld [vmem:[%s4581_s1 + $0x1e8] ss:$12 sps:$4 sm:$0xff]  }
  0x7b   :  { %1769 = vperm.xlu0 %2493, %v1438_v18  }
  0x7c   :  { %1734 = vperm.xlu1 %2494, %v1431_v51   ;;  %v2590_v51 = vld [vmem:[%s4581_s1 + $0x230] ss:$12 sps:$4 sm:$0xff]   ;;  %s1243_s1 = sld [smem:[#allocation2]] }
  0x80   :  { %1744 = vperm.xlu1 %2494, %v1433_v59  }
  0x81   :  { %775 = vmatmul.mubr.bf16.gmra.mxu0 %v2534_v53  ;;  %2408 = vmatmul.mubr.bf16.vlgmr.msra.gmra.mxu1 %v2535_v54 }
  0x82   :  { %782 = vmatprep.mubr.bf16.mxu0 %v2536_v56  ;;  %2411 = vmatprep.mubr.bf16.mxu1 %v2538_v57 }
  0x84   :  { %1754 = vperm.xlu1 %2494, %v1435_v63  }
  0x88   :  { %1764 = vperm.xlu1 %2494, %v1437_v8  }
  0x89   :  { %783 = vmatmul.mubr.bf16.gmra.mxu0 %v2539_v1  ;;  %2412 = vmatmul.mubr.bf16.gmra.mxu1 %v2540_v2 }
  0x8a   :  { %790 = vmatprep.mubr.bf16.mxu0 %v2541_v5  ;;  %2415 = vmatprep.mubr.bf16.mxu1 %v2543_v6 }
  0x8c   :  { %1774 = vperm.xlu1 %2494, %v1439_v12  }
  0x91   :  { %791 = vmatmul.mubr.bf16.gmra.mxu0 %v2544_v14  ;;  %2416 = vmatmul.mubr.bf16.gmra.mxu1 %v2545_v15 }
  0x92   :  { %798 = vmatprep.mubr.bf16.mxu0 %v2546_v16  ;;  %2419 = vmatprep.mubr.bf16.mxu1 %v2548_v17 }
  0x93   :  { %v3283_v7 = vpop.permute.xlu0 %1539 }
  0x94   :  { %v3299_v17 = vpop.permute.xlu1 %1549 }
  0x97   :  { %v3291_v14 = vpop.permute.xlu0 %1544 }
  0x99   :  { %799 = vmatmul.mubr.bf16.gmra.mxu0 %v2549_v19  ;;  %2420 = vmatmul.mubr.bf16.gmra.mxu1 %v2550_v20  ;;  %v1297_v20 = vld [vmem:[%s4583_s3 + $0x10] sm:$0xff] }
  0x9a   :  { %806 = vmatprep.mubr.bf16.mxu0 %v2551_v21  ;;  %2423 = vmatprep.mubr.bf16.mxu1 %v2553_v29  ;;  %v1295_v21 = vld [vmem:[%s4583_s3] sm:$0xff]  ;;  %v1298_v29 = vld [vmem:[%s4583_s3 + $0x18] sm:$0xff] }
  0xa1   :  { %807 = vmatmul.mubr.bf16.gmra.mxu0 %v2554_v22  ;;  %2424 = vmatmul.mubr.bf16.gmra.mxu1 %v2555_v23 }
  0xa2   :  { %814 = vmatprep.mubr.bf16.mxu0 %v2556_v24  ;;  %2427 = vmatprep.mubr.bf16.mxu1 %v2558_v25  ;;  %v2022_v24 = vld [vmem:[%s4584_s4 + $0x10] sm:$0xff]  ;;  %v1296_v25 = vld [vmem:[%s4583_s3 + $0x8] sm:$0xff] }
  0xa9   :  { %815 = vmatmul.mubr.bf16.gmra.mxu0 %v2559_v26  ;;  %2428 = vmatmul.mubr.bf16.gmra.mxu1 %v2560_v27  ;;  %v1301_v26 = vld [vmem:[%s4583_s3 + $0x30] sm:$0xff]  ;;  %v3323_v27 = vpop.permute.xlu0 %1559 }
  0xaa   :  { %822 = vmatprep.mubr.bf16.mxu0 %v2561_v3  ;;  %2431 = vmatprep.mubr.bf16.mxu1 %v2563_v28  ;;  %v3325_v3 = vstv %s1243_s1  ;;  %v2020_v28 = vld [vmem:[%s4584_s4] sm:$0xff] }
  0xb1   :  { %823 = vmatmul.mubr.bf16.gmra.mxu0 %v2564_v30  ;;  %2432 = vmatmul.mubr.bf16.gmra.mxu1 %v2565_v31  ;;  %v1299_v30 = vld [vmem:[%s4583_s3 + $0x20] sm:$0xff]  ;;  %v1302_v31 = vld [vmem:[%s4583_s3 + $0x38] sm:$0xff] }
  0xb2   :  { %830 = vmatprep.mubr.bf16.mxu0 %v2566_v32  ;;  %2435 = vmatprep.mubr.bf16.mxu1 %v2568_v33 }
  0xb9   :  { %831 = vmatmul.mubr.bf16.gmra.mxu0 %v2569_v34  ;;  %2436 = vmatmul.mubr.bf16.gmra.mxu1 %v2570_v35  ;;  %v3338_v34 = vstv %s3289_s21  ;;  %v2023_v35 = vld [vmem:[%s4584_s4 + $0x18] sm:$0xff] }
  0xba   :  { %838 = vmatprep.mubr.bf16.mxu0 %v2571_v36  ;;  %2439 = vmatprep.mubr.bf16.mxu1 %v2573_v37  ;;  %v2021_v36 = vld [vmem:[%s4584_s4 + $0x8] sm:$0xff]  ;;  %v2026_v37 = vld [vmem:[%s4584_s4 + $0x30] sm:$0xff] }
  0xc1   :  { %839 = vmatmul.mubr.bf16.gmra.mxu0 %v2574_v38  ;;  %2440 = vmatmul.mubr.bf16.gmra.mxu1 %v2575_v39  ;;  %v1300_v38 = vld [vmem:[%s4583_s3 + $0x28] sm:$0xff]  ;;  %v3353_v39 = vpop.permute.xlu1 %1554 }
  0xc2   :  { %846 = vmatprep.mubr.bf16.mxu0 %v2576_v40  ;;  %2443 = vmatprep.mubr.bf16.mxu1 %v2578_v41  ;;  %v2024_v40 = vld [vmem:[%s4584_s4 + $0x20] sm:$0xff]  ;;  %v2027_v41 = vld [vmem:[%s4584_s4 + $0x38] sm:$0xff] }
  0xc9   :  { %847 = vmatmul.mubr.bf16.gmra.mxu0 %v2579_v42  ;;  %2444 = vmatmul.mubr.bf16.gmra.mxu1 %v2580_v43  ;;  %v1305_v42 = vld [vmem:[%s4583_s3 + $0x50] sm:$0xff]  ;;  %v1303_v43 = vld [vmem:[%s4583_s3 + $0x40] sm:$0xff] }
  0xca   :  { %854 = vmatprep.mubr.bf16.mxu0 %v2581_v44  ;;  %2447 = vmatprep.mubr.bf16.mxu1 %v2583_v45 }
  0xd1   :  { %855 = vmatmul.mubr.bf16.gmra.mxu0 %v2584_v46  ;;  %2448 = vmatmul.mubr.bf16.gmra.mxu1 %v2585_v47  ;;  %v3372_v46 = vmul.f32 %v3325_v3, %v1297_v20  ;;  %v3375_v47 = vstv %s3293_s22  ;;  %v3424_v20 = vmul.f32 %v3325_v3, %v1299_v30  ;;  %v3444_v30 = vmul.f32 %v3338_v34, %v2023_v35  ;;  %v1311_v35 = vld [vmem:[%s4583_s3 + $0x80] sm:$0xff] }
  0xd2   :  { %862 = vmatprep.mubr.bf16.mxu0 %v2586_v48  ;;  %2451 = vmatprep.mubr.bf16.mxu1 %v2588_v49  ;;  %v3378_v48 = vmul.f32 %v3325_v3, %v1295_v21  ;;  %v3381_v49 = vmul.f32 %v3325_v3, %v1298_v29  ;;  %v3427_v21 = vmul.f32 %v3325_v3, %v1302_v31  ;;  %v2031_v29 = vld [vmem:[%s4584_s4 + $0x58] sm:$0xff] }
  0xd3   :  { %v3447_v31 = vmul.f32 %v3338_v34, %v2021_v36  ;;  %v1314_v36 = vld [vmem:[%s4583_s3 + $0x98] sm:$0xff] }
  0xd9   :  { %863 = vmatmul.mubr.bf16.gmra.mxu0 %v2589_v50  ;;  %2452 = vmatmul.mubr.bf16.gmra.mxu1 %v2590_v51  ;;  %v2025_v50 = vld [vmem:[%s4584_s4 + $0x28] sm:$0xff]  ;;  %v1306_v51 = vld [vmem:[%s4583_s3 + $0x58] sm:$0xff] }
 0x111   :  { %v3263_v52 = vpop.f32.mrf.mxu0  ;;  %v3265_v53 = vpop.f32.mrf.mxu1 }
 0x112   :  { %4588 = vst [vmem:[#allocation8_spill] sm:$0xff] %v3265_v53 }
 0x113   :  { %v730_v54 = vpop.f32.mrf.mxu0  ;;  %v874_v55 = vpop.f32.mrf.mxu1 }
 0x114   :  { %v1304_v54 = vld [vmem:[%s4583_s3 + $0x48] sm:$0xff]  ;;  %v1309_v55 = vld [vmem:[%s4583_s3 + $0x70] sm:$0xff] }
 0x115   :  { %v3267_v56 = vpop.f32.mrf.mxu0  ;;  %v3269_v57 = vpop.f32.mrf.mxu1  ;;  %v3507_v53 = vmul.f32 %v3325_v3, %v1309_v55 }
 0x116   :  { %4589 = vst [vmem:[#allocation9_spill] sm:$0xff] %v3269_v57  ;;  %v3501_v57 = vmul.f32 %v3325_v3, %v1306_v51  ;;  %v1318_v51 = vld [vmem:[%s4583_s3 + $0xb8] sm:$0xff] }
 0x117   :  { %v733_v58 = vpop.f32.mrf.mxu0  ;;  %v877_v59 = vpop.f32.mrf.mxu1  ;;  %4603 = vst [vmem:[#allocation23_spill] sm:$0xff] %v3507_v53 }
 0x118   :  { %v3395_v58 = vstv %s1922_s0  ;;  %v3398_v59 = vmul.f32 %v3338_v34, %v2022_v24  ;;  %v2029_v24 = vld [vmem:[%s4584_s4 + $0x48] sm:$0xff]  ;;  %4601 = vst [vmem:[#allocation21_spill] sm:$0xff] %v3501_v57  ;;  %v2039_v57 = vld [vmem:[%s4584_s4 + $0x98] sm:$0xff] }
 0x119   :  { %v3271_v60 = vpop.f32.mrf.mxu0  ;;  %v3273_v61 = vpop.f32.mrf.mxu1 }
 0x11a   :  { %4590 = vst [vmem:[#allocation10_spill] sm:$0xff] %v3273_v61  ;;  %v2038_v61 = vld [vmem:[%s4584_s4 + $0x90] sm:$0xff] }
 0x11b   :  { %v738_v62 = vpop.f32.mrf.mxu0  ;;  %v882_v63 = vpop.f32.mrf.mxu1 }
 0x11c   :  { %v3401_v62 = vmul.f32 %v3325_v3, %v1296_v25  ;;  %v3404_v63 = vmul.f32 %v3325_v3, %v1301_v26  ;;  %v1308_v25 = vld [vmem:[%s4583_s3 + $0x68] sm:$0xff]  ;;  %v1313_v26 = vld [vmem:[%s4583_s3 + $0x90] sm:$0xff] }
 0x11d   :  { %v3275_v0 = vpop.f32.mrf.mxu0  ;;  %v3277_v1 = vpop.f32.mrf.mxu1 }
 0x11e   :  { %4591 = vst [vmem:[#allocation11_spill] sm:$0xff] %v3277_v1  ;;  %v3504_v1 = vmul.f32 %v3325_v3, %v1304_v54 }
 0x11f   :  { %v741_v2 = vpop.f32.mrf.mxu0  ;;  %v885_v4 = vpop.f32.mrf.mxu1 }
 0x120   :  { %v2030_v2 = vld [vmem:[%s4584_s4 + $0x50] sm:$0xff]  ;;  %v2028_v4 = vld [vmem:[%s4584_s4 + $0x40] sm:$0xff]  ;;  %4602 = vst [vmem:[#allocation22_spill] sm:$0xff] %v3504_v1 }
 0x121   :  { %v3279_v5 = vpop.f32.mrf.mxu0  ;;  %v3281_v6 = vpop.f32.mrf.mxu1  ;;  %v3522_v55 = vmul.f32 %v3338_v34, %v2030_v2  ;;  %v3525_v53 = vmul.f32 %v3338_v34, %v2028_v4  ;;  %v2042_v2 = vld [vmem:[%s4584_s4 + $0xb0] sm:$0xff]  ;;  %v1316_v4 = vld [vmem:[%s4583_s3 + $0xa8] sm:$0xff] }
 0x122   :  { %4592 = vst [vmem:[#allocation12_spill] sm:$0xff] %v3281_v6  ;;  %v3481_v6 = vmul.f32 %v3325_v3, %v1303_v43  ;;  %v3498_v43 = vmul.f32 %v3338_v34, %v2025_v50  ;;  %v1315_v50 = vld [vmem:[%s4583_s3 + $0xa0] sm:$0xff] }
 0x123   :  { %v746_v8 = vpop.f32.mrf.mxu0  ;;  %v890_v9 = vpop.f32.mrf.mxu1  ;;  %4604 = vst [vmem:[#allocation24_spill] sm:$0xff] %v3525_v53  ;;  %v2043_v53 = vld [vmem:[%s4584_s4 + $0xb8] sm:$0xff] }
 0x124   :  { %v1307_v8 = vld [vmem:[%s4583_s3 + $0x60] sm:$0xff]  ;;  %v1310_v9 = vld [vmem:[%s4583_s3 + $0x78] sm:$0xff]  ;;  %4600 = vst [vmem:[#allocation20_spill] sm:$0xff] %v3498_v43 }
 0x125   :  { %v3285_v10 = vpop.f32.mrf.mxu0  ;;  %v3287_v11 = vpop.f32.mrf.mxu1  ;;  %v3528_v1 = vmul.f32 %v3325_v3, %v1307_v8  ;;  %v3546_v8 = vmul.f32 %v3338_v34, %v2031_v29  ;;  %v1319_v29 = vld [vmem:[%s4583_s3 + $0xc0] sm:$0xff] }
 0x126   :  { %4593 = vst [vmem:[#allocation13_spill] sm:$0xff] %v3287_v11  ;;  %v3475_v11 = vmul.f32 %v3338_v34, %v2027_v41  ;;  %v1317_v41 = vld [vmem:[%s4583_s3 + $0xb0] sm:$0xff] }
 0x127   :  { %v749_v12 = vpop.f32.mrf.mxu0  ;;  %v893_v13 = vpop.f32.mrf.mxu1  ;;  %4605 = vst [vmem:[#allocation25_spill] sm:$0xff] %v3528_v1  ;;  %4607 = vst [vmem:[#allocation27_spill] sm:$0xff] %v3546_v8  ;;  %v2040_v1 = vld [vmem:[%s4584_s4 + $0xa0] sm:$0xff]  ;;  %v2041_v8 = vld [vmem:[%s4584_s4 + $0xa8] sm:$0xff] }
 0x128   :  { %4599 = vst [vmem:[#allocation19_spill] sm:$0xff] %v3475_v11  ;;  %v3531_v11 = vmul.f32 %v3325_v3, %v1310_v9  ;;  %v3549_v9 = vmul.f32 %v3338_v34, %v2029_v24 }
 0x129   :  { %v3295_v15 = vpop.f32.mrf.mxu0  ;;  %v3297_v16 = vpop.f32.mrf.mxu1 }
 0x12a   :  { %4594 = vst [vmem:[#allocation14_spill] sm:$0xff] %v3297_v16  ;;  %v2035_v16 = vld [vmem:[%s4584_s4 + $0x78] sm:$0xff]  ;;  %4606 = vst [vmem:[#allocation26_spill] sm:$0xff] %v3531_v11  ;;  %v3555_v11 = vmul.f32 %v3325_v3, %v1313_v26 }
 0x12b   :  { %v754_v18 = vpop.f32.mrf.mxu0  ;;  %v898_v19 = vpop.f32.mrf.mxu1  ;;  %4608 = vst [vmem:[#allocation28_spill] sm:$0xff] %v3549_v9 }
 0x12c   :  { %v3418_v18 = vstv %s2117_s16  ;;  %v3421_v19 = vmul.f32 %v3338_v34, %v2020_v28  ;;  %v3441_v28 = vpop.permute.xlu0 %1569  ;;  %4610 = vst [vmem:[#allocation30_spill] sm:$0xff] %v3555_v11  ;;  %v3577_v11 = vmul.f32 %v3325_v3, %v1311_v35  ;;  %v3594_v35 = vmul.f32 %v3338_v34, %v2035_v16  ;;  %v1322_v16 = vld [vmem:[%s4583_s3 + $0xd8] sm:$0xff] }
 0x12d   :  { %v3310_v22 = vpop.f32.mrf.mxu0  ;;  %v3312_v23 = vpop.f32.mrf.mxu1 }
 0x12e   :  { %4595 = vst [vmem:[#allocation15_spill] sm:$0xff] %v3312_v23  ;;  %v3478_v23 = vmul.f32 %v3325_v3, %v1305_v42  ;;  %v3495_v42 = vpop.permute.xlu1 %1564  ;;  %4614 = vst [vmem:[#allocation34_spill] sm:$0xff] %v3577_v11  ;;  %v2044_v11 = vld [vmem:[%s4584_s4 + $0xc0] sm:$0xff] }
 0x12f   :  { %v757_v32 = vpop.f32.mrf.mxu0  ;;  %v901_v33 = vpop.f32.mrf.mxu1  ;;  %4616 = vst [vmem:[#allocation36_spill] sm:$0xff] %v3594_v35  ;;  %v2046_v35 = vld [vmem:[%s4584_s4 + $0xd0] sm:$0xff] }
 0x130   :  { %v3450_v32 = vmul.f32 %v3338_v34, %v2026_v37  ;;  %v3453_v33 = vmul.f32 %v3325_v3, %v1300_v38 }
 0x131   :  { %v3367_v44 = vpop.f32.mrf.mxu0  ;;  %v3369_v45 = vpop.f32.mrf.mxu1 }
 0x132   :  { %4596 = vst [vmem:[#allocation16_spill] sm:$0xff] %v3369_v45  ;;  %v3472_v45 = vmul.f32 %v3338_v34, %v2024_v40  ;;  %v1312_v40 = vld [vmem:[%s4583_s3 + $0x88] sm:$0xff] }
 0x133   :  { %v762_v12 = vpop.f32.mrf.mxu0  ;;  %v906_v13 = vpop.f32.mrf.mxu1 }
 0x134   :  { %v2034_v12 = vld [vmem:[%s4584_s4 + $0x70] sm:$0xff]  ;;  %v2032_v13 = vld [vmem:[%s4584_s4 + $0x60] sm:$0xff] }
 0x135   :  { %v3467_v37 = vpop.f32.mrf.mxu0  ;;  %v3469_v38 = vpop.f32.mrf.mxu1  ;;  %v3574_v26 = vmul.f32 %v3338_v34, %v2032_v13 }
 0x136   :  { %4597 = vst [vmem:[#allocation17_spill] sm:$0xff] %v3467_v37  ;;  %4598 = vst [vmem:[#allocation18_spill] sm:$0xff] %v3469_v38  ;;  %v2033_v38 = vld [vmem:[%s4584_s4 + $0x68] sm:$0xff]  ;;  %v2036_v37 = vld [vmem:[%s4584_s4 + $0x80] sm:$0xff]  ;;  %v3591_v13 = vpop.permute.xlu0 %1579 }
 0x137   :  { %v765_v54 = vpop.f32.mrf.mxu0  ;;  %v909_v43 = vpop.f32.mrf.mxu1  ;;  %4613 = vst [vmem:[#allocation33_spill] sm:$0xff] %v3574_v26  ;;  %v3600_v26 = vmul.f32 %v3325_v3, %v1312_v40  ;;  %v3615_v40 = vmul.f32 %v3338_v34, %v2038_v61  ;;  %v1323_v61 = vld [vmem:[%s4583_s3 + $0xe0] sm:$0xff] }
 0x138   :  { %v2037_v43 = vld [vmem:[%s4584_s4 + $0x88] sm:$0xff]  ;;  %v3552_v54 = vmul.f32 %v3325_v3, %v1308_v25  ;;  %v3571_v25 = vmul.f32 %v3338_v34, %v2034_v12  ;;  %v1321_v12 = vld [vmem:[%s4583_s3 + $0xd0] sm:$0xff] }
 0x139   :  { %v3566_v24 = vpop.f32.mrf.mxu0  ;;  %v3568_v9 = vpop.f32.mrf.mxu1  ;;  %4618 = vst [vmem:[#allocation38_spill] sm:$0xff] %v3600_v26  ;;  %v3624_v26 = vmul.f32 %v3325_v3, %v1318_v51  ;;  %v3641_v51 = vmul.f32 %v3338_v34, %v2037_v43 }
 0x13a   :  { %4609 = vst [vmem:[#allocation29_spill] sm:$0xff] %v3552_v54  ;;  %4611 = vst [vmem:[#allocation31_spill] sm:$0xff] %v3568_v9  ;;  %v3580_v54 = vmul.f32 %v3325_v3, %v1314_v36  ;;  %v1320_v9 = vld [vmem:[%s4583_s3 + $0xc8] sm:$0xff]  ;;  %v3597_v36 = vmul.f32 %v3338_v34, %v2033_v38 }
 0x13b   :  { %4612 = vst [vmem:[#allocation32_spill] sm:$0xff] %v3571_v25  ;;  %v2045_v25 = vld [vmem:[%s4584_s4 + $0xc8] sm:$0xff]  ;;  %v770_v38 = vpop.f32.mrf.mxu0  ;;  %4622 = vst [vmem:[#allocation42_spill] sm:$0xff] %v3624_v26 }
 0x13c   :  { %4615 = vst [vmem:[#allocation35_spill] sm:$0xff] %v3580_v54  ;;  %4617 = vst [vmem:[#allocation37_spill] sm:$0xff] %v3597_v36  ;;  %v3603_v54 = vmul.f32 %v3325_v3, %v1317_v41  ;;  %v914_v36 = vpop.f32.mrf.mxu1  ;;  %v3618_v41 = vmul.f32 %v3338_v34, %v2036_v37  ;;  %v3635_v37 = vpop.permute.xlu1 %1574  ;;  %v3644_v38 = vmul.f32 %v3338_v34, %v2042_v2  ;;  %v1324_v26 = vld [vmem:[%s4583_s3 + $0xe8] sm:$0xff] }
 0x13d   :  { %v2047_v36 = vld [vmem:[%s4584_s4 + $0xd8] sm:$0xff]  ;;  %4624 = vst [vmem:[#allocation44_spill] sm:$0xff] %v3641_v51  ;;  %v3658_v43 = vpop.f32.mrf.mxu0  ;;  %v3663_v2 = vmul.f32 %v3338_v34, %v2040_v1  ;;  %v1331_v1 = vld [vmem:[%s4583_s3 + $0x120] sm:$0xff] }
 0x13e   :  { %4619 = vst [vmem:[#allocation39_spill] sm:$0xff] %v3603_v54  ;;  %4620 = vst [vmem:[#allocation40_spill] sm:$0xff] %v3618_v41  ;;  %v3621_v54 = vmul.f32 %v3325_v3, %v1315_v50  ;;  %v3638_v50 = vmul.f32 %v3338_v34, %v2039_v57  ;;  %v3647_v41 = vmul.f32 %v3325_v3, %v1316_v4  ;;  %v1333_v57 = vld [vmem:[%s4583_s3 + $0x130] sm:$0xff]  ;;  %v3660_v51 = vpop.f32.mrf.mxu1 }
 0x13f   :  { %4625 = vst [vmem:[#allocation45_spill] sm:$0xff] %v3644_v38  ;;  %4627 = vst [vmem:[#allocation47_spill] sm:$0xff] %v3660_v51  ;;  %v3666_v4 = vmul.f32 %v3338_v34, %v2043_v53  ;;  %v3669_v38 = vmul.f32 %v3325_v3, %v1319_v29  ;;  %v2049_v51 = vld [vmem:[%s4584_s4 + $0xe8] sm:$0xff]  ;;  %v3684_v53 = vmul.f32 %v3338_v34, %v2041_v8  ;;  %v1334_v8 = vld [vmem:[%s4583_s3 + $0x138] sm:$0xff] }
 0x140   :  { %4621 = vst [vmem:[#allocation41_spill] sm:$0xff] %v3621_v54  ;;  %4623 = vst [vmem:[#allocation43_spill] sm:$0xff] %v3638_v50  ;;  %v1325_v54 = vld [vmem:[%s4583_s3 + $0xf0] sm:$0xff]  ;;  %v2048_v50 = vld [vmem:[%s4584_s4 + $0xe0] sm:$0xff]  ;;  %v3687_v29 = vmul.f32 %v3338_v34, %v2044_v11  ;;  %v773_v11 = vpop.f32.mrf.mxu0 }
 0x141   :  { %4626 = vst [vmem:[#allocation46_spill] sm:$0xff] %v3647_v41  ;;  %4628 = vst [vmem:[#allocation48_spill] sm:$0xff] %v3663_v2  ;;  %v3672_v41 = vmul.f32 %v3325_v3, %v1320_v9  ;;  %v3690_v9 = vmul.f32 %v3325_v3, %v1321_v12  ;;  %v2050_v2 = vld [vmem:[%s4584_s4 + $0xf0] sm:$0xff]  ;;  %v3705_v12 = vmul.f32 %v3338_v34, %v2045_v25  ;;  %v1327_v25 = vld [vmem:[%s4583_s3 + $0x100] sm:$0xff] }
 0x142   :  { %4629 = vst [vmem:[#allocation49_spill] sm:$0xff] %v3666_v4  ;;  %4630 = vst [vmem:[#allocation50_spill] sm:$0xff] %v3669_v38  ;;  %v3693_v4 = vmul.f32 %v3325_v3, %v1322_v16  ;;  %v3708_v16 = vmul.f32 %v3338_v34, %v2046_v35  ;;  %v3725_v35 = vpop.permute.xlu0 %1589  ;;  %v3734_v11 = vmul.f32 %v3325_v3, %v1325_v54 }
 0x143   :  { %4631 = vst [vmem:[#allocation51_spill] sm:$0xff] %v3672_v41  ;;  %4632 = vst [vmem:[#allocation52_spill] sm:$0xff] %v3684_v53  ;;  %v1326_v41 = vld [vmem:[%s4583_s3 + $0xf8] sm:$0xff]  ;;  %v3711_v53 = vmul.f32 %v3338_v34, %v2047_v36  ;;  %v3728_v36 = vmul.f32 %v3338_v34, %v2048_v50  ;;  %v1337_v50 = vld [vmem:[%s4583_s3 + $0x150] sm:$0xff]  ;;  %v3751_v54 = vmul.f32 %v3338_v34, %v2049_v51 }
 0x144   :  { %4633 = vst [vmem:[#allocation53_spill] sm:$0xff] %v3687_v29  ;;  %4634 = vst [vmem:[#allocation54_spill] sm:$0xff] %v3690_v9  ;;  %v917_v29 = vpop.f32.mrf.mxu1  ;;  %v2058_v9 = vld [vmem:[%s4584_s4 + $0x130] sm:$0xff]  ;;  %v1338_v51 = vld [vmem:[%s4583_s3 + $0x158] sm:$0xff] }
 0x145   :  { %4635 = vst [vmem:[#allocation55_spill] sm:$0xff] %v3693_v4  ;;  %4636 = vst [vmem:[#allocation56_spill] sm:$0xff] %v3705_v12  ;;  %v3714_v4 = vmul.f32 %v3325_v3, %v1323_v61  ;;  %v1332_v29 = vld [vmem:[%s4583_s3 + $0x128] sm:$0xff]  ;;  %v3731_v61 = vmul.f32 %v3325_v3, %v1324_v26  ;;  %v2051_v12 = vld [vmem:[%s4584_s4 + $0xf8] sm:$0xff]  ;;  %v3748_v26 = vpop.f32.mrf.mxu0 }
 0x146   :  { %4637 = vst [vmem:[#allocation57_spill] sm:$0xff] %v3708_v16  ;;  %4638 = vst [vmem:[#allocation58_spill] sm:$0xff] %v3711_v53  ;;  %v3737_v53 = vmul.f32 %v3325_v3, %v1333_v57  ;;  %v2056_v16 = vld [vmem:[%s4584_s4 + $0x120] sm:$0xff]  ;;  %v3754_v57 = vmul.f32 %v3325_v3, %v1331_v1  ;;  %v3771_v1 = vpop.permute.xlu1 %1584 }
 0x147   :  { %4639 = vst [vmem:[#allocation59_spill] sm:$0xff] %v3714_v4  ;;  %4640 = vst [vmem:[#allocation60_spill] sm:$0xff] %v3728_v36  ;;  %v2409_v36 = vpop.f32.mrf.mxu1  ;;  %v1328_v4 = vld [vmem:[%s4583_s3 + $0x108] sm:$0xff] }
 0x148   :  { %4641 = vst [vmem:[#allocation61_spill] sm:$0xff] %v3731_v61  ;;  %4642 = vst [vmem:[#allocation62_spill] sm:$0xff] %v3734_v11  ;;  %v3760_v11 = vmul.f32 %v3325_v3, %v1334_v8  ;;  %v1335_v61 = vld [vmem:[%s4583_s3 + $0x140] sm:$0xff]  ;;  %v3777_v8 = vmul.f32 %v3338_v34, %v2050_v2  ;;  %v778_v2 = vpop.f32.mrf.mxu0 }
 0x149   :  { %4643 = vst [vmem:[#allocation63_spill] sm:$0xff] %v3737_v53  ;;  %4644 = vst [vmem:[#allocation64_spill] sm:$0xff] %v3751_v54  ;;  %v3757_v53 = vmul.f32 %v3325_v3, %v1326_v41  ;;  %v3774_v41 = vadd.f32 %v2409_v36, %v3271_v60  ;;  %v2059_v54 = vld [vmem:[%s4584_s4 + $0x138] sm:$0xff]  ;;  %v1336_v60 = vld [vmem:[%s4583_s3 + $0x148] sm:$0xff]  ;;  %v953_v36 = vpop.f32.mrf.mxu1 }
 0x14a   :  { %4645 = vst [vmem:[#allocation65_spill] sm:$0xff] %v3754_v57  ;;  %4647 = vst [vmem:[#allocation67_spill] sm:$0xff] %v3760_v11  ;;  %v3780_v11 = vmul.f32 %v3338_v34, %v2058_v9  ;;  %v2057_v57 = vld [vmem:[%s4584_s4 + $0x128] sm:$0xff]  ;;  %v3795_v9 = vmul.f32 %v3338_v34, %v2056_v16  ;;  %v2062_v2 = vld [vmem:[%s4584_s4 + $0x150] sm:$0xff]  ;;  %v3813_v16 = vadd.f32 %v953_v36, %v3263_v52  ;;  %v3830_v52 = vpop.f32.mrf.mxu0  ;;  %v3880_v38 = vpop.permute.xlu1 %1594 }
 0x14b   :  { %4646 = vst [vmem:[#allocation66_spill] sm:$0xff] %v3757_v53  ;;  %4648 = vst [vmem:[#allocation68_spill] sm:$0xff] %v3777_v8  ;;  %v3786_v53 = vmul.f32 %v3325_v3, %v1332_v29  ;;  %v3801_v8 = vmul.f32 %v3325_v3, %v1327_v25  ;;  %v2052_v29 = vld [vmem:[%s4584_s4 + $0x100] sm:$0xff]  ;;  %v2410_v36 = vpop.f32.mrf.mxu1 }
 0x14c   :  { %4649 = vst [vmem:[#allocation69_spill] sm:$0xff] %v3780_v11  ;;  %4651 = vst [vmem:[#allocation71_spill] sm:$0xff] %v3795_v9  ;;  %v3798_v11 = vmul.f32 %v3338_v34, %v2051_v12  ;;  %v3816_v12 = vmul.f32 %v3325_v3, %v1335_v61  ;;  %v2060_v25 = vld [vmem:[%s4584_s4 + $0x140] sm:$0xff]  ;;  %v3833_v61 = vmul.f32 %v3338_v34, %v2059_v54 }
 0x14d   :  { %4650 = vst [vmem:[#allocation70_spill] sm:$0xff] %v3786_v53  ;;  %4653 = vst [vmem:[#allocation73_spill] sm:$0xff] %v3801_v8  ;;  %v3807_v53 = vmul.f32 %v3325_v3, %v1337_v50  ;;  %v1329_v50 = vld [vmem:[%s4583_s3 + $0x110] sm:$0xff]  ;;  %v3845_v9 = vmul.f32 %v3325_v3, %v1336_v60  ;;  %v3847_v8 = vpop.permute.xlu0 %1599  ;;  %v1491_v54 = vadd.f32 %v3372_v46, %v3774_v41  ;;  %v1339_v60 = vld [vmem:[%s4583_s3 + $0x160] sm:$0xff] }
 0x14e   :  { %4652 = vst [vmem:[#allocation72_spill] sm:$0xff] %v3798_v11  ;;  %4655 = vst [vmem:[#allocation75_spill] sm:$0xff] %v3816_v12  ;;  %v3822_v11 = vmul.f32 %v3325_v3, %v1328_v4  ;;  %v3836_v12 = vmul.f32 %v3338_v34, %v2057_v57  ;;  %v2053_v4 = vld [vmem:[%s4584_s4 + $0x108] sm:$0xff]  ;;  %v965_v57 = vadd.f32 %v2410_v36, %v3275_v0 }
 0x14f   :  { %4654 = vst [vmem:[#allocation74_spill] sm:$0xff] %v3807_v53  ;;  %v1341_v53 = vld [vmem:[%s4583_s3 + $0x170] sm:$0xff]  ;;  %4657 = vst [vmem:[#allocation77_spill] sm:$0xff] %v3833_v61  ;;  %v956_v61 = vpop.f32.mrf.mxu1  ;;  %v3866_v46 = vmul.f32 %v3338_v34, %v2062_v2  ;;  %v3869_v0 = vmul.f32 %v3338_v34, %v2060_v25  ;;  %v3875_v36 = vmul.f32 %v3325_v3, %v1329_v50  ;;  %v1342_v50 = vld [vmem:[%s4583_s3 + $0x178] sm:$0xff] }
 0x150   :  { %4656 = vst [vmem:[#allocation76_spill] sm:$0xff] %v3822_v11  ;;  %4658 = vst [vmem:[#allocation78_spill] sm:$0xff] %v3836_v12  ;;  %v3842_v11 = vmul.f32 %v3325_v3, %v1338_v51  ;;  %v3854_v12 = vmul.f32 %v3338_v34, %v2052_v29  ;;  %v2063_v51 = vld [vmem:[%s4584_s4 + $0x158] sm:$0xff]  ;;  %v2061_v29 = vld [vmem:[%s4584_s4 + $0x148] sm:$0xff]  ;;  %v1489_v2 = vadd.f32 %v3378_v48, %v3813_v16 }
 0x151   :  { %4660 = vst [vmem:[#allocation80_spill] sm:$0xff] %v3845_v9  ;;  %1194 = vst [vmem:[#allocation5 + $0x10] sm:$0xff] %v3774_v41  ;;  %v1330_v9 = vld [vmem:[%s4583_s3 + $0x118] sm:$0xff]  ;;  %v3887_v25 = vmul.f32 %v3338_v34, %v2053_v4 }
 0x152   :  { %4659 = vst [vmem:[#allocation79_spill] sm:$0xff] %v3842_v11  ;;  %4661 = vst [vmem:[#allocation81_spill] sm:$0xff] %v3854_v12  ;;  %v781_v11 = vpop.f32.mrf.mxu0  ;;  %v3878_v12 = vmul.f32 %v3325_v3, %v1341_v53  ;;  %v3902_v48 = vmul.f32 %v3325_v3, %v1330_v9  ;;  %v3915_v9 = vpop.permute.xlu0 %1609 }
 0x153   :  { %4662 = vst [vmem:[#allocation82_spill] sm:$0xff] %v3866_v46  ;;  %4663 = vst [vmem:[#allocation83_spill] sm:$0xff] %v3869_v0  ;;  %v1779_v11 = vmul.f32 %v3299_v17, %v1491_v54  ;;  %v957_v0 = vadd.f32 %v956_v61, %v3267_v56  ;;  %v3899_v17 = vmul.f32 %v3325_v3, %v1339_v60 }
 0x154   :  { %4664 = vst [vmem:[#allocation84_spill] sm:$0xff] %v3875_v36  ;;  %4665 = vst [vmem:[#allocation85_spill] sm:$0xff] %v3878_v12  ;;  %v3893_v53 = vpop.f32.mrf.mxu0  ;;  %v2413_v12 = vpop.f32.mrf.mxu1  ;;  %v3896_v36 = vmul.f32 %v3338_v34, %v2063_v51  ;;  %v1492_v46 = vadd.f32 %v3381_v49, %v965_v57  ;;  %v3908_v56 = vmul.f32 %v3338_v34, %v2061_v29 }
 0x155   :  { %1192 = vst [vmem:[#allocation5] sm:$0xff] %v3813_v16  ;;  %4666 = vst [vmem:[#allocation86_spill] sm:$0xff] %v3887_v25  ;;  %v1827_v4 = vsub.f32 %v3774_v41, %v1779_v11  ;;  %v1777_v25 = vmul.f32 %v3283_v7, %v1489_v2  ;;  %v1876_v61 = vmul.f32 %v3375_v47, %v1491_v54 }
 0x156   :  { %4667 = vst [vmem:[#allocation87_spill] sm:$0xff] %v3896_v36  ;;  %4668 = vst [vmem:[#allocation88_spill] sm:$0xff] %v3899_v17  ;;  %v978_v51 = vadd.f32 %v2413_v12, %v3295_v15  ;;  %v786_v36 = vpop.f32.mrf.mxu0  ;;  %v969_v60 = vpop.f32.mrf.mxu1  ;;  %v3913_v17 = vmul.f32 %v3325_v3, %v1342_v50  ;;  %v1874_v49 = vmul.f32 %v3375_v47, %v1489_v2 }
 0x157   :  { %4669 = vst [vmem:[#allocation89_spill] sm:$0xff] %v3902_v48  ;;  %1195 = vst [vmem:[#allocation5 + $0x18] sm:$0xff] %v965_v57  ;;  %v1926_v41 = vmul.f32 %v3395_v58, %v1827_v4  ;;  %v1825_v7 = vsub.f32 %v3813_v16, %v1777_v25  ;;  %v1780_v29 = vmul.f32 %v3353_v39, %v1492_v46  ;;  %v3926_v50 = vpop.permute.xlu1 %1604 }
 0x158   :  { %4670 = vst [vmem:[#allocation90_spill] sm:$0xff] %v3908_v56  ;;  %4671 = vst [vmem:[#allocation91_spill] sm:$0xff] %v3913_v17  ;;  %v1877_v11 = vmul.f32 %v3375_v47, %v1492_v46  ;;  %v1490_v15 = vadd.f32 %v3401_v62, %v957_v0  ;;  %v970_v12 = vadd.f32 %v969_v60, %v3279_v5  ;;  %v3924_v54 = vpop.f32.mrf.mxu0  ;;  %v2414_v36 = vpop.f32.mrf.mxu1 }
 0x159   :  { %1193 = vst [vmem:[#allocation5 + $0x8] sm:$0xff] %v957_v0  ;;  %v1974_v17 = vadd.f32 %v1926_v41, %v1876_v61  ;;  %v1924_v4 = vmul.f32 %v3395_v58, %v1825_v7  ;;  %v1828_v16 = vsub.f32 %v965_v57, %v1780_v29  ;;  %v981_v2 = vadd.f32 %v2414_v36, %v3310_v22  ;;  %v3940_v29 = vpop.permute.xlu0 %1619 }
 0x15a   :  { %v1778_v39 = vmul.f32 %v3291_v14, %v1490_v15  ;;  %v1875_v46 = vmul.f32 %v3375_v47, %v1490_v15  ;;  %1198 = vst [vmem:[#allocation5 + $0x30] sm:$0xff] %v978_v51  ;;  %v1495_v62 = vadd.f32 %v3404_v63, %v978_v51  ;;  %v789_v25 = vpop.f32.mrf.mxu0  ;;  %v972_v5 = vpop.f32.mrf.mxu1  ;;  %1196 = vst [vmem:[#allocation5 + $0x20] sm:$0xff] %v970_v12 }
 0x15b   :  { %v2121_v60 = vmul.f32 %v3418_v18, %v1974_v17  ;;  %v1972_v56 = vadd.f32 %v1924_v4, %v1874_v49  ;;  %v1927_v48 = vmul.f32 %v3395_v58, %v1828_v16  ;;  %v1493_v14 = vadd.f32 %v3424_v20, %v970_v12  ;;  %1199 = vst [vmem:[#allocation5 + $0x38] sm:$0xff] %v981_v2 }
 0x15c   :  { %v1826_v61 = vsub.f32 %v957_v0, %v1778_v39  ;;  %v1783_v41 = vmul.f32 %v3441_v28, %v1495_v62  ;;  %v1880_v57 = vmul.f32 %v3375_v47, %v1495_v62  ;;  %v3938_v22 = vpop.f32.mrf.mxu0  ;;  %v2417_v7 = vpop.f32.mrf.mxu1  ;;  %v1496_v0 = vadd.f32 %v3427_v21, %v981_v2 }
 0x15d   :  { %v2169_v63 = vadd.f32 %v2121_v60, %v3398_v59  ;;  %v2119_v17 = vmul.f32 %v3418_v18, %v1972_v56  ;;  %v1975_v49 = vadd.f32 %v1927_v48, %v1877_v11  ;;  %v1781_v36 = vmul.f32 %v3323_v27, %v1493_v14  ;;  %v3948_v39 = vpop.permute.xlu1 %1614 }
 0x15e   :  { %v1925_v28 = vmul.f32 %v3395_v58, %v1826_v61  ;;  %v1831_v15 = vsub.f32 %v978_v51, %v1783_v41  ;;  %v1878_v20 = vmul.f32 %v3375_v47, %v1493_v14  ;;  %v794_v4 = vpop.f32.mrf.mxu0  ;;  %v985_v16 = vpop.f32.mrf.mxu1  ;;  %v1784_v21 = vmul.f32 %v3635_v37, %v1496_v0 }
 0x15f   :  { %2217 = vst [vmem:[%s4587_s7 + $0x10] sm:$0xff] %v2169_v63  ;;  %v2167_v59 = vadd.f32 %v2119_v17, %v3421_v19  ;;  %v2122_v48 = vmul.f32 %v3418_v18, %v1975_v49  ;;  %v1881_v56 = vmul.f32 %v3375_v47, %v1496_v0  ;;  %v1829_v11 = vsub.f32 %v970_v12, %v1781_v36  ;;  %v3969_v63 = vpop.permute.xlu0 %1629 }
 0x160   :  { %v1973_v51 = vadd.f32 %v1925_v28, %v1875_v46  ;;  %v1930_v27 = vmul.f32 %v3395_v58, %v1831_v15  ;;  %v973_v62 = vadd.f32 %v972_v5, %v3285_v10  ;;  %v3959_v25 = vpop.f32.mrf.mxu0  ;;  %v2418_v60 = vpop.f32.mrf.mxu1  ;;  %v1832_v61 = vsub.f32 %v981_v2, %v1784_v21 }
 0x161   :  { %2215 = vst [vmem:[%s4587_s7] sm:$0xff] %v2167_v59  ;;  %v2170_v19 = vadd.f32 %v2122_v48, %v3444_v30  ;;  %v994_v37 = vadd.f32 %v2417_v7, %v3566_v24  ;;  %v986_v41 = vadd.f32 %v985_v16, %v3367_v44  ;;  %v1928_v12 = vmul.f32 %v3395_v58, %v1829_v11  ;;  %v3981_v0 = vpop.permute.xlu1 %1624 }
 0x162   :  { %v2120_v46 = vmul.f32 %v3418_v18, %v1973_v51  ;;  %v1978_v14 = vadd.f32 %v1930_v27, %v1880_v57  ;;  %v797_v10 = vpop.f32.mrf.mxu0  ;;  %v988_v5 = vpop.f32.mrf.mxu1  ;;  %v1931_v30 = vmul.f32 %v3395_v58, %v1832_v61  ;;  %v997_v2 = vadd.f32 %v2418_v60, %v3658_v43  ;;  %1197 = vst [vmem:[#allocation5 + $0x28] sm:$0xff] %v973_v62  ;;  %v4673_v60 = vld [vmem:[#allocation19_spill] sm:$0xff] }
 0x163   :  { %2218 = vst [vmem:[%s4587_s7 + $0x18] sm:$0xff] %v2170_v19  ;;  %v1976_v7 = vadd.f32 %v1928_v12, %v1878_v20  ;;  %v1494_v57 = vadd.f32 %v3453_v33, %v973_v62  ;;  %1202 = vst [vmem:[#allocation5 + $0x50] sm:$0xff] %v994_v37  ;;  %v1499_v15 = vadd.f32 %v3478_v23, %v994_v37 }
 0x164   :  { %v2168_v24 = vadd.f32 %v2120_v46, %v3447_v31  ;;  %v2125_v44 = vmul.f32 %v3418_v18, %v1978_v14  ;;  %v3979_v17 = vpop.f32.mrf.mxu0  ;;  %v2421_v49 = vpop.f32.mrf.mxu1  ;;  %v1979_v28 = vadd.f32 %v1931_v30, %v1881_v56  ;;  %1200 = vst [vmem:[#allocation5 + $0x40] sm:$0xff] %v986_v41  ;;  %v1497_v43 = vadd.f32 %v3481_v6, %v986_v41  ;;  %v4672_v56 = vld [vmem:[#allocation21_spill] sm:$0xff] }
 0x165   :  { %v2123_v33 = vmul.f32 %v3418_v18, %v1976_v7  ;;  %v1782_v36 = vmul.f32 %v3495_v42, %v1494_v57  ;;  %v1879_v20 = vmul.f32 %v3375_v47, %v1494_v57  ;;  %v1787_v23 = vmul.f32 %v3725_v35, %v1499_v15  ;;  %1203 = vst [vmem:[#allocation5 + $0x58] sm:$0xff] %v997_v2  ;;  %v4004_v35 = vpop.permute.xlu0 %1639  ;;  %v4674_v46 = vld [vmem:[#allocation17_spill] sm:$0xff] }
 0x166   :  { %2216 = vst [vmem:[%s4587_s7 + $0x8] sm:$0xff] %v2168_v24  ;;  %v2173_v31 = vadd.f32 %v2125_v44, %v3450_v32  ;;  %v802_v4 = vpop.f32.mrf.mxu0  ;;  %v1001_v16 = vpop.f32.mrf.mxu1  ;;  %v2126_v59 = vmul.f32 %v3418_v18, %v1979_v28  ;;  %v1884_v6 = vmul.f32 %v3375_v47, %v1499_v15  ;;  %v1785_v48 = vmul.f32 %v3591_v13, %v1497_v43 }
 0x167   :  { %v2171_v32 = vadd.f32 %v2123_v33, %v3472_v45  ;;  %v1830_v42 = vsub.f32 %v973_v62, %v1782_v36  ;;  %v1882_v21 = vmul.f32 %v3375_v47, %v1497_v43  ;;  %v1500_v51 = vadd.f32 %v4672_v56, %v997_v2  ;;  %v4015_v44 = vpop.permute.xlu1 %1634  ;;  %v4675_v43 = vld [vmem:[#allocation22_spill] sm:$0xff] }
 0x168   :  { %2221 = vst [vmem:[%s4587_s7 + $0x30] sm:$0xff] %v2173_v31  ;;  %v4002_v27 = vpop.f32.mrf.mxu0  ;;  %v2422_v11 = vpop.f32.mrf.mxu1  ;;  %v2174_v19 = vadd.f32 %v2126_v59, %v4673_v60  ;;  %v1835_v13 = vsub.f32 %v994_v37, %v1787_v23  ;;  %v1833_v61 = vsub.f32 %v986_v41, %v1785_v48  ;;  %v989_v14 = vadd.f32 %v988_v5, %v4674_v46  ;;  %v4677_v48 = vld [vmem:[#allocation20_spill] sm:$0xff]  ;;  %v4679_v46 = vld [vmem:[#allocation25_spill] sm:$0xff] }
 0x169   :  { %2219 = vst [vmem:[%s4587_s7 + $0x20] sm:$0xff] %v2171_v32  ;;  %v1929_v45 = vmul.f32 %v3395_v58, %v1830_v42  ;;  %v1788_v62 = vmul.f32 %v3880_v38, %v1500_v51  ;;  %v1885_v12 = vmul.f32 %v3375_v47, %v1500_v51  ;;  %v1010_v10 = vadd.f32 %v2421_v49, %v3893_v53 }
 0x16a   :  { %v805_v30 = vpop.f32.mrf.mxu0  ;;  %v1004_v24 = vpop.f32.mrf.mxu1  ;;  %2222 = vst [vmem:[%s4587_s7 + $0x38] sm:$0xff] %v2174_v19  ;;  %v1934_v37 = vmul.f32 %v3395_v58, %v1835_v13  ;;  %v1932_v41 = vmul.f32 %v3395_v58, %v1833_v61  ;;  %v4023_v5 = vadd.f32 %v1001_v16, %v3748_v26  ;;  %v4026_v57 = vadd.f32 %v2422_v11, %v3924_v54  ;;  %v4676_v26 = vld [vmem:[#allocation23_spill] sm:$0xff]  ;;  %v4678_v19 = vld [vmem:[#allocation24_spill] sm:$0xff] }
 0x16b   :  { %v1977_v38 = vadd.f32 %v1929_v45, %v1879_v20  ;;  %v1836_v7 = vsub.f32 %v997_v2, %v1788_v62  ;;  %1201 = vst [vmem:[#allocation5 + $0x48] sm:$0xff] %v989_v14  ;;  %v1498_v31 = vadd.f32 %v4675_v43, %v989_v14  ;;  %1206 = vst [vmem:[#allocation5 + $0x70] sm:$0xff] %v1010_v10  ;;  %v4034_v16 = vpop.permute.xlu0 %1649  ;;  %v4047_v60 = vpop.permute.xlu1 %1644 }
 0x16c   :  { %v4028_v53 = vpop.f32.mrf.mxu0  ;;  %v2425_v49 = vpop.f32.mrf.mxu1  ;;  %v1982_v28 = vadd.f32 %v1934_v37, %v1884_v6  ;;  %v1980_v15 = vadd.f32 %v1932_v41, %v1882_v21  ;;  %v1503_v4 = vadd.f32 %v4676_v26, %v1010_v10  ;;  %1204 = vst [vmem:[#allocation5 + $0x60] sm:$0xff] %v4023_v5  ;;  %1207 = vst [vmem:[#allocation5 + $0x78] sm:$0xff] %v4026_v57 }
 0x16d   :  { %v2124_v33 = vmul.f32 %v3418_v18, %v1977_v38  ;;  %v1935_v36 = vmul.f32 %v3395_v58, %v1836_v7  ;;  %v1786_v23 = vmul.f32 %v3771_v1, %v1498_v31  ;;  %v1883_v6 = vmul.f32 %v3375_v47, %v1498_v31 }
 0x16e   :  { %v810_v20 = vpop.f32.mrf.mxu0  ;;  %v1017_v2 = vpop.f32.mrf.mxu1  ;;  %v2129_v54 = vmul.f32 %v3418_v18, %v1982_v28  ;;  %v2127_v59 = vmul.f32 %v3418_v18, %v1980_v15  ;;  %v1791_v21 = vmul.f32 %v3915_v9, %v1503_v4  ;;  %v1888_v56 = vmul.f32 %v3375_v47, %v1503_v4 }
 0x16f   :  { %v2172_v32 = vadd.f32 %v2124_v33, %v4677_v48  ;;  %v1983_v42 = vadd.f32 %v1935_v36, %v1885_v12  ;;  %v1834_v61 = vsub.f32 %v989_v14, %v1786_v23  ;;  %v1501_v45 = vadd.f32 %v4679_v46, %v4023_v5  ;;  %v4680_v12 = vld [vmem:[#allocation26_spill] sm:$0xff]  ;;  %v4076_v36 = vpop.permute.xlu0 %1659 }
 0x170   :  { %v4045_v51 = vpop.f32.mrf.mxu0  ;;  %v2426_v11 = vpop.f32.mrf.mxu1  ;;  %v2177_v1 = vadd.f32 %v2129_v54, %v3522_v55  ;;  %v2175_v13 = vadd.f32 %v2127_v59, %v4678_v19  ;;  %v1839_v62 = vsub.f32 %v1010_v10, %v1791_v21  ;;  %v1504_v30 = vadd.f32 %v4680_v12, %v4026_v57  ;;  %v4684_v21 = vld [vmem:[#allocation28_spill] sm:$0xff] }
 0x171   :  { %2220 = vst [vmem:[%s4587_s7 + $0x28] sm:$0xff] %v2172_v32  ;;  %v2130_v9 = vmul.f32 %v3418_v18, %v1983_v42  ;;  %v4060_v37 = vadd.f32 %v1004_v24, %v3830_v52  ;;  %v1933_v14 = vmul.f32 %v3395_v58, %v1834_v61  ;;  %v1789_v10 = vmul.f32 %v3847_v8, %v1501_v45  ;;  %v4681_v52 = vld [vmem:[#allocation27_spill] sm:$0xff]  ;;  %v4089_v59 = vpop.permute.xlu1 %1654 }
 0x172   :  { %v813_v55 = vpop.f32.mrf.mxu0  ;;  %v1020_v41 = vpop.f32.mrf.mxu1  ;;  %2225 = vst [vmem:[%s4587_s7 + $0x50] sm:$0xff] %v2177_v1  ;;  %2223 = vst [vmem:[%s4587_s7 + $0x40] sm:$0xff] %v2175_v13  ;;  %v1886_v38 = vmul.f32 %v3375_v47, %v1501_v45  ;;  %v1026_v7 = vadd.f32 %v2425_v49, %v3979_v17  ;;  %v1938_v28 = vmul.f32 %v3395_v58, %v1839_v62  ;;  %v4685_v13 = vld [vmem:[#allocation32_spill] sm:$0xff] }
 0x173   :  { %v2178_v24 = vadd.f32 %v2130_v9, %v4681_v52  ;;  %v1792_v15 = vmul.f32 %v3948_v39, %v1504_v30  ;;  %v1889_v43 = vmul.f32 %v3375_v47, %v1504_v30  ;;  %v1981_v26 = vadd.f32 %v1933_v14, %v1883_v6  ;;  %1205 = vst [vmem:[#allocation5 + $0x68] sm:$0xff] %v4060_v37  ;;  %v4682_v6 = vld [vmem:[#allocation29_spill] sm:$0xff]  ;;  %v4109_v30 = vpop.permute.xlu0 %1669 }
 0x174   :  { %v816_v31 = vpop.f32.mrf.mxu0  ;;  %v2429_v33 = vpop.f32.mrf.mxu1  ;;  %v1837_v4 = vsub.f32 %v4023_v5, %v1789_v10  ;;  %v1986_v8 = vadd.f32 %v1938_v28, %v1888_v56  ;;  %v4084_v49 = vadd.f32 %v1017_v2, %v3938_v22  ;;  %v4087_v39 = vadd.f32 %v2426_v11, %v4002_v27  ;;  %1210 = vst [vmem:[#allocation5 + $0x90] sm:$0xff] %v1026_v7  ;;  %v4687_v10 = vld [vmem:[#allocation35_spill] sm:$0xff] }
 0x175   :  { %2226 = vst [vmem:[%s4587_s7 + $0x58] sm:$0xff] %v2178_v24  ;;  %v1840_v17 = vsub.f32 %v4026_v57, %v1792_v15  ;;  %v2128_v23 = vmul.f32 %v3418_v18, %v1981_v26  ;;  %v1502_v48 = vadd.f32 %v4682_v6, %v4060_v37  ;;  %v4683_v57 = vld [vmem:[#allocation30_spill] sm:$0xff]  ;;  %v4125_v28 = vadd.f32 %v1020_v41, %v3959_v25  ;;  %v4131_v26 = vpop.permute.xlu1 %1664 }
 0x176   :  { %v818_v20 = vpop.f32.mrf.mxu0  ;;  %v1033_v54 = vpop.f32.mrf.mxu1  ;;  %v1936_v5 = vmul.f32 %v3395_v58, %v1837_v4  ;;  %v1507_v22 = vadd.f32 %v4683_v57, %v1026_v7  ;;  %v2133_v2 = vmul.f32 %v3418_v18, %v1986_v8  ;;  %1208 = vst [vmem:[#allocation5 + $0x80] sm:$0xff] %v4084_v49  ;;  %1211 = vst [vmem:[#allocation5 + $0x98] sm:$0xff] %v4087_v39  ;;  %v4688_v4 = vld [vmem:[#allocation33_spill] sm:$0xff] }
 0x177   :  { %v1939_v27 = vmul.f32 %v3395_v58, %v1840_v17  ;;  %v2176_v56 = vadd.f32 %v2128_v23, %v4684_v21  ;;  %v1790_v1 = vmul.f32 %v3926_v50, %v1502_v48  ;;  %v1887_v19 = vmul.f32 %v3375_v47, %v1502_v48  ;;  %1209 = vst [vmem:[#allocation5 + $0x88] sm:$0xff] %v4125_v28 }
 0x178   :  { %v819_v32 = vpop.f32.mrf.mxu0  ;;  %v2430_v42 = vpop.f32.mrf.mxu1  ;;  %v1984_v11 = vadd.f32 %v1936_v5, %v1886_v38  ;;  %v2181_v61 = vadd.f32 %v2133_v2, %v4685_v13  ;;  %v1795_v45 = vmul.f32 %v3969_v63, %v1507_v22  ;;  %v1892_v9 = vmul.f32 %v3375_v47, %v1507_v22  ;;  %v4686_v63 = vld [vmem:[#allocation34_spill] sm:$0xff]  ;;  %v4689_v5 = vld [vmem:[#allocation36_spill] sm:$0xff] }
 0x179   :  { %v1987_v46 = vadd.f32 %v1939_v27, %v1889_v43  ;;  %2224 = vst [vmem:[%s4587_s7 + $0x48] sm:$0xff] %v2176_v56  ;;  %v1838_v55 = vsub.f32 %v4060_v37, %v1790_v1  ;;  %v1505_v14 = vadd.f32 %v4686_v63, %v4084_v49  ;;  %v1508_v38 = vadd.f32 %v4687_v10, %v4087_v39  ;;  %v4156_v56 = vpop.permute.xlu0 %1679  ;;  %v4690_v1 = vld [vmem:[#allocation38_spill] sm:$0xff] }
 0x17a   :  { %v821_v62 = vpop.f32.mrf.mxu0  ;;  %v4107_v12 = vpop.f32.mrf.mxu1  ;;  %v2131_v50 = vmul.f32 %v3418_v18, %v1984_v11  ;;  %2229 = vst [vmem:[%s4587_s7 + $0x70] sm:$0xff] %v2181_v61  ;;  %v1843_v24 = vsub.f32 %v1026_v7, %v1795_v45  ;;  %v4127_v15 = vadd.f32 %v2429_v33, %v816_v31  ;;  %v4152_v2 = vadd.f32 %v2430_v42, %v819_v32 }
 0x17b   :  { %v2134_v52 = vmul.f32 %v3418_v18, %v1987_v46  ;;  %v1937_v17 = vmul.f32 %v3395_v58, %v1838_v55  ;;  %v1793_v20 = vmul.f32 %v3940_v29, %v1505_v14  ;;  %v1890_v23 = vmul.f32 %v3375_v47, %v1505_v14  ;;  %v4168_v61 = vpop.permute.xlu1 %1674  ;;  %v4692_v46 = vld [vmem:[#allocation37_spill] sm:$0xff] }
 0x17c   :  { %v824_v43 = vpop.f32.mrf.mxu0  ;;  %v4129_v37 = vpop.f32.mrf.mxu1  ;;  %v2179_v8 = vadd.f32 %v2131_v50, %v4688_v4  ;;  %v1942_v25 = vmul.f32 %v3395_v58, %v1843_v24  ;;  %v1796_v41 = vmul.f32 %v4015_v44, %v1508_v38  ;;  %v1893_v31 = vmul.f32 %v3375_v47, %v1508_v38  ;;  %1214 = vst [vmem:[#allocation5 + $0xb0] sm:$0xff] %v4127_v15  ;;  %v4693_v24 = vld [vmem:[#allocation41_spill] sm:$0xff]  ;;  %v4694_v4 = vld [vmem:[#allocation42_spill] sm:$0xff] }
 0x17d   :  { %v2182_v7 = vadd.f32 %v2134_v52, %v4689_v5  ;;  %v1985_v48 = vadd.f32 %v1937_v17, %v1887_v19  ;;  %v1841_v57 = vsub.f32 %v4084_v49, %v1793_v20  ;;  %v4150_v44 = vadd.f32 %v1033_v54, %v4028_v53  ;;  %v4691_v53 = vld [vmem:[#allocation39_spill] sm:$0xff]  ;;  %1215 = vst [vmem:[#allocation5 + $0xb8] sm:$0xff] %v4152_v2 }
 0x17e   :  { %v826_v33 = vpop.f32.mrf.mxu0  ;;  %v1049_v6 = vpop.f32.mrf.mxu1  ;;  %2227 = vst [vmem:[%s4587_s7 + $0x60] sm:$0xff] %v2179_v8  ;;  %v1990_v29 = vadd.f32 %v1942_v25, %v1892_v9  ;;  %v1844_v22 = vsub.f32 %v4087_v39, %v1796_v41  ;;  %v1506_v19 = vadd.f32 %v4690_v1, %v4125_v28  ;;  %v1511_v39 = vadd.f32 %v4691_v53, %v4127_v15  ;;  %v4695_v41 = vld [vmem:[#allocation40_spill] sm:$0xff] }
 0x17f   :  { %2230 = vst [vmem:[%s4587_s7 + $0x78] sm:$0xff] %v2182_v7  ;;  %v2132_v11 = vmul.f32 %v3418_v18, %v1985_v48  ;;  %v1940_v49 = vmul.f32 %v3395_v58, %v1841_v57  ;;  %1212 = vst [vmem:[#allocation5 + $0xa0] sm:$0xff] %v4150_v44  ;;  %v1512_v8 = vadd.f32 %v4694_v4, %v4152_v2  ;;  %v4200_v25 = vpop.permute.xlu0 %1689 }
 0x180   :  { %v827_v27 = vpop.f32.mrf.mxu0  ;;  %v4154_v21 = vpop.f32.mrf.mxu1  ;;  %v2137_v54 = vmul.f32 %v3418_v18, %v1990_v29  ;;  %v1943_v32 = vmul.f32 %v3395_v58, %v1844_v22  ;;  %v1794_v62 = vmul.f32 %v3981_v0, %v1506_v19  ;;  %v1891_v50 = vmul.f32 %v3375_v47, %v1506_v19  ;;  %v4696_v29 = vld [vmem:[#allocation43_spill] sm:$0xff] }
 0x181   :  { %v2180_v45 = vadd.f32 %v2132_v11, %v4692_v46  ;;  %v1988_v9 = vadd.f32 %v1940_v49, %v1890_v23  ;;  %v1799_v14 = vmul.f32 %v4034_v16, %v1511_v39  ;;  %v1896_v10 = vmul.f32 %v3375_v47, %v1511_v39  ;;  %v4212_v11 = vpop.permute.xlu1 %1684  ;;  %v4697_v46 = vld [vmem:[#allocation46_spill] sm:$0xff] }
 0x182   :  { %v829_v42 = vpop.f32.mrf.mxu0  ;;  %v1052_v13 = vpop.f32.mrf.mxu1  ;;  %v2185_v55 = vadd.f32 %v2137_v54, %v3615_v40  ;;  %v1991_v63 = vadd.f32 %v1943_v32, %v1893_v31  ;;  %v1842_v40 = vsub.f32 %v4125_v28, %v1794_v62  ;;  %v1509_v16 = vadd.f32 %v4693_v24, %v4150_v44  ;;  %v1340_v32 = vld [vmem:[%s4583_s3 + $0x168] sm:$0xff]  ;;  %s2603_s3 = scalar_lea.vmem %s4513_s19, 6144 }
 0x183   :  { %2228 = vst [vmem:[%s4587_s7 + $0x68] sm:$0xff] %v2180_v45  ;;  %v2135_v0 = vmul.f32 %v3418_v18, %v1988_v9  ;;  %v1847_v20 = vsub.f32 %v4127_v15, %v1799_v14  ;;  %v4196_v23 = vadd.f32 %v4107_v12, %v4045_v51  ;;  %v4198_v5 = vadd.f32 %v1049_v6, %v824_v43  ;;  %p2604_p5 = scmp.ne.s32.totalorder %s4513_s19, %s2603_s3  ;;  %p2609_p7 = scmp.lt.s32.totalorder %s2603_s3, %s2603_s3 }
 0x184   :  { %v832_v38 = vpop.f32.mrf.mxu0  ;;  %v4178_v52 = vpop.f32.mrf.mxu1  ;;  %2233 = vst [vmem:[%s4587_s7 + $0x90] sm:$0xff] %v2185_v55  ;;  %v2138_v17 = vmul.f32 %v3418_v18, %v1991_v63  ;;  %v1941_v33 = vmul.f32 %v3395_v58, %v1842_v40  ;;  %v1797_v48 = vmul.f32 %v4004_v35, %v1509_v16  ;;  %v1894_v57 = vmul.f32 %v3375_v47, %v1509_v16  ;;  %v4699_v55 = vld [vmem:[#allocation44_spill] sm:$0xff] }
 0x185   :  { %v2183_v31 = vadd.f32 %v2135_v0, %v4695_v41  ;;  %v1946_v22 = vmul.f32 %v3395_v58, %v1847_v20  ;;  %v1800_v51 = vmul.f32 %v4089_v59, %v1512_v8  ;;  %v1897_v12 = vmul.f32 %v3375_v47, %v1512_v8  ;;  %1213 = vst [vmem:[#allocation5 + $0xa8] sm:$0xff] %v4196_v23  ;;  %v4700_v0 = vld [vmem:[#allocation45_spill] sm:$0xff]  ;;  %v4256_v20 = vpop.permute.xlu1 %1694  ;;  %v4702_v41 = vld [vmem:[#allocation54_spill] sm:$0xff]  ;;  %p2610_p8 = por %p2609_p7, %p2608_p6 }
 0x186   :  { %v834_v28 = vpop.f32.mrf.mxu0  ;;  %v1065_v7 = vpop.f32.mrf.mxu1  ;;  %v2186_v15 = vadd.f32 %v2138_v17, %v4696_v29  ;;  %v1989_v35 = vadd.f32 %v1941_v33, %v1891_v50  ;;  %v1845_v49 = vsub.f32 %v4150_v44, %v1797_v48  ;;  %v4222_v19 = vadd.f32 %v1052_v13, %v827_v27  ;;  %1216 = vst [vmem:[#allocation5 + $0xc0] sm:$0xff] %v4198_v5 }
 0x187   :  { %2231 = vst [vmem:[%s4587_s7 + $0x80] sm:$0xff] %v2183_v31  ;;  %v1994_v1 = vadd.f32 %v1946_v22, %v1896_v10  ;;  %v1848_v59 = vsub.f32 %v4152_v2, %v1800_v51  ;;  %v4225_v53 = vadd.f32 %v4129_v37, %v832_v38  ;;  %v1510_v2 = vadd.f32 %v4697_v46, %v4196_v23  ;;  %v4698_v37 = vld [vmem:[#allocation50_spill] sm:$0xff]  ;;  %v4242_v50 = vpop.permute.xlu0 %1699  ;;  %v4701_v28 = vld [vmem:[#allocation51_spill] sm:$0xff]  ;;  %v4703_v22 = vld [vmem:[#allocation48_spill] sm:$0xff]  ;;  %p2611_p9 = pnand %p2610_p8, %p2604_p5 }
 0x188   :  { %v835_v43 = vpop.f32.mrf.mxu0  ;;  %v4210_v6 = vpop.f32.mrf.mxu1  ;;  %2234 = vst [vmem:[%s4587_s7 + $0x98] sm:$0xff] %v2186_v15  ;;  %v2136_v44 = vmul.f32 %v3418_v18, %v1989_v35  ;;  %v1944_v42 = vmul.f32 %v3395_v58, %v1845_v49  ;;  %v1513_v27 = vadd.f32 %v4698_v37, %v4198_v5  ;;  %v4247_v38 = vmul.f32 %v3325_v3, %v1340_v32 }
 0x189   :  { %v2141_v13 = vmul.f32 %v3418_v18, %v1994_v1  ;;  %v1947_v45 = vmul.f32 %v3395_v58, %v1848_v59  ;;  %v1798_v10 = vmul.f32 %v4047_v60, %v1510_v2  ;;  %v1895_v16 = vmul.f32 %v3375_v47, %v1510_v2  ;;  %1217 = vst [vmem:[#allocation5 + $0xc8] sm:$0xff] %v4222_v19  ;;  %v4704_v1 = vld [vmem:[#allocation49_spill] sm:$0xff] }
 0x18a   :  { %v837_v39 = vpop.f32.mrf.mxu0  ;;  %v1068_v54 = vpop.f32.mrf.mxu1  ;;  %v2184_v63 = vadd.f32 %v2136_v44, %v4699_v55  ;;  %v1992_v14 = vadd.f32 %v1944_v42, %v1894_v57  ;;  %v1801_v4 = vmul.f32 %v4076_v36, %v1513_v27  ;;  %1218 = vst [vmem:[#allocation5 + $0xd0] sm:$0xff] %v4225_v53  ;;  %v1514_v36 = vadd.f32 %v4701_v28, %v4222_v19 }
 0x18b   :  { %v2189_v40 = vadd.f32 %v2141_v13, %v4700_v0  ;;  %v1995_v24 = vadd.f32 %v1947_v45, %v1897_v12  ;;  %v1846_v60 = vsub.f32 %v4196_v23, %v1798_v10  ;;  %v1515_v31 = vadd.f32 %v4702_v41, %v4225_v53  ;;  %v4287_v32 = vpop.permute.xlu0 %1709  ;;  %v4298_v13 = vpop.permute.xlu1 %1704 }
 0x18c   :  { %v840_v9 = vpop.f32.mrf.mxu0  ;;  %v4240_v62 = vpop.f32.mrf.mxu1  ;;  %2232 = vst [vmem:[%s4587_s7 + $0x88] sm:$0xff] %v2184_v63  ;;  %v2139_v3 = vmul.f32 %v3418_v18, %v1992_v14  ;;  %v1849_v48 = vsub.f32 %v4198_v5, %v1801_v4  ;;  %v1061_v57 = vadd.f32 %v4154_v21, %v835_v43  ;;  %v1898_v35 = vmul.f32 %v3375_v47, %v1513_v27  ;;  %v4706_v63 = vld [vmem:[#allocation59_spill] sm:$0xff] }
 0x18d   :  { %2237 = vst [vmem:[%s4587_s7 + $0xb0] sm:$0xff] %v2189_v40  ;;  %v2142_v33 = vmul.f32 %v3418_v18, %v1995_v24  ;;  %v4273_v29 = vadd.f32 %v1065_v7, %v840_v9  ;;  %v1945_v12 = vmul.f32 %v3395_v58, %v1846_v60  ;;  %v1802_v49 = vmul.f32 %v4131_v26, %v1514_v36  ;;  %v4707_v24 = vld [vmem:[#allocation52_spill] sm:$0xff]  ;;  %v4708_v60 = vld [vmem:[#allocation53_spill] sm:$0xff] }
 0x18e   :  { %v842_v8 = vpop.f32.mrf.mxu0  ;;  %v4254_v17 = vpop.f32.mrf.mxu1  ;;  %v2187_v51 = vadd.f32 %v2139_v3, %v4703_v22  ;;  %v1948_v39 = vmul.f32 %v3395_v58, %v1849_v48  ;;  %v1899_v5 = vmul.f32 %v3375_v47, %v1514_v36  ;;  %v1803_v21 = vmul.f32 %v4109_v30, %v1515_v31  ;;  %1219 = vst [vmem:[#allocation5 + $0xd8] sm:$0xff] %v1061_v57 }
 0x18f   :  { %v2190_v59 = vadd.f32 %v2142_v33, %v4704_v1  ;;  %v1993_v44 = vadd.f32 %v1945_v12, %v1895_v16  ;;  %v1850_v26 = vsub.f32 %v4222_v19, %v1802_v49  ;;  %v1900_v30 = vmul.f32 %v3375_v47, %v1515_v31  ;;  %v4705_v19 = vld [vmem:[#allocation55_spill] sm:$0xff]  ;;  %1220 = vst [vmem:[#allocation5 + $0xe0] sm:$0xff] %v4273_v29  ;;  %v4711_v1 = vld [vmem:[#allocation8_spill] sm:$0xff] }
 0x190   :  { %v843_v15 = vpop.f32.mrf.mxu0  ;;  %v4275_v23 = vpop.f32.mrf.mxu1  ;;  %2235 = vst [vmem:[%s4587_s7 + $0xa0] sm:$0xff] %v2187_v51  ;;  %v1996_v42 = vadd.f32 %v1948_v39, %v1898_v35  ;;  %v1851_v46 = vsub.f32 %v4225_v53, %v1803_v21  ;;  %v1516_v55 = vadd.f32 %v4705_v19, %v1061_v57  ;;  %v1517_v14 = vadd.f32 %v4706_v63, %v4273_v29  ;;  %v4710_v35 = vld [vmem:[#allocation10_spill] sm:$0xff]  ;;  %v4712_v21 = vld [vmem:[#allocation56_spill] sm:$0xff] }
 0x191   :  { %2238 = vst [vmem:[%s4587_s7 + $0xb8] sm:$0xff] %v2190_v59  ;;  %v1069_v2 = vadd.f32 %v1068_v54, %v843_v15  ;;  %v2140_v45 = vmul.f32 %v3418_v18, %v1993_v44  ;;  %v1949_v9 = vmul.f32 %v3395_v58, %v1850_v26 }
 0x192   :  { %v845_v7 = vpop.f32.mrf.mxu0  ;;  %v4285_v43 = vpop.f32.mrf.mxu1  ;;  %v2143_v53 = vmul.f32 %v3418_v18, %v1996_v42  ;;  %v1950_v54 = vmul.f32 %v3395_v58, %v1851_v46  ;;  %v1804_v8 = vmul.f32 %v4168_v61, %v1516_v55  ;;  %v1901_v3 = vmul.f32 %v3375_v47, %v1516_v55  ;;  %v4709_v61 = vld [vmem:[#allocation61_spill] sm:$0xff] }
 0x193   :  { %v2188_v16 = vadd.f32 %v2140_v45, %v4707_v24  ;;  %v1997_v4 = vadd.f32 %v1949_v9, %v1899_v5  ;;  %v1805_v41 = vmul.f32 %v4156_v56, %v1517_v14  ;;  %v1902_v31 = vmul.f32 %v3375_v47, %v1517_v14  ;;  %1221 = vst [vmem:[#allocation5 + $0xe8] sm:$0xff] %v1069_v2  ;;  %v4329_v5 = vpop.permute.xlu1 %1714  ;;  %v4713_v42 = vld [vmem:[#allocation57_spill] sm:$0xff] }
 0x194   :  { %v848_v37 = vpop.f32.mrf.mxu0  ;;  %v2445_v27 = vpop.f32.mrf.mxu1  ;;  %v2191_v28 = vadd.f32 %v2143_v53, %v4708_v60  ;;  %v1998_v36 = vadd.f32 %v1950_v54, %v1900_v30  ;;  %v1852_v15 = vsub.f32 %v1061_v57, %v1804_v8  ;;  %v1518_v22 = vadd.f32 %v4709_v61, %v1069_v2  ;;  %v4714_v30 = vld [vmem:[#allocation62_spill] sm:$0xff]  ;;  %v4715_v53 = vld [vmem:[#allocation63_spill] sm:$0xff]  ;;  %v4716_v24 = vld [vmem:[#allocation65_spill] sm:$0xff] }
 0x195   :  { %v4309_v10 = vadd.f32 %v4178_v52, %v848_v37  ;;  %v1720_v52 = vpop.permute.xlu0 %1719  ;;  %2236 = vst [vmem:[%s4587_s7 + $0xa8] sm:$0xff] %v2188_v16  ;;  %v2144_v48 = vmul.f32 %v3418_v18, %v1997_v4  ;;  %v1853_v12 = vsub.f32 %v4273_v29, %v1805_v41  ;;  %v1106_v49 = vadd.f32 %v2445_v27, %v4710_v35  ;;  %v4718_v61 = vld [vmem:[#allocation60_spill] sm:$0xff] }
 0x196   :  { %v850_v0 = vpop.f32.mrf.mxu0  ;;  %v1097_v40 = vpop.f32.mrf.mxu1  ;;  %2239 = vst [vmem:[%s4587_s7 + $0xc0] sm:$0xff] %v2191_v28  ;;  %v2145_v56 = vmul.f32 %v3418_v18, %v1998_v36  ;;  %v1951_v7 = vmul.f32 %v3395_v58, %v1852_v15  ;;  %v1806_v44 = vmul.f32 %v4212_v11, %v1518_v22  ;;  %v1903_v26 = vmul.f32 %v3375_v47, %v1518_v22  ;;  %v4717_v36 = vld [vmem:[#allocation58_spill] sm:$0xff] }
 0x197   :  { %v1098_v59 = vadd.f32 %v1097_v40, %v4711_v1  ;;  %v2192_v57 = vadd.f32 %v2144_v48, %v4712_v21  ;;  %1222 = vst [vmem:[#allocation5 + $0xf0] sm:$0xff] %v4309_v10  ;;  %v1952_v29 = vmul.f32 %v3395_v58, %v1853_v12  ;;  %v1519_v37 = vadd.f32 %v4714_v30, %v4309_v10  ;;  %v1725_v28 = vpop.permute.xlu1 %1724  ;;  %v4719_v12 = vld [vmem:[#allocation66_spill] sm:$0xff]  ;;  %v4720_v21 = vld [vmem:[#allocation11_spill] sm:$0xff]  ;;  %v4722_v30 = vld [vmem:[#allocation64_spill] sm:$0xff] }
 0x198   :  { %v851_v33 = vpop.f32.mrf.mxu0  ;;  %v2446_v51 = vpop.f32.mrf.mxu1  ;;  %v2193_v46 = vadd.f32 %v2145_v56, %v4713_v42  ;;  %v1999_v45 = vadd.f32 %v1951_v7, %v1901_v3  ;;  %v1854_v9 = vsub.f32 %v1069_v2, %v1806_v44  ;;  %1230 = vst [vmem:[#allocation5 + $0x130] sm:$0xff] %v1106_v49  ;;  %v1527_v54 = vadd.f32 %v4715_v53, %v1106_v49  ;;  %v4721_v7 = vld [vmem:[#allocation9_spill] sm:$0xff] }
 0x199   :  { %2240 = vst [vmem:[%s4587_s7 + $0xc8] sm:$0xff] %v2192_v57  ;;  %v4344_v11 = vadd.f32 %v4210_v6, %v851_v33  ;;  %v2000_v55 = vadd.f32 %v1952_v29, %v1902_v31  ;;  %v1807_v63 = vmul.f32 %v4200_v25, %v1519_v37  ;;  %v1904_v14 = vmul.f32 %v3375_v47, %v1519_v37  ;;  %v1730_v40 = vpop.permute.xlu0 %1729 }
 0x19a   :  { %v853_v39 = vpop.f32.mrf.mxu0  ;;  %v1100_v19 = vpop.f32.mrf.mxu1  ;;  %2241 = vst [vmem:[%s4587_s7 + $0xd0] sm:$0xff] %v2193_v46  ;;  %v2146_v2 = vmul.f32 %v3418_v18, %v1999_v45  ;;  %v1953_v6 = vmul.f32 %v3395_v58, %v1854_v9  ;;  %1228 = vst [vmem:[#allocation5 + $0x120] sm:$0xff] %v1098_v59  ;;  %v1525_v16 = vadd.f32 %v4716_v24, %v1098_v59 }
 0x19b   :  { %v2147_v4 = vmul.f32 %v3418_v18, %v2000_v55  ;;  %v1855_v8 = vsub.f32 %v4309_v10, %v1807_v63  ;;  %v1815_v3 = vmul.f32 %v1730_v40, %v1527_v54  ;;  %v1912_v25 = vmul.f32 %v3375_v47, %v1527_v54  ;;  %1223 = vst [vmem:[#allocation5 + $0xf8] sm:$0xff] %v4344_v11  ;;  %v4723_v54 = vld [vmem:[#allocation67_spill] sm:$0xff]  ;;  %v4724_v40 = vld [vmem:[#allocation70_spill] sm:$0xff] }
 0x19c   :  { %v856_v27 = vpop.f32.mrf.mxu0  ;;  %v2194_v41 = vadd.f32 %v2146_v2, %v4717_v36  ;;  %v2001_v31 = vadd.f32 %v1953_v6, %v1903_v26  ;;  %v1813_v33 = vmul.f32 %v1720_v52, %v1525_v16  ;;  %v1910_v48 = vmul.f32 %v3375_v47, %v1525_v16  ;;  %v2449_v15 = vpop.f32.mrf.mxu1 }
 0x19d   :  { %v2195_v22 = vadd.f32 %v2147_v4, %v4718_v61  ;;  %v1954_v56 = vmul.f32 %v3395_v58, %v1855_v8  ;;  %v1863_v10 = vsub.f32 %v1106_v49, %v1815_v3  ;;  %v1520_v35 = vadd.f32 %v4719_v12, %v4344_v11  ;;  %v4729_v12 = vld [vmem:[#allocation71_spill] sm:$0xff] }
 0x19e   :  { %v858_v0 = vpop.f32.mrf.mxu0  ;;  %2242 = vst [vmem:[%s4587_s7 + $0xd8] sm:$0xff] %v2194_v41  ;;  %v2148_v52 = vmul.f32 %v3418_v18, %v2001_v31  ;;  %v1861_v39 = vsub.f32 %v1098_v59, %v1813_v33  ;;  %v1109_v57 = vadd.f32 %v2446_v51, %v4720_v21  ;;  %v1101_v44 = vadd.f32 %v1100_v19, %v4721_v7  ;;  %v1113_v51 = vpop.f32.mrf.mxu1  ;;  %v4727_v33 = vld [vmem:[#allocation69_spill] sm:$0xff]  ;;  %v4730_v7 = vld [vmem:[#allocation12_spill] sm:$0xff] }
 0x19f   :  { %2243 = vst [vmem:[%s4587_s7 + $0xe0] sm:$0xff] %v2195_v22  ;;  %v2002_v49 = vadd.f32 %v1954_v56, %v1904_v14  ;;  %v1962_v26 = vmul.f32 %v3395_v58, %v1863_v10  ;;  %v1808_v42 = vmul.f32 %v4256_v20, %v1520_v35  ;;  %v1905_v46 = vmul.f32 %v3375_v47, %v1520_v35  ;;  %v2054_v20 = vld [vmem:[%s4584_s4 + $0x110] sm:$0xff]  ;;  %v1735_v14 = vpop.permute.xlu1 %1734  ;;  %v4728_v22 = vld [vmem:[#allocation73_spill] sm:$0xff] }
 0x1a0   :  { %v4358_v60 = vpop.f32.mrf.mxu0  ;;  %v2196_v37 = vadd.f32 %v2148_v52, %v4722_v30  ;;  %v1960_v59 = vmul.f32 %v3395_v58, %v1861_v39  ;;  %v1082_v55 = vadd.f32 %v4254_v17, %v856_v27  ;;  %1231 = vst [vmem:[#allocation5 + $0x138] sm:$0xff] %v1109_v57  ;;  %v1528_v0 = vadd.f32 %v4723_v54, %v1109_v57  ;;  %v1740_v17 = vpop.permute.xlu0 %1739  ;;  %v4726_v27 = vld [vmem:[#allocation68_spill] sm:$0xff] }
 0x1a1   :  { %v2149_v45 = vmul.f32 %v3418_v18, %v2002_v49  ;;  %v2010_v9 = vadd.f32 %v1962_v26, %v1912_v25  ;;  %v1856_v19 = vsub.f32 %v4344_v11, %v1808_v42  ;;  %1229 = vst [vmem:[#allocation5 + $0x128] sm:$0xff] %v1101_v44  ;;  %v1526_v2 = vadd.f32 %v4724_v40, %v1101_v44  ;;  %v4725_v11 = vld [vmem:[#allocation14_spill] sm:$0xff]  ;;  %v2450_v41 = vpop.f32.mrf.mxu1 }
 0x1a2   :  { %v861_v1 = vpop.f32.mrf.mxu0  ;;  %2244 = vst [vmem:[%s4587_s7 + $0xe8] sm:$0xff] %v2196_v37  ;;  %v2008_v53 = vadd.f32 %v1960_v59, %v1910_v48  ;;  %v1122_v6 = vadd.f32 %v2449_v15, %v4725_v11  ;;  %v1816_v25 = vmul.f32 %v1735_v14, %v1528_v0  ;;  %v4402_v31 = vmul.f32 %v3338_v34, %v2054_v20 }
 0x1a3   :  { %v2197_v24 = vadd.f32 %v2149_v45, %v4726_v27  ;;  %v2157_v16 = vmul.f32 %v3418_v18, %v2010_v9  ;;  %v1955_v4 = vmul.f32 %v3395_v58, %v1856_v19  ;;  %v1814_v36 = vmul.f32 %v1725_v28, %v1526_v2  ;;  %1224 = vst [vmem:[#allocation5 + $0x100] sm:$0xff] %v1082_v55  ;;  %v1116_v30 = vpop.f32.mrf.mxu1  ;;  %v1745_v37 = vpop.permute.xlu1 %1744  ;;  %v4733_v9 = vld [vmem:[#allocation15_spill] sm:$0xff] }
 0x1a4   :  { %v4379_v29 = vpop.f32.mrf.mxu0  ;;  %v2155_v3 = vmul.f32 %v3418_v18, %v2008_v53  ;;  %v1913_v61 = vmul.f32 %v3375_v47, %v1528_v0  ;;  %v1521_v56 = vadd.f32 %v4728_v22, %v1082_v55  ;;  %v1864_v28 = vsub.f32 %v1109_v57, %v1816_v25  ;;  %1234 = vst [vmem:[#allocation5 + $0x150] sm:$0xff] %v1122_v6  ;;  %v1750_v59 = vpop.permute.xlu0 %1749 }
 0x1a5   :  { %2245 = vst [vmem:[%s4587_s7 + $0xf0] sm:$0xff] %v2197_v24  ;;  %v2205_v48 = vadd.f32 %v2157_v16, %v4727_v33  ;;  %v2003_v15 = vadd.f32 %v1955_v4, %v1905_v46  ;;  %v1862_v1 = vsub.f32 %v1101_v44, %v1814_v36  ;;  %v1911_v39 = vmul.f32 %v3375_v47, %v1526_v2  ;;  %v4731_v44 = vld [vmem:[#allocation74_spill] sm:$0xff]  ;;  %v4735_v2 = vld [vmem:[#allocation13_spill] sm:$0xff]  ;;  %v2453_v27 = vpop.f32.mrf.mxu1 }
 0x1a6   :  { %v866_v63 = vpop.f32.mrf.mxu0  ;;  %v2203_v35 = vadd.f32 %v2155_v3, %v4729_v12  ;;  %v1809_v21 = vmul.f32 %v4242_v50, %v1521_v56  ;;  %v1114_v49 = vadd.f32 %v1113_v51, %v4730_v7  ;;  %v1963_v26 = vmul.f32 %v3395_v58, %v1864_v28  ;;  %v4732_v50 = vld [vmem:[#allocation72_spill] sm:$0xff]  ;;  %v4737_v36 = vld [vmem:[#allocation77_spill] sm:$0xff]  ;;  %v4738_v33 = vld [vmem:[#allocation78_spill] sm:$0xff] }
 0x1a7   :  { %2253 = vst [vmem:[%s4587_s7 + $0x130] sm:$0xff] %v2205_v48  ;;  %v2150_v52 = vmul.f32 %v3418_v18, %v2003_v15  ;;  %v1961_v57 = vmul.f32 %v3395_v58, %v1862_v1  ;;  %v1531_v42 = vadd.f32 %v4731_v44, %v1122_v6  ;;  %v1085_v46 = vadd.f32 %v4285_v43, %v4358_v60  ;;  %v4734_v43 = vld [vmem:[#allocation75_spill] sm:$0xff]  ;;  %v4736_v3 = vld [vmem:[#allocation76_spill] sm:$0xff] }
 0x1a8   :  { %v4398_v8 = vpop.f32.mrf.mxu0  ;;  %2251 = vst [vmem:[%s4587_s7 + $0x120] sm:$0xff] %v2203_v35  ;;  %v1857_v51 = vsub.f32 %v1082_v55, %v1809_v21  ;;  %v1125_v19 = vadd.f32 %v2450_v41, %v4733_v9  ;;  %v2011_v20 = vadd.f32 %v1963_v26, %v1913_v61  ;;  %v1906_v14 = vmul.f32 %v3375_v47, %v1521_v56  ;;  %v4739_v61 = vld [vmem:[#allocation79_spill] sm:$0xff]  ;;  %v4741_v44 = vld [vmem:[#allocation80_spill] sm:$0xff] }
 0x1a9   :  { %v2198_v45 = vadd.f32 %v2150_v52, %v4732_v50  ;;  %v2009_v63 = vadd.f32 %v1961_v57, %v1911_v39  ;;  %v1819_v53 = vmul.f32 %v1750_v59, %v1531_v42  ;;  %1232 = vst [vmem:[#allocation5 + $0x140] sm:$0xff] %v1114_v49  ;;  %v1529_v60 = vadd.f32 %v4734_v43, %v1114_v49  ;;  %v1129_v52 = vpop.f32.mrf.mxu1  ;;  %v4740_v39 = vld [vmem:[#allocation81_spill] sm:$0xff]  ;;  %v1760_v50 = vpop.permute.xlu0 %1759 }
 0x1aa   :  { %v869_v10 = vpop.f32.mrf.mxu0  ;;  %v1956_v54 = vmul.f32 %v3395_v58, %v1857_v51  ;;  %v2158_v0 = vmul.f32 %v3418_v18, %v2011_v20  ;;  %v1117_v11 = vadd.f32 %v1116_v30, %v4735_v2  ;;  %v1916_v16 = vmul.f32 %v3375_v47, %v1531_v42  ;;  %1225 = vst [vmem:[#allocation5 + $0x108] sm:$0xff] %v1085_v46  ;;  %v4742_v30 = vld [vmem:[#allocation31_spill] sm:$0xff]  ;;  %v4744_v20 = vld [vmem:[#allocation82_spill] sm:$0xff] }
 0x1ab   :  { %2246 = vst [vmem:[%s4587_s7 + $0xf8] sm:$0xff] %v2198_v45  ;;  %v2156_v55 = vmul.f32 %v3418_v18, %v2009_v63  ;;  %v1867_v40 = vsub.f32 %v1122_v6, %v1819_v53  ;;  %v1817_v4 = vmul.f32 %v1740_v17, %v1529_v60  ;;  %v1522_v25 = vadd.f32 %v4736_v3, %v1085_v46  ;;  %v1755_v6 = vpop.permute.xlu1 %1754  ;;  %v4746_v2 = vld [vmem:[#allocation83_spill] sm:$0xff] }
 0x1ac   :  { %v2004_v24 = vadd.f32 %v1956_v54, %v1906_v14  ;;  %1235 = vst [vmem:[#allocation5 + $0x158] sm:$0xff] %v1125_v19  ;;  %v2206_v41 = vadd.f32 %v2158_v0, %v4737_v36  ;;  %v1532_v22 = vadd.f32 %v4739_v61, %v1125_v19  ;;  %v1914_v12 = vmul.f32 %v3375_v47, %v1529_v60  ;;  %v4745_v54 = vld [vmem:[#allocation84_spill] sm:$0xff]  ;;  %v2454_v60 = vpop.f32.mrf.mxu1  ;;  %v4750_v61 = vld [vmem:[#allocation47_spill] sm:$0xff] }
 0x1ad   :  { %v2204_v48 = vadd.f32 %v2156_v55, %v4738_v33  ;;  %v1966_v15 = vmul.f32 %v3395_v58, %v1867_v40  ;;  %v1865_v10 = vsub.f32 %v1114_v49, %v1817_v4  ;;  %v1810_v17 = vmul.f32 %v4298_v13, %v1522_v25  ;;  %1233 = vst [vmem:[#allocation5 + $0x148] sm:$0xff] %v1117_v11  ;;  %v2066_v4 = vld [vmem:[%s4584_s4 + $0x170] sm:$0xff]  ;;  %v4748_v36 = vld [vmem:[#allocation88_spill] sm:$0xff]  ;;  %v1770_v33 = vpop.permute.xlu0 %1769 }
 0x1ae   :  { %v2151_v56 = vmul.f32 %v3418_v18, %v2004_v24  ;;  %2254 = vst [vmem:[%s4587_s7 + $0x138] sm:$0xff] %v2206_v41  ;;  %v1907_v28 = vmul.f32 %v3375_v47, %v1522_v25  ;;  %v1820_v1 = vmul.f32 %v1755_v6, %v1532_v22  ;;  %v1090_v13 = vadd.f32 %v4240_v62, %v4379_v29  ;;  %v1132_v6 = vpop.f32.mrf.mxu1 }
 0x1af   :  { %2252 = vst [vmem:[%s4587_s7 + $0x128] sm:$0xff] %v2204_v48  ;;  %v2014_v35 = vadd.f32 %v1966_v15, %v1916_v16  ;;  %v1964_v7 = vmul.f32 %v3395_v58, %v1865_v10  ;;  %v1858_v49 = vsub.f32 %v1085_v46, %v1810_v17  ;;  %v1530_v42 = vadd.f32 %v4741_v44, %v1117_v11  ;;  %v4743_v46 = vld [vmem:[#allocation16_spill] sm:$0xff]  ;;  %v4482_v3 = vpop.permute.xlu1 %1764 }
 0x1b0   :  { %v2199_v21 = vadd.f32 %v2151_v56, %v4740_v39  ;;  %v1868_v57 = vsub.f32 %v1125_v19, %v1820_v1  ;;  %v1138_v59 = vadd.f32 %v2453_v27, %v4742_v30  ;;  %v1130_v9 = vadd.f32 %v1129_v52, %v4743_v46  ;;  %1226 = vst [vmem:[#allocation5 + $0x110] sm:$0xff] %v1090_v13  ;;  %v4751_v56 = vld [vmem:[#allocation87_spill] sm:$0xff]  ;;  %v4752_v39 = vld [vmem:[#allocation89_spill] sm:$0xff]  ;;  %v2064_v30 = vld [vmem:[%s4584_s4 + $0x160] sm:$0xff] }
 0x1b1   :  { %v2161_v26 = vmul.f32 %v3418_v18, %v2014_v35  ;;  %v2012_v45 = vadd.f32 %v1964_v7, %v1914_v12  ;;  %v1957_v51 = vmul.f32 %v3395_v58, %v1858_v49  ;;  %v1917_v29 = vmul.f32 %v3375_v47, %v1532_v22 }
 0x1b2   :  { %2247 = vst [vmem:[%s4587_s7 + $0x100] sm:$0xff] %v2199_v21  ;;  %v1967_v19 = vmul.f32 %v3395_v58, %v1868_v57  ;;  %v1818_v63 = vmul.f32 %v1745_v37, %v1530_v42  ;;  %v1523_v43 = vadd.f32 %v4745_v54, %v1090_v13  ;;  %v1093_v40 = vadd.f32 %v4275_v23, %v4398_v8  ;;  %v4747_v23 = vld [vmem:[#allocation85_spill] sm:$0xff] }
 0x1b3   :  { %v2209_v62 = vadd.f32 %v2161_v26, %v4744_v20  ;;  %v2159_v14 = vmul.f32 %v3418_v18, %v2012_v45  ;;  %v2005_v53 = vadd.f32 %v1957_v51, %v1907_v28  ;;  %v1915_v24 = vmul.f32 %v3375_v47, %v1530_v42  ;;  %1238 = vst [vmem:[#allocation5 + $0x170] sm:$0xff] %v1138_v59  ;;  %v4754_v45 = vld [vmem:[#allocation90_spill] sm:$0xff] }
 0x1b4   :  { %v2015_v0 = vadd.f32 %v1967_v19, %v1917_v29  ;;  %v1866_v55 = vsub.f32 %v1117_v11, %v1818_v63  ;;  %v1811_v16 = vmul.f32 %v4287_v32, %v1523_v43  ;;  %v1535_v8 = vadd.f32 %v4747_v23, %v1138_v59  ;;  %1236 = vst [vmem:[#allocation5 + $0x160] sm:$0xff] %v1130_v9  ;;  %v4749_v32 = vld [vmem:[#allocation86_spill] sm:$0xff] }
 0x1b5   :  { %2257 = vst [vmem:[%s4587_s7 + $0x150] sm:$0xff] %v2209_v62  ;;  %v2207_v27 = vadd.f32 %v2159_v14, %v4746_v2  ;;  %v2152_v37 = vmul.f32 %v3418_v18, %v2005_v53  ;;  %v1533_v41 = vadd.f32 %v4748_v36, %v1130_v9  ;;  %v4493_v22 = vadd.f32 %v2454_v60, %v4750_v61  ;;  %v1775_v62 = vpop.permute.xlu1 %1774  ;;  %v2055_v53 = vld [vmem:[%s4584_s4 + $0x118] sm:$0xff] }
 0x1b6   :  { %v2162_v11 = vmul.f32 %v3418_v18, %v2015_v0  ;;  %v1965_v25 = vmul.f32 %v3395_v58, %v1866_v55  ;;  %v1859_v15 = vsub.f32 %v1090_v13, %v1811_v16  ;;  %v1823_v17 = vmul.f32 %v1770_v33, %v1535_v8  ;;  %1227 = vst [vmem:[#allocation5 + $0x118] sm:$0xff] %v1093_v40  ;;  %v4753_v13 = vld [vmem:[#allocation18_spill] sm:$0xff] }
 0x1b7   :  { %2255 = vst [vmem:[%s4587_s7 + $0x140] sm:$0xff] %v2207_v27  ;;  %v2200_v48 = vadd.f32 %v2152_v37, %v4749_v32  ;;  %v2115_v35 = vmul.f32 %v3338_v34, %v2066_v4  ;;  %v1908_v28 = vmul.f32 %v3375_v47, %v1523_v43  ;;  %v1821_v52 = vmul.f32 %v1760_v50, %v1533_v41 }
 0x1b8   :  { %v2210_v10 = vadd.f32 %v2162_v11, %v4751_v56  ;;  %v2013_v12 = vadd.f32 %v1965_v25, %v1915_v24  ;;  %v1958_v1 = vmul.f32 %v3395_v58, %v1859_v15  ;;  %v1524_v21 = vadd.f32 %v4752_v39, %v1093_v40  ;;  %1239 = vst [vmem:[#allocation5 + $0x178] sm:$0xff] %v4493_v22 }
 0x1b9   :  { %2248 = vst [vmem:[%s4587_s7 + $0x108] sm:$0xff] %v2200_v48  ;;  %v1871_v49 = vsub.f32 %v1138_v59, %v1823_v17  ;;  %v1133_v26 = vadd.f32 %v1132_v6, %v4753_v13  ;;  %v1920_v44 = vmul.f32 %v3375_v47, %v1535_v8  ;;  %v1869_v42 = vsub.f32 %v1130_v9, %v1821_v52  ;;  %v4755_v59 = vld [vmem:[#allocation91_spill] sm:$0xff] }
 0x1ba   :  { %2258 = vst [vmem:[%s4587_s7 + $0x158] sm:$0xff] %v2210_v10  ;;  %v2160_v7 = vmul.f32 %v3418_v18, %v2013_v12  ;;  %v2006_v57 = vadd.f32 %v1958_v1, %v1908_v28  ;;  %v1812_v50 = vmul.f32 %v4329_v5, %v1524_v21  ;;  %v1536_v20 = vadd.f32 %v4755_v59, %v4493_v22 }
 0x1bb   :  { %v1970_v46 = vmul.f32 %v3395_v58, %v1871_v49  ;;  %v1918_v29 = vmul.f32 %v3375_v47, %v1533_v41  ;;  %v1968_v5 = vmul.f32 %v3395_v58, %v1869_v42  ;;  %v2113_v14 = vmul.f32 %v3338_v34, %v2064_v30  ;;  %1237 = vst [vmem:[#allocation5 + $0x168] sm:$0xff] %v1133_v26 }
 0x1bc   :  { %v2208_v51 = vadd.f32 %v2160_v7, %v4754_v45  ;;  %v2153_v9 = vmul.f32 %v3418_v18, %v2006_v57  ;;  %v1860_v19 = vsub.f32 %v1093_v40, %v1812_v50  ;;  %v1824_v54 = vmul.f32 %v1775_v62, %v1536_v20 }
 0x1bd   :  { %v2018_v63 = vadd.f32 %v1970_v46, %v1920_v44  ;;  %v1534_v43 = vadd.f32 %v4247_v38, %v1133_v26  ;;  %v2016_v0 = vadd.f32 %v1968_v5, %v1918_v29  ;;  %v1909_v55 = vmul.f32 %v3375_v47, %v1524_v21 }
 0x1be   :  { %2256 = vst [vmem:[%s4587_s7 + $0x148] sm:$0xff] %v2208_v51  ;;  %v2201_v60 = vadd.f32 %v2153_v9, %v4402_v31  ;;  %v1959_v40 = vmul.f32 %v3395_v58, %v1860_v19 }
 0x1bf   :  { %2614 = shalt.err (!%p2611_p9)
}
 0x1c0   :  { %s2630_s28 = smov 128   ;;  %s2631_s29 = smov 8   ;;  %v2165_v38 = vmul.f32 %v3418_v18, %v2018_v63  ;;  %v1872_v31 = vsub.f32 %v4493_v22, %v1824_v54  ;;  %v1822_v2 = vmul.f32 %v4482_v3, %v1534_v43  ;;  %2249 = vst [vmem:[%s4587_s7 + $0x110] sm:$0xff] %v2201_v60  ;;  %v2163_v27 = vmul.f32 %v3418_v18, %v2016_v0  ;;  %v2067_v16 = vld [vmem:[%s4584_s4 + $0x178] sm:$0xff]  ;;  %v2065_v36 = vld [vmem:[%s4584_s4 + $0x168] sm:$0xff] }
 0x1c1   :  { %2274 = dma.vmem_to_hbm [thread:$0]  %s4513_s19, 6144, %s4586_s6, [#allocation3], %s2630_s28, %s2630_s28, %s2631_s29   ;;  %v2007_v37 = vadd.f32 %v1959_v40, %v1909_v55  ;;  %v2104_v24 = vmul.f32 %v3338_v34, %v2055_v53  ;;  %v1921_v11 = vmul.f32 %v3375_v47, %v1536_v20  ;;  %v2116_v33 = vmul.f32 %v3338_v34, %v2067_v16 }
 0x1c2   :  { %v2213_v4 = vadd.f32 %v2165_v38, %v2115_v35  ;;  %v1971_v25 = vmul.f32 %v3395_v58, %v1872_v31  ;;  %v1870_v23 = vsub.f32 %v1133_v26, %v1822_v2  ;;  %v2211_v3 = vadd.f32 %v2163_v27, %v2113_v14 }
 0x1c3   :  { %v2154_v8 = vmul.f32 %v3418_v18, %v2007_v37  ;;  %v1919_v32 = vmul.f32 %v3375_v47, %v1534_v43  ;;  %v2114_v6 = vmul.f32 %v3338_v34, %v2065_v36 }
 0x1c4   :  { %2261 = vst [vmem:[%s4587_s7 + $0x170] sm:$0xff] %v2213_v4  ;;  %v2019_v41 = vadd.f32 %v1971_v25, %v1921_v11  ;;  %v1969_v48 = vmul.f32 %v3395_v58, %v1870_v23  ;;  %2259 = vst [vmem:[%s4587_s7 + $0x160] sm:$0xff] %v2211_v3 }
 0x1c5   :  { %v2202_v15 = vadd.f32 %v2154_v8, %v2104_v24 }
 0x1c6   :  { %v2166_v61 = vmul.f32 %v3418_v18, %v2019_v41  ;;  %v2017_v22 = vadd.f32 %v1969_v48, %v1919_v32 }
 0x1c7   :  { %2250 = vst [vmem:[%s4587_s7 + $0x118] sm:$0xff] %v2202_v15 }
 0x1c8   :  { %v2214_v56 = vadd.f32 %v2166_v61, %v2116_v33  ;;  %v2164_v10 = vmul.f32 %v3418_v18, %v2017_v22 }
 0x1ca   :  { %2262 = vst [vmem:[%s4587_s7 + $0x178] sm:$0xff] %v2214_v56  ;;  %v2212_v47 = vadd.f32 %v2164_v10, %v2114_v6 }
 0x1cc   :  { %2260 = vst [vmem:[%s4587_s7 + $0x168] sm:$0xff] %v2212_v47 }
 0x1cd   :  { %2625 = dma.done.wait [#allocation3], 6144  }
 0x1ce   :  { %2626 = vsyncadd [#allocation3], 4294961152 }
 0x1cf   :  { %2282 = vsyncpa [#allocation3], 1 }
 0x1d0   :  { %2283 = vsyncpa [#allocation4], 1 }

// kernel: noflayer_forward.4
= control target key start
LH: loop header
LB: loop body
LE: loop exit
PB: predicated region body
PF: predicated region fallthrough
CT: control target
= control target key end

     0   :  { %v4365_v0 = vmov 0   ;;  %v450_v49 = vlaneseq  ;;  %s9674_s0 = inlined_call_operand.vmem [shape: f32[384,1], index: 0, kind: input, shape index: {}]   ;;  %s9675_s1 = inlined_call_operand.vmem [shape: f32[1,384], index: 1, kind: input, shape index: {}]   ;;  %s9676_s2 = inlined_call_operand.vmem [shape: f32[384,384], index: 2, kind: input, shape index: {}]   ;;  %s9677_s3 = inlined_call_operand.vmem [shape: bf16[384,384], index: 3, kind: output, shape index: {0}]   ;;  %s9678_s4 = inlined_call_operand.vmem [shape: f32[384,1], index: 4, kind: output, shape index: {1}]  }
   0x1   :  { %3836 = vset.pattern.permute.xlu1 %v4365_v0  ;;  %3835 = vset.pattern.permute.xlu0 %v4365_v0  ;;  %v18_v1 = vld [vmem:[%s9674_s0 + $0x10] sm:$0xff]  ;;  %v16_v2 = vld [vmem:[%s9674_s0] sm:$0xff]  ;;  %v19_v3 = vld [vmem:[%s9674_s0 + $0x18] sm:$0xff] }
   0x2   :  { %221 = vperm.xlu1 %3836, %v18_v1   ;;  %211 = vperm.xlu0 %3835, %v16_v2   ;;  %v17_v4 = vld [vmem:[%s9674_s0 + $0x8] sm:$0xff]  ;;  %v20_v6 = vld [vmem:[%s9674_s0 + $0x20] sm:$0xff]  ;;  %v23_v7 = vld [vmem:[%s9674_s0 + $0x38] sm:$0xff]  ;;  %v451_v50 = vshrl.u32 %v450_v49, 7 }
   0x3   :  { %v21_v5 = vld [vmem:[%s9674_s0 + $0x28] sm:$0xff]  ;;  %v22_v8 = vld [vmem:[%s9674_s0 + $0x30] sm:$0xff]  ;;  %v24_v10 = vld [vmem:[%s9674_s0 + $0x40] sm:$0xff] }
   0x4   :  { %v25_v9 = vld [vmem:[%s9674_s0 + $0x48] sm:$0xff]  ;;  %v27_v11 = vld [vmem:[%s9674_s0 + $0x58] sm:$0xff]  ;;  %v26_v12 = vld [vmem:[%s9674_s0 + $0x50] sm:$0xff]  ;;  %v452_v51 = vsub.s32 0, %v451_v50  ;;  %v456_v52 = vsub.s32 1, %v451_v50  ;;  %v460_v54 = vsub.s32 2, %v451_v50 }
   0x5   :  { %v29_v13 = vld [vmem:[%s9674_s0 + $0x68] sm:$0xff]  ;;  %v28_v14 = vld [vmem:[%s9674_s0 + $0x60] sm:$0xff]  ;;  %v31_v15 = vld [vmem:[%s9674_s0 + $0x78] sm:$0xff] }
   0x6   :  { %226 = vperm.xlu1 %3836, %v19_v3   ;;  %216 = vperm.xlu0 %3835, %v17_v4   ;;  %v30_v16 = vld [vmem:[%s9674_s0 + $0x70] sm:$0xff]  ;;  %v33_v17 = vld [vmem:[%s9674_s0 + $0x88] sm:$0xff]  ;;  %v32_v18 = vld [vmem:[%s9674_s0 + $0x80] sm:$0xff] }
   0x7   :  { %v35_v19 = vld [vmem:[%s9674_s0 + $0x98] sm:$0xff]  ;;  %v34_v20 = vld [vmem:[%s9674_s0 + $0x90] sm:$0xff]  ;;  %v37_v21 = vld [vmem:[%s9674_s0 + $0xa8] sm:$0xff] }
   0x8   :  { %v36_v22 = vld [vmem:[%s9674_s0 + $0xa0] sm:$0xff]  ;;  %v39_v23 = vld [vmem:[%s9674_s0 + $0xb8] sm:$0xff]  ;;  %v38_v24 = vld [vmem:[%s9674_s0 + $0xb0] sm:$0xff] }
   0x9   :  { %v41_v25 = vld [vmem:[%s9674_s0 + $0xc8] sm:$0xff]  ;;  %v40_v26 = vld [vmem:[%s9674_s0 + $0xc0] sm:$0xff]  ;;  %v43_v27 = vld [vmem:[%s9674_s0 + $0xd8] sm:$0xff] }
   0xa   :  { %236 = vperm.xlu1 %3836, %v21_v5   ;;  %231 = vperm.xlu0 %3835, %v20_v6   ;;  %v42_v28 = vld [vmem:[%s9674_s0 + $0xd0] sm:$0xff]  ;;  %v45_v29 = vld [vmem:[%s9674_s0 + $0xe8] sm:$0xff]  ;;  %v44_v30 = vld [vmem:[%s9674_s0 + $0xe0] sm:$0xff] }
   0xb   :  { %v47_v31 = vld [vmem:[%s9674_s0 + $0xf8] sm:$0xff]  ;;  %v46_v32 = vld [vmem:[%s9674_s0 + $0xf0] sm:$0xff]  ;;  %v49_v33 = vld [vmem:[%s9674_s0 + $0x108] sm:$0xff] }
   0xc   :  { %v48_v34 = vld [vmem:[%s9674_s0 + $0x100] sm:$0xff]  ;;  %v51_v35 = vld [vmem:[%s9674_s0 + $0x118] sm:$0xff]  ;;  %v50_v36 = vld [vmem:[%s9674_s0 + $0x110] sm:$0xff] }
   0xd   :  { %v53_v37 = vld [vmem:[%s9674_s0 + $0x128] sm:$0xff]  ;;  %v52_v38 = vld [vmem:[%s9674_s0 + $0x120] sm:$0xff]  ;;  %v55_v39 = vld [vmem:[%s9674_s0 + $0x138] sm:$0xff] }
   0xe   :  { %246 = vperm.xlu1 %3836, %v23_v7   ;;  %241 = vperm.xlu0 %3835, %v22_v8   ;;  %v54_v40 = vld [vmem:[%s9674_s0 + $0x130] sm:$0xff]  ;;  %v57_v41 = vld [vmem:[%s9674_s0 + $0x148] sm:$0xff]  ;;  %v56_v42 = vld [vmem:[%s9674_s0 + $0x140] sm:$0xff] }
   0xf   :  { %v59_v43 = vld [vmem:[%s9674_s0 + $0x158] sm:$0xff]  ;;  %v58_v44 = vld [vmem:[%s9674_s0 + $0x150] sm:$0xff]  ;;  %v61_v45 = vld [vmem:[%s9674_s0 + $0x168] sm:$0xff] }
  0x10   :  { %v60_v46 = vld [vmem:[%s9674_s0 + $0x160] sm:$0xff]  ;;  %v63_v47 = vld [vmem:[%s9674_s0 + $0x178] sm:$0xff]  ;;  %v62_v48 = vld [vmem:[%s9674_s0 + $0x170] sm:$0xff] }
  0x11   :  { %v64_v53 = vld [vmem:[%s9675_s1] sm:$0x7]  ;;  %v66_v58 = vld [vmem:[%s9676_s2 + $0x8] sm:$0xff]  ;;  %v67_v60 = vld [vmem:[%s9676_s2 + $0x10] sm:$0xff] }
  0x12   :  { %256 = vperm.xlu1 %3836, %v25_v9   ;;  %251 = vperm.xlu0 %3835, %v24_v10   ;;  %v4538_v55 = vrot.slane %v64_v53, %v452_v51  ;;  %v4540_v56 = vrot.slane %v64_v53, %v456_v52  ;;  %v65_v57 = vld [vmem:[%s9676_s2] sm:$0xff]  ;;  %v4548_v59 = vrot.slane %v64_v53, %v460_v54  ;;  %v4556_v61 = vld [vmem:[%s9676_s2 + $0x30] sm:$0xff]  ;;  %v4561_v62 = vld [vmem:[%s9676_s2 + $0x38] sm:$0xff]  ;;  %vm1042_vm1 = vcmp.ne.f32.partialorder %v66_v58, 0.0 }
  0x13   :  { %vm1041_vm0 = vcmp.ne.f32.partialorder %v65_v57, 0.0  ;;  %v4566_v1 = vld [vmem:[%s9676_s2 + $0x40] sm:$0xff]  ;;  %vm1043_vm2 = vcmp.ne.f32.partialorder %v67_v60, 0.0  ;;  %vm1047_vm3 = vcmp.ne.f32.partialorder %v4556_v61, 0.0  ;;  %vm1048_vm4 = vcmp.ne.f32.partialorder %v4561_v62, 0.0  ;;  %v4578_v7 = vld [vmem:[%s9676_s2 + $0x18] sm:$0xff] }
  0x14   :  { %vm1049_vm7 = vcmp.ne.f32.partialorder %v4566_v1, 0.0  ;;  %v4585_v10 = vld [vmem:[%s9676_s2 + $0x20] sm:$0xff]  ;;  %vm1044_vm11 = vcmp.ne.f32.partialorder %v4578_v7, 0.0  ;;  %v4693_v57 = vld [vmem:[%s9676_s2 + $0x68] sm:$0xff]  ;;  %v4698_v58 = vld [vmem:[%s9676_s2 + $0x70] sm:$0xff] }
  0x15   :  { %vm1045_vm12 = vcmp.ne.f32.partialorder %v4585_v10, 0.0 }
  0x16   :  { %266 = vperm.xlu1 %3836, %v27_v11   ;;  %261 = vperm.xlu0 %3835, %v26_v12   ;;  %v4590_v11 = vld [vmem:[%s9676_s2 + $0x28] sm:$0xff] }
  0x17   :  { %vm1046_vm13 = vcmp.ne.f32.partialorder %v4590_v11, 0.0  ;;  %v4781_v11 = vld [vmem:[%s9676_s2 + $0x90] sm:$0xff] }
  0x1a   :  { %276 = vperm.xlu1 %3836, %v29_v13   ;;  %271 = vperm.xlu0 %3835, %v28_v14  }
  0x1e   :  { %286 = vperm.xlu1 %3836, %v31_v15   ;;  %281 = vperm.xlu0 %3835, %v30_v16  }
  0x22   :  { %296 = vperm.xlu1 %3836, %v33_v17   ;;  %291 = vperm.xlu0 %3835, %v32_v18  }
  0x26   :  { %306 = vperm.xlu1 %3836, %v35_v19   ;;  %301 = vperm.xlu0 %3835, %v34_v20  }
  0x2a   :  { %316 = vperm.xlu1 %3836, %v37_v21   ;;  %311 = vperm.xlu0 %3835, %v36_v22  }
  0x2e   :  { %326 = vperm.xlu1 %3836, %v39_v23   ;;  %321 = vperm.xlu0 %3835, %v38_v24  }
  0x32   :  { %336 = vperm.xlu1 %3836, %v41_v25   ;;  %331 = vperm.xlu0 %3835, %v40_v26  }
  0x36   :  { %346 = vperm.xlu1 %3836, %v43_v27   ;;  %341 = vperm.xlu0 %3835, %v42_v28  }
  0x3a   :  { %356 = vperm.xlu1 %3836, %v45_v29   ;;  %351 = vperm.xlu0 %3835, %v44_v30  }
  0x3e   :  { %366 = vperm.xlu1 %3836, %v47_v31   ;;  %361 = vperm.xlu0 %3835, %v46_v32  }
  0x42   :  { %376 = vperm.xlu1 %3836, %v49_v33   ;;  %371 = vperm.xlu0 %3835, %v48_v34  }
  0x46   :  { %386 = vperm.xlu1 %3836, %v51_v35   ;;  %381 = vperm.xlu0 %3835, %v50_v36   ;;  %v4637_v36 = vld [vmem:[%s9676_s2 + $0x48] sm:$0xff] }
  0x4a   :  { %396 = vperm.xlu1 %3836, %v53_v37   ;;  %391 = vperm.xlu0 %3835, %v52_v38   ;;  %v4642_v37 = vld [vmem:[%s9676_s2 + $0x50] sm:$0xff]  ;;  %v4647_v38 = vld [vmem:[%s9676_s2 + $0x58] sm:$0xff] }
  0x4e   :  { %406 = vperm.xlu1 %3836, %v55_v39   ;;  %401 = vperm.xlu0 %3835, %v54_v40  }
  0x52   :  { %416 = vperm.xlu1 %3836, %v57_v41   ;;  %411 = vperm.xlu0 %3835, %v56_v42  }
  0x56   :  { %426 = vperm.xlu1 %3836, %v59_v43   ;;  %421 = vperm.xlu0 %3835, %v58_v44  }
  0x5a   :  { %436 = vperm.xlu1 %3836, %v61_v45   ;;  %431 = vperm.xlu0 %3835, %v60_v46   ;;  %v4665_v46 = vld [vmem:[%s9676_s2 + $0x60] sm:$0xff] }
  0x5e   :  { %446 = vperm.xlu1 %3836, %v63_v47   ;;  %441 = vperm.xlu0 %3835, %v62_v48  }
  0x7d   :  { %v222_v63 = vpop.permute.xlu1 %221  ;;  %v212_v0 = vpop.permute.xlu0 %211 }
  0x7e   :  { %v471_v2 = vadd.f32 %v4538_v55, %v222_v63  ;;  %v472_v3 = vadd.f32 %v4540_v56, %v222_v63  ;;  %v465_v4 = vadd.f32 %v4538_v55, %v212_v0  ;;  %v466_v5 = vadd.f32 %v4540_v56, %v212_v0 }
  0x7f   :  { %v467_v6 = vadd.f32 %v4548_v59, %v212_v0  ;;  %v473_v8 = vadd.f32 %v4548_v59, %v222_v63 }
  0x80   :  { %vm609_vm5 = vcmp.gt.f32.partialorder %v465_v4, 0.0  ;;  %v753_v9 = vmul.f32 0.2, %v465_v4  ;;  %vm615_vm6 = vcmp.gt.f32.partialorder %v471_v2, 0.0  ;;  %vm610_vm8 = vcmp.gt.f32.partialorder %v466_v5, 0.0 }
  0x81   :  { %v227_v12 = vpop.permute.xlu1 %226  ;;  %v217_v13 = vpop.permute.xlu0 %216  ;;  %vm611_vm9 = vcmp.gt.f32.partialorder %v467_v6, 0.0  ;;  %v754_v14 = vmul.f32 0.2, %v466_v5  ;;  %v755_v15 = vmul.f32 0.2, %v467_v6  ;;  %vm616_vm10 = vcmp.gt.f32.partialorder %v472_v3, 0.0 }
  0x82   :  { %v4593_v16 = vadd.f32 %v4538_v55, %v227_v12  ;;  %v4596_v17 = vadd.f32 %v4540_v56, %v227_v12  ;;  %v4599_v18 = vadd.f32 %v4548_v59, %v227_v12  ;;  %v4602_v19 = vadd.f32 %v4538_v55, %v217_v13 }
  0x83   :  { %v4605_v20 = vadd.f32 %v4540_v56, %v217_v13  ;;  %v897_v21 = vsel %vm609_vm5, %v465_v4, %v753_v9  ;;  %v898_v22 = vsel %vm610_vm8, %v466_v5, %v754_v14  ;;  %v4609_v23 = vadd.f32 %v4548_v59, %v217_v13  ;;  %v4740_v14 = vld [vmem:[%s9676_s2 + $0x78] sm:$0xff] }
  0x84   :  { %v899_v24 = vsel %vm611_vm9, %v467_v6, %v755_v15  ;;  %v4612_v25 = vsel %vm1041_vm0, %v897_v21, -1e+30  ;;  %v4615_v26 = vsel %vm1042_vm1, %v898_v22, -1e+30  ;;  %vm617_vm14 = vcmp.gt.f32.partialorder %v473_v8, 0.0  ;;  %v4745_v15 = vld [vmem:[%s9676_s2 + $0x80] sm:$0xff] }
  0x85   :  { %v237_v27 = vpop.permute.xlu1 %236  ;;  %v232_v28 = vpop.permute.xlu0 %231  ;;  %v1329_v29 = vmax.f32 %v4612_v25, %v4615_v26  ;;  %v759_v30 = vmul.f32 0.2, %v471_v2  ;;  %v760_v31 = vmul.f32 0.2, %v472_v3  ;;  %v4632_v35 = vsel %vm1043_vm2, %v899_v24, -1e+30 }
  0x86   :  { %v4623_v32 = vadd.f32 %v4538_v55, %v237_v27  ;;  %v4626_v33 = vadd.f32 %v4540_v56, %v237_v27  ;;  %v4629_v34 = vadd.f32 %v4548_v59, %v237_v27  ;;  %v4650_v39 = vadd.f32 %v4538_v55, %v232_v28 }
  0x87   :  { %v4653_v40 = vadd.f32 %v4540_v56, %v232_v28  ;;  %v1330_v41 = vmax.f32 %v1329_v29, %v4632_v35  ;;  %v761_v42 = vmul.f32 0.2, %v473_v8  ;;  %v4657_v43 = vadd.f32 %v4548_v59, %v232_v28  ;;  %v4786_v28 = vld [vmem:[%s9676_s2 + $0x98] sm:$0xff] }
  0x88   :  { %v903_v44 = vsel %vm615_vm6, %v471_v2, %v759_v30  ;;  %v904_v45 = vsel %vm616_vm10, %v472_v3, %v760_v31  ;;  %vm612_vm15 = vcmp.gt.f32.partialorder %v4602_v19, 0.0  ;;  %vm613_vm0 = vcmp.gt.f32.partialorder %v4605_v20, 0.0 }
  0x89   :  { %1331 = vmax.xlane.f32.xlu0 %v1330_v41  ;;  %v247_v47 = vpop.permute.xlu1 %246  ;;  %v242_v48 = vpop.permute.xlu0 %241  ;;  %v905_v49 = vsel %vm617_vm14, %v473_v8, %v761_v42  ;;  %v4670_v50 = vsel %vm1047_vm3, %v903_v44, -1e+30  ;;  %v4674_v51 = vsel %vm1048_vm4, %v904_v45, -1e+30  ;;  %vm1050_vm1 = vcmp.ne.f32.partialorder %v4637_v36, 0.0  ;;  %v4804_v45 = vld [vmem:[%s9676_s2 + $0xa0] sm:$0xff] }
  0x8a   :  { %vm1051_vm2 = vcmp.ne.f32.partialorder %v4642_v37, 0.0  ;;  %vm1052_vm5 = vcmp.ne.f32.partialorder %v4647_v38, 0.0  ;;  %v4681_v52 = vadd.f32 %v4538_v55, %v247_v47  ;;  %v4684_v53 = vadd.f32 %v4540_v56, %v247_v47 }
  0x8b   :  { %v4687_v54 = vadd.f32 %v4548_v59, %v247_v47  ;;  %vm614_vm3 = vcmp.gt.f32.partialorder %v4609_v23, 0.0  ;;  %v4701_v60 = vadd.f32 %v4538_v55, %v242_v48  ;;  %v4704_v61 = vadd.f32 %v4540_v56, %v242_v48 }
  0x8c   :  { %v4708_v62 = vsel %vm1049_vm7, %v905_v49, -1e+30  ;;  %v1337_v63 = vmax.f32 %v4670_v50, %v4674_v51  ;;  %vm1053_vm4 = vcmp.ne.f32.partialorder %v4665_v46, 0.0  ;;  %v4714_v0 = vadd.f32 %v4548_v59, %v242_v48 }
  0x8d   :  { %v756_v2 = vmul.f32 0.2, %v4602_v19  ;;  %v757_v3 = vmul.f32 0.2, %v4605_v20  ;;  %v758_v4 = vmul.f32 0.2, %v4609_v23  ;;  %v257_v6 = vpop.permute.xlu1 %256  ;;  %v252_v1 = vpop.permute.xlu0 %251 }
  0x8e   :  { %v1338_v5 = vmax.f32 %v1337_v63, %v4708_v62  ;;  %vm618_vm6 = vcmp.gt.f32.partialorder %v4593_v16, 0.0  ;;  %vm619_vm7 = vcmp.gt.f32.partialorder %v4596_v17, 0.0  ;;  %vm620_vm8 = vcmp.gt.f32.partialorder %v4599_v18, 0.0 }
  0x8f   :  { %vm1054_vm9 = vcmp.ne.f32.partialorder %v4693_v57, 0.0  ;;  %vm1055_vm10 = vcmp.ne.f32.partialorder %v4698_v58, 0.0  ;;  %v900_v8 = vsel %vm612_vm15, %v4602_v19, %v756_v2  ;;  %v901_v9 = vsel %vm613_vm0, %v4605_v20, %v757_v3  ;;  %v4750_v19 = vld [vmem:[%s9676_s2 + $0x88] sm:$0xff] }
  0x90   :  { %v902_v12 = vsel %vm614_vm3, %v4609_v23, %v758_v4  ;;  %v4735_v13 = vadd.f32 %v4538_v55, %v257_v6  ;;  %1339 = vmax.xlane.f32.xlu0 %v1338_v5  ;;  %v4754_v20 = vsel %vm1044_vm11, %v900_v8, -1e+30  ;;  %v4758_v21 = vsel %vm1045_vm12, %v901_v9, -1e+30 }
  0x91   :  { %v4762_v22 = vsel %vm1046_vm13, %v902_v12, -1e+30  ;;  %v4765_v23 = vadd.f32 %v4540_v56, %v257_v6  ;;  %v1333_v24 = vmax.f32 %v4754_v20, %v4758_v21  ;;  %v4770_v27 = vadd.f32 %v4548_v59, %v257_v6  ;;  %v267_v42 = vpop.permute.xlu1 %266  ;;  %v262_v2 = vpop.permute.xlu0 %261 }
  0x92   :  { %v4773_v7 = vadd.f32 %v4538_v55, %v252_v1  ;;  %v4776_v10 = vadd.f32 %v4540_v56, %v252_v1  ;;  %v4789_v29 = vadd.f32 %v4548_v59, %v252_v1  ;;  %v762_v30 = vmul.f32 0.2, %v4593_v16 }
  0x93   :  { %v763_v31 = vmul.f32 0.2, %v4596_v17  ;;  %v764_v41 = vmul.f32 0.2, %v4599_v18  ;;  %vm1056_vm11 = vcmp.ne.f32.partialorder %v4740_v14, 0.0  ;;  %v1334_v44 = vmax.f32 %v1333_v24, %v4762_v22  ;;  %v4867_v24 = vld [vmem:[%s9676_s2 + $0xa8] sm:$0xff] }
  0x94   :  { %vm621_vm12 = vcmp.gt.f32.partialorder %v4650_v39, 0.0  ;;  %vm622_vm13 = vcmp.gt.f32.partialorder %v4653_v40, 0.0  ;;  %vm623_vm14 = vcmp.gt.f32.partialorder %v4657_v43, 0.0  ;;  %vm1057_vm15 = vcmp.ne.f32.partialorder %v4745_v15, 0.0 }
  0x95   :  { %vm1058_vm0 = vcmp.ne.f32.partialorder %v4750_v19, 0.0  ;;  %v906_v47 = vsel %vm618_vm6, %v4593_v16, %v762_v30  ;;  %v907_v48 = vsel %vm619_vm7, %v4596_v17, %v763_v31  ;;  %v908_v49 = vsel %vm620_vm8, %v4599_v18, %v764_v41  ;;  %1335 = vmax.xlane.f32.xlu1 %v1334_v44  ;;  %v4872_v30 = vld [vmem:[%s9676_s2 + $0xb0] sm:$0xff]  ;;  %v4904_v44 = vld [vmem:[%s9676_s2 + $0xc8] sm:$0xff] }
  0x96   :  { %v765_v63 = vmul.f32 0.2, %v4650_v39  ;;  %vm1059_vm3 = vcmp.ne.f32.partialorder %v4781_v11, 0.0  ;;  %v4819_v3 = vsel %vm1050_vm1, %v906_v47, -1e+30  ;;  %v4830_v18 = vadd.f32 %v4538_v55, %v267_v42  ;;  %v4909_v47 = vld [vmem:[%s9676_s2 + $0xd0] sm:$0xff] }
  0x97   :  { %v4823_v16 = vsel %vm1051_vm2, %v907_v48, -1e+30  ;;  %v4827_v17 = vsel %vm1052_vm5, %v908_v49, -1e+30  ;;  %vm1060_vm6 = vcmp.ne.f32.partialorder %v4786_v28, 0.0  ;;  %vm1061_vm1 = vcmp.ne.f32.partialorder %v4804_v45, 0.0 }
  0x98   :  { %v1341_v4 = vmax.f32 %v4819_v3, %v4823_v16  ;;  %v766_v36 = vmul.f32 0.2, %v4653_v40  ;;  %v767_v5 = vmul.f32 0.2, %v4657_v43  ;;  %v909_v37 = vsel %vm621_vm12, %v4650_v39, %v765_v63  ;;  %v4988_v28 = vld [vmem:[%s9676_s2 + $0xd8] sm:$0xff]  ;;  %v4998_v45 = vld [vmem:[%s9676_s2 + $0xe8] sm:$0xff] }
  0x99   :  { %v4843_v38 = vsel %vm1053_vm4, %v909_v37, -1e+30  ;;  %v4846_v6 = vadd.f32 %v4540_v56, %v267_v42  ;;  %v4849_v1 = vadd.f32 %v4548_v59, %v267_v42  ;;  %v4852_v8 = vadd.f32 %v4538_v55, %v262_v2  ;;  %v4894_v42 = vld [vmem:[%s9676_s2 + $0xc0] sm:$0xff] }
  0x9a   :  { %v1342_v9 = vmax.f32 %v1341_v4, %v4827_v17  ;;  %v910_v39 = vsel %vm622_vm13, %v4653_v40, %v766_v36  ;;  %v911_v46 = vsel %vm623_vm14, %v4657_v43, %v767_v5  ;;  %v4862_v12 = vadd.f32 %v4540_v56, %v262_v2  ;;  %v4877_v40 = vld [vmem:[%s9676_s2 + $0xb8] sm:$0xff]  ;;  %v277_v36 = vpop.permute.xlu1 %276 }
  0x9b   :  { %v4881_v43 = vsel %vm1054_vm9, %v910_v39, -1e+30  ;;  %v4885_v31 = vsel %vm1055_vm10, %v911_v46, -1e+30  ;;  %v4888_v41 = vadd.f32 %v4548_v59, %v262_v2  ;;  %vm624_vm2 = vcmp.gt.f32.partialorder %v4623_v32, 0.0  ;;  %v272_v46 = vpop.permute.xlu0 %271 }
  0x9c   :  { %1343 = vmax.xlane.f32.xlu0 %v1342_v9  ;;  %v1345_v57 = vmax.f32 %v4843_v38, %v4881_v43  ;;  %vm625_vm5 = vcmp.gt.f32.partialorder %v4626_v33, 0.0  ;;  %vm626_vm4 = vcmp.gt.f32.partialorder %v4629_v34, 0.0  ;;  %v768_v58 = vmul.f32 0.2, %v4623_v32 }
  0x9d   :  { %v769_v48 = vmul.f32 0.2, %v4626_v33  ;;  %v770_v49 = vmul.f32 0.2, %v4629_v34  ;;  %vm627_vm7 = vcmp.gt.f32.partialorder %v4701_v60, 0.0  ;;  %vm628_vm8 = vcmp.gt.f32.partialorder %v4704_v61, 0.0 }
  0x9e   :  { %vm1062_vm9 = vcmp.ne.f32.partialorder %v4867_v24, 0.0  ;;  %vm1063_vm10 = vcmp.ne.f32.partialorder %v4872_v30, 0.0  ;;  %v1346_v63 = vmax.f32 %v1345_v57, %v4885_v31  ;;  %v912_v2 = vsel %vm624_vm2, %v4623_v32, %v768_v58 }
  0x9f   :  { %vm629_vm12 = vcmp.gt.f32.partialorder %v4714_v0, 0.0  ;;  %v771_v4 = vmul.f32 0.2, %v4701_v60  ;;  %vm1064_vm13 = vcmp.ne.f32.partialorder %v4877_v40, 0.0  ;;  %v913_v5 = vsel %vm625_vm5, %v4626_v33, %v769_v48  ;;  %v282_v30 = vpop.permute.xlu0 %281 }
  0xa0   :  { %v914_v37 = vsel %vm626_vm4, %v4629_v34, %v770_v49  ;;  %v4932_v9 = vsel %vm1056_vm11, %v912_v2, -1e+30  ;;  %v772_v32 = vmul.f32 0.2, %v4704_v61  ;;  %vm1065_vm14 = vcmp.ne.f32.partialorder %v4894_v42, 0.0  ;;  %1347 = vmax.xlane.f32.xlu1 %v1346_v63 }
  0xa1   :  { %10144 = vst [vmem:[#allocation2_spill] sm:$0xff] %v4932_v9  ;;  %vm1066_vm2 = vcmp.ne.f32.partialorder %v4904_v44, 0.0  ;;  %v4939_v39 = vsel %vm1057_vm15, %v913_v5, -1e+30  ;;  %v4943_v33 = vsel %vm1058_vm0, %v914_v37, -1e+30  ;;  %v915_v14 = vsel %vm627_vm7, %v4701_v60, %v771_v4 }
  0xa2   :  { %10145 = vst [vmem:[#allocation3_spill] sm:$0xff] %v4939_v39  ;;  %10146 = vst [vmem:[#allocation4_spill] sm:$0xff] %v4943_v33  ;;  %v773_v34 = vmul.f32 0.2, %v4714_v0  ;;  %vm1067_vm11 = vcmp.ne.f32.partialorder %v4909_v47, 0.0  ;;  %v1349_v57 = vmax.f32 %v4932_v9, %v4939_v39  ;;  %v916_v15 = vsel %vm628_vm8, %v4704_v61, %v772_v32  ;;  %v4993_v4 = vld [vmem:[%s9676_s2 + $0xe0] sm:$0xff] }
  0xa3   :  { %v4957_v19 = vsel %vm1059_vm3, %v915_v14, -1e+30  ;;  %v4960_v58 = vadd.f32 %v4538_v55, %v277_v36  ;;  %v4967_v48 = vsel %vm1060_vm6, %v916_v15, -1e+30  ;;  %v4970_v49 = vadd.f32 %v4540_v56, %v277_v36  ;;  %v5011_v37 = vld [vmem:[%s9676_s2 + $0xf0] sm:$0xff]  ;;  %v5040_v39 = vld [vmem:[%s9676_s2 + $0x100] sm:$0xff] }
  0xa4   :  { %v917_v60 = vsel %vm629_vm12, %v4714_v0, %v773_v34  ;;  %10147 = vst [vmem:[#allocation5_spill] sm:$0xff] %v4967_v48  ;;  %v4973_v61 = vadd.f32 %v4548_v59, %v277_v36  ;;  %v1350_v11 = vmax.f32 %v1349_v57, %v4943_v33  ;;  %v1353_v2 = vmax.f32 %v4957_v19, %v4967_v48  ;;  %v5020_v57 = vld [vmem:[%s9676_s2 + $0xf8] sm:$0xff] }
  0xa5   :  { %v4978_v63 = vsel %vm1061_vm1, %v917_v60, -1e+30  ;;  %v4983_v0 = vadd.f32 %v4538_v55, %v272_v46  ;;  %v5001_v36 = vadd.f32 %v4540_v56, %v272_v46  ;;  %v5004_v5 = vadd.f32 %v4548_v59, %v272_v46  ;;  %v287_v46 = vpop.permute.xlu1 %286 }
  0xa6   :  { %10148 = vst [vmem:[#allocation6_spill] sm:$0xff] %v4978_v63  ;;  %vm630_vm15 = vcmp.gt.f32.partialorder %v4681_v52, 0.0  ;;  %vm631_vm0 = vcmp.gt.f32.partialorder %v4684_v53, 0.0  ;;  %1351 = vmax.xlane.f32.xlu0 %v1350_v11  ;;  %v1354_v32 = vmax.f32 %v1353_v2, %v4978_v63  ;;  %vm632_vm3 = vcmp.gt.f32.partialorder %v4687_v54, 0.0  ;;  %v292_v63 = vpop.permute.xlu0 %291 }
  0xa7   :  { %v774_v34 = vmul.f32 0.2, %v4681_v52  ;;  %v775_v14 = vmul.f32 0.2, %v4684_v53  ;;  %v776_v15 = vmul.f32 0.2, %v4687_v54  ;;  %v5091_v42 = vadd.f32 %v4540_v56, %v287_v46 }
  0xa8   :  { %vm633_vm6 = vcmp.gt.f32.partialorder %v4773_v7, 0.0  ;;  %vm634_vm1 = vcmp.gt.f32.partialorder %v4776_v10, 0.0  ;;  %vm635_vm5 = vcmp.gt.f32.partialorder %v4789_v29, 0.0  ;;  %vm1068_vm4 = vcmp.ne.f32.partialorder %v4988_v28, 0.0  ;;  %1355 = vmax.xlane.f32.xlu1 %v1354_v32 }
  0xa9   :  { %vm1069_vm7 = vcmp.ne.f32.partialorder %v4993_v4, 0.0  ;;  %vm1070_vm8 = vcmp.ne.f32.partialorder %v4998_v45, 0.0  ;;  %v918_v60 = vsel %vm630_vm15, %v4681_v52, %v774_v34  ;;  %v919_v11 = vsel %vm631_vm0, %v4684_v53, %v775_v14  ;;  %v297_v44 = vpop.permute.xlu1 %296 }
  0xaa   :  { %v777_v2 = vmul.f32 0.2, %v4773_v7  ;;  %v778_v33 = vmul.f32 0.2, %v4776_v10  ;;  %vm1071_vm12 = vcmp.ne.f32.partialorder %v5011_v37, 0.0  ;;  %v920_v32 = vsel %vm632_vm3, %v4687_v54, %v776_v15 }
  0xab   :  { %v5048_v52 = vsel %vm1062_vm9, %v918_v60, -1e+30  ;;  %v5052_v53 = vsel %vm1063_vm10, %v919_v11, -1e+30  ;;  %v779_v34 = vmul.f32 0.2, %v4789_v29  ;;  %v5080_v11 = vadd.f32 %v4538_v55, %v287_v46 }
  0xac   :  { %10149 = vst [vmem:[#allocation7_spill] sm:$0xff] %v5048_v52  ;;  %10150 = vst [vmem:[#allocation8_spill] sm:$0xff] %v5052_v53  ;;  %vm1072_vm15 = vcmp.ne.f32.partialorder %v5020_v57, 0.0  ;;  %v5058_v14 = vsel %vm1064_vm13, %v920_v32, -1e+30  ;;  %v1357_v9 = vmax.f32 %v5048_v52, %v5052_v53  ;;  %v921_v54 = vsel %vm633_vm6, %v4773_v7, %v777_v2 }
  0xad   :  { %10151 = vst [vmem:[#allocation9_spill] sm:$0xff] %v5058_v14  ;;  %v922_v24 = vsel %vm634_vm1, %v4776_v10, %v778_v33  ;;  %v923_v15 = vsel %vm635_vm5, %v4789_v29, %v779_v34  ;;  %v5073_v40 = vsel %vm1065_vm14, %v921_v54, -1e+30  ;;  %vm1073_vm9 = vcmp.ne.f32.partialorder %v5040_v39, 0.0  ;;  %v5096_v33 = vld [vmem:[%s9676_s2 + $0x108] sm:$0xff]  ;;  %v5118_v54 = vld [vmem:[%s9676_s2 + $0x118] sm:$0xff] }
  0xae   :  { %10152 = vst [vmem:[#allocation10_spill] sm:$0xff] %v5073_v40  ;;  %v5077_v60 = vsel %vm1066_vm2, %v922_v24, -1e+30  ;;  %v1358_v7 = vmax.f32 %v1357_v9, %v5058_v14  ;;  %v5086_v10 = vsel %vm1067_vm11, %v923_v15, -1e+30  ;;  %v5101_v9 = vld [vmem:[%s9676_s2 + $0x110] sm:$0xff]  ;;  %v5104_v47 = vadd.f32 %v4548_v59, %v287_v46 }
  0xaf   :  { %10153 = vst [vmem:[#allocation11_spill] sm:$0xff] %v5077_v60  ;;  %10154 = vst [vmem:[#allocation12_spill] sm:$0xff] %v5086_v10  ;;  %v1361_v29 = vmax.f32 %v5073_v40, %v5077_v60  ;;  %v5107_v2 = vadd.f32 %v4538_v55, %v282_v30  ;;  %v5110_v32 = vadd.f32 %v4540_v56, %v282_v30  ;;  %vm636_vm10 = vcmp.gt.f32.partialorder %v4735_v13, 0.0  ;;  %v5127_v46 = vld [vmem:[%s9676_s2 + $0x120] sm:$0xff]  ;;  %v5137_v15 = vld [vmem:[%s9676_s2 + $0x130] sm:$0xff] }
  0xb0   :  { %v5113_v34 = vadd.f32 %v4548_v59, %v282_v30  ;;  %1359 = vmax.xlane.f32.xlu0 %v1358_v7  ;;  %vm637_vm13 = vcmp.gt.f32.partialorder %v4765_v23, 0.0  ;;  %vm638_vm14 = vcmp.gt.f32.partialorder %v4770_v27, 0.0  ;;  %v5132_v30 = vld [vmem:[%s9676_s2 + $0x128] sm:$0xff]  ;;  %v780_v7 = vmul.f32 0.2, %v4735_v13 }
  0xb1   :  { %v1362_v24 = vmax.f32 %v1361_v29, %v5086_v10  ;;  %v781_v29 = vmul.f32 0.2, %v4765_v23  ;;  %v782_v14 = vmul.f32 0.2, %v4770_v27  ;;  %v5143_v53 = vadd.f32 %v4538_v55, %v297_v44 }
  0xb2   :  { %vm1074_vm2 = vcmp.ne.f32.partialorder %v5096_v33, 0.0  ;;  %vm639_vm0 = vcmp.gt.f32.partialorder %v4852_v8, 0.0  ;;  %vm640_vm3 = vcmp.gt.f32.partialorder %v4862_v12, 0.0  ;;  %vm641_vm6 = vcmp.gt.f32.partialorder %v4888_v41, 0.0 }
  0xb3   :  { %1363 = vmax.xlane.f32.xlu1 %v1362_v24  ;;  %v783_v52 = vmul.f32 0.2, %v4852_v8  ;;  %vm1076_vm1 = vcmp.ne.f32.partialorder %v5118_v54, 0.0  ;;  %v924_v10 = vsel %vm636_vm10, %v4735_v13, %v780_v7  ;;  %v925_v60 = vsel %vm637_vm13, %v4765_v23, %v781_v29 }
  0xb4   :  { %v926_v24 = vsel %vm638_vm14, %v4770_v27, %v782_v14  ;;  %v784_v40 = vmul.f32 0.2, %v4862_v12  ;;  %vm1077_vm5 = vcmp.ne.f32.partialorder %v5127_v46, 0.0  ;;  %vm1078_vm11 = vcmp.ne.f32.partialorder %v5132_v30, 0.0 }
  0xb5   :  { %v5166_v48 = vsel %vm1068_vm4, %v924_v10, -1e+30  ;;  %v5170_v13 = vsel %vm1069_vm7, %v925_v60, -1e+30  ;;  %v5174_v23 = vsel %vm1070_vm8, %v926_v24, -1e+30  ;;  %v927_v27 = vsel %vm639_vm0, %v4852_v8, %v783_v52 }
  0xb6   :  { %10155 = vst [vmem:[#allocation13_spill] sm:$0xff] %v5166_v48  ;;  %10156 = vst [vmem:[#allocation14_spill] sm:$0xff] %v5170_v13  ;;  %vm1079_vm10 = vcmp.ne.f32.partialorder %v5137_v15, 0.0  ;;  %v1365_v14 = vmax.f32 %v5166_v48, %v5170_v13  ;;  %v785_v7 = vmul.f32 0.2, %v4888_v41  ;;  %v928_v28 = vsel %vm640_vm3, %v4862_v12, %v784_v40  ;;  %v5213_v40 = vld [vmem:[%s9676_s2 + $0x138] sm:$0xff] }
  0xb7   :  { %10157 = vst [vmem:[#allocation15_spill] sm:$0xff] %v5174_v23  ;;  %v5186_v4 = vsel %vm1071_vm12, %v927_v27, -1e+30  ;;  %v5190_v45 = vsel %vm1072_vm15, %v928_v28, -1e+30  ;;  %v5193_v8 = vadd.f32 %v4540_v56, %v297_v44  ;;  %v5196_v52 = vadd.f32 %v4548_v59, %v297_v44  ;;  %v5218_v44 = vld [vmem:[%s9676_s2 + $0x140] sm:$0xff] }
  0xb8   :  { %10158 = vst [vmem:[#allocation16_spill] sm:$0xff] %v5186_v4  ;;  %10159 = vst [vmem:[#allocation17_spill] sm:$0xff] %v5190_v45  ;;  %v5199_v60 = vadd.f32 %v4538_v55, %v292_v63  ;;  %v1366_v10 = vmax.f32 %v1365_v14, %v5174_v23  ;;  %v929_v12 = vsel %vm641_vm6, %v4888_v41, %v785_v7  ;;  %v5223_v41 = vld [vmem:[%s9676_s2 + $0x148] sm:$0xff]  ;;  %vm642_vm4 = vcmp.gt.f32.partialorder %v4830_v18, 0.0  ;;  %v5237_v27 = vld [vmem:[%s9676_s2 + $0x150] sm:$0xff] }
  0xb9   :  { %v1369_v37 = vmax.f32 %v5186_v4, %v5190_v45  ;;  %v5208_v57 = vadd.f32 %v4540_v56, %v292_v63  ;;  %v5227_v29 = vsel %vm1073_vm9, %v929_v12, -1e+30  ;;  %v5230_v24 = vadd.f32 %v4548_v59, %v292_v63  ;;  %v307_v63 = vpop.permute.xlu1 %306  ;;  %v5246_v28 = vld [vmem:[%s9676_s2 + $0x158] sm:$0xff]  ;;  %v5266_v48 = vld [vmem:[%s9676_s2 + $0x160] sm:$0xff] }
  0xba   :  { %10160 = vst [vmem:[#allocation18_spill] sm:$0xff] %v5227_v29  ;;  %vm643_vm7 = vcmp.gt.f32.partialorder %v4846_v6, 0.0  ;;  %1367 = vmax.xlane.f32.xlu0 %v1366_v10  ;;  %vm644_vm8 = vcmp.gt.f32.partialorder %v4849_v1, 0.0  ;;  %v786_v39 = vmul.f32 0.2, %v4830_v18  ;;  %vm645_vm12 = vcmp.gt.f32.partialorder %v4983_v0, 0.0 }
  0xbb   :  { %v1370_v14 = vmax.f32 %v1369_v37, %v5227_v29  ;;  %v787_v7 = vmul.f32 0.2, %v4846_v6  ;;  %v788_v12 = vmul.f32 0.2, %v4849_v1  ;;  %vm646_vm15 = vcmp.gt.f32.partialorder %v5001_v36, 0.0 }
  0xbc   :  { %vm647_vm9 = vcmp.gt.f32.partialorder %v5004_v5, 0.0  ;;  %vm1080_vm13 = vcmp.ne.f32.partialorder %v5213_v40, 0.0  ;;  %vm1081_vm14 = vcmp.ne.f32.partialorder %v5218_v44, 0.0  ;;  %vm1082_vm0 = vcmp.ne.f32.partialorder %v5223_v41, 0.0 }
  0xbd   :  { %1371 = vmax.xlane.f32.xlu1 %v1370_v14  ;;  %v930_v10 = vsel %vm642_vm4, %v4830_v18, %v786_v39  ;;  %v931_v37 = vsel %vm643_vm7, %v4846_v6, %v787_v7  ;;  %v789_v23 = vmul.f32 0.2, %v4983_v0  ;;  %v790_v13 = vmul.f32 0.2, %v5001_v36  ;;  %v317_v30 = vpop.permute.xlu1 %316 }
  0xbe   :  { %vm1083_vm3 = vcmp.ne.f32.partialorder %v5237_v27, 0.0  ;;  %v932_v14 = vsel %vm644_vm8, %v4849_v1, %v788_v12  ;;  %v5274_v18 = vsel %vm1074_vm2, %v930_v10, -1e+30  ;;  %vm10162_vm6 = vcmp.ne.f32.partialorder %v5101_v9, 0.0  ;;  %v302_v9 = vpop.permute.xlu0 %301 }
  0xbf   :  { %10161 = vst [vmem:[#allocation19_spill] sm:$0xff] %v5274_v18  ;;  %v5278_v6 = vsel %vm10162_vm6, %v931_v37, -1e+30  ;;  %v791_v39 = vmul.f32 0.2, %v5004_v5  ;;  %vm1084_vm4 = vcmp.ne.f32.partialorder %v5246_v28, 0.0  ;;  %v933_v1 = vsel %vm645_vm12, %v4983_v0, %v789_v23 }
  0xc0   :  { %10163 = vst [vmem:[#allocation20_spill] sm:$0xff] %v5278_v6  ;;  %v5284_v7 = vsel %vm1076_vm1, %v932_v14, -1e+30  ;;  %v1373_v29 = vmax.f32 %v5274_v18, %v5278_v6  ;;  %v934_v33 = vsel %vm646_vm15, %v5001_v36, %v790_v13  ;;  %v5299_v54 = vsel %vm1077_vm5, %v933_v1, -1e+30  ;;  %v5322_v13 = vld [vmem:[%s9676_s2 + $0x168] sm:$0xff] }
  0xc1   :  { %10164 = vst [vmem:[#allocation21_spill] sm:$0xff] %v5284_v7  ;;  %v935_v12 = vsel %vm647_vm9, %v5004_v5, %v791_v39  ;;  %10165 = vst [vmem:[#allocation22_spill] sm:$0xff] %v5299_v54  ;;  %v5303_v10 = vsel %vm1078_vm11, %v934_v33, -1e+30  ;;  %v5306_v37 = vadd.f32 %v4538_v55, %v307_v63  ;;  %vm1085_vm2 = vcmp.ne.f32.partialorder %v5266_v48, 0.0  ;;  %v5327_v23 = vld [vmem:[%s9676_s2 + $0x170] sm:$0xff] }
  0xc2   :  { %10166 = vst [vmem:[#allocation23_spill] sm:$0xff] %v5303_v10  ;;  %v1374_v0 = vmax.f32 %v1373_v29, %v5284_v7  ;;  %v5312_v36 = vsel %vm1079_vm10, %v935_v12, -1e+30  ;;  %v1377_v5 = vmax.f32 %v5299_v54, %v5303_v10  ;;  %v5317_v46 = vadd.f32 %v4540_v56, %v307_v63  ;;  %v5344_v1 = vld [vmem:[%s9676_s2 + $0x178] sm:$0xff]  ;;  %v5363_v12 = vld [vmem:[%s9676_s2 + $0x190] sm:$0xff]  ;;  %v312_v45 = vpop.permute.xlu0 %311 }
  0xc3   :  { %10167 = vst [vmem:[#allocation24_spill] sm:$0xff] %v5312_v36  ;;  %v5330_v15 = vadd.f32 %v4548_v59, %v307_v63  ;;  %v5333_v29 = vadd.f32 %v4538_v55, %v302_v9  ;;  %v5336_v14 = vadd.f32 %v4540_v56, %v302_v9  ;;  %v5339_v39 = vadd.f32 %v4548_v59, %v302_v9  ;;  %v5353_v63 = vld [vmem:[%s9676_s2 + $0x180] sm:$0xff]  ;;  %v5358_v9 = vld [vmem:[%s9676_s2 + $0x188] sm:$0xff] }
  0xc4   :  { %1375 = vmax.xlane.f32.xlu0 %v1374_v0  ;;  %v1378_v33 = vmax.f32 %v1377_v5, %v5312_v36  ;;  %vm648_vm11 = vcmp.gt.f32.partialorder %v4960_v58, 0.0  ;;  %vm649_vm1 = vcmp.gt.f32.partialorder %v4970_v49, 0.0  ;;  %vm650_vm5 = vcmp.gt.f32.partialorder %v4973_v61, 0.0 }
  0xc5   :  { %v792_v0 = vmul.f32 0.2, %v4960_v58  ;;  %v793_v5 = vmul.f32 0.2, %v4970_v49  ;;  %v794_v7 = vmul.f32 0.2, %v4973_v61  ;;  %v5369_v6 = vadd.f32 %v4538_v55, %v317_v30 }
  0xc6   :  { %vm1086_vm10 = vcmp.ne.f32.partialorder %v5322_v13, 0.0  ;;  %1379 = vmax.xlane.f32.xlu1 %v1378_v33  ;;  %vm651_vm8 = vcmp.gt.f32.partialorder %v5107_v2, 0.0  ;;  %vm652_vm12 = vcmp.gt.f32.partialorder %v5110_v32, 0.0  ;;  %vm653_vm15 = vcmp.gt.f32.partialorder %v5113_v34, 0.0 }
  0xc7   :  { %v795_v18 = vmul.f32 0.2, %v5107_v2  ;;  %vm1088_vm9 = vcmp.ne.f32.partialorder %v5344_v1, 0.0  ;;  %v936_v36 = vsel %vm648_vm11, %v4960_v58, %v792_v0  ;;  %v937_v10 = vsel %vm649_vm1, %v4970_v49, %v793_v5 }
  0xc8   :  { %v938_v33 = vsel %vm650_vm5, %v4973_v61, %v794_v7  ;;  %v796_v54 = vmul.f32 0.2, %v5110_v32  ;;  %vm1089_vm6 = vcmp.ne.f32.partialorder %v5353_v63, 0.0  ;;  %vm1090_vm7 = vcmp.ne.f32.partialorder %v5358_v9, 0.0 }
  0xc9   :  { %v5392_v4 = vsel %vm1080_vm13, %v936_v36, -1e+30  ;;  %v5396_v58 = vsel %vm1081_vm14, %v937_v10, -1e+30  ;;  %v5400_v49 = vsel %vm1082_vm0, %v938_v33, -1e+30  ;;  %v939_v61 = vsel %vm651_vm8, %v5107_v2, %v795_v18 }
  0xca   :  { %10168 = vst [vmem:[#allocation25_spill] sm:$0xff] %v5392_v4  ;;  %10169 = vst [vmem:[#allocation26_spill] sm:$0xff] %v5396_v58  ;;  %vm1091_vm11 = vcmp.ne.f32.partialorder %v5363_v12, 0.0  ;;  %v1381_v7 = vmax.f32 %v5392_v4, %v5396_v58  ;;  %v797_v0 = vmul.f32 0.2, %v5113_v34  ;;  %v940_v40 = vsel %vm652_vm12, %v5110_v32, %v796_v54  ;;  %v5439_v54 = vld [vmem:[%s9676_s2 + $0x198] sm:$0xff] }
  0xcb   :  { %10170 = vst [vmem:[#allocation27_spill] sm:$0xff] %v5400_v49  ;;  %v5412_v44 = vsel %vm1083_vm3, %v939_v61, -1e+30  ;;  %v5416_v41 = vsel %vm1084_vm4, %v940_v40, -1e+30  ;;  %v5419_v2 = vadd.f32 %v4540_v56, %v317_v30  ;;  %v5422_v18 = vadd.f32 %v4548_v59, %v317_v30  ;;  %v5444_v30 = vld [vmem:[%s9676_s2 + $0x1a0] sm:$0xff] }
  0xcc   :  { %10171 = vst [vmem:[#allocation28_spill] sm:$0xff] %v5412_v44  ;;  %10172 = vst [vmem:[#allocation29_spill] sm:$0xff] %v5416_v41  ;;  %v5425_v10 = vadd.f32 %v4538_v55, %v312_v45  ;;  %v1382_v36 = vmax.f32 %v1381_v7, %v5400_v49  ;;  %v941_v32 = vsel %vm653_vm15, %v5113_v34, %v797_v0  ;;  %v5449_v34 = vld [vmem:[%s9676_s2 + $0x1a8] sm:$0xff]  ;;  %vm654_vm13 = vcmp.gt.f32.partialorder %v5080_v11, 0.0  ;;  %v5463_v61 = vld [vmem:[%s9676_s2 + $0x1b0] sm:$0xff] }
  0xcd   :  { %v1385_v27 = vmax.f32 %v5412_v44, %v5416_v41  ;;  %v5434_v28 = vadd.f32 %v4540_v56, %v312_v45  ;;  %v5453_v5 = vsel %vm1085_vm2, %v941_v32, -1e+30  ;;  %v5456_v33 = vadd.f32 %v4548_v59, %v312_v45  ;;  %v327_v45 = vpop.permute.xlu1 %326  ;;  %v5472_v40 = vld [vmem:[%s9676_s2 + $0x1b8] sm:$0xff]  ;;  %v5492_v4 = vld [vmem:[%s9676_s2 + $0x1c0] sm:$0xff] }
  0xce   :  { %10173 = vst [vmem:[#allocation30_spill] sm:$0xff] %v5453_v5  ;;  %vm655_vm14 = vcmp.gt.f32.partialorder %v5091_v42, 0.0  ;;  %1383 = vmax.xlane.f32.xlu0 %v1382_v36  ;;  %vm656_vm0 = vcmp.gt.f32.partialorder %v5104_v47, 0.0  ;;  %v798_v48 = vmul.f32 0.2, %v5080_v11  ;;  %vm657_vm3 = vcmp.gt.f32.partialorder %v5199_v60, 0.0 }
  0xcf   :  { %v1386_v7 = vmax.f32 %v1385_v27, %v5453_v5  ;;  %v799_v0 = vmul.f32 0.2, %v5091_v42  ;;  %v800_v32 = vmul.f32 0.2, %v5104_v47  ;;  %vm658_vm4 = vcmp.gt.f32.partialorder %v5208_v57, 0.0 }
  0xd0   :  { %vm659_vm2 = vcmp.gt.f32.partialorder %v5230_v24, 0.0  ;;  %vm1092_vm1 = vcmp.ne.f32.partialorder %v5439_v54, 0.0  ;;  %vm1093_vm5 = vcmp.ne.f32.partialorder %v5444_v30, 0.0  ;;  %vm1094_vm8 = vcmp.ne.f32.partialorder %v5449_v34, 0.0 }
  0xd1   :  { %1387 = vmax.xlane.f32.xlu1 %v1386_v7  ;;  %v942_v36 = vsel %vm654_vm13, %v5080_v11, %v798_v48  ;;  %v943_v27 = vsel %vm655_vm14, %v5091_v42, %v799_v0  ;;  %v801_v49 = vmul.f32 0.2, %v5199_v60  ;;  %v802_v58 = vmul.f32 0.2, %v5208_v57  ;;  %v337_v9 = vpop.permute.xlu1 %336 }
  0xd2   :  { %vm1095_vm12 = vcmp.ne.f32.partialorder %v5463_v61, 0.0  ;;  %v944_v7 = vsel %vm656_vm0, %v5104_v47, %v800_v32  ;;  %v5500_v11 = vsel %vm1086_vm10, %v942_v36, -1e+30  ;;  %vm10175_vm15 = vcmp.ne.f32.partialorder %v5327_v23, 0.0  ;;  %v322_v23 = vpop.permute.xlu0 %321 }
  0xd3   :  { %10174 = vst [vmem:[#allocation31_spill] sm:$0xff] %v5500_v11  ;;  %v5504_v42 = vsel %vm10175_vm15, %v943_v27, -1e+30  ;;  %v803_v48 = vmul.f32 0.2, %v5230_v24  ;;  %vm1096_vm13 = vcmp.ne.f32.partialorder %v5472_v40, 0.0  ;;  %v945_v47 = vsel %vm657_vm3, %v5199_v60, %v801_v49 }
  0xd4   :  { %10176 = vst [vmem:[#allocation32_spill] sm:$0xff] %v5504_v42  ;;  %v5510_v0 = vsel %vm1088_vm9, %v944_v7, -1e+30  ;;  %v1389_v5 = vmax.f32 %v5500_v11, %v5504_v42  ;;  %v946_v13 = vsel %vm658_vm4, %v5208_v57, %v802_v58  ;;  %v5525_v1 = vsel %vm1089_vm6, %v945_v47, -1e+30  ;;  %v5548_v58 = vld [vmem:[%s9676_s2 + $0x1c8] sm:$0xff] }
  0xd5   :  { %10177 = vst [vmem:[#allocation33_spill] sm:$0xff] %v5510_v0  ;;  %v947_v32 = vsel %vm659_vm2, %v5230_v24, %v803_v48  ;;  %10178 = vst [vmem:[#allocation34_spill] sm:$0xff] %v5525_v1  ;;  %v5529_v36 = vsel %vm1090_vm7, %v946_v13, -1e+30  ;;  %v5532_v27 = vadd.f32 %v4538_v55, %v327_v45  ;;  %vm1097_vm10 = vcmp.ne.f32.partialorder %v5492_v4, 0.0  ;;  %v5553_v49 = vld [vmem:[%s9676_s2 + $0x1d0] sm:$0xff] }
  0xd6   :  { %10179 = vst [vmem:[#allocation35_spill] sm:$0xff] %v5529_v36  ;;  %v1390_v60 = vmax.f32 %v1389_v5, %v5510_v0  ;;  %v5538_v57 = vsel %vm1091_vm11, %v947_v32, -1e+30  ;;  %v1393_v24 = vmax.f32 %v5525_v1, %v5529_v36  ;;  %v5543_v63 = vadd.f32 %v4540_v56, %v327_v45  ;;  %v5570_v47 = vld [vmem:[%s9676_s2 + $0x1d8] sm:$0xff]  ;;  %v5589_v32 = vld [vmem:[%s9676_s2 + $0x1f0] sm:$0xff]  ;;  %v332_v41 = vpop.permute.xlu0 %331 }
  0xd7   :  { %10180 = vst [vmem:[#allocation36_spill] sm:$0xff] %v5538_v57  ;;  %v5556_v12 = vadd.f32 %v4548_v59, %v327_v45  ;;  %v5559_v5 = vadd.f32 %v4538_v55, %v322_v23  ;;  %v5562_v7 = vadd.f32 %v4540_v56, %v322_v23  ;;  %v5565_v48 = vadd.f32 %v4548_v59, %v322_v23  ;;  %v5579_v45 = vld [vmem:[%s9676_s2 + $0x1e0] sm:$0xff]  ;;  %v5584_v23 = vld [vmem:[%s9676_s2 + $0x1e8] sm:$0xff] }
  0xd8   :  { %1391 = vmax.xlane.f32.xlu0 %v1390_v60  ;;  %v1394_v13 = vmax.f32 %v1393_v24, %v5538_v57  ;;  %vm660_vm7 = vcmp.gt.f32.partialorder %v5143_v53, 0.0  ;;  %vm661_vm9 = vcmp.gt.f32.partialorder %v5193_v8, 0.0  ;;  %vm662_vm6 = vcmp.gt.f32.partialorder %v5196_v52, 0.0 }
  0xd9   :  { %v804_v60 = vmul.f32 0.2, %v5143_v53  ;;  %v805_v24 = vmul.f32 0.2, %v5193_v8  ;;  %v806_v0 = vmul.f32 0.2, %v5196_v52  ;;  %v5595_v42 = vadd.f32 %v4538_v55, %v337_v9 }
  0xda   :  { %vm1098_vm11 = vcmp.ne.f32.partialorder %v5548_v58, 0.0  ;;  %1395 = vmax.xlane.f32.xlu1 %v1394_v13  ;;  %vm663_vm0 = vcmp.gt.f32.partialorder %v5333_v29, 0.0  ;;  %vm664_vm3 = vcmp.gt.f32.partialorder %v5336_v14, 0.0  ;;  %vm665_vm4 = vcmp.gt.f32.partialorder %v5339_v39, 0.0 }
  0xdb   :  { %v807_v11 = vmul.f32 0.2, %v5333_v29  ;;  %vm1100_vm2 = vcmp.ne.f32.partialorder %v5570_v47, 0.0  ;;  %v948_v57 = vsel %vm660_vm7, %v5143_v53, %v804_v60  ;;  %v949_v36 = vsel %vm661_vm9, %v5193_v8, %v805_v24 }
  0xdc   :  { %v950_v13 = vsel %vm662_vm6, %v5196_v52, %v806_v0  ;;  %v808_v1 = vmul.f32 0.2, %v5336_v14  ;;  %vm1101_vm15 = vcmp.ne.f32.partialorder %v5579_v45, 0.0  ;;  %vm1102_vm14 = vcmp.ne.f32.partialorder %v5584_v23, 0.0 }
  0xdd   :  { %v5618_v44 = vsel %vm1092_vm1, %v948_v57, -1e+30  ;;  %v5622_v53 = vsel %vm1093_vm5, %v949_v36, -1e+30  ;;  %v5626_v8 = vsel %vm1094_vm8, %v950_v13, -1e+30  ;;  %v951_v52 = vsel %vm663_vm0, %v5333_v29, %v807_v11 }
  0xde   :  { %10181 = vst [vmem:[#allocation37_spill] sm:$0xff] %v5618_v44  ;;  %10182 = vst [vmem:[#allocation38_spill] sm:$0xff] %v5622_v53  ;;  %vm1103_vm7 = vcmp.ne.f32.partialorder %v5589_v32, 0.0  ;;  %v1397_v0 = vmax.f32 %v5618_v44, %v5622_v53  ;;  %v809_v60 = vmul.f32 0.2, %v5339_v39  ;;  %v952_v54 = vsel %vm664_vm3, %v5336_v14, %v808_v1  ;;  %v5665_v1 = vld [vmem:[%s9676_s2 + $0x1f8] sm:$0xff] }
  0xdf   :  { %10183 = vst [vmem:[#allocation39_spill] sm:$0xff] %v5626_v8  ;;  %v5638_v30 = vsel %vm1095_vm12, %v951_v52, -1e+30  ;;  %v5642_v34 = vsel %vm1096_vm13, %v952_v54, -1e+30  ;;  %v5645_v29 = vadd.f32 %v4540_v56, %v337_v9  ;;  %v5648_v11 = vadd.f32 %v4548_v59, %v337_v9  ;;  %v5670_v9 = vld [vmem:[%s9676_s2 + $0x200] sm:$0xff] }
  0xe0   :  { %10184 = vst [vmem:[#allocation40_spill] sm:$0xff] %v5638_v30  ;;  %10185 = vst [vmem:[#allocation41_spill] sm:$0xff] %v5642_v34  ;;  %v5651_v36 = vadd.f32 %v4538_v55, %v332_v41  ;;  %v1398_v57 = vmax.f32 %v1397_v0, %v5626_v8  ;;  %v953_v14 = vsel %vm665_vm4, %v5339_v39, %v809_v60  ;;  %v5675_v39 = vld [vmem:[%s9676_s2 + $0x208] sm:$0xff]  ;;  %vm666_vm1 = vcmp.gt.f32.partialorder %v5306_v37, 0.0  ;;  %v5689_v52 = vld [vmem:[%s9676_s2 + $0x210] sm:$0xff] }
  0xe1   :  { %v1401_v61 = vmax.f32 %v5638_v30, %v5642_v34  ;;  %v5660_v40 = vadd.f32 %v4540_v56, %v332_v41  ;;  %v5679_v24 = vsel %vm1097_vm10, %v953_v14, -1e+30  ;;  %v5682_v13 = vadd.f32 %v4548_v59, %v332_v41  ;;  %v347_v41 = vpop.permute.xlu1 %346  ;;  %v5698_v54 = vld [vmem:[%s9676_s2 + $0x218] sm:$0xff]  ;;  %v5718_v44 = vld [vmem:[%s9676_s2 + $0x220] sm:$0xff] }
  0xe2   :  { %10186 = vst [vmem:[#allocation42_spill] sm:$0xff] %v5679_v24  ;;  %vm667_vm5 = vcmp.gt.f32.partialorder %v5317_v46, 0.0  ;;  %1399 = vmax.xlane.f32.xlu0 %v1398_v57  ;;  %vm668_vm8 = vcmp.gt.f32.partialorder %v5330_v15, 0.0  ;;  %v810_v4 = vmul.f32 0.2, %v5306_v37  ;;  %vm669_vm12 = vcmp.gt.f32.partialorder %v5425_v10, 0.0 }
  0xe3   :  { %v1402_v0 = vmax.f32 %v1401_v61, %v5679_v24  ;;  %v811_v60 = vmul.f32 0.2, %v5317_v46  ;;  %v812_v14 = vmul.f32 0.2, %v5330_v15  ;;  %vm670_vm13 = vcmp.gt.f32.partialorder %v5434_v28, 0.0 }
  0xe4   :  { %vm671_vm10 = vcmp.gt.f32.partialorder %v5456_v33, 0.0  ;;  %vm1104_vm9 = vcmp.ne.f32.partialorder %v5665_v1, 0.0  ;;  %vm1105_vm6 = vcmp.ne.f32.partialorder %v5670_v9, 0.0  ;;  %vm1106_vm0 = vcmp.ne.f32.partialorder %v5675_v39, 0.0 }
  0xe5   :  { %1403 = vmax.xlane.f32.xlu1 %v1402_v0  ;;  %v954_v57 = vsel %vm666_vm1, %v5306_v37, %v810_v4  ;;  %v955_v61 = vsel %vm667_vm5, %v5317_v46, %v811_v60  ;;  %v813_v8 = vmul.f32 0.2, %v5425_v10  ;;  %v814_v53 = vmul.f32 0.2, %v5434_v28  ;;  %v357_v23 = vpop.permute.xlu1 %356 }
  0xe6   :  { %vm1107_vm3 = vcmp.ne.f32.partialorder %v5689_v52, 0.0  ;;  %v956_v0 = vsel %vm668_vm8, %v5330_v15, %v812_v14  ;;  %v5726_v37 = vsel %vm1098_vm11, %v954_v57, -1e+30  ;;  %vm10188_vm4 = vcmp.ne.f32.partialorder %v5553_v49, 0.0  ;;  %v342_v49 = vpop.permute.xlu0 %341 }
  0xe7   :  { %10187 = vst [vmem:[#allocation43_spill] sm:$0xff] %v5726_v37  ;;  %v5730_v46 = vsel %vm10188_vm4, %v955_v61, -1e+30  ;;  %v815_v4 = vmul.f32 0.2, %v5456_v33  ;;  %vm1108_vm1 = vcmp.ne.f32.partialorder %v5698_v54, 0.0  ;;  %v957_v15 = vsel %vm669_vm12, %v5425_v10, %v813_v8 }
  0xe8   :  { %10189 = vst [vmem:[#allocation44_spill] sm:$0xff] %v5730_v46  ;;  %v5736_v60 = vsel %vm1100_vm2, %v956_v0, -1e+30  ;;  %v1405_v24 = vmax.f32 %v5726_v37, %v5730_v46  ;;  %v958_v58 = vsel %vm670_vm13, %v5434_v28, %v814_v53  ;;  %v5751_v47 = vsel %vm1101_vm15, %v957_v15, -1e+30  ;;  %v5774_v53 = vld [vmem:[%s9676_s2 + $0x228] sm:$0xff] }
  0xe9   :  { %10190 = vst [vmem:[#allocation45_spill] sm:$0xff] %v5736_v60  ;;  %v959_v14 = vsel %vm671_vm10, %v5456_v33, %v815_v4  ;;  %10191 = vst [vmem:[#allocation46_spill] sm:$0xff] %v5751_v47  ;;  %v5755_v57 = vsel %vm1102_vm14, %v958_v58, -1e+30  ;;  %v5758_v61 = vadd.f32 %v4538_v55, %v347_v41  ;;  %vm1109_vm11 = vcmp.ne.f32.partialorder %v5718_v44, 0.0  ;;  %v5779_v8 = vld [vmem:[%s9676_s2 + $0x230] sm:$0xff] }
  0xea   :  { %10192 = vst [vmem:[#allocation47_spill] sm:$0xff] %v5755_v57  ;;  %v1406_v10 = vmax.f32 %v1405_v24, %v5736_v60  ;;  %v5764_v28 = vsel %vm1103_vm7, %v959_v14, -1e+30  ;;  %v1409_v33 = vmax.f32 %v5751_v47, %v5755_v57  ;;  %v5769_v45 = vadd.f32 %v4540_v56, %v347_v41  ;;  %v5796_v15 = vld [vmem:[%s9676_s2 + $0x238] sm:$0xff]  ;;  %v5815_v14 = vld [vmem:[%s9676_s2 + $0x250] sm:$0xff]  ;;  %v352_v34 = vpop.permute.xlu0 %351 }
  0xeb   :  { %10193 = vst [vmem:[#allocation48_spill] sm:$0xff] %v5764_v28  ;;  %v5782_v32 = vadd.f32 %v4548_v59, %v347_v41  ;;  %v5785_v24 = vadd.f32 %v4538_v55, %v342_v49  ;;  %v5788_v0 = vadd.f32 %v4540_v56, %v342_v49  ;;  %v5791_v4 = vadd.f32 %v4548_v59, %v342_v49  ;;  %v5805_v41 = vld [vmem:[%s9676_s2 + $0x240] sm:$0xff]  ;;  %v5810_v49 = vld [vmem:[%s9676_s2 + $0x248] sm:$0xff] }
  0xec   :  { %1407 = vmax.xlane.f32.xlu0 %v1406_v10  ;;  %v1410_v58 = vmax.f32 %v1409_v33, %v5764_v28  ;;  %vm672_vm14 = vcmp.gt.f32.partialorder %v5369_v6, 0.0  ;;  %vm673_vm2 = vcmp.gt.f32.partialorder %v5419_v2, 0.0  ;;  %vm674_vm15 = vcmp.gt.f32.partialorder %v5422_v18, 0.0 }
  0xed   :  { %v816_v10 = vmul.f32 0.2, %v5369_v6  ;;  %v817_v33 = vmul.f32 0.2, %v5419_v2  ;;  %v818_v60 = vmul.f32 0.2, %v5422_v18  ;;  %v5821_v46 = vadd.f32 %v4538_v55, %v357_v23 }
  0xee   :  { %vm1110_vm7 = vcmp.ne.f32.partialorder %v5774_v53, 0.0  ;;  %1411 = vmax.xlane.f32.xlu1 %v1410_v58  ;;  %vm675_vm8 = vcmp.gt.f32.partialorder %v5559_v5, 0.0  ;;  %vm676_vm12 = vcmp.gt.f32.partialorder %v5562_v7, 0.0  ;;  %vm677_vm13 = vcmp.gt.f32.partialorder %v5565_v48, 0.0 }
  0xef   :  { %v819_v37 = vmul.f32 0.2, %v5559_v5  ;;  %vm1112_vm10 = vcmp.ne.f32.partialorder %v5796_v15, 0.0  ;;  %v960_v28 = vsel %vm672_vm14, %v5369_v6, %v816_v10  ;;  %v961_v57 = vsel %vm673_vm2, %v5419_v2, %v817_v33 }
  0xf0   :  { %v962_v58 = vsel %vm674_vm15, %v5422_v18, %v818_v60  ;;  %v820_v47 = vmul.f32 0.2, %v5562_v7  ;;  %vm1113_vm4 = vcmp.ne.f32.partialorder %v5805_v41, 0.0  ;;  %vm1114_vm5 = vcmp.ne.f32.partialorder %v5810_v49, 0.0 }
  0xf1   :  { %v5844_v30 = vsel %vm1104_vm9, %v960_v28, -1e+30  ;;  %v5848_v6 = vsel %vm1105_vm6, %v961_v57, -1e+30  ;;  %v5852_v2 = vsel %vm1106_vm0, %v962_v58, -1e+30  ;;  %v963_v18 = vsel %vm675_vm8, %v5559_v5, %v819_v37 }
  0xf2   :  { %10194 = vst [vmem:[#allocation49_spill] sm:$0xff] %v5844_v30  ;;  %10195 = vst [vmem:[#allocation50_spill] sm:$0xff] %v5848_v6  ;;  %vm1115_vm14 = vcmp.ne.f32.partialorder %v5815_v14, 0.0  ;;  %v1413_v60 = vmax.f32 %v5844_v30, %v5848_v6  ;;  %v821_v10 = vmul.f32 0.2, %v5565_v48  ;;  %v964_v1 = vsel %vm676_vm12, %v5562_v7, %v820_v47  ;;  %v5891_v47 = vld [vmem:[%s9676_s2 + $0x258] sm:$0xff] }
  0xf3   :  { %10196 = vst [vmem:[#allocation51_spill] sm:$0xff] %v5852_v2  ;;  %v5864_v9 = vsel %vm1107_vm3, %v963_v18, -1e+30  ;;  %v5868_v39 = vsel %vm1108_vm1, %v964_v1, -1e+30  ;;  %v5871_v5 = vadd.f32 %v4540_v56, %v357_v23  ;;  %v5874_v37 = vadd.f32 %v4548_v59, %v357_v23  ;;  %v5896_v23 = vld [vmem:[%s9676_s2 + $0x260] sm:$0xff] }
  0xf4   :  { %10197 = vst [vmem:[#allocation52_spill] sm:$0xff] %v5868_v39  ;;  %v5877_v57 = vadd.f32 %v4538_v55, %v352_v34  ;;  %v1414_v28 = vmax.f32 %v1413_v60, %v5852_v2  ;;  %v965_v7 = vsel %vm677_vm13, %v5565_v48, %v821_v10  ;;  %v1417_v52 = vmax.f32 %v5864_v9, %v5868_v39  ;;  %v5901_v48 = vld [vmem:[%s9676_s2 + $0x268] sm:$0xff]  ;;  %v5915_v18 = vld [vmem:[%s9676_s2 + $0x270] sm:$0xff]  ;;  %v5924_v1 = vld [vmem:[%s9676_s2 + $0x278] sm:$0xff] }
  0xf5   :  { %v5886_v54 = vadd.f32 %v4540_v56, %v352_v34  ;;  %v5905_v33 = vsel %vm1109_vm11, %v965_v7, -1e+30  ;;  %v5908_v58 = vadd.f32 %v4548_v59, %v352_v34  ;;  %vm678_vm9 = vcmp.gt.f32.partialorder %v5532_v27, 0.0  ;;  %v367_v34 = vpop.permute.xlu1 %366  ;;  %v5944_v30 = vld [vmem:[%s9676_s2 + $0x280] sm:$0xff] }
  0xf6   :  { %10198 = vst [vmem:[#allocation53_spill] sm:$0xff] %v5905_v33  ;;  %vm679_vm6 = vcmp.gt.f32.partialorder %v5543_v63, 0.0  ;;  %1415 = vmax.xlane.f32.xlu0 %v1414_v28  ;;  %v1418_v60 = vmax.f32 %v1417_v52, %v5905_v33  ;;  %vm680_vm0 = vcmp.gt.f32.partialorder %v5556_v12, 0.0  ;;  %v822_v44 = vmul.f32 0.2, %v5532_v27 }
  0xf7   :  { %v823_v10 = vmul.f32 0.2, %v5543_v63  ;;  %v824_v7 = vmul.f32 0.2, %v5556_v12  ;;  %vm681_vm3 = vcmp.gt.f32.partialorder %v5651_v36, 0.0  ;;  %vm682_vm1 = vcmp.gt.f32.partialorder %v5660_v40, 0.0 }
  0xf8   :  { %vm683_vm11 = vcmp.gt.f32.partialorder %v5682_v13, 0.0  ;;  %vm1116_vm2 = vcmp.ne.f32.partialorder %v5891_v47, 0.0  ;;  %vm1117_vm15 = vcmp.ne.f32.partialorder %v5896_v23, 0.0  ;;  %vm1118_vm8 = vcmp.ne.f32.partialorder %v5901_v48, 0.0  ;;  %1419 = vmax.xlane.f32.xlu1 %v1418_v60 }
  0xf9   :  { %v966_v28 = vsel %vm678_vm9, %v5532_v27, %v822_v44  ;;  %v967_v52 = vsel %vm679_vm6, %v5543_v63, %v823_v10  ;;  %v825_v2 = vmul.f32 0.2, %v5651_v36  ;;  %v826_v6 = vmul.f32 0.2, %v5660_v40  ;;  %v377_v49 = vpop.permute.xlu1 %376 }
  0xfa   :  { %vm1119_vm12 = vcmp.ne.f32.partialorder %v5915_v18, 0.0  ;;  %v968_v60 = vsel %vm680_vm0, %v5556_v12, %v824_v7  ;;  %v5952_v27 = vsel %vm1110_vm7, %v966_v28, -1e+30  ;;  %vm10200_vm13 = vcmp.ne.f32.partialorder %v5779_v8, 0.0  ;;  %v362_v8 = vpop.permute.xlu0 %361 }
  0xfb   :  { %10199 = vst [vmem:[#allocation54_spill] sm:$0xff] %v5952_v27  ;;  %v5956_v63 = vsel %vm10200_vm13, %v967_v52, -1e+30  ;;  %v827_v44 = vmul.f32 0.2, %v5682_v13  ;;  %vm1120_vm9 = vcmp.ne.f32.partialorder %v5924_v1, 0.0  ;;  %v969_v12 = vsel %vm681_vm3, %v5651_v36, %v825_v2 }
  0xfc   :  { %10201 = vst [vmem:[#allocation55_spill] sm:$0xff] %v5956_v63  ;;  %v5962_v10 = vsel %vm1112_vm10, %v968_v60, -1e+30  ;;  %v1421_v33 = vmax.f32 %v5952_v27, %v5956_v63  ;;  %v970_v53 = vsel %vm682_vm1, %v5660_v40, %v826_v6  ;;  %v5977_v15 = vsel %vm1113_vm4, %v969_v12, -1e+30  ;;  %v6000_v6 = vld [vmem:[%s9676_s2 + $0x288] sm:$0xff] }
  0xfd   :  { %10202 = vst [vmem:[#allocation56_spill] sm:$0xff] %v5962_v10  ;;  %v971_v7 = vsel %vm683_vm11, %v5682_v13, %v827_v44  ;;  %10203 = vst [vmem:[#allocation57_spill] sm:$0xff] %v5977_v15  ;;  %v5981_v28 = vsel %vm1114_vm5, %v970_v53, -1e+30  ;;  %v5984_v52 = vadd.f32 %v4538_v55, %v367_v34  ;;  %vm1121_vm7 = vcmp.ne.f32.partialorder %v5944_v30, 0.0  ;;  %v6005_v2 = vld [vmem:[%s9676_s2 + $0x290] sm:$0xff] }
  0xfe   :  { %10204 = vst [vmem:[#allocation58_spill] sm:$0xff] %v5981_v28  ;;  %v1422_v36 = vmax.f32 %v1421_v33, %v5962_v10  ;;  %v5990_v40 = vsel %vm1115_vm14, %v971_v7, -1e+30  ;;  %v1425_v13 = vmax.f32 %v5977_v15, %v5981_v28  ;;  %v5995_v41 = vadd.f32 %v4540_v56, %v367_v34  ;;  %v6022_v12 = vld [vmem:[%s9676_s2 + $0x298] sm:$0xff]  ;;  %v372_v15 = vpop.permute.xlu0 %371 }
  0xff   :  { %10205 = vst [vmem:[#allocation59_spill] sm:$0xff] %v5990_v40  ;;  %v6008_v14 = vadd.f32 %v4548_v59, %v367_v34  ;;  %v6011_v33 = vadd.f32 %v4538_v55, %v362_v8  ;;  %v6014_v60 = vadd.f32 %v4540_v56, %v362_v8  ;;  %v6017_v44 = vadd.f32 %v4548_v59, %v362_v8  ;;  %v6031_v34 = vld [vmem:[%s9676_s2 + $0x2a0] sm:$0xff]  ;;  %v6036_v8 = vld [vmem:[%s9676_s2 + $0x2a8] sm:$0xff] }
 0x100   :  { %1423 = vmax.xlane.f32.xlu0 %v1422_v36  ;;  %v1426_v53 = vmax.f32 %v1425_v13, %v5990_v40  ;;  %vm684_vm5 = vcmp.gt.f32.partialorder %v5595_v42, 0.0  ;;  %vm685_vm10 = vcmp.gt.f32.partialorder %v5645_v29, 0.0  ;;  %vm686_vm4 = vcmp.gt.f32.partialorder %v5648_v11, 0.0 }
 0x101   :  { %v828_v7 = vmul.f32 0.2, %v5595_v42  ;;  %v829_v36 = vmul.f32 0.2, %v5645_v29  ;;  %v830_v13 = vmul.f32 0.2, %v5648_v11  ;;  %v6042_v10 = vadd.f32 %v4538_v55, %v377_v49 }
 0x102   :  { %vm1122_vm14 = vcmp.ne.f32.partialorder %v6000_v6, 0.0  ;;  %1427 = vmax.xlane.f32.xlu1 %v1426_v53  ;;  %vm687_vm0 = vcmp.gt.f32.partialorder %v5785_v24, 0.0  ;;  %vm688_vm3 = vcmp.gt.f32.partialorder %v5788_v0, 0.0  ;;  %vm689_vm1 = vcmp.gt.f32.partialorder %v5791_v4, 0.0 }
 0x103   :  { %v831_v63 = vmul.f32 0.2, %v5785_v24  ;;  %vm1124_vm11 = vcmp.ne.f32.partialorder %v6022_v12, 0.0  ;;  %v972_v27 = vsel %vm684_vm5, %v5595_v42, %v828_v7  ;;  %v973_v40 = vsel %vm685_vm10, %v5645_v29, %v829_v36 }
 0x104   :  { %v974_v53 = vsel %vm686_vm4, %v5648_v11, %v830_v13  ;;  %v832_v28 = vmul.f32 0.2, %v5788_v0  ;;  %vm1125_vm13 = vcmp.ne.f32.partialorder %v6031_v34, 0.0  ;;  %vm1126_vm6 = vcmp.ne.f32.partialorder %v6036_v8, 0.0 }
 0x105   :  { %v6065_v39 = vsel %vm1116_vm2, %v972_v27, -1e+30  ;;  %v6069_v42 = vsel %vm1117_vm15, %v973_v40, -1e+30  ;;  %v6073_v29 = vsel %vm1118_vm8, %v974_v53, -1e+30  ;;  %v975_v11 = vsel %vm687_vm0, %v5785_v24, %v831_v63 }
 0x106   :  { %v1429_v7 = vmax.f32 %v6065_v39, %v6069_v42  ;;  %v833_v36 = vmul.f32 0.2, %v5791_v4  ;;  %v976_v47 = vsel %vm688_vm3, %v5788_v0, %v832_v28  ;;  %v6084_v23 = vsel %vm1119_vm12, %v975_v11, -1e+30 }
 0x107   :  { %v6088_v48 = vsel %vm1120_vm9, %v976_v47, -1e+30  ;;  %v6091_v27 = vadd.f32 %v4540_v56, %v377_v49  ;;  %v6094_v24 = vadd.f32 %v4548_v59, %v377_v49  ;;  %v6097_v63 = vadd.f32 %v4538_v55, %v372_v15 }
 0x108   :  { %v1430_v40 = vmax.f32 %v1429_v7, %v6073_v29  ;;  %v977_v0 = vsel %vm689_vm1, %v5791_v4, %v833_v36  ;;  %v1433_v18 = vmax.f32 %v6084_v23, %v6088_v48  ;;  %v6106_v1 = vadd.f32 %v4540_v56, %v372_v15  ;;  %v151_v7 = vld [vmem:[%s9676_s2 + $0x2b0] sm:$0xff] }
 0x109   :  { %v6110_v28 = vsel %vm1121_vm7, %v977_v0, -1e+30  ;;  %v6113_v49 = vadd.f32 %v4548_v59, %v372_v15  ;;  %vm690_vm2 = vcmp.gt.f32.partialorder %v5758_v61, 0.0  ;;  %vm691_vm15 = vcmp.gt.f32.partialorder %v5769_v45, 0.0 }
 0x10a   :  { %1431 = vmax.xlane.f32.xlu0 %v1430_v40  ;;  %v1434_v4 = vmax.f32 %v1433_v18, %v6110_v28  ;;  %vm692_vm8 = vcmp.gt.f32.partialorder %v5782_v32, 0.0  ;;  %v834_v13 = vmul.f32 0.2, %v5758_v61  ;;  %v835_v53 = vmul.f32 0.2, %v5769_v45 }
 0x10b   :  { %v836_v30 = vmul.f32 0.2, %v5782_v32  ;;  %vm693_vm12 = vcmp.gt.f32.partialorder %v5877_v57, 0.0  ;;  %vm694_vm9 = vcmp.gt.f32.partialorder %v5886_v54, 0.0  ;;  %vm695_vm7 = vcmp.gt.f32.partialorder %v5908_v58, 0.0 }
 0x10c   :  { %1435 = vmax.xlane.f32.xlu1 %v1434_v4  ;;  %v978_v15 = vsel %vm690_vm2, %v5758_v61, %v834_v13  ;;  %v979_v11 = vsel %vm691_vm15, %v5769_v45, %v835_v53  ;;  %v837_v36 = vmul.f32 0.2, %v5877_v57  ;;  %v838_v47 = vmul.f32 0.2, %v5886_v54  ;;  %v387_v45 = vpop.permute.xlu1 %386 }
 0x10d   :  { %v980_v40 = vsel %vm692_vm8, %v5782_v32, %v836_v30  ;;  %v6135_v0 = vsel %vm1122_vm14, %v978_v15, -1e+30  ;;  %vm10207_vm5 = vcmp.ne.f32.partialorder %v6005_v2, 0.0  ;;  %v839_v61 = vmul.f32 0.2, %v5908_v58  ;;  %v382_v2 = vpop.permute.xlu0 %381 }
 0x10e   :  { %10206 = vst [vmem:[#allocation60_spill] sm:$0xff] %v6135_v0  ;;  %v6139_v18 = vsel %vm10207_vm5, %v979_v11, -1e+30  ;;  %v6144_v4 = vsel %vm1124_vm11, %v980_v40, -1e+30  ;;  %v981_v32 = vsel %vm693_vm12, %v5877_v57, %v837_v36  ;;  %v982_v6 = vsel %vm694_vm9, %v5886_v54, %v838_v47  ;;  %v153_v47 = vld [vmem:[%s9676_s2 + $0x2c0] sm:$0xff] }
 0x10f   :  { %10208 = vst [vmem:[#allocation61_spill] sm:$0xff] %v6139_v18  ;;  %10209 = vst [vmem:[#allocation62_spill] sm:$0xff] %v6144_v4  ;;  %v1437_v13 = vmax.f32 %v6135_v0, %v6139_v18  ;;  %v983_v53 = vsel %vm695_vm7, %v5908_v58, %v839_v61  ;;  %vm1127_vm10 = vcmp.ne.f32.partialorder %v151_v7, 0.0  ;;  %v6159_v12 = vsel %vm1125_vm13, %v981_v32, -1e+30  ;;  %v152_v58 = vld [vmem:[%s9676_s2 + $0x2b8] sm:$0xff] }
 0x110   :  { %v6163_v30 = vsel %vm1126_vm6, %v982_v6, -1e+30  ;;  %v6166_v15 = vsel %vm1127_vm10, %v983_v53, -1e+30  ;;  %v6171_v11 = vadd.f32 %v4538_v55, %v387_v45  ;;  %v6177_v34 = vadd.f32 %v4540_v56, %v387_v45  ;;  %v154_v40 = vld [vmem:[%s9676_s2 + $0x2c8] sm:$0xff]  ;;  %v397_v18 = vpop.permute.xlu1 %396 }
 0x111   :  { %v1438_v57 = vmax.f32 %v1437_v13, %v6144_v4  ;;  %v1441_v54 = vmax.f32 %v6159_v12, %v6163_v30  ;;  %v6180_v8 = vadd.f32 %v4548_v59, %v387_v45  ;;  %v6183_v7 = vadd.f32 %v4538_v55, %v382_v2 }
 0x112   :  { %v6186_v36 = vadd.f32 %v4540_v56, %v382_v2  ;;  %v6196_v45 = vadd.f32 %v4548_v59, %v382_v2  ;;  %vm696_vm4 = vcmp.gt.f32.partialorder %v5821_v46, 0.0  ;;  %vm697_vm14 = vcmp.gt.f32.partialorder %v5871_v5, 0.0 }
 0x113   :  { %1439 = vmax.xlane.f32.xlu0 %v1438_v57  ;;  %v1442_v61 = vmax.f32 %v1441_v54, %v6166_v15  ;;  %vm698_vm6 = vcmp.gt.f32.partialorder %v5874_v37, 0.0  ;;  %v840_v13 = vmul.f32 0.2, %v5821_v46  ;;  %v841_v32 = vmul.f32 0.2, %v5871_v5  ;;  %v155_v57 = vld [vmem:[%s9676_s2 + $0x2d0] sm:$0xff] }
 0x114   :  { %vm1128_vm0 = vcmp.ne.f32.partialorder %v152_v58, 0.0  ;;  %v842_v6 = vmul.f32 0.2, %v5874_v37  ;;  %vm1129_vm3 = vcmp.ne.f32.partialorder %v153_v47, 0.0  ;;  %vm1130_vm1 = vcmp.ne.f32.partialorder %v154_v40, 0.0  ;;  %v156_v54 = vld [vmem:[%s9676_s2 + $0x2d8] sm:$0xff] }
 0x115   :  { %1443 = vmax.xlane.f32.xlu1 %v1442_v61  ;;  %vm699_vm11 = vcmp.gt.f32.partialorder %v6011_v33, 0.0  ;;  %v984_v2 = vsel %vm696_vm4, %v5821_v46, %v840_v13  ;;  %v985_v53 = vsel %vm697_vm14, %v5871_v5, %v841_v32  ;;  %v157_v58 = vld [vmem:[%s9676_s2 + $0x2e0] sm:$0xff]  ;;  %vm700_vm13 = vcmp.gt.f32.partialorder %v6014_v60, 0.0 }
 0x116   :  { %vm701_vm2 = vcmp.gt.f32.partialorder %v6017_v44, 0.0  ;;  %v986_v46 = vsel %vm698_vm6, %v5874_v37, %v842_v6  ;;  %v6221_v5 = vsel %vm1128_vm0, %v984_v2, -1e+30  ;;  %v6223_v47 = vsel %vm1129_vm3, %v985_v53, -1e+30  ;;  %v392_v6 = vpop.permute.xlu0 %391 }
 0x117   :  { %10210 = vst [vmem:[#allocation63_spill] sm:$0xff] %v6221_v5  ;;  %10211 = vst [vmem:[#allocation64_spill] sm:$0xff] %v6223_v47  ;;  %v843_v40 = vmul.f32 0.2, %v6011_v33  ;;  %v6226_v61 = vsel %vm1130_vm1, %v986_v46, -1e+30  ;;  %v1445_v13 = vmax.f32 %v6221_v5, %v6223_v47 }
 0x118   :  { %10212 = vst [vmem:[#allocation65_spill] sm:$0xff] %v6226_v61  ;;  %v844_v32 = vmul.f32 0.2, %v6014_v60  ;;  %v845_v4 = vmul.f32 0.2, %v6017_v44  ;;  %vm1131_vm15 = vcmp.ne.f32.partialorder %v155_v57, 0.0  ;;  %v6252_v57 = vadd.f32 %v4540_v56, %v397_v18 }
 0x119   :  { %v987_v37 = vsel %vm699_vm11, %v6011_v33, %v843_v40  ;;  %vm1132_vm8 = vcmp.ne.f32.partialorder %v156_v54, 0.0  ;;  %vm1133_vm12 = vcmp.ne.f32.partialorder %v157_v58, 0.0  ;;  %v1446_v2 = vmax.f32 %v1445_v13, %v6226_v61  ;;  %v158_v58 = vld [vmem:[%s9676_s2 + $0x2e8] sm:$0xff]  ;;  %v159_v40 = vld [vmem:[%s9676_s2 + $0x2f0] sm:$0xff]  ;;  %v160_v13 = vld [vmem:[%s9676_s2 + $0x2f8] sm:$0xff] }
 0x11a   :  { %v988_v53 = vsel %vm700_vm13, %v6014_v60, %v844_v32  ;;  %v989_v46 = vsel %vm701_vm2, %v6017_v44, %v845_v4  ;;  %v6242_v47 = vsel %vm1131_vm15, %v987_v37, -1e+30  ;;  %v6249_v33 = vadd.f32 %v4538_v55, %v397_v18 }
 0x11b   :  { %10213 = vst [vmem:[#allocation66_spill] sm:$0xff] %v6242_v47  ;;  %v6244_v5 = vsel %vm1132_vm8, %v988_v53, -1e+30  ;;  %v6246_v0 = vsel %vm1133_vm12, %v989_v46, -1e+30  ;;  %1447 = vmax.xlane.f32.xlu0 %v1446_v2  ;;  %v6257_v54 = vadd.f32 %v4548_v59, %v397_v18  ;;  %v6260_v44 = vadd.f32 %v4538_v55, %v392_v6  ;;  %v407_v46 = vpop.permute.xlu1 %406 }
 0x11c   :  { %10214 = vst [vmem:[#allocation67_spill] sm:$0xff] %v6244_v5  ;;  %10215 = vst [vmem:[#allocation68_spill] sm:$0xff] %v6246_v0  ;;  %v1449_v60 = vmax.f32 %v6242_v47, %v6244_v5  ;;  %v6263_v4 = vadd.f32 %v4540_v56, %v392_v6  ;;  %v6275_v18 = vadd.f32 %v4548_v59, %v392_v6  ;;  %vm702_vm9 = vcmp.gt.f32.partialorder %v5984_v52, 0.0 }
 0x11d   :  { %vm703_vm7 = vcmp.gt.f32.partialorder %v5995_v41, 0.0  ;;  %vm704_vm5 = vcmp.gt.f32.partialorder %v6008_v14, 0.0  ;;  %v846_v37 = vmul.f32 0.2, %v5984_v52  ;;  %v847_v2 = vmul.f32 0.2, %v5995_v41 }
 0x11e   :  { %v1450_v32 = vmax.f32 %v1449_v60, %v6246_v0  ;;  %v848_v53 = vmul.f32 0.2, %v6008_v14  ;;  %vm1134_vm10 = vcmp.ne.f32.partialorder %v158_v58, 0.0  ;;  %vm1135_vm4 = vcmp.ne.f32.partialorder %v159_v40, 0.0  ;;  %v161_v60 = vld [vmem:[%s9676_s2 + $0x300] sm:$0xff]  ;;  %v162_v0 = vld [vmem:[%s9676_s2 + $0x308] sm:$0xff] }
 0x11f   :  { %vm1136_vm14 = vcmp.ne.f32.partialorder %v160_v13, 0.0  ;;  %vm705_vm6 = vcmp.gt.f32.partialorder %v6097_v63, 0.0  ;;  %v990_v6 = vsel %vm702_vm9, %v5984_v52, %v846_v37  ;;  %v991_v61 = vsel %vm703_vm7, %v5995_v41, %v847_v2  ;;  %v163_v58 = vld [vmem:[%s9676_s2 + $0x310] sm:$0xff] }
 0x120   :  { %1451 = vmax.xlane.f32.xlu1 %v1450_v32  ;;  %v992_v5 = vsel %vm704_vm5, %v6008_v14, %v848_v53  ;;  %vm706_vm0 = vcmp.gt.f32.partialorder %v6106_v1, 0.0  ;;  %v6298_v40 = vsel %vm1134_vm10, %v990_v6, -1e+30  ;;  %v6300_v52 = vsel %vm1135_vm4, %v991_v61, -1e+30  ;;  %v402_v61 = vpop.permute.xlu0 %401 }
 0x121   :  { %10216 = vst [vmem:[#allocation69_spill] sm:$0xff] %v6298_v40  ;;  %10217 = vst [vmem:[#allocation70_spill] sm:$0xff] %v6300_v52  ;;  %v6302_v41 = vsel %vm1136_vm14, %v992_v5, -1e+30  ;;  %v6305_v14 = vadd.f32 %v4538_v55, %v407_v46  ;;  %v1453_v13 = vmax.f32 %v6298_v40, %v6300_v52  ;;  %vm707_vm3 = vcmp.gt.f32.partialorder %v6113_v49, 0.0 }
 0x122   :  { %10218 = vst [vmem:[#allocation71_spill] sm:$0xff] %v6302_v41  ;;  %v849_v32 = vmul.f32 0.2, %v6097_v63  ;;  %v850_v37 = vmul.f32 0.2, %v6106_v1  ;;  %vm1137_vm1 = vcmp.ne.f32.partialorder %v161_v60, 0.0  ;;  %v6321_v52 = vadd.f32 %v4540_v56, %v407_v46 }
 0x123   :  { %v851_v2 = vmul.f32 0.2, %v6113_v49  ;;  %vm1138_vm11 = vcmp.ne.f32.partialorder %v162_v0, 0.0  ;;  %vm1139_vm13 = vcmp.ne.f32.partialorder %v163_v58, 0.0  ;;  %v1454_v5 = vmax.f32 %v1453_v13, %v6302_v41 }
 0x124   :  { %v993_v53 = vsel %vm705_vm6, %v6097_v63, %v849_v32  ;;  %v994_v6 = vsel %vm706_vm0, %v6106_v1, %v850_v37  ;;  %v6329_v60 = vadd.f32 %v4548_v59, %v407_v46  ;;  %v6336_v1 = vadd.f32 %v4538_v55, %v402_v61  ;;  %v165_v46 = vld [vmem:[%s9676_s2 + $0x320] sm:$0xff] }
 0x125   :  { %v995_v40 = vsel %vm707_vm3, %v6113_v49, %v851_v2  ;;  %v6324_v47 = vsel %vm1137_vm1, %v993_v53, -1e+30  ;;  %v6326_v0 = vsel %vm1138_vm11, %v994_v6, -1e+30  ;;  %1455 = vmax.xlane.f32.xlu0 %v1454_v5  ;;  %v6339_v13 = vadd.f32 %v4540_v56, %v402_v61  ;;  %v164_v49 = vld [vmem:[%s9676_s2 + $0x318] sm:$0xff]  ;;  %v417_v6 = vpop.permute.xlu1 %416 }
 0x126   :  { %10219 = vst [vmem:[#allocation72_spill] sm:$0xff] %v6324_v47  ;;  %10220 = vst [vmem:[#allocation73_spill] sm:$0xff] %v6326_v0  ;;  %v6331_v58 = vsel %vm1139_vm13, %v995_v40, -1e+30  ;;  %v1457_v63 = vmax.f32 %v6324_v47, %v6326_v0  ;;  %v166_v40 = vld [vmem:[%s9676_s2 + $0x328] sm:$0xff]  ;;  %v6351_v32 = vadd.f32 %v4548_v59, %v402_v61  ;;  %vm708_vm2 = vcmp.gt.f32.partialorder %v6042_v10, 0.0 }
 0x127   :  { %10221 = vst [vmem:[#allocation74_spill] sm:$0xff] %v6331_v58  ;;  %vm709_vm15 = vcmp.gt.f32.partialorder %v6091_v27, 0.0  ;;  %vm710_vm8 = vcmp.gt.f32.partialorder %v6094_v24, 0.0  ;;  %v852_v2 = vmul.f32 0.2, %v6042_v10  ;;  %vm1140_vm12 = vcmp.ne.f32.partialorder %v164_v49, 0.0 }
 0x128   :  { %v1458_v37 = vmax.f32 %v1457_v63, %v6331_v58  ;;  %v853_v5 = vmul.f32 0.2, %v6091_v27  ;;  %v854_v53 = vmul.f32 0.2, %v6094_v24  ;;  %vm1141_vm9 = vcmp.ne.f32.partialorder %v165_v46, 0.0  ;;  %v167_v63 = vld [vmem:[%s9676_s2 + $0x330] sm:$0xff] }
 0x129   :  { %vm1142_vm7 = vcmp.ne.f32.partialorder %v166_v40, 0.0  ;;  %vm711_vm5 = vcmp.gt.f32.partialorder %v6183_v7, 0.0  ;;  %v996_v61 = vsel %vm708_vm2, %v6042_v10, %v852_v2  ;;  %v168_v58 = vld [vmem:[%s9676_s2 + $0x338] sm:$0xff]  ;;  %v169_v49 = vld [vmem:[%s9676_s2 + $0x340] sm:$0xff]  ;;  %vm712_vm10 = vcmp.gt.f32.partialorder %v6186_v36, 0.0 }
 0x12a   :  { %1459 = vmax.xlane.f32.xlu1 %v1458_v37  ;;  %v997_v41 = vsel %vm709_vm15, %v6091_v27, %v853_v5  ;;  %v998_v0 = vsel %vm710_vm8, %v6094_v24, %v854_v53  ;;  %v6374_v46 = vsel %vm1140_vm12, %v996_v61, -1e+30  ;;  %v6381_v24 = vadd.f32 %v4538_v55, %v417_v6 }
 0x12b   :  { %10222 = vst [vmem:[#allocation75_spill] sm:$0xff] %v6374_v46  ;;  %v6376_v10 = vsel %vm1141_vm9, %v997_v41, -1e+30  ;;  %v6378_v27 = vsel %vm1142_vm7, %v998_v0, -1e+30  ;;  %vm713_vm4 = vcmp.gt.f32.partialorder %v6196_v45, 0.0  ;;  %v412_v41 = vpop.permute.xlu0 %411 }
 0x12c   :  { %10223 = vst [vmem:[#allocation76_spill] sm:$0xff] %v6376_v10  ;;  %10224 = vst [vmem:[#allocation77_spill] sm:$0xff] %v6378_v27  ;;  %v1461_v40 = vmax.f32 %v6374_v46, %v6376_v10  ;;  %v855_v37 = vmul.f32 0.2, %v6183_v7  ;;  %v856_v2 = vmul.f32 0.2, %v6186_v36  ;;  %v6397_v10 = vadd.f32 %v4540_v56, %v417_v6 }
 0x12d   :  { %v857_v5 = vmul.f32 0.2, %v6196_v45  ;;  %vm1143_vm14 = vcmp.ne.f32.partialorder %v167_v63, 0.0  ;;  %vm1144_vm6 = vcmp.ne.f32.partialorder %v168_v58, 0.0  ;;  %vm1145_vm0 = vcmp.ne.f32.partialorder %v169_v49, 0.0 }
 0x12e   :  { %v1462_v0 = vmax.f32 %v1461_v40, %v6378_v27  ;;  %v999_v53 = vsel %vm711_vm5, %v6183_v7, %v855_v37  ;;  %v1000_v61 = vsel %vm712_vm10, %v6186_v36, %v856_v2  ;;  %v6405_v63 = vadd.f32 %v4548_v59, %v417_v6  ;;  %v171_v6 = vld [vmem:[%s9676_s2 + $0x350] sm:$0xff] }
 0x12f   :  { %v1001_v46 = vsel %vm713_vm4, %v6196_v45, %v857_v5  ;;  %v6400_v47 = vsel %vm1143_vm14, %v999_v53, -1e+30  ;;  %v6402_v58 = vsel %vm1144_vm6, %v1000_v61, -1e+30  ;;  %v6412_v36 = vadd.f32 %v4538_v55, %v412_v41  ;;  %v170_v45 = vld [vmem:[%s9676_s2 + $0x348] sm:$0xff]  ;;  %v427_v61 = vpop.permute.xlu1 %426 }
 0x130   :  { %10225 = vst [vmem:[#allocation78_spill] sm:$0xff] %v6400_v47  ;;  %10226 = vst [vmem:[#allocation79_spill] sm:$0xff] %v6402_v58  ;;  %1463 = vmax.xlane.f32.xlu0 %v1462_v0  ;;  %v6407_v49 = vsel %vm1145_vm0, %v1001_v46, -1e+30  ;;  %v1465_v7 = vmax.f32 %v6400_v47, %v6402_v58  ;;  %v6415_v40 = vadd.f32 %v4540_v56, %v412_v41  ;;  %v172_v46 = vld [vmem:[%s9676_s2 + $0x358] sm:$0xff]  ;;  %vm714_vm3 = vcmp.gt.f32.partialorder %v6171_v11, 0.0 }
 0x131   :  { %10227 = vst [vmem:[#allocation80_spill] sm:$0xff] %v6407_v49  ;;  %v6427_v37 = vadd.f32 %v4548_v59, %v412_v41  ;;  %vm715_vm1 = vcmp.gt.f32.partialorder %v6177_v34, 0.0  ;;  %vm716_vm11 = vcmp.gt.f32.partialorder %v6180_v8, 0.0  ;;  %v858_v5 = vmul.f32 0.2, %v6171_v11 }
 0x132   :  { %v1466_v2 = vmax.f32 %v1465_v7, %v6407_v49  ;;  %v859_v0 = vmul.f32 0.2, %v6177_v34  ;;  %v860_v53 = vmul.f32 0.2, %v6180_v8  ;;  %vm1146_vm13 = vcmp.ne.f32.partialorder %v170_v45, 0.0  ;;  %v173_v7 = vld [vmem:[%s9676_s2 + $0x360] sm:$0xff] }
 0x133   :  { %vm1147_vm2 = vcmp.ne.f32.partialorder %v171_v6, 0.0  ;;  %vm1148_vm15 = vcmp.ne.f32.partialorder %v172_v46, 0.0  ;;  %vm717_vm8 = vcmp.gt.f32.partialorder %v6260_v44, 0.0  ;;  %v1002_v41 = vsel %vm714_vm3, %v6171_v11, %v858_v5  ;;  %v174_v49 = vld [vmem:[%s9676_s2 + $0x368] sm:$0xff]  ;;  %v175_v45 = vld [vmem:[%s9676_s2 + $0x370] sm:$0xff] }
 0x134   :  { %1467 = vmax.xlane.f32.xlu1 %v1466_v2  ;;  %v1003_v27 = vsel %vm715_vm1, %v6177_v34, %v859_v0  ;;  %v1004_v58 = vsel %vm716_vm11, %v6180_v8, %v860_v53  ;;  %vm718_vm12 = vcmp.gt.f32.partialorder %v6263_v4, 0.0  ;;  %v6450_v6 = vsel %vm1146_vm13, %v1002_v41, -1e+30 }
 0x135   :  { %10228 = vst [vmem:[#allocation81_spill] sm:$0xff] %v6450_v6  ;;  %v6452_v11 = vsel %vm1147_vm2, %v1003_v27, -1e+30  ;;  %v6454_v34 = vsel %vm1148_vm15, %v1004_v58, -1e+30  ;;  %v6457_v8 = vadd.f32 %v4538_v55, %v427_v61  ;;  %vm719_vm9 = vcmp.gt.f32.partialorder %v6275_v18, 0.0  ;;  %v422_v27 = vpop.permute.xlu0 %421 }
 0x136   :  { %10229 = vst [vmem:[#allocation82_spill] sm:$0xff] %v6452_v11  ;;  %10230 = vst [vmem:[#allocation83_spill] sm:$0xff] %v6454_v34  ;;  %v1469_v46 = vmax.f32 %v6450_v6, %v6452_v11  ;;  %v861_v2 = vmul.f32 0.2, %v6260_v44  ;;  %v862_v5 = vmul.f32 0.2, %v6263_v4  ;;  %v6473_v11 = vadd.f32 %v4540_v56, %v427_v61 }
 0x137   :  { %v863_v0 = vmul.f32 0.2, %v6275_v18  ;;  %vm1149_vm7 = vcmp.ne.f32.partialorder %v173_v7, 0.0  ;;  %vm1150_vm5 = vcmp.ne.f32.partialorder %v174_v49, 0.0  ;;  %vm1151_vm10 = vcmp.ne.f32.partialorder %v175_v45, 0.0 }
 0x138   :  { %v1470_v58 = vmax.f32 %v1469_v46, %v6454_v34  ;;  %v1005_v53 = vsel %vm717_vm8, %v6260_v44, %v861_v2  ;;  %v1006_v41 = vsel %vm718_vm12, %v6263_v4, %v862_v5  ;;  %v6481_v7 = vadd.f32 %v4548_v59, %v427_v61  ;;  %v177_v61 = vld [vmem:[%s9676_s2 + $0x380] sm:$0xff] }
 0x139   :  { %v1007_v6 = vsel %vm719_vm9, %v6275_v18, %v863_v0  ;;  %v6476_v47 = vsel %vm1149_vm7, %v1005_v53, -1e+30  ;;  %v6478_v49 = vsel %vm1150_vm5, %v1006_v41, -1e+30  ;;  %v6488_v4 = vadd.f32 %v4538_v55, %v422_v27  ;;  %v176_v18 = vld [vmem:[%s9676_s2 + $0x378] sm:$0xff]  ;;  %v437_v41 = vpop.permute.xlu1 %436 }
 0x13a   :  { %10231 = vst [vmem:[#allocation84_spill] sm:$0xff] %v6476_v47  ;;  %10232 = vst [vmem:[#allocation85_spill] sm:$0xff] %v6478_v49  ;;  %1471 = vmax.xlane.f32.xlu0 %v1470_v58  ;;  %v6483_v45 = vsel %vm1151_vm10, %v1007_v6, -1e+30  ;;  %v1473_v44 = vmax.f32 %v6476_v47, %v6478_v49  ;;  %v6491_v46 = vadd.f32 %v4540_v56, %v422_v27  ;;  %v178_v6 = vld [vmem:[%s9676_s2 + $0x388] sm:$0xff]  ;;  %vm720_vm4 = vcmp.gt.f32.partialorder %v6249_v33, 0.0 }
 0x13b   :  { %10233 = vst [vmem:[#allocation86_spill] sm:$0xff] %v6483_v45  ;;  %v6503_v2 = vadd.f32 %v4548_v59, %v422_v27  ;;  %vm721_vm14 = vcmp.gt.f32.partialorder %v6252_v57, 0.0  ;;  %vm722_vm6 = vcmp.gt.f32.partialorder %v6257_v54, 0.0  ;;  %v864_v0 = vmul.f32 0.2, %v6249_v33 }
 0x13c   :  { %v1474_v5 = vmax.f32 %v1473_v44, %v6483_v45  ;;  %v865_v58 = vmul.f32 0.2, %v6252_v57  ;;  %v866_v53 = vmul.f32 0.2, %v6257_v54  ;;  %vm1152_vm0 = vcmp.ne.f32.partialorder %v176_v18, 0.0  ;;  %v179_v44 = vld [vmem:[%s9676_s2 + $0x390] sm:$0xff] }
 0x13d   :  { %vm1153_vm3 = vcmp.ne.f32.partialorder %v177_v61, 0.0  ;;  %vm1154_vm1 = vcmp.ne.f32.partialorder %v178_v6, 0.0  ;;  %vm723_vm11 = vcmp.gt.f32.partialorder %v6336_v1, 0.0  ;;  %v1008_v27 = vsel %vm720_vm4, %v6249_v33, %v864_v0  ;;  %v180_v45 = vld [vmem:[%s9676_s2 + $0x398] sm:$0xff]  ;;  %v181_v18 = vld [vmem:[%s9676_s2 + $0x3a0] sm:$0xff] }
 0x13e   :  { %1475 = vmax.xlane.f32.xlu1 %v1474_v5  ;;  %v1009_v49 = vsel %vm721_vm14, %v6252_v57, %v865_v58  ;;  %v1010_v47 = vsel %vm722_vm6, %v6257_v54, %v866_v53  ;;  %vm724_vm13 = vcmp.gt.f32.partialorder %v6339_v13, 0.0  ;;  %v6526_v61 = vsel %vm1152_vm0, %v1008_v27, -1e+30 }
 0x13f   :  { %10234 = vst [vmem:[#allocation87_spill] sm:$0xff] %v6526_v61  ;;  %v6528_v33 = vsel %vm1153_vm3, %v1009_v49, -1e+30  ;;  %v6530_v57 = vsel %vm1154_vm1, %v1010_v47, -1e+30  ;;  %v6533_v54 = vadd.f32 %v4538_v55, %v437_v41  ;;  %vm725_vm2 = vcmp.gt.f32.partialorder %v6351_v32, 0.0  ;;  %v432_v49 = vpop.permute.xlu0 %431 }
 0x140   :  { %10235 = vst [vmem:[#allocation88_spill] sm:$0xff] %v6528_v33  ;;  %10236 = vst [vmem:[#allocation89_spill] sm:$0xff] %v6530_v57  ;;  %v1477_v6 = vmax.f32 %v6526_v61, %v6528_v33  ;;  %v867_v5 = vmul.f32 0.2, %v6336_v1  ;;  %v868_v0 = vmul.f32 0.2, %v6339_v13  ;;  %v6549_v33 = vadd.f32 %v4540_v56, %v437_v41 }
 0x141   :  { %v869_v58 = vmul.f32 0.2, %v6351_v32  ;;  %vm1155_vm15 = vcmp.ne.f32.partialorder %v179_v44, 0.0  ;;  %vm1156_vm8 = vcmp.ne.f32.partialorder %v180_v45, 0.0  ;;  %vm1157_vm12 = vcmp.ne.f32.partialorder %v181_v18, 0.0 }
 0x142   :  { %v1478_v47 = vmax.f32 %v1477_v6, %v6530_v57  ;;  %v1011_v53 = vsel %vm723_vm11, %v6336_v1, %v867_v5  ;;  %v1012_v27 = vsel %vm724_vm13, %v6339_v13, %v868_v0  ;;  %v6557_v44 = vadd.f32 %v4548_v59, %v437_v41  ;;  %v183_v41 = vld [vmem:[%s9676_s2 + $0x3b0] sm:$0xff] }
 0x143   :  { %v1013_v61 = vsel %vm725_vm2, %v6351_v32, %v869_v58  ;;  %v6552_v34 = vsel %vm1155_vm15, %v1011_v53, -1e+30  ;;  %v6554_v45 = vsel %vm1156_vm8, %v1012_v27, -1e+30  ;;  %v6564_v13 = vadd.f32 %v4538_v55, %v432_v49  ;;  %v182_v32 = vld [vmem:[%s9676_s2 + $0x3a8] sm:$0xff]  ;;  %v447_v27 = vpop.permute.xlu1 %446 }
 0x144   :  { %10237 = vst [vmem:[#allocation90_spill] sm:$0xff] %v6552_v34  ;;  %10238 = vst [vmem:[#allocation91_spill] sm:$0xff] %v6554_v45  ;;  %1479 = vmax.xlane.f32.xlu0 %v1478_v47  ;;  %v6559_v18 = vsel %vm1157_vm12, %v1013_v61, -1e+30  ;;  %v1481_v1 = vmax.f32 %v6552_v34, %v6554_v45  ;;  %v6567_v6 = vadd.f32 %v4540_v56, %v432_v49  ;;  %v184_v61 = vld [vmem:[%s9676_s2 + $0x3b8] sm:$0xff]  ;;  %vm726_vm9 = vcmp.gt.f32.partialorder %v6305_v14, 0.0 }
 0x145   :  { %10239 = vst [vmem:[#allocation92_spill] sm:$0xff] %v6559_v18  ;;  %v6579_v5 = vadd.f32 %v4548_v59, %v432_v49  ;;  %vm727_vm7 = vcmp.gt.f32.partialorder %v6321_v52, 0.0  ;;  %vm728_vm5 = vcmp.gt.f32.partialorder %v6329_v60, 0.0  ;;  %v870_v58 = vmul.f32 0.2, %v6305_v14 }
 0x146   :  { %v1482_v0 = vmax.f32 %v1481_v1, %v6559_v18  ;;  %v871_v47 = vmul.f32 0.2, %v6321_v52  ;;  %v872_v53 = vmul.f32 0.2, %v6329_v60  ;;  %vm1158_vm10 = vcmp.ne.f32.partialorder %v182_v32, 0.0  ;;  %v185_v1 = vld [vmem:[%s9676_s2 + $0x3c0] sm:$0xff] }
 0x147   :  { %vm1159_vm4 = vcmp.ne.f32.partialorder %v183_v41, 0.0  ;;  %vm1160_vm14 = vcmp.ne.f32.partialorder %v184_v61, 0.0  ;;  %vm729_vm6 = vcmp.gt.f32.partialorder %v6412_v36, 0.0  ;;  %v1014_v49 = vsel %vm726_vm9, %v6305_v14, %v870_v58  ;;  %v186_v18 = vld [vmem:[%s9676_s2 + $0x3c8] sm:$0xff]  ;;  %v187_v32 = vld [vmem:[%s9676_s2 + $0x3d0] sm:$0xff] }
 0x148   :  { %1483 = vmax.xlane.f32.xlu1 %v1482_v0  ;;  %v1015_v57 = vsel %vm727_vm7, %v6321_v52, %v871_v47  ;;  %v1016_v45 = vsel %vm728_vm5, %v6329_v60, %v872_v53  ;;  %vm730_vm0 = vcmp.gt.f32.partialorder %v6415_v40, 0.0  ;;  %v6602_v41 = vsel %vm1158_vm10, %v1014_v49, -1e+30 }
 0x149   :  { %10240 = vst [vmem:[#allocation93_spill] sm:$0xff] %v6602_v41  ;;  %v6604_v14 = vsel %vm1159_vm4, %v1015_v57, -1e+30  ;;  %v6606_v52 = vsel %vm1160_vm14, %v1016_v45, -1e+30  ;;  %v6609_v60 = vadd.f32 %v4538_v55, %v447_v27  ;;  %vm731_vm3 = vcmp.gt.f32.partialorder %v6427_v37, 0.0  ;;  %v442_v57 = vpop.permute.xlu0 %441 }
 0x14a   :  { %10241 = vst [vmem:[#allocation94_spill] sm:$0xff] %v6604_v14  ;;  %v1485_v61 = vmax.f32 %v6602_v41, %v6604_v14  ;;  %v873_v0 = vmul.f32 0.2, %v6412_v36  ;;  %v874_v58 = vmul.f32 0.2, %v6415_v40  ;;  %vm1161_vm1 = vcmp.ne.f32.partialorder %v185_v1, 0.0 }
 0x14b   :  { %v875_v47 = vmul.f32 0.2, %v6427_v37  ;;  %vm1162_vm11 = vcmp.ne.f32.partialorder %v186_v18, 0.0  ;;  %vm1163_vm13 = vcmp.ne.f32.partialorder %v187_v32, 0.0  ;;  %v6625_v14 = vadd.f32 %v4540_v56, %v447_v27 }
 0x14c   :  { %v1486_v45 = vmax.f32 %v1485_v61, %v6606_v52  ;;  %v1017_v53 = vsel %vm729_vm6, %v6412_v36, %v873_v0  ;;  %v1018_v49 = vsel %vm730_vm0, %v6415_v40, %v874_v58  ;;  %v6633_v1 = vadd.f32 %v4548_v59, %v447_v27  ;;  %v189_v27 = vld [vmem:[%s9676_s2 + $0x3e0] sm:$0xff] }
 0x14d   :  { %v1019_v41 = vsel %vm731_vm3, %v6427_v37, %v875_v47  ;;  %v6628_v34 = vsel %vm1161_vm1, %v1017_v53, -1e+30  ;;  %v6630_v18 = vsel %vm1162_vm11, %v1018_v49, -1e+30  ;;  %v6640_v40 = vadd.f32 %v4538_v55, %v442_v57  ;;  %v188_v37 = vld [vmem:[%s9676_s2 + $0x3d8] sm:$0xff]  ;;  %v191_v49 = vld [vmem:[%s9676_s2 + $0x3f0] sm:$0xff] }
 0x14e   :  { %1487 = vmax.xlane.f32.xlu0 %v1486_v45  ;;  %v6635_v32 = vsel %vm1163_vm13, %v1019_v41, -1e+30  ;;  %v1489_v36 = vmax.f32 %v6628_v34, %v6630_v18  ;;  %v6643_v61 = vadd.f32 %v4540_v56, %v442_v57  ;;  %v190_v41 = vld [vmem:[%s9676_s2 + $0x3e8] sm:$0xff]  ;;  %v6655_v0 = vadd.f32 %v4548_v59, %v442_v57  ;;  %v6664_v45 = vpop.xlane.xlu0 %1331 }
 0x14f   :  { %vm732_vm2 = vcmp.gt.f32.partialorder %v6381_v24, 0.0  ;;  %vm733_vm15 = vcmp.gt.f32.partialorder %v6397_v10, 0.0  ;;  %vm734_vm8 = vcmp.gt.f32.partialorder %v6405_v63, 0.0  ;;  %v876_v56 = vmul.f32 0.2, %v6381_v24  ;;  %10242 = vst [vmem:[#allocation95_spill] sm:$0xff] %v6664_v45 }
 0x150   :  { %v1490_v55 = vmax.f32 %v1489_v36, %v6635_v32  ;;  %v877_v58 = vmul.f32 0.2, %v6397_v10  ;;  %v878_v47 = vmul.f32 0.2, %v6405_v63  ;;  %vm1164_vm12 = vcmp.ne.f32.partialorder %v188_v37, 0.0  ;;  %v192_v36 = vld [vmem:[%s9676_s2 + $0x3f8] sm:$0xff] }
 0x151   :  { %vm1165_vm9 = vcmp.ne.f32.partialorder %v189_v27, 0.0  ;;  %vm1166_vm7 = vcmp.ne.f32.partialorder %v190_v41, 0.0  ;;  %vm735_vm5 = vcmp.gt.f32.partialorder %v6488_v4, 0.0  ;;  %v1020_v59 = vsel %vm732_vm2, %v6381_v24, %v876_v56  ;;  %v193_v37 = vld [vmem:[%s9676_s2 + $0x400] sm:$0xff] }
 0x152   :  { %1491 = vmax.xlane.f32.xlu1 %v1490_v55  ;;  %v1021_v57 = vsel %vm733_vm15, %v6397_v10, %v877_v58  ;;  %v1022_v53 = vsel %vm734_vm8, %v6405_v63, %v878_v47  ;;  %vm736_vm10 = vcmp.gt.f32.partialorder %v6491_v46, 0.0  ;;  %v6680_v27 = vsel %vm1164_vm12, %v1020_v59, -1e+30  ;;  %v195_v63 = vld [vmem:[%s9676_s2 + $0x410] sm:$0xff] }
 0x153   :  { %v6682_v24 = vsel %vm1165_vm9, %v1021_v57, -1e+30  ;;  %v6684_v10 = vsel %vm1166_vm7, %v1022_v53, -1e+30  ;;  %vm737_vm4 = vcmp.gt.f32.partialorder %v6503_v2, 0.0  ;;  %vm1167_vm14 = vcmp.ne.f32.partialorder %v191_v49, 0.0 }
 0x154   :  { %v1493_v41 = vmax.f32 %v6680_v27, %v6682_v24  ;;  %v879_v55 = vmul.f32 0.2, %v6488_v4  ;;  %v880_v56 = vmul.f32 0.2, %v6491_v46  ;;  %v881_v58 = vmul.f32 0.2, %v6503_v2 }
 0x155   :  { %vm1168_vm6 = vcmp.ne.f32.partialorder %v192_v36, 0.0  ;;  %vm1169_vm0 = vcmp.ne.f32.partialorder %v193_v37, 0.0  ;;  %v194_v53 = vld [vmem:[%s9676_s2 + $0x408] sm:$0xff]  ;;  %vm738_vm3 = vcmp.gt.f32.partialorder %v6457_v8, 0.0  ;;  %vm739_vm1 = vcmp.gt.f32.partialorder %v6473_v11, 0.0 }
 0x156   :  { %v1494_v47 = vmax.f32 %v1493_v41, %v6684_v10  ;;  %v1023_v59 = vsel %vm735_vm5, %v6488_v4, %v879_v55  ;;  %v1024_v57 = vsel %vm736_vm10, %v6491_v46, %v880_v56  ;;  %v1025_v49 = vsel %vm737_vm4, %v6503_v2, %v881_v58  ;;  %v196_v4 = vld [vmem:[%s9676_s2 + $0x418] sm:$0xff]  ;;  %v197_v55 = vld [vmem:[%s9676_s2 + $0x420] sm:$0xff] }
 0x157   :  { %v6707_v36 = vsel %vm1167_vm14, %v1023_v59, -1e+30  ;;  %v6709_v37 = vsel %vm1168_vm6, %v1024_v57, -1e+30  ;;  %v6715_v46 = vsel %vm1169_vm0, %v1025_v49, -1e+30 }
 0x158   :  { %10243 = vst [vmem:[#allocation96_spill] sm:$0xff] %v6709_v37  ;;  %1495 = vmax.xlane.f32.xlu0 %v1494_v47  ;;  %v1497_v41 = vmax.f32 %v6707_v36, %v6709_v37  ;;  %vm740_vm11 = vcmp.gt.f32.partialorder %v6481_v7, 0.0  ;;  %v882_v2 = vmul.f32 0.2, %v6457_v8  ;;  %v883_v56 = vmul.f32 0.2, %v6473_v11 }
 0x159   :  { %v884_v58 = vmul.f32 0.2, %v6481_v7  ;;  %vm1170_vm13 = vcmp.ne.f32.partialorder %v194_v53, 0.0  ;;  %vm1171_vm2 = vcmp.ne.f32.partialorder %v195_v63, 0.0  ;;  %vm1172_vm15 = vcmp.ne.f32.partialorder %v196_v4, 0.0  ;;  %v198_v53 = vld [vmem:[%s9676_s2 + $0x428] sm:$0xff] }
 0x15a   :  { %v1498_v47 = vmax.f32 %v1497_v41, %v6715_v46  ;;  %v1026_v59 = vsel %vm738_vm3, %v6457_v8, %v882_v2  ;;  %vm741_vm8 = vcmp.gt.f32.partialorder %v6564_v13, 0.0  ;;  %v1027_v57 = vsel %vm739_vm1, %v6473_v11, %v883_v56  ;;  %v199_v63 = vld [vmem:[%s9676_s2 + $0x430] sm:$0xff] }
 0x15b   :  { %v1028_v49 = vsel %vm740_vm11, %v6481_v7, %v884_v58  ;;  %v6733_v37 = vsel %vm1170_vm13, %v1026_v59, -1e+30  ;;  %vm742_vm12 = vcmp.gt.f32.partialorder %v6567_v6, 0.0  ;;  %v6742_v8 = vsel %vm1171_vm2, %v1027_v57, -1e+30  ;;  %v200_v57 = vld [vmem:[%s9676_s2 + $0x438] sm:$0xff] }
 0x15c   :  { %10244 = vst [vmem:[#allocation97_spill] sm:$0xff] %v6733_v37  ;;  %1499 = vmax.xlane.f32.xlu1 %v1498_v47  ;;  %10245 = vst [vmem:[#allocation98_spill] sm:$0xff] %v6742_v8  ;;  %v6744_v4 = vsel %vm1172_vm15, %v1028_v49, -1e+30  ;;  %vm743_vm9 = vcmp.gt.f32.partialorder %v6579_v5, 0.0  ;;  %vm1173_vm7 = vcmp.ne.f32.partialorder %v197_v55, 0.0  ;;  %v1501_v11 = vmax.f32 %v6733_v37, %v6742_v8 }
 0x15d   :  { %10246 = vst [vmem:[#allocation99_spill] sm:$0xff] %v6744_v4  ;;  %v885_v7 = vmul.f32 0.2, %v6564_v13  ;;  %v886_v41 = vmul.f32 0.2, %v6567_v6  ;;  %vm1174_vm5 = vcmp.ne.f32.partialorder %v198_v53, 0.0 }
 0x15e   :  { %v887_v2 = vmul.f32 0.2, %v6579_v5  ;;  %vm1175_vm10 = vcmp.ne.f32.partialorder %v199_v63, 0.0  ;;  %vm744_vm4 = vcmp.gt.f32.partialorder %v6533_v54, 0.0  ;;  %vm745_vm14 = vcmp.gt.f32.partialorder %v6549_v33, 0.0  ;;  %v201_v49 = vld [vmem:[%s9676_s2 + $0x440] sm:$0xff] }
 0x15f   :  { %v1502_v56 = vmax.f32 %v1501_v11, %v6744_v4  ;;  %v1029_v58 = vsel %vm741_vm8, %v6564_v13, %v885_v7  ;;  %v1030_v47 = vsel %vm742_vm12, %v6567_v6, %v886_v41  ;;  %v202_v53 = vld [vmem:[%s9676_s2 + $0x448] sm:$0xff]  ;;  %vm746_vm6 = vcmp.gt.f32.partialorder %v6557_v44, 0.0 }
 0x160   :  { %v1031_v59 = vsel %vm743_vm9, %v6579_v5, %v887_v2  ;;  %v6772_v13 = vsel %vm1173_vm7, %v1029_v58, -1e+30  ;;  %v6774_v63 = vsel %vm1174_vm5, %v1030_v47, -1e+30  ;;  %v888_v7 = vmul.f32 0.2, %v6533_v54  ;;  %v6786_v2 = vpop.xlane.xlu0 %1339 }
 0x161   :  { %10247 = vst [vmem:[#allocation100_spill] sm:$0xff] %v6772_v13  ;;  %10248 = vst [vmem:[#allocation101_spill] sm:$0xff] %v6774_v63  ;;  %v6776_v6 = vsel %vm1175_vm10, %v1031_v59, -1e+30  ;;  %1503 = vmax.xlane.f32.xlu0 %v1502_v56  ;;  %v1505_v11 = vmax.f32 %v6772_v13, %v6774_v63  ;;  %v889_v41 = vmul.f32 0.2, %v6549_v33 }
 0x162   :  { %10249 = vst [vmem:[#allocation102_spill] sm:$0xff] %v6776_v6  ;;  %v890_v55 = vmul.f32 0.2, %v6557_v44  ;;  %vm1176_vm0 = vcmp.ne.f32.partialorder %v200_v57, 0.0  ;;  %vm1177_vm3 = vcmp.ne.f32.partialorder %v201_v49, 0.0  ;;  %vm1178_vm1 = vcmp.ne.f32.partialorder %v202_v53, 0.0  ;;  %v6802_v49 = vpop.xlane.xlu1 %1335 }
 0x163   :  { %10250 = vst [vmem:[#allocation103_spill] sm:$0xff] %v6786_v2  ;;  %v1506_v58 = vmax.f32 %v1505_v11, %v6776_v6  ;;  %v1032_v56 = vsel %vm744_vm4, %v6533_v54, %v888_v7  ;;  %v1033_v47 = vsel %vm745_vm14, %v6549_v33, %v889_v41  ;;  %v203_v59 = vld [vmem:[%s9676_s2 + $0x450] sm:$0xff]  ;;  %v204_v57 = vld [vmem:[%s9676_s2 + $0x458] sm:$0xff]  ;;  %vm747_vm11 = vcmp.gt.f32.partialorder %v6640_v40, 0.0  ;;  %10251 = vst [vmem:[#allocation104_spill] sm:$0xff] %v6802_v49 }
 0x164   :  { %v1034_v53 = vsel %vm746_vm6, %v6557_v44, %v890_v55  ;;  %v6805_v11 = vsel %vm1176_vm0, %v1032_v56, -1e+30  ;;  %v6807_v54 = vsel %vm1177_vm3, %v1033_v47, -1e+30  ;;  %v205_v33 = vld [vmem:[%s9676_s2 + $0x460] sm:$0xff]  ;;  %vm748_vm13 = vcmp.gt.f32.partialorder %v6643_v61, 0.0 }
 0x165   :  { %10252 = vst [vmem:[#allocation105_spill] sm:$0xff] %v6805_v11  ;;  %10253 = vst [vmem:[#allocation106_spill] sm:$0xff] %v6807_v54  ;;  %1507 = vmax.xlane.f32.xlu1 %v1506_v58  ;;  %v6813_v7 = vsel %vm1178_vm1, %v1034_v53, -1e+30  ;;  %v1509_v41 = vmax.f32 %v6805_v11, %v6807_v54  ;;  %vm749_vm2 = vcmp.gt.f32.partialorder %v6655_v0, 0.0  ;;  %v206_v55 = vld [vmem:[%s9676_s2 + $0x468] sm:$0xff] }
 0x166   :  { %10254 = vst [vmem:[#allocation107_spill] sm:$0xff] %v6813_v7  ;;  %v891_v44 = vmul.f32 0.2, %v6640_v40  ;;  %v892_v56 = vmul.f32 0.2, %v6643_v61  ;;  %vm1179_vm15 = vcmp.ne.f32.partialorder %v203_v59, 0.0 }
 0x167   :  { %v893_v47 = vmul.f32 0.2, %v6655_v0  ;;  %vm1180_vm8 = vcmp.ne.f32.partialorder %v204_v57, 0.0  ;;  %v1510_v58 = vmax.f32 %v1509_v41, %v6813_v7  ;;  %vm1181_vm12 = vcmp.ne.f32.partialorder %v205_v33, 0.0  ;;  %v207_v59 = vld [vmem:[%s9676_s2 + $0x470] sm:$0xff]  ;;  %v208_v57 = vld [vmem:[%s9676_s2 + $0x478] sm:$0xff] }
 0x168   :  { %v1035_v53 = vsel %vm747_vm11, %v6640_v40, %v891_v44  ;;  %vm750_vm9 = vcmp.gt.f32.partialorder %v6609_v60, 0.0  ;;  %v1036_v5 = vsel %vm748_vm13, %v6643_v61, %v892_v56  ;;  %vm751_vm7 = vcmp.gt.f32.partialorder %v6625_v14, 0.0  ;;  %v6840_v40 = vpop.xlane.xlu0 %1343 }
 0x169   :  { %v1037_v54 = vsel %vm749_vm2, %v6655_v0, %v893_v47  ;;  %v6831_v11 = vsel %vm1179_vm15, %v1035_v53, -1e+30  ;;  %10256 = vst [vmem:[#allocation109_spill] sm:$0xff] %v6840_v40  ;;  %1511 = vmax.xlane.f32.xlu0 %v1510_v58  ;;  %v6842_v33 = vsel %vm1180_vm8, %v1036_v5, -1e+30  ;;  %vm752_vm5 = vcmp.gt.f32.partialorder %v6633_v1, 0.0  ;;  %v6847_v0 = vpop.xlane.xlu1 %1347 }
 0x16a   :  { %10255 = vst [vmem:[#allocation108_spill] sm:$0xff] %v6831_v11  ;;  %10257 = vst [vmem:[#allocation110_spill] sm:$0xff] %v6842_v33  ;;  %v6844_v61 = vsel %vm1181_vm12, %v1037_v54, -1e+30  ;;  %vm1182_vm10 = vcmp.ne.f32.partialorder %v206_v55, 0.0  ;;  %v1513_v41 = vmax.f32 %v6831_v11, %v6842_v33  ;;  %vm1183_vm4 = vcmp.ne.f32.partialorder %v207_v59, 0.0 }
 0x16b   :  { %10258 = vst [vmem:[#allocation111_spill] sm:$0xff] %v6844_v61  ;;  %10259 = vst [vmem:[#allocation112_spill] sm:$0xff] %v6847_v0  ;;  %v894_v44 = vmul.f32 0.2, %v6609_v60  ;;  %v895_v56 = vmul.f32 0.2, %v6625_v14  ;;  %v1523_v5 = vsub.f32 %v4632_v35, %v6664_v45  ;;  %v10260_v54 = vsub.f32 %v4612_v25, %v6664_v45 }
 0x16c   :  { %v896_v47 = vmul.f32 0.2, %v6633_v1  ;;  %vm1184_vm14 = vcmp.ne.f32.partialorder %v208_v57, 0.0  ;;  %v1514_v58 = vmax.f32 %v1513_v41, %v6844_v61 }
 0x16d   :  { %v1665_v55 = vmul.f32 1.442695, %v10260_v54  ;;  %v1038_v53 = vsel %vm750_vm9, %v6609_v60, %v894_v44  ;;  %v1039_v33 = vsel %vm751_vm7, %v6625_v14, %v895_v56  ;;  %v10264_v60 = vsub.f32 %v4615_v26, %v6664_v45  ;;  %v6890_v26 = vpop.xlane.xlu1 %1355 }
 0x16e   :  { %v1040_v59 = vsel %vm752_vm5, %v6633_v1, %v896_v47  ;;  %v6867_v57 = vsel %vm1182_vm10, %v1038_v53, -1e+30  ;;  %v6869_v11 = vsel %vm1183_vm4, %v1039_v33, -1e+30  ;;  %1515 = vmax.xlane.f32.xlu1 %v1514_v58  ;;  %v1669_v44 = vmul.f32 1.442695, %v1523_v5  ;;  %v6880_v1 = vpop.xlane.xlu0 %1351 }
 0x16f   :  { %10261 = vst [vmem:[#allocation113_spill] sm:$0xff] %v6867_v57  ;;  %10262 = vst [vmem:[#allocation114_spill] sm:$0xff] %v6869_v11  ;;  %v6871_v35 = vsel %vm1184_vm14, %v1040_v59, -1e+30  ;;  %3837 = vpow2.f32 %v1665_v55  ;;  %v1517_v25 = vmax.f32 %v6867_v57, %v6869_v11  ;;  %v1667_v41 = vmul.f32 1.442695, %v10264_v60 }
 0x170   :  { %10263 = vst [vmem:[#allocation115_spill] sm:$0xff] %v6871_v35  ;;  %v1524_v14 = vsub.f32 %v4754_v20, %v6802_v49  ;;  %10265 = vst [vmem:[#allocation116_spill] sm:$0xff] %v6880_v1  ;;  %v1525_v33 = vsub.f32 %v4758_v21, %v6802_v49  ;;  %v1526_v56 = vsub.f32 %v4762_v22, %v6802_v49 }
 0x171   :  { %v1527_v47 = vsub.f32 %v4670_v50, %v6786_v2  ;;  %v1528_v54 = vsub.f32 %v4674_v51, %v6786_v2  ;;  %10266 = vst [vmem:[#allocation117_spill] sm:$0xff] %v6890_v26  ;;  %v1518_v5 = vmax.f32 %v1517_v25, %v6871_v35  ;;  %3839 = vpow2.f32 %v1667_v41 }
 0x172   :  { %v1671_v20 = vmul.f32 1.442695, %v1524_v14  ;;  %v1529_v55 = vsub.f32 %v4708_v62, %v6786_v2  ;;  %3841 = vpow2.f32 %v1669_v44  ;;  %v1673_v21 = vmul.f32 1.442695, %v1525_v33  ;;  %v6905_v44 = vpop.xlane.xlu0 %1359  ;;  %v6909_v33 = vpop.xlane.xlu1 %1363 }
 0x173   :  { %v1675_v58 = vmul.f32 1.442695, %v1526_v56  ;;  %v1677_v53 = vmul.f32 1.442695, %v1527_v47  ;;  %1519 = vmax.xlane.f32.xlu0 %v1518_v5  ;;  %v1679_v22 = vmul.f32 1.442695, %v1528_v54  ;;  %v1533_v51 = vsub.f32 %v4843_v38, %v6847_v0 }
 0x174   :  { %3843 = vpow2.f32 %v1671_v20  ;;  %v1681_v50 = vmul.f32 1.442695, %v1529_v55  ;;  %v1534_v59 = vsub.f32 %v4881_v43, %v6847_v0  ;;  %v1535_v25 = vsub.f32 %v4885_v31, %v6847_v0  ;;  %10267 = vst [vmem:[#allocation118_spill] sm:$0xff] %v6905_v44  ;;  %10268 = vst [vmem:[#allocation119_spill] sm:$0xff] %v6909_v33  ;;  %v10269_v56 = vld [vmem:[#allocation5_spill] sm:$0xff]  ;;  %v10270_v54 = vld [vmem:[#allocation6_spill] sm:$0xff] }
 0x175   :  { %3845 = vpow2.f32 %v1673_v21  ;;  %v1530_v62 = vsub.f32 %v4819_v3, %v6840_v40  ;;  %v1689_v60 = vmul.f32 1.442695, %v1533_v51  ;;  %v1531_v41 = vsub.f32 %v4823_v16, %v6840_v40  ;;  %v10275_v51 = vld [vmem:[#allocation4_spill] sm:$0xff] }
 0x176   :  { %3847 = vpow2.f32 %v1675_v58  ;;  %v1691_v14 = vmul.f32 1.442695, %v1534_v59  ;;  %v1532_v38 = vsub.f32 %v4827_v17, %v6840_v40  ;;  %v1693_v43 = vmul.f32 1.442695, %v1535_v25  ;;  %v10271_v17 = vld [vmem:[#allocation2_spill] sm:$0xff]  ;;  %v6927_v25 = vpop.xlane.xlu1 %1371  ;;  %v10296_v40 = vld [vmem:[#allocation13_spill] sm:$0xff] }
 0x177   :  { %3849 = vpow2.f32 %v1677_v53  ;;  %v1539_v31 = vsub.f32 %v4957_v19, %v6890_v26  ;;  %v1683_v3 = vmul.f32 1.442695, %v1530_v62  ;;  %v1540_v47 = vsub.f32 %v10269_v56, %v6890_v26  ;;  %v10273_v19 = vld [vmem:[#allocation3_spill] sm:$0xff]  ;;  %10276 = vst [vmem:[#allocation2_spill] sm:$0xff] %v6927_v25 }
 0x178   :  { %3851 = vpow2.f32 %v1679_v22  ;;  %v1685_v16 = vmul.f32 1.442695, %v1531_v41  ;;  %v1541_v5 = vsub.f32 %v10270_v54, %v6890_v26  ;;  %v1687_v20 = vmul.f32 1.442695, %v1532_v38  ;;  %v6923_v22 = vpop.xlane.xlu0 %1367  ;;  %v10293_v26 = vld [vmem:[#allocation17_spill] sm:$0xff] }
 0x179   :  { %3853 = vpow2.f32 %v1681_v50  ;;  %v1536_v55 = vsub.f32 %v10271_v17, %v6880_v1  ;;  %v1701_v58 = vmul.f32 1.442695, %v1539_v31  ;;  %v1537_v53 = vsub.f32 %v10273_v19, %v6880_v1  ;;  %10274 = vst [vmem:[#allocation6_spill] sm:$0xff] %v6923_v22 }
 0x17a   :  { %3855 = vpow2.f32 %v1689_v60  ;;  %v1703_v50 = vmul.f32 1.442695, %v1540_v47  ;;  %v1538_v59 = vsub.f32 %v10275_v51, %v6880_v1  ;;  %v1705_v62 = vmul.f32 1.442695, %v1541_v5  ;;  %v10277_v60 = vld [vmem:[#allocation10_spill] sm:$0xff]  ;;  %v10281_v47 = vld [vmem:[#allocation12_spill] sm:$0xff] }
 0x17b   :  { %3857 = vpow2.f32 %v1691_v14  ;;  %v1545_v41 = vsub.f32 %v10277_v60, %v6909_v33  ;;  %v1695_v38 = vmul.f32 1.442695, %v1536_v55  ;;  %v1547_v54 = vsub.f32 %v10281_v47, %v6909_v33  ;;  %v10283_v5 = vld [vmem:[#allocation7_spill] sm:$0xff]  ;;  %v10288_v47 = vld [vmem:[#allocation9_spill] sm:$0xff] }
 0x17c   :  { %v6919_v21 = vpop.eup %3837  ;;  %3859 = vpow2.f32 %v1693_v43  ;;  %v10279_v43 = vld [vmem:[#allocation11_spill] sm:$0xff]  ;;  %v1542_v19 = vsub.f32 %v10283_v5, %v6905_v44 }
 0x17d   :  { %10272 = vst [vmem:[#allocation5_spill] sm:$0xff] %v6919_v21  ;;  %3861 = vpow2.f32 %v1683_v3  ;;  %v1546_v31 = vsub.f32 %v10279_v43, %v6909_v33  ;;  %v1697_v3 = vmul.f32 1.442695, %v1537_v53  ;;  %v1713_v60 = vmul.f32 1.442695, %v1545_v41  ;;  %v6947_v43 = vpop.xlane.xlu0 %1375 }
 0x17e   :  { %3863 = vpow2.f32 %v1685_v16  ;;  %v6931_v14 = vpop.eup %3839  ;;  %v1699_v16 = vmul.f32 1.442695, %v1538_v59  ;;  %10286 = vst [vmem:[#allocation12_spill] sm:$0xff] %v6947_v43  ;;  %v6953_v59 = vpop.xlane.xlu1 %1379  ;;  %v1717_v5 = vmul.f32 1.442695, %v1547_v54 }
 0x17f   :  { %10278 = vst [vmem:[#allocation3_spill] sm:$0xff] %v6931_v14  ;;  %3865 = vpow2.f32 %v1687_v20  ;;  %v6935_v56 = vpop.eup %3841  ;;  %v10284_v20 = vld [vmem:[#allocation8_spill] sm:$0xff]  ;;  %v1715_v53 = vmul.f32 1.442695, %v1546_v31 }
 0x180   :  { %10280 = vst [vmem:[#allocation4_spill] sm:$0xff] %v6935_v56  ;;  %3867 = vpow2.f32 %v1701_v58  ;;  %v1543_v55 = vsub.f32 %v10284_v20, %v6905_v44  ;;  %10289 = vst [vmem:[#allocation8_spill] sm:$0xff] %v6953_v59  ;;  %v10291_v20 = vld [vmem:[#allocation16_spill] sm:$0xff] }
 0x181   :  { %v6939_v17 = vpop.eup %3843  ;;  %3869 = vpow2.f32 %v1703_v50  ;;  %v1544_v50 = vsub.f32 %v10288_v47, %v6905_v44  ;;  %v1551_v1 = vsub.f32 %v10291_v20, %v6927_v25  ;;  %v1552_v47 = vsub.f32 %v10293_v26, %v6927_v25  ;;  %v10299_v26 = vld [vmem:[#allocation14_spill] sm:$0xff] }
 0x182   :  { %10282 = vst [vmem:[#allocation10_spill] sm:$0xff] %v6939_v17  ;;  %v6945_v51 = vpop.eup %3845  ;;  %3871 = vpow2.f32 %v1705_v62  ;;  %v1953_v62 = vadd.f32 %v6931_v14, %v6919_v21  ;;  %v1709_v31 = vmul.f32 1.442695, %v1543_v55  ;;  %v1548_v20 = vsub.f32 %v10296_v40, %v6923_v22 }
 0x183   :  { %10285 = vst [vmem:[#allocation11_spill] sm:$0xff] %v6945_v51  ;;  %v6949_v58 = vpop.eup %3847  ;;  %3873 = vpow2.f32 %v1695_v38  ;;  %v1707_v38 = vmul.f32 1.442695, %v1542_v19  ;;  %v1725_v55 = vmul.f32 1.442695, %v1551_v1  ;;  %v1549_v2 = vsub.f32 %v10299_v26, %v6923_v22  ;;  %v6988_v1 = vpop.xlane.xlu1 %1387 }
 0x184   :  { %10287 = vst [vmem:[#allocation7_spill] sm:$0xff] %v6949_v58  ;;  %v6955_v33 = vpop.eup %3849  ;;  %3875 = vpow2.f32 %v1697_v3  ;;  %v10295_v3 = vld [vmem:[#allocation18_spill] sm:$0xff]  ;;  %v1954_v0 = vadd.f32 %v6935_v56, %v1953_v62  ;;  %v1727_v62 = vmul.f32 1.442695, %v1552_v47  ;;  %10303 = vst [vmem:[#allocation120_spill] sm:$0xff] %v6988_v1 }
 0x185   :  { %10290 = vst [vmem:[#allocation9_spill] sm:$0xff] %v6955_v33  ;;  %v6961_v41 = vpop.eup %3851  ;;  %3877 = vpow2.f32 %v1699_v16  ;;  %v1553_v54 = vsub.f32 %v10295_v3, %v6927_v25  ;;  %v1711_v16 = vmul.f32 1.442695, %v1544_v50  ;;  %v6980_v3 = vpop.xlane.xlu0 %1383  ;;  %v1721_v61 = vmul.f32 1.442695, %v1549_v2  ;;  %v10314_v2 = vld [vmem:[#allocation21_spill] sm:$0xff] }
 0x186   :  { %10292 = vst [vmem:[#allocation16_spill] sm:$0xff] %v6961_v41  ;;  %v6965_v44 = vpop.eup %3853  ;;  %3879 = vpow2.f32 %v1713_v60  ;;  %v10300_v60 = vld [vmem:[#allocation15_spill] sm:$0xff]  ;;  %1955 = vadd.xlane.f32.xlu1 %v1954_v0  ;;  %10301 = vst [vmem:[#allocation14_spill] sm:$0xff] %v6980_v3  ;;  %v1961_v50 = vadd.f32 %v6961_v41, %v6955_v33  ;;  %v10305_v0 = vld [vmem:[#allocation22_spill] sm:$0xff] }
 0x187   :  { %10294 = vst [vmem:[#allocation17_spill] sm:$0xff] %v6965_v44  ;;  %v6972_v49 = vpop.eup %3855  ;;  %3881 = vpow2.f32 %v1715_v53  ;;  %v1550_v45 = vsub.f32 %v10300_v60, %v6923_v22  ;;  %v1957_v53 = vadd.f32 %v6945_v51, %v6939_v17  ;;  %v1729_v26 = vmul.f32 1.442695, %v1553_v54  ;;  %v10309_v54 = vld [vmem:[#allocation24_spill] sm:$0xff] }
 0x188   :  { %10297 = vst [vmem:[#allocation18_spill] sm:$0xff] %v6972_v49  ;;  %v6974_v19 = vpop.eup %3857  ;;  %3883 = vpow2.f32 %v1717_v5  ;;  %v1719_v60 = vmul.f32 1.442695, %v1548_v20  ;;  %v1557_v22 = vsub.f32 %v10305_v0, %v6953_v59  ;;  %v1962_v11 = vadd.f32 %v6965_v44, %v1961_v50 }
 0x189   :  { %10298 = vst [vmem:[#allocation13_spill] sm:$0xff] %v6974_v19  ;;  %v6982_v40 = vpop.eup %3859  ;;  %3885 = vpow2.f32 %v1707_v38  ;;  %v10307_v38 = vld [vmem:[#allocation23_spill] sm:$0xff]  ;;  %v1958_v35 = vadd.f32 %v6949_v58, %v1957_v53  ;;  %v1559_v20 = vsub.f32 %v10309_v54, %v6953_v59  ;;  %v1969_v53 = vadd.f32 %v6974_v19, %v6972_v49  ;;  %v7018_v54 = vpop.xlane.xlu0 %1391 }
 0x18a   :  { %10302 = vst [vmem:[#allocation15_spill] sm:$0xff] %v6982_v40  ;;  %v6990_v5 = vpop.eup %3861  ;;  %3887 = vpow2.f32 %v1709_v31  ;;  %v1558_v47 = vsub.f32 %v10307_v38, %v6953_v59  ;;  %v1723_v31 = vmul.f32 1.442695, %v1550_v45  ;;  %v10312_v38 = vld [vmem:[#allocation20_spill] sm:$0xff]  ;;  %1963 = vadd.xlane.f32.xlu1 %v1962_v11  ;;  %v1737_v45 = vmul.f32 1.442695, %v1557_v22 }
 0x18b   :  { %10304 = vst [vmem:[#allocation121_spill] sm:$0xff] %v6990_v5  ;;  %v6994_v25 = vpop.eup %3863  ;;  %3889 = vpow2.f32 %v1711_v16  ;;  %v10311_v16 = vld [vmem:[#allocation19_spill] sm:$0xff]  ;;  %v1555_v6 = vsub.f32 %v10312_v38, %v6947_v43  ;;  %1959 = vadd.xlane.f32.xlu0 %v1958_v35  ;;  %v1556_v50 = vsub.f32 %v10314_v2, %v6947_v43  ;;  %10315 = vst [vmem:[#allocation20_spill] sm:$0xff] %v7018_v54  ;;  %v7023_v38 = vpop.xlane.xlu1 %1395  ;;  %v1741_v22 = vmul.f32 1.442695, %v1559_v20 }
 0x18c   :  { %10306 = vst [vmem:[#allocation22_spill] sm:$0xff] %v6994_v25  ;;  %v7000_v57 = vpop.eup %3865  ;;  %3891 = vpow2.f32 %v1725_v55  ;;  %v1554_v0 = vsub.f32 %v10311_v16, %v6947_v43  ;;  %v1739_v35 = vmul.f32 1.442695, %v1558_v47  ;;  %v1970_v11 = vadd.f32 %v6982_v40, %v1969_v53  ;;  %10317 = vst [vmem:[#allocation122_spill] sm:$0xff] %v7023_v38 }
 0x18d   :  { %10308 = vst [vmem:[#allocation23_spill] sm:$0xff] %v7000_v57  ;;  %v7004_v7 = vpop.eup %3867  ;;  %3893 = vpow2.f32 %v1727_v62  ;;  %v1965_v62 = vadd.f32 %v6994_v25, %v6990_v5  ;;  %v1733_v4 = vmul.f32 1.442695, %v1555_v6  ;;  %v1735_v8 = vmul.f32 1.442695, %v1556_v50 }
 0x18e   :  { %10310 = vst [vmem:[#allocation24_spill] sm:$0xff] %v7004_v7  ;;  %v7012_v55 = vpop.eup %3869  ;;  %3895 = vpow2.f32 %v1729_v26  ;;  %v10319_v26 = vld [vmem:[#allocation28_spill] sm:$0xff]  ;;  %v1731_v13 = vmul.f32 1.442695, %v1554_v0  ;;  %1971 = vadd.xlane.f32.xlu1 %v1970_v11  ;;  %v10326_v0 = vld [vmem:[#allocation26_spill] sm:$0xff] }
 0x18f   :  { %10313 = vst [vmem:[#allocation19_spill] sm:$0xff] %v7012_v55  ;;  %v7020_v16 = vpop.eup %3871  ;;  %3897 = vpow2.f32 %v1719_v60  ;;  %v1563_v2 = vsub.f32 %v10319_v26, %v6988_v1  ;;  %v1966_v43 = vadd.f32 %v7000_v57, %v1965_v62  ;;  %v10321_v60 = vld [vmem:[#allocation29_spill] sm:$0xff]  ;;  %v1561_v37 = vsub.f32 %v10326_v0, %v6980_v3 }
 0x190   :  { %10316 = vst [vmem:[#allocation21_spill] sm:$0xff] %v7020_v16  ;;  %v7025_v59 = vpop.eup %3873  ;;  %3899 = vpow2.f32 %v1721_v61  ;;  %v1564_v47 = vsub.f32 %v10321_v60, %v6988_v1  ;;  %v10323_v61 = vld [vmem:[#allocation30_spill] sm:$0xff]  ;;  %v10325_v62 = vld [vmem:[#allocation25_spill] sm:$0xff]  ;;  %v1977_v11 = vadd.f32 %v7012_v55, %v7004_v7 }
 0x191   :  { %10318 = vst [vmem:[#allocation123_spill] sm:$0xff] %v7025_v59  ;;  %v7030_v63 = vpop.eup %3875  ;;  %3901 = vpow2.f32 %v1723_v31  ;;  %v1565_v20 = vsub.f32 %v10323_v61, %v6988_v1  ;;  %1967 = vadd.xlane.f32.xlu0 %v1966_v43  ;;  %v1560_v31 = vsub.f32 %v10325_v62, %v6980_v3  ;;  %v1749_v6 = vmul.f32 1.442695, %v1563_v2  ;;  %v7050_v43 = vpop.xlane.xlu0 %1399  ;;  %v10330_v61 = vld [vmem:[#allocation27_spill] sm:$0xff]  ;;  %v10333_v2 = vld [vmem:[#allocation34_spill] sm:$0xff] }
 0x192   :  { %10320 = vst [vmem:[#allocation28_spill] sm:$0xff] %v7030_v63  ;;  %v7034_v53 = vpop.eup %3877  ;;  %3903 = vpow2.f32 %v1737_v45  ;;  %v1973_v45 = vadd.f32 %v7030_v63, %v7025_v59  ;;  %10328 = vst [vmem:[#allocation26_spill] sm:$0xff] %v7050_v43  ;;  %v1562_v62 = vsub.f32 %v10330_v61, %v6980_v3  ;;  %v1978_v0 = vadd.f32 %v7020_v16, %v1977_v11  ;;  %v7057_v1 = vpop.xlane.xlu1 %1403  ;;  %v10335_v61 = vld [vmem:[#allocation35_spill] sm:$0xff] }
 0x193   :  { %10322 = vst [vmem:[#allocation29_spill] sm:$0xff] %v7034_v53  ;;  %v7038_v26 = vpop.eup %3879  ;;  %3905 = vpow2.f32 %v1739_v35  ;;  %v1751_v35 = vmul.f32 1.442695, %v1564_v47  ;;  %10331 = vst [vmem:[#allocation27_spill] sm:$0xff] %v7057_v1  ;;  %v1569_v63 = vsub.f32 %v10333_v2, %v7023_v38  ;;  %v1745_v47 = vmul.f32 1.442695, %v1561_v37 }
 0x194   :  { %10324 = vst [vmem:[#allocation30_spill] sm:$0xff] %v7038_v26  ;;  %v7046_v60 = vpop.eup %3881  ;;  %3907 = vpow2.f32 %v1741_v22  ;;  %v1753_v22 = vmul.f32 1.442695, %v1565_v20  ;;  %v1974_v59 = vadd.f32 %v7034_v53, %v1973_v45  ;;  %v1570_v3 = vsub.f32 %v10335_v61, %v7023_v38  ;;  %1979 = vadd.xlane.f32.xlu1 %v1978_v0  ;;  %v10338_v16 = vld [vmem:[#allocation31_spill] sm:$0xff] }
 0x195   :  { %10327 = vst [vmem:[#allocation25_spill] sm:$0xff] %v7046_v60  ;;  %v7052_v50 = vpop.eup %3883  ;;  %3909 = vpow2.f32 %v1731_v13  ;;  %v1743_v13 = vmul.f32 1.442695, %v1560_v31  ;;  %v1566_v2 = vsub.f32 %v10338_v16, %v7018_v54  ;;  %v1985_v45 = vadd.f32 %v7046_v60, %v7038_v26  ;;  %v10340_v31 = vld [vmem:[#allocation32_spill] sm:$0xff] }
 0x196   :  { %10329 = vst [vmem:[#allocation124_spill] sm:$0xff] %v7052_v50  ;;  %v7059_v55 = vpop.eup %3885  ;;  %3911 = vpow2.f32 %v1733_v4  ;;  %v10337_v4 = vld [vmem:[#allocation36_spill] sm:$0xff]  ;;  %1975 = vadd.xlane.f32.xlu0 %v1974_v59  ;;  %v1747_v37 = vmul.f32 1.442695, %v1562_v62  ;;  %v1567_v0 = vsub.f32 %v10340_v31, %v7018_v54  ;;  %v7085_v59 = vpop.xlane.xlu0 %1407  ;;  %v1763_v60 = vmul.f32 1.442695, %v1570_v3 }
 0x197   :  { %10332 = vst [vmem:[#allocation125_spill] sm:$0xff] %v7059_v55  ;;  %v7064_v7 = vpop.eup %3887  ;;  %3913 = vpow2.f32 %v1735_v8  ;;  %v1571_v20 = vsub.f32 %v10337_v4, %v7023_v38  ;;  %v1761_v4 = vmul.f32 1.442695, %v1569_v63  ;;  %v1986_v16 = vadd.f32 %v7052_v50, %v1985_v45  ;;  %10342 = vst [vmem:[#allocation32_spill] sm:$0xff] %v7085_v59  ;;  %v7092_v26 = vpop.xlane.xlu1 %1411  ;;  %v10347_v45 = vld [vmem:[#allocation40_spill] sm:$0xff] }
 0x198   :  { %10334 = vst [vmem:[#allocation34_spill] sm:$0xff] %v7064_v7  ;;  %v7068_v11 = vpop.eup %3889  ;;  %3915 = vpow2.f32 %v1749_v6  ;;  %v1981_v6 = vadd.f32 %v7064_v7, %v7059_v55  ;;  %v1755_v63 = vmul.f32 1.442695, %v1566_v2  ;;  %v1575_v50 = vsub.f32 %v10347_v45, %v7057_v1  ;;  %v10352_v2 = vld [vmem:[#allocation37_spill] sm:$0xff] }
 0x199   :  { %10336 = vst [vmem:[#allocation35_spill] sm:$0xff] %v7068_v11  ;;  %v7076_v8 = vpop.eup %3891  ;;  %3917 = vpow2.f32 %v1751_v35  ;;  %v10344_v35 = vld [vmem:[#allocation33_spill] sm:$0xff]  ;;  %1987 = vadd.xlane.f32.xlu1 %v1986_v16  ;;  %v1757_v3 = vmul.f32 1.442695, %v1567_v0  ;;  %v1572_v16 = vsub.f32 %v10352_v2, %v7050_v43 }
 0x19a   :  { %10339 = vst [vmem:[#allocation36_spill] sm:$0xff] %v7076_v8  ;;  %v7082_v61 = vpop.eup %3893  ;;  %3919 = vpow2.f32 %v1753_v22  ;;  %v1568_v62 = vsub.f32 %v10344_v35, %v7018_v54  ;;  %v1982_v31 = vadd.f32 %v7068_v11, %v1981_v6  ;;  %10345 = vst [vmem:[#allocation33_spill] sm:$0xff] %v7092_v26  ;;  %v1765_v22 = vmul.f32 1.442695, %v1571_v20 }
 0x19b   :  { %10341 = vst [vmem:[#allocation31_spill] sm:$0xff] %v7082_v61  ;;  %v7087_v38 = vpop.eup %3895  ;;  %3921 = vpow2.f32 %v1743_v13  ;;  %v10349_v13 = vld [vmem:[#allocation41_spill] sm:$0xff]  ;;  %v1993_v6 = vadd.f32 %v7082_v61, %v7076_v8  ;;  %v7122_v8 = vpop.xlane.xlu0 %1415 }
 0x19c   :  { %10343 = vst [vmem:[#allocation126_spill] sm:$0xff] %v7087_v38  ;;  %v7094_v7 = vpop.eup %3897  ;;  %3923 = vpow2.f32 %v1745_v47  ;;  %v1576_v35 = vsub.f32 %v10349_v13, %v7057_v1  ;;  %1983 = vadd.xlane.f32.xlu0 %v1982_v31  ;;  %v10351_v47 = vld [vmem:[#allocation42_spill] sm:$0xff]  ;;  %v1759_v45 = vmul.f32 1.442695, %v1568_v62  ;;  %v7126_v62 = vpop.xlane.xlu1 %1419 }
 0x19d   :  { %10346 = vst [vmem:[#allocation127_spill] sm:$0xff] %v7094_v7  ;;  %v7098_v55 = vpop.eup %3899  ;;  %3925 = vpow2.f32 %v1747_v37  ;;  %v1577_v20 = vsub.f32 %v10351_v47, %v7057_v1  ;;  %v10354_v31 = vld [vmem:[#allocation38_spill] sm:$0xff]  ;;  %v1994_v11 = vadd.f32 %v7087_v38, %v1993_v6  ;;  %v10356_v47 = vld [vmem:[#allocation39_spill] sm:$0xff]  ;;  %10359 = vst [vmem:[#allocation128_spill] sm:$0xff] %v7126_v62 }
 0x19e   :  { %10348 = vst [vmem:[#allocation40_spill] sm:$0xff] %v7098_v55  ;;  %v7104_v54 = vpop.eup %3901  ;;  %3927 = vpow2.f32 %v1761_v4  ;;  %v1989_v37 = vadd.f32 %v7098_v55, %v7094_v7  ;;  %v1573_v13 = vsub.f32 %v10354_v31, %v7050_v43  ;;  %v1773_v4 = vmul.f32 1.442695, %v1575_v50  ;;  %10357 = vst [vmem:[#allocation38_spill] sm:$0xff] %v7122_v8  ;;  %v10361_v50 = vld [vmem:[#allocation46_spill] sm:$0xff] }
 0x19f   :  { %10350 = vst [vmem:[#allocation41_spill] sm:$0xff] %v7104_v54  ;;  %v7112_v0 = vpop.eup %3903  ;;  %3929 = vpow2.f32 %v1763_v60  ;;  %v1574_v1 = vsub.f32 %v10356_v47, %v7050_v43  ;;  %v1775_v60 = vmul.f32 1.442695, %v1576_v35  ;;  %1995 = vadd.xlane.f32.xlu1 %v1994_v11  ;;  %v1777_v6 = vmul.f32 1.442695, %v1577_v20  ;;  %v10363_v43 = vld [vmem:[#allocation47_spill] sm:$0xff] }
 0x1a0   :  { %10353 = vst [vmem:[#allocation42_spill] sm:$0xff] %v7112_v0  ;;  %v7117_v61 = vpop.eup %3905  ;;  %3931 = vpow2.f32 %v1765_v22  ;;  %v1990_v2 = vadd.f32 %v7104_v54, %v1989_v37  ;;  %v1767_v22 = vmul.f32 1.442695, %v1572_v16  ;;  %v1581_v38 = vsub.f32 %v10361_v50, %v7092_v26  ;;  %v10365_v20 = vld [vmem:[#allocation48_spill] sm:$0xff] }
 0x1a1   :  { %10355 = vst [vmem:[#allocation37_spill] sm:$0xff] %v7117_v61  ;;  %v7124_v55 = vpop.eup %3907  ;;  %3933 = vpow2.f32 %v1755_v63  ;;  %v1769_v37 = vmul.f32 1.442695, %v1573_v13  ;;  %v1582_v63 = vsub.f32 %v10363_v43, %v7092_v26  ;;  %v2001_v11 = vadd.f32 %v7117_v61, %v7112_v0  ;;  %v10368_v43 = vld [vmem:[#allocation44_spill] sm:$0xff] }
 0x1a2   :  { %10358 = vst [vmem:[#allocation39_spill] sm:$0xff] %v7124_v55  ;;  %v7128_v31 = vpop.eup %3909  ;;  %3935 = vpow2.f32 %v1757_v3  ;;  %1991 = vadd.xlane.f32.xlu0 %v1990_v2  ;;  %v1771_v3 = vmul.f32 1.442695, %v1574_v1  ;;  %v1583_v16 = vsub.f32 %v10365_v20, %v7092_v26  ;;  %v1579_v54 = vsub.f32 %v10368_v43, %v7085_v59  ;;  %v7154_v20 = vpop.xlane.xlu0 %1423 }
 0x1a3   :  { %10360 = vst [vmem:[#allocation129_spill] sm:$0xff] %v7128_v31  ;;  %v7132_v47 = vpop.eup %3911  ;;  %3937 = vpow2.f32 %v1759_v45  ;;  %v10367_v45 = vld [vmem:[#allocation43_spill] sm:$0xff]  ;;  %v2002_v61 = vadd.f32 %v7124_v55, %v2001_v11  ;;  %v1785_v1 = vmul.f32 1.442695, %v1581_v38  ;;  %10370 = vst [vmem:[#allocation44_spill] sm:$0xff] %v7154_v20  ;;  %v1587_v38 = vsub.f32 %v5864_v9, %v7126_v62 }
 0x1a4   :  { %10362 = vst [vmem:[#allocation46_spill] sm:$0xff] %v7132_v47  ;;  %v7138_v35 = vpop.eup %3913  ;;  %3939 = vpow2.f32 %v1773_v4  ;;  %v1997_v2 = vadd.f32 %v7132_v47, %v7128_v31  ;;  %v1578_v13 = vsub.f32 %v10367_v45, %v7085_v59  ;;  %v10372_v47 = vld [vmem:[#allocation45_spill] sm:$0xff]  ;;  %v7160_v31 = vpop.xlane.xlu1 %1427  ;;  %v1789_v11 = vmul.f32 1.442695, %v1583_v16 }
 0x1a5   :  { %10364 = vst [vmem:[#allocation47_spill] sm:$0xff] %v7138_v35  ;;  %v7144_v50 = vpop.eup %3915  ;;  %3941 = vpow2.f32 %v1775_v60  ;;  %v1787_v60 = vmul.f32 1.442695, %v1582_v63  ;;  %v1580_v45 = vsub.f32 %v10372_v47, %v7085_v59  ;;  %2003 = vadd.xlane.f32.xlu1 %v2002_v61  ;;  %10373 = vst [vmem:[#allocation45_spill] sm:$0xff] %v7160_v31  ;;  %v1781_v63 = vmul.f32 1.442695, %v1579_v54 }
 0x1a6   :  { %10366 = vst [vmem:[#allocation48_spill] sm:$0xff] %v7144_v50  ;;  %v7151_v0 = vpop.eup %3917  ;;  %3943 = vpow2.f32 %v1777_v6  ;;  %v1998_v4 = vadd.f32 %v7138_v35, %v1997_v2  ;;  %v10376_v61 = vld [vmem:[#allocation52_spill] sm:$0xff]  ;;  %v10380_v54 = vld [vmem:[#allocation49_spill] sm:$0xff] }
 0x1a7   :  { %10369 = vst [vmem:[#allocation43_spill] sm:$0xff] %v7151_v0  ;;  %v7156_v26 = vpop.eup %3919  ;;  %3945 = vpow2.f32 %v1767_v22  ;;  %v2009_v6 = vadd.f32 %v7151_v0, %v7144_v50  ;;  %v1779_v22 = vmul.f32 1.442695, %v1578_v13  ;;  %v1588_v47 = vsub.f32 %v10376_v61, %v7126_v62 }
 0x1a8   :  { %10371 = vst [vmem:[#allocation130_spill] sm:$0xff] %v7156_v26  ;;  %v7162_v43 = vpop.eup %3921  ;;  %3947 = vpow2.f32 %v1769_v37  ;;  %1999 = vadd.xlane.f32.xlu0 %v1998_v4  ;;  %v10378_v37 = vld [vmem:[#allocation53_spill] sm:$0xff]  ;;  %v1584_v13 = vsub.f32 %v10380_v54, %v7122_v8  ;;  %v1797_v61 = vmul.f32 1.442695, %v1587_v38  ;;  %v7194_v54 = vpop.xlane.xlu1 %1435 }
 0x1a9   :  { %10374 = vst [vmem:[#allocation131_spill] sm:$0xff] %v7162_v43  ;;  %v7168_v2 = vpop.eup %3923  ;;  %3949 = vpow2.f32 %v1771_v3  ;;  %v1589_v16 = vsub.f32 %v10378_v37, %v7126_v62  ;;  %v2010_v9 = vadd.f32 %v7156_v26, %v2009_v6  ;;  %v1783_v3 = vmul.f32 1.442695, %v1580_v45  ;;  %v7188_v37 = vpop.xlane.xlu0 %1431  ;;  %v10385_v45 = vld [vmem:[#allocation51_spill] sm:$0xff] }
 0x1aa   :  { %10375 = vst [vmem:[#allocation132_spill] sm:$0xff] %v7168_v2  ;;  %v7172_v59 = vpop.eup %3925  ;;  %3951 = vpow2.f32 %v1785_v1  ;;  %v2005_v4 = vadd.f32 %v7168_v2, %v7162_v43  ;;  %v10382_v1 = vld [vmem:[#allocation50_spill] sm:$0xff]  ;;  %v1586_v26 = vsub.f32 %v10385_v45, %v7122_v8  ;;  %10386 = vst [vmem:[#allocation51_spill] sm:$0xff] %v7194_v54  ;;  %v10391_v45 = vld [vmem:[#allocation59_spill] sm:$0xff] }
 0x1ab   :  { %10377 = vst [vmem:[#allocation52_spill] sm:$0xff] %v7172_v59  ;;  %v7179_v35 = vpop.eup %3927  ;;  %3953 = vpow2.f32 %v1787_v60  ;;  %v1585_v0 = vsub.f32 %v10382_v1, %v7122_v8  ;;  %2011 = vadd.xlane.f32.xlu1 %v2010_v9  ;;  %10383 = vst [vmem:[#allocation50_spill] sm:$0xff] %v7188_v37  ;;  %v1799_v60 = vmul.f32 1.442695, %v1588_v47  ;;  %v1801_v9 = vmul.f32 1.442695, %v1589_v16 }
 0x1ac   :  { %10379 = vst [vmem:[#allocation53_spill] sm:$0xff] %v7179_v35  ;;  %v7183_v55 = vpop.eup %3929  ;;  %3955 = vpow2.f32 %v1789_v11  ;;  %v2006_v6 = vadd.f32 %v7172_v59, %v2005_v4  ;;  %v10388_v4 = vld [vmem:[#allocation57_spill] sm:$0xff]  ;;  %v10389_v59 = vld [vmem:[#allocation58_spill] sm:$0xff]  ;;  %v1791_v47 = vmul.f32 1.442695, %v1584_v13  ;;  %v1595_v8 = vsub.f32 %v10391_v45, %v7160_v31  ;;  %v10395_v13 = vld [vmem:[#allocation55_spill] sm:$0xff] }
 0x1ad   :  { %10381 = vst [vmem:[#allocation49_spill] sm:$0xff] %v7183_v55  ;;  %v7190_v62 = vpop.eup %3931  ;;  %3957 = vpow2.f32 %v1779_v22  ;;  %v2017_v11 = vadd.f32 %v7183_v55, %v7179_v35  ;;  %v1593_v1 = vsub.f32 %v10388_v4, %v7160_v31  ;;  %v1594_v2 = vsub.f32 %v10389_v59, %v7160_v31  ;;  %v10393_v16 = vld [vmem:[#allocation54_spill] sm:$0xff]  ;;  %v10396_v45 = vld [vmem:[#allocation56_spill] sm:$0xff] }
 0x1ae   :  { %10384 = vst [vmem:[#allocation133_spill] sm:$0xff] %v7190_v62  ;;  %v7198_v38 = vpop.eup %3933  ;;  %3959 = vpow2.f32 %v1781_v63  ;;  %2007 = vadd.xlane.f32.xlu0 %v2006_v6  ;;  %v1793_v63 = vmul.f32 1.442695, %v1585_v0  ;;  %v1590_v4 = vsub.f32 %v10393_v16, %v7154_v20  ;;  %v1591_v43 = vsub.f32 %v10395_v13, %v7154_v20  ;;  %v7230_v13 = vpop.xlane.xlu1 %1443 }
 0x1af   :  { %10387 = vst [vmem:[#allocation134_spill] sm:$0xff] %v7198_v38  ;;  %v7204_v22 = vpop.eup %3935  ;;  %3961 = vpow2.f32 %v1783_v3  ;;  %v2018_v55 = vadd.f32 %v7190_v62, %v2017_v11  ;;  %v1795_v3 = vmul.f32 1.442695, %v1586_v26  ;;  %v1592_v11 = vsub.f32 %v10396_v45, %v7154_v20  ;;  %v7224_v62 = vpop.xlane.xlu0 %1439  ;;  %10400 = vst [vmem:[#allocation135_spill] sm:$0xff] %v7230_v13 }
 0x1b0   :  { %10390 = vst [vmem:[#allocation57_spill] sm:$0xff] %v7204_v22  ;;  %v7209_v35 = vpop.eup %3937  ;;  %3963 = vpow2.f32 %v1797_v61  ;;  %v2013_v59 = vadd.f32 %v7204_v22, %v7198_v38  ;;  %v1809_v0 = vmul.f32 1.442695, %v1593_v1  ;;  %v1811_v61 = vmul.f32 1.442695, %v1594_v2  ;;  %10398 = vst [vmem:[#allocation55_spill] sm:$0xff] %v7224_v62 }
 0x1b1   :  { %10392 = vst [vmem:[#allocation58_spill] sm:$0xff] %v7209_v35  ;;  %v7215_v6 = vpop.eup %3939  ;;  %3965 = vpow2.f32 %v1799_v60  ;;  %2019 = vadd.xlane.f32.xlu1 %v2018_v55  ;;  %v1813_v26 = vmul.f32 1.442695, %v1595_v8  ;;  %v1599_v60 = vsub.f32 %v6084_v23, %v7194_v54  ;;  %v1803_v2 = vmul.f32 1.442695, %v1590_v4 }
 0x1b2   :  { %10394 = vst [vmem:[#allocation59_spill] sm:$0xff] %v7215_v6  ;;  %v7221_v31 = vpop.eup %3941  ;;  %3967 = vpow2.f32 %v1801_v9  ;;  %v2014_v16 = vadd.f32 %v7209_v35, %v2013_v59  ;;  %v1600_v9 = vsub.f32 %v6088_v48, %v7194_v54  ;;  %v1601_v1 = vsub.f32 %v6110_v28, %v7194_v54 }
 0x1b3   :  { %10397 = vst [vmem:[#allocation54_spill] sm:$0xff] %v7221_v31  ;;  %v7226_v22 = vpop.eup %3943  ;;  %3969 = vpow2.f32 %v1791_v47  ;;  %v2025_v55 = vadd.f32 %v7221_v31, %v7215_v6  ;;  %v1805_v23 = vmul.f32 1.442695, %v1591_v43  ;;  %v1807_v47 = vmul.f32 1.442695, %v1592_v11 }
 0x1b4   :  { %10399 = vst [vmem:[#allocation56_spill] sm:$0xff] %v7226_v22  ;;  %v7234_v45 = vpop.eup %3945  ;;  %3971 = vpow2.f32 %v1793_v63  ;;  %2015 = vadd.xlane.f32.xlu0 %v2014_v16  ;;  %v1596_v63 = vsub.f32 %v6065_v39, %v7188_v37  ;;  %v1597_v48 = vsub.f32 %v6069_v42, %v7188_v37  ;;  %v1598_v43 = vsub.f32 %v6073_v29, %v7188_v37 }
 0x1b5   :  { %10401 = vst [vmem:[#allocation136_spill] sm:$0xff] %v7234_v45  ;;  %v7240_v8 = vpop.eup %3947  ;;  %3973 = vpow2.f32 %v1795_v3  ;;  %v2026_v59 = vadd.f32 %v7226_v22, %v2025_v55  ;;  %v1821_v3 = vmul.f32 1.442695, %v1599_v60  ;;  %v1605_v11 = vsub.f32 %v6159_v12, %v7230_v13  ;;  %v7260_v55 = vpop.xlane.xlu0 %1447 }
 0x1b6   :  { %10402 = vst [vmem:[#allocation137_spill] sm:$0xff] %v7240_v8  ;;  %v7243_v20 = vpop.eup %3949  ;;  %3975 = vpow2.f32 %v1809_v0  ;;  %v2021_v28 = vadd.f32 %v7240_v8, %v7234_v45  ;;  %v1823_v39 = vmul.f32 1.442695, %v1600_v9  ;;  %v1825_v16 = vmul.f32 1.442695, %v1601_v1  ;;  %10406 = vst [vmem:[#allocation141_spill] sm:$0xff] %v7260_v55  ;;  %v7268_v12 = vpop.xlane.xlu1 %1451 }
 0x1b7   :  { %10403 = vst [vmem:[#allocation138_spill] sm:$0xff] %v7243_v20  ;;  %v7251_v4 = vpop.eup %3951  ;;  %3977 = vpow2.f32 %v1811_v61  ;;  %2027 = vadd.xlane.f32.xlu1 %v2026_v59  ;;  %v1606_v61 = vsub.f32 %v6163_v30, %v7230_v13  ;;  %v1607_v29 = vsub.f32 %v6166_v15, %v7230_v13  ;;  %10408 = vst [vmem:[#allocation143_spill] sm:$0xff] %v7268_v12  ;;  %v1815_v9 = vmul.f32 1.442695, %v1596_v63  ;;  %v10410_v59 = vld [vmem:[#allocation60_spill] sm:$0xff] }
 0x1b8   :  { %10404 = vst [vmem:[#allocation139_spill] sm:$0xff] %v7251_v4  ;;  %v7257_v0 = vpop.eup %3953  ;;  %3979 = vpow2.f32 %v1813_v26  ;;  %v2022_v42 = vadd.f32 %v7243_v20, %v2021_v28  ;;  %v1817_v1 = vmul.f32 1.442695, %v1597_v48  ;;  %v1602_v28 = vsub.f32 %v10410_v59, %v7224_v62  ;;  %v10413_v20 = vld [vmem:[#allocation61_spill] sm:$0xff] }
 0x1b9   :  { %10405 = vst [vmem:[#allocation140_spill] sm:$0xff] %v7257_v0  ;;  %v7262_v54 = vpop.eup %3955  ;;  %3981 = vpow2.f32 %v1803_v2  ;;  %v2033_v26 = vadd.f32 %v7257_v0, %v7251_v4  ;;  %v1819_v30 = vmul.f32 1.442695, %v1598_v43  ;;  %v1833_v37 = vmul.f32 1.442695, %v1605_v11  ;;  %v10416_v11 = vld [vmem:[#allocation66_spill] sm:$0xff] }
 0x1ba   :  { %10407 = vst [vmem:[#allocation142_spill] sm:$0xff] %v7262_v54  ;;  %v7272_v60 = vpop.eup %3957  ;;  %3983 = vpow2.f32 %v1805_v23  ;;  %2023 = vadd.xlane.f32.xlu0 %v2022_v42  ;;  %v1603_v22 = vsub.f32 %v10413_v20, %v7224_v62  ;;  %v10414_v23 = vld [vmem:[#allocation62_spill] sm:$0xff]  ;;  %v1837_v43 = vmul.f32 1.442695, %v1607_v29  ;;  %v10418_v20 = vld [vmem:[#allocation67_spill] sm:$0xff] }
 0x1bb   :  { %10409 = vst [vmem:[#allocation144_spill] sm:$0xff] %v7272_v60  ;;  %v7276_v2 = vpop.eup %3959  ;;  %3985 = vpow2.f32 %v1807_v47  ;;  %v2034_v15 = vadd.f32 %v7262_v54, %v2033_v26  ;;  %v1604_v63 = vsub.f32 %v10414_v23, %v7224_v62  ;;  %v1835_v47 = vmul.f32 1.442695, %v1606_v61  ;;  %v7296_v62 = vpop.xlane.xlu0 %1455  ;;  %v10422_v29 = vld [vmem:[#allocation63_spill] sm:$0xff] }
 0x1bc   :  { %10411 = vst [vmem:[#allocation60_spill] sm:$0xff] %v7276_v2  ;;  %v7279_v13 = vpop.eup %3961  ;;  %3987 = vpow2.f32 %v1821_v3  ;;  %v2029_v48 = vadd.f32 %v7276_v2, %v7272_v60  ;;  %v1611_v26 = vsub.f32 %v10416_v11, %v7268_v12  ;;  %v1827_v3 = vmul.f32 1.442695, %v1602_v28  ;;  %10419 = vst [vmem:[#allocation66_spill] sm:$0xff] %v7296_v62  ;;  %v7304_v11 = vpop.xlane.xlu1 %1459 }
 0x1bd   :  { %10412 = vst [vmem:[#allocation145_spill] sm:$0xff] %v7279_v13  ;;  %v7287_v42 = vpop.eup %3963  ;;  %3989 = vpow2.f32 %v1823_v39  ;;  %2035 = vadd.xlane.f32.xlu1 %v2034_v15  ;;  %v1612_v54 = vsub.f32 %v10418_v20, %v7268_v12  ;;  %v10421_v39 = vld [vmem:[#allocation68_spill] sm:$0xff]  ;;  %v1608_v15 = vsub.f32 %v10422_v29, %v7260_v55  ;;  %v1831_v20 = vmul.f32 1.442695, %v1604_v63  ;;  %v10427_v29 = vld [vmem:[#allocation65_spill] sm:$0xff] }
 0x1be   :  { %10415 = vst [vmem:[#allocation61_spill] sm:$0xff] %v7287_v42  ;;  %v7291_v59 = vpop.eup %3965  ;;  %3991 = vpow2.f32 %v1825_v16  ;;  %v2030_v23 = vadd.f32 %v7279_v13, %v2029_v48  ;;  %v1613_v61 = vsub.f32 %v10421_v39, %v7268_v12  ;;  %10423 = vst [vmem:[#allocation68_spill] sm:$0xff] %v7304_v11  ;;  %v1829_v48 = vmul.f32 1.442695, %v1603_v22  ;;  %v10425_v13 = vld [vmem:[#allocation64_spill] sm:$0xff]  ;;  %v10430_v63 = vld [vmem:[#allocation73_spill] sm:$0xff] }
 0x1bf   :  { %10417 = vst [vmem:[#allocation62_spill] sm:$0xff] %v7291_v59  ;;  %v7298_v35 = vpop.eup %3967  ;;  %3993 = vpow2.f32 %v1815_v9  ;;  %v2041_v16 = vadd.f32 %v7291_v59, %v7287_v42  ;;  %v1609_v2 = vsub.f32 %v10425_v13, %v7260_v55  ;;  %v1845_v39 = vmul.f32 1.442695, %v1611_v26 }
 0x1c0   :  { %10420 = vst [vmem:[#allocation67_spill] sm:$0xff] %v7298_v35  ;;  %v7308_v28 = vpop.eup %3969  ;;  %3995 = vpow2.f32 %v1817_v1  ;;  %2031 = vadd.xlane.f32.xlu0 %v2030_v23  ;;  %v1610_v12 = vsub.f32 %v10427_v29, %v7260_v55  ;;  %v10429_v1 = vld [vmem:[#allocation72_spill] sm:$0xff]  ;;  %v1618_v59 = vsub.f32 %v10430_v63, %v7304_v11  ;;  %v1849_v26 = vmul.f32 1.442695, %v1613_v61  ;;  %v10433_v55 = vld [vmem:[#allocation74_spill] sm:$0xff]  ;;  %v7332_v63 = vpop.xlane.xlu0 %1463 }
 0x1c1   :  { %10424 = vst [vmem:[#allocation63_spill] sm:$0xff] %v7308_v28  ;;  %v7312_v9 = vpop.eup %3971  ;;  %3997 = vpow2.f32 %v1819_v30  ;;  %v2042_v60 = vadd.f32 %v7298_v35, %v2041_v16  ;;  %v1617_v22 = vsub.f32 %v10429_v1, %v7304_v11  ;;  %v1847_v30 = vmul.f32 1.442695, %v1612_v54  ;;  %10434 = vst [vmem:[#allocation74_spill] sm:$0xff] %v7332_v63  ;;  %v10437_v61 = vld [vmem:[#allocation70_spill] sm:$0xff] }
 0x1c2   :  { %10426 = vst [vmem:[#allocation64_spill] sm:$0xff] %v7312_v9  ;;  %v7317_v0 = vpop.eup %3973  ;;  %3999 = vpow2.f32 %v1833_v37  ;;  %v2037_v13 = vadd.f32 %v7312_v9, %v7308_v28  ;;  %v1839_v29 = vmul.f32 1.442695, %v1608_v15  ;;  %v1841_v37 = vmul.f32 1.442695, %v1609_v2  ;;  %v7340_v15 = vpop.xlane.xlu1 %1467 }
 0x1c3   :  { %10428 = vst [vmem:[#allocation65_spill] sm:$0xff] %v7317_v0  ;;  %v7325_v23 = vpop.eup %3975  ;;  %4001 = vpow2.f32 %v1835_v47  ;;  %2043 = vadd.xlane.f32.xlu1 %v2042_v60  ;;  %v1619_v1 = vsub.f32 %v10433_v55, %v7304_v11  ;;  %v10436_v47 = vld [vmem:[#allocation69_spill] sm:$0xff]  ;;  %v1615_v60 = vsub.f32 %v10437_v61, %v7296_v62  ;;  %v1843_v55 = vmul.f32 1.442695, %v1610_v12  ;;  %v10442_v61 = vld [vmem:[#allocation75_spill] sm:$0xff] }
 0x1c4   :  { %10431 = vst [vmem:[#allocation72_spill] sm:$0xff] %v7325_v23  ;;  %v7327_v16 = vpop.eup %3977  ;;  %4003 = vpow2.f32 %v1837_v43  ;;  %v2038_v35 = vadd.f32 %v7317_v0, %v2037_v13  ;;  %v1614_v54 = vsub.f32 %v10436_v47, %v7296_v62  ;;  %10438 = vst [vmem:[#allocation69_spill] sm:$0xff] %v7340_v15  ;;  %v1857_v13 = vmul.f32 1.442695, %v1617_v22 }
 0x1c5   :  { %10432 = vst [vmem:[#allocation73_spill] sm:$0xff] %v7327_v16  ;;  %v7334_v42 = vpop.eup %3979  ;;  %4005 = vpow2.f32 %v1827_v3  ;;  %v2049_v2 = vadd.f32 %v7327_v16, %v7325_v23  ;;  %v1859_v11 = vmul.f32 1.442695, %v1618_v59  ;;  %v10441_v3 = vld [vmem:[#allocation71_spill] sm:$0xff]  ;;  %v1620_v9 = vsub.f32 %v10442_v61, %v7332_v63  ;;  %v10445_v59 = vld [vmem:[#allocation76_spill] sm:$0xff] }
 0x1c6   :  { %10435 = vst [vmem:[#allocation146_spill] sm:$0xff] %v7334_v42  ;;  %v7344_v43 = vpop.eup %3981  ;;  %4007 = vpow2.f32 %v1829_v48  ;;  %2039 = vadd.xlane.f32.xlu0 %v2038_v35  ;;  %v1616_v47 = vsub.f32 %v10441_v3, %v7296_v62  ;;  %v10444_v48 = vld [vmem:[#allocation78_spill] sm:$0xff]  ;;  %v1621_v35 = vsub.f32 %v10445_v59, %v7332_v63  ;;  %v1861_v3 = vmul.f32 1.442695, %v1619_v1 }
 0x1c7   :  { %10439 = vst [vmem:[#allocation70_spill] sm:$0xff] %v7344_v43  ;;  %v7346_v0 = vpop.eup %3983  ;;  %4009 = vpow2.f32 %v1831_v20  ;;  %v2050_v28 = vadd.f32 %v7334_v42, %v2049_v2  ;;  %v1623_v12 = vsub.f32 %v10444_v48, %v7340_v15  ;;  %v1851_v62 = vmul.f32 1.442695, %v1614_v54  ;;  %v10449_v48 = vld [vmem:[#allocation80_spill] sm:$0xff] }
 0x1c8   :  { %10440 = vst [vmem:[#allocation147_spill] sm:$0xff] %v7346_v0  ;;  %v7353_v4 = vpop.eup %3985  ;;  %4011 = vpow2.f32 %v1845_v39  ;;  %v2045_v20 = vadd.f32 %v7346_v0, %v7344_v43  ;;  %v1853_v61 = vmul.f32 1.442695, %v1615_v60  ;;  %v10448_v39 = vld [vmem:[#allocation79_spill] sm:$0xff]  ;;  %v1625_v16 = vsub.f32 %v10449_v48, %v7340_v15 }
 0x1c9   :  { %10443 = vst [vmem:[#allocation71_spill] sm:$0xff] %v7353_v4  ;;  %v7361_v22 = vpop.eup %3987  ;;  %4013 = vpow2.f32 %v1847_v30  ;;  %2051 = vadd.xlane.f32.xlu1 %v2050_v28  ;;  %v1624_v42 = vsub.f32 %v10448_v39, %v7340_v15  ;;  %v1855_v0 = vmul.f32 1.442695, %v1616_v47  ;;  %v10451_v30 = vld [vmem:[#allocation77_spill] sm:$0xff]  ;;  %v7378_v60 = vmul.f32 1.442695, %v1620_v9  ;;  %v7401_v15 = vpop.xlane.xlu1 %1475 }
 0x1ca   :  { %10446 = vst [vmem:[#allocation75_spill] sm:$0xff] %v7361_v22  ;;  %v7363_v2 = vpop.eup %3989  ;;  %4015 = vpow2.f32 %v1849_v26  ;;  %v2046_v59 = vadd.f32 %v7353_v4, %v2045_v20  ;;  %v1622_v1 = vsub.f32 %v10451_v30, %v7332_v63  ;;  %v1869_v26 = vmul.f32 1.442695, %v1623_v12  ;;  %v7382_v20 = vpop.xlane.xlu0 %1471  ;;  %v4221_v47 = vld [vmem:[%s9676_s2] sm:$0xff]  ;;  %v4222_v9 = vld [vmem:[%s9676_s2 + $0x8] sm:$0xff]  ;;  %10457 = vst [vmem:[#allocation150_spill] sm:$0xff] %v7401_v15 }
 0x1cb   :  { %10447 = vst [vmem:[#allocation78_spill] sm:$0xff] %v7363_v2  ;;  %v7370_v23 = vpop.eup %3991  ;;  %4017 = vpow2.f32 %v1839_v29  ;;  %v2057_v28 = vadd.f32 %v7363_v2, %v7361_v22  ;;  %v7380_v39 = vmul.f32 1.442695, %v1621_v35  ;;  %10453 = vst [vmem:[#allocation80_spill] sm:$0xff] %v7382_v20  ;;  %v2481_v30 = vmul.f32 %v4221_v47, %v6919_v21  ;;  %v10458_v47 = vld [vmem:[#allocation81_spill] sm:$0xff] }
 0x1cc   :  { %10450 = vst [vmem:[#allocation76_spill] sm:$0xff] %v7370_v23  ;;  %v7376_v54 = vpop.eup %3993  ;;  %4019 = vpow2.f32 %v1841_v37  ;;  %2047 = vadd.xlane.f32.xlu0 %v2046_v59  ;;  %v2482_v37 = vmul.f32 %v4222_v9, %v6931_v14  ;;  %v1871_v35 = vmul.f32 1.442695, %v1624_v42  ;;  %v1873_v59 = vmul.f32 1.442695, %v1625_v16  ;;  %v4223_v9 = vld [vmem:[%s9676_s2 + $0x30] sm:$0xff] }
 0x1cd   :  { %10452 = vst [vmem:[#allocation79_spill] sm:$0xff] %v7376_v54  ;;  %v7384_v48 = vpop.eup %3995  ;;  %4021 = vpow2.f32 %v1843_v55  ;;  %v2058_v29 = vadd.f32 %v7370_v23, %v2057_v28  ;;  %v1867_v63 = vmul.f32 1.442695, %v1622_v1  ;;  %v1626_v21 = vsub.f32 %v10458_v47, %v7382_v20  ;;  %v4224_v1 = vld [vmem:[%s9676_s2 + $0x38] sm:$0xff]  ;;  %v10461_v23 = vld [vmem:[#allocation83_spill] sm:$0xff] }
 0x1ce   :  { %10454 = vst [vmem:[#allocation77_spill] sm:$0xff] %v7384_v48  ;;  %v7395_v12 = vpop.eup %3997  ;;  %4023 = vpow2.f32 %v1857_v13  ;;  %v2053_v55 = vadd.f32 %v7384_v48, %v7376_v54  ;;  %v2487_v42 = vmul.f32 %v4223_v9, %v6955_v33  ;;  %v10460_v13 = vld [vmem:[#allocation82_spill] sm:$0xff]  ;;  %v1628_v9 = vsub.f32 %v10461_v23, %v7382_v20 }
 0x1cf   :  { %10455 = vst [vmem:[#allocation148_spill] sm:$0xff] %v7395_v12  ;;  %v7399_v28 = vpop.eup %3999  ;;  %4025 = vpow2.f32 %v1859_v11  ;;  %2059 = vadd.xlane.f32.xlu1 %v2058_v29  ;;  %v1627_v14 = vsub.f32 %v10460_v13, %v7382_v20  ;;  %v2488_v29 = vmul.f32 %v4224_v1, %v6961_v41  ;;  %v2625_v33 = vadd.f32 %v2482_v37, %v2481_v30  ;;  %v4225_v1 = vld [vmem:[%s9676_s2 + $0x10] sm:$0xff]  ;;  %v4226_v23 = vld [vmem:[%s9676_s2 + $0x40] sm:$0xff] }
 0x1d0   :  { %10456 = vst [vmem:[#allocation149_spill] sm:$0xff] %v7399_v28  ;;  %v7409_v16 = vpop.eup %4001  ;;  %4027 = vpow2.f32 %v1861_v3  ;;  %v2054_v11 = vadd.f32 %v7395_v12, %v2053_v55  ;;  %v10463_v55 = vld [vmem:[#allocation84_spill] sm:$0xff]  ;;  %v2489_v20 = vmul.f32 %v4226_v23, %v6965_v44  ;;  %v1879_v23 = vmul.f32 1.442695, %v1628_v9 }
 0x1d1   :  { %10459 = vst [vmem:[#allocation81_spill] sm:$0xff] %v7409_v16  ;;  %v7418_v47 = vpop.eup %4003  ;;  %4029 = vpow2.f32 %v1851_v62  ;;  %v2065_v3 = vadd.f32 %v7409_v16, %v7399_v28  ;;  %v1629_v13 = vsub.f32 %v10463_v55, %v7401_v15  ;;  %v2483_v62 = vmul.f32 %v4225_v1, %v6935_v56  ;;  %v10467_v1 = vld [vmem:[#allocation86_spill] sm:$0xff]  ;;  %v7447_v44 = vpop.xlane.xlu1 %1483 }
 0x1d2   :  { %v7424_v48 = vpop.eup %4005  ;;  %4031 = vpow2.f32 %v1853_v61  ;;  %2055 = vadd.xlane.f32.xlu0 %v2054_v11  ;;  %v10465_v61 = vld [vmem:[#allocation85_spill] sm:$0xff]  ;;  %v1875_v55 = vmul.f32 1.442695, %v1626_v21  ;;  %v1631_v56 = vsub.f32 %v10467_v1, %v7401_v15  ;;  %v1877_v12 = vmul.f32 1.442695, %v1627_v14  ;;  %10469 = vst [vmem:[#allocation86_spill] sm:$0xff] %v7447_v44 }
 0x1d3   :  { %10462 = vst [vmem:[#allocation82_spill] sm:$0xff] %v7424_v48  ;;  %v7436_v30 = vpop.eup %4007  ;;  %4033 = vpow2.f32 %v1855_v0  ;;  %v1630_v37 = vsub.f32 %v10465_v61, %v7401_v15  ;;  %v2066_v11 = vadd.f32 %v7418_v47, %v2065_v3  ;;  %v2633_v16 = vadd.f32 %v2488_v29, %v2487_v42  ;;  %v4227_v14 = vld [vmem:[%s9676_s2 + $0x18] sm:$0xff]  ;;  %v10474_v1 = vld [vmem:[#allocation90_spill] sm:$0xff] }
 0x1d4   :  { %10464 = vst [vmem:[#allocation83_spill] sm:$0xff] %v7436_v30  ;;  %v7441_v41 = vpop.eup %4009  ;;  %4035 = vpow2.f32 %v1869_v26  ;;  %v2061_v21 = vadd.f32 %v7436_v30, %v7424_v48  ;;  %v7451_v0 = vadd.f32 %v2625_v33, %v2483_v62  ;;  %v1881_v26 = vmul.f32 1.442695, %v1629_v13  ;;  %v7466_v62 = vpop.xlane.xlu0 %1479 }
 0x1d5   :  { %10466 = vst [vmem:[#allocation84_spill] sm:$0xff] %v7441_v41  ;;  %v7445_v28 = vpop.eup %4011  ;;  %4037 = vpow2.f32 %v1871_v35  ;;  %2067 = vadd.xlane.f32.xlu1 %v2066_v11  ;;  %v2484_v42 = vmul.f32 %v4227_v14, %v6939_v17  ;;  %v4228_v35 = vld [vmem:[%s9676_s2 + $0x20] sm:$0xff]  ;;  %v1883_v33 = vmul.f32 1.442695, %v1630_v37  ;;  %10472 = vst [vmem:[#allocation153_spill] sm:$0xff] %v7466_v62  ;;  %v1635_v14 = vsub.f32 %v10474_v1, %v7447_v44 }
 0x1d6   :  { %10468 = vst [vmem:[#allocation85_spill] sm:$0xff] %v7445_v28  ;;  %v7453_v3 = vpop.eup %4013  ;;  %4039 = vpow2.f32 %v1873_v59  ;;  %v2485_v29 = vmul.f32 %v4228_v35, %v6945_v51  ;;  %v2062_v59 = vadd.f32 %v7441_v41, %v2061_v21  ;;  %v1885_v11 = vmul.f32 1.442695, %v1631_v56  ;;  %v4229_v51 = vld [vmem:[%s9676_s2 + $0x28] sm:$0xff] }
 0x1d7   :  { %10470 = vst [vmem:[#allocation151_spill] sm:$0xff] %v7453_v3  ;;  %v7463_v9 = vpop.eup %4015  ;;  %4041 = vpow2.f32 %v7378_v60  ;;  %v2073_v13 = vadd.f32 %v7453_v3, %v7445_v28  ;;  %v7476_v35 = vadd.f32 %v2633_v16, %v2489_v20  ;;  %v10476_v60 = vld [vmem:[#allocation91_spill] sm:$0xff]  ;;  %v7487_v56 = vmul.f32 %v4229_v51, %v6949_v58  ;;  %v10478_v20 = vld [vmem:[#allocation92_spill] sm:$0xff] }
 0x1d8   :  { %10471 = vst [vmem:[#allocation152_spill] sm:$0xff] %v7463_v9  ;;  %v7471_v61 = vpop.eup %4017  ;;  %4043 = vpow2.f32 %v7380_v39  ;;  %v1636_v37 = vsub.f32 %v10476_v60, %v7447_v44  ;;  %2063 = vadd.xlane.f32.xlu0 %v2062_v59  ;;  %v1637_v16 = vsub.f32 %v10478_v20, %v7447_v44  ;;  %v4230_v59 = vld [vmem:[%s9676_s2 + $0x60] sm:$0xff]  ;;  %v10480_v60 = vld [vmem:[#allocation87_spill] sm:$0xff]  ;;  %v10482_v44 = vld [vmem:[#allocation88_spill] sm:$0xff] }
 0x1d9   :  { %10473 = vst [vmem:[#allocation154_spill] sm:$0xff] %v7471_v61  ;;  %v7478_v15 = vpop.eup %4019  ;;  %4045 = vpow2.f32 %v1867_v63  ;;  %v2074_v21 = vadd.f32 %v7463_v9, %v2073_v13  ;;  %v2629_v63 = vadd.f32 %v2485_v29, %v2484_v42  ;;  %v2493_v13 = vmul.f32 %v4230_v59, %v6972_v49  ;;  %v4231_v42 = vld [vmem:[%s9676_s2 + $0x68] sm:$0xff]  ;;  %v10483_v49 = vld [vmem:[#allocation89_spill] sm:$0xff]  ;;  %v7517_v9 = vpop.xlane.xlu0 %1487 }
 0x1da   :  { %10475 = vst [vmem:[#allocation90_spill] sm:$0xff] %v7478_v15  ;;  %v7489_v39 = vpop.eup %4021  ;;  %4047 = vpow2.f32 %v1881_v26  ;;  %v1632_v51 = vsub.f32 %v10480_v60, %v7466_v62  ;;  %v2069_v26 = vadd.f32 %v7478_v15, %v7471_v61  ;;  %v2494_v29 = vmul.f32 %v4231_v42, %v6974_v19  ;;  %10486 = vst [vmem:[#allocation155_spill] sm:$0xff] %v7517_v9 }
 0x1db   :  { %10477 = vst [vmem:[#allocation91_spill] sm:$0xff] %v7489_v39  ;;  %v7497_v1 = vpop.eup %4023  ;;  %4049 = vpow2.f32 %v1883_v33  ;;  %2075 = vadd.xlane.f32.xlu1 %v2074_v21  ;;  %v1893_v59 = vmul.f32 1.442695, %v1635_v14  ;;  %v1633_v33 = vsub.f32 %v10482_v44, %v7466_v62  ;;  %v1634_v60 = vsub.f32 %v10483_v49, %v7466_v62  ;;  %v7515_v17 = vpop.xlane.xlu1 %1491 }
 0x1dc   :  { %10479 = vst [vmem:[#allocation92_spill] sm:$0xff] %v7497_v1  ;;  %v7507_v20 = vpop.eup %4025  ;;  %4051 = vpow2.f32 %v1885_v11  ;;  %v1895_v58 = vmul.f32 1.442695, %v1636_v37  ;;  %10485 = vst [vmem:[#allocation89_spill] sm:$0xff] %v7515_v17  ;;  %v2070_v42 = vadd.f32 %v7489_v39, %v2069_v26  ;;  %v1897_v44 = vmul.f32 1.442695, %v1637_v16 }
 0x1dd   :  { %10481 = vst [vmem:[#allocation87_spill] sm:$0xff] %v7507_v20  ;;  %v7513_v21 = vpop.eup %4027  ;;  %4053 = vpow2.f32 %v1875_v55  ;;  %v2081_v11 = vadd.f32 %v7507_v20, %v7497_v1  ;;  %v1641_v49 = vsub.f32 %v6628_v34, %v7515_v17  ;;  %v4232_v55 = vld [vmem:[%s9676_s2 + $0x70] sm:$0xff]  ;;  %v1887_v26 = vmul.f32 1.442695, %v1632_v51 }
 0x1de   :  { %10484 = vst [vmem:[#allocation88_spill] sm:$0xff] %v7513_v21  ;;  %v7522_v14 = vpop.eup %4029  ;;  %4055 = vpow2.f32 %v1877_v12  ;;  %v2495_v37 = vmul.f32 %v4232_v55, %v6982_v40  ;;  %v1642_v19 = vsub.f32 %v6630_v18, %v7515_v17  ;;  %2071 = vadd.xlane.f32.xlu0 %v2070_v42  ;;  %v1889_v34 = vmul.f32 1.442695, %v1633_v33  ;;  %v10493_v33 = vld [vmem:[#allocation94_spill] sm:$0xff] }
 0x1df   :  { %10487 = vst [vmem:[#allocation156_spill] sm:$0xff] %v7522_v14  ;;  %v7530_v62 = vpop.eup %4031  ;;  %4057 = vpow2.f32 %v1879_v23  ;;  %v2082_v12 = vadd.f32 %v7513_v21, %v2081_v11  ;;  %v1643_v39 = vsub.f32 %v6635_v32, %v7515_v17  ;;  %v2641_v20 = vadd.f32 %v2494_v29, %v2493_v13  ;;  %v10491_v23 = vld [vmem:[#allocation93_spill] sm:$0xff] }
 0x1e0   :  { %10488 = vst [vmem:[#allocation157_spill] sm:$0xff] %v7530_v62  ;;  %v7535_v16 = vpop.eup %4033  ;;  %4059 = vpow2.f32 %v1893_v59  ;;  %v1891_v55 = vmul.f32 1.442695, %v1634_v60  ;;  %v1638_v51 = vsub.f32 %v10491_v23, %v7517_v9  ;;  %v2077_v18 = vadd.f32 %v7530_v62, %v7522_v14 }
 0x1e1   :  { %10489 = vst [vmem:[#allocation158_spill] sm:$0xff] %v7535_v16  ;;  %v7539_v1 = vpop.eup %4035  ;;  %4061 = vpow2.f32 %v1895_v58  ;;  %2083 = vadd.xlane.f32.xlu1 %v2082_v12  ;;  %v1905_v59 = vmul.f32 1.442695, %v1641_v49  ;;  %v1639_v11 = vsub.f32 %v10493_v33, %v7517_v9  ;;  %v1640_v32 = vsub.f32 %v6606_v52, %v7517_v9  ;;  %v7553_v29 = vpop.xlane.xlu0 %1495  ;;  %v4233_v52 = vld [vmem:[%s9676_s2 + $0x48] sm:$0xff] }
 0x1e2   :  { %10490 = vst [vmem:[#allocation159_spill] sm:$0xff] %v7539_v1  ;;  %v7545_v42 = vpop.eup %4037  ;;  %4063 = vpow2.f32 %v1897_v44  ;;  %v1907_v58 = vmul.f32 1.442695, %v1642_v19  ;;  %10494 = vst [vmem:[#allocation94_spill] sm:$0xff] %v7553_v29  ;;  %v2078_v60 = vadd.f32 %v7535_v16, %v2077_v18  ;;  %v1909_v44 = vmul.f32 1.442695, %v1643_v39 }
 0x1e3   :  { %10492 = vst [vmem:[#allocation93_spill] sm:$0xff] %v7545_v42  ;;  %v7551_v13 = vpop.eup %4039  ;;  %4065 = vpow2.f32 %v1887_v26  ;;  %v2089_v12 = vadd.f32 %v7545_v42, %v7539_v1  ;;  %v7561_v49 = vadd.f32 %v2629_v63, %v7487_v56  ;;  %v2490_v19 = vmul.f32 %v4233_v52, %v6990_v5 }
 0x1e4   :  { %v7558_v23 = vpop.eup %4041  ;;  %4067 = vpow2.f32 %v1889_v34  ;;  %v1899_v18 = vmul.f32 1.442695, %v1638_v51  ;;  %2079 = vadd.xlane.f32.xlu0 %v2078_v60  ;;  %v7570_v9 = vadd.f32 %v2641_v20, %v2495_v37  ;;  %v1901_v56 = vmul.f32 1.442695, %v1639_v11  ;;  %v4234_v60 = vld [vmem:[%s9676_s2 + $0x50] sm:$0xff] }
 0x1e5   :  { %v7567_v26 = vpop.eup %4043  ;;  %4069 = vpow2.f32 %v1891_v55  ;;  %v2090_v33 = vadd.f32 %v7551_v13, %v2089_v12  ;;  %v1903_v39 = vmul.f32 1.442695, %v1640_v32  ;;  %v1644_v63 = vsub.f32 %v6680_v27, %v7553_v29  ;;  %v7578_v52 = vpop.xlane.xlu1 %1499 }
 0x1e6   :  { %10495 = vst [vmem:[#allocation160_spill] sm:$0xff] %v7567_v26  ;;  %v7572_v34 = vpop.eup %4045  ;;  %4071 = vpow2.f32 %v1905_v59  ;;  %10498 = vst [vmem:[#allocation163_spill] sm:$0xff] %v7578_v52  ;;  %v1645_v55 = vsub.f32 %v6682_v24, %v7553_v29  ;;  %v1646_v20 = vsub.f32 %v6684_v10, %v7553_v29  ;;  %v2085_v37 = vadd.f32 %v7567_v26, %v7558_v23  ;;  %v10500_v59 = vld [vmem:[#allocation96_spill] sm:$0xff]  ;;  %v4235_v29 = vld [vmem:[%s9676_s2 + $0x58] sm:$0xff] }
 0x1e7   :  { %10496 = vst [vmem:[#allocation161_spill] sm:$0xff] %v7572_v34  ;;  %v7576_v17 = vpop.eup %4047  ;;  %4073 = vpow2.f32 %v1907_v58  ;;  %2091 = vadd.xlane.f32.xlu1 %v2090_v33  ;;  %v1647_v27 = vsub.f32 %v6707_v36, %v7578_v52  ;;  %v1648_v11 = vsub.f32 %v10500_v59, %v7578_v52  ;;  %v1649_v32 = vsub.f32 %v6715_v46, %v7578_v52  ;;  %v10553_v26 = vld [vmem:[#allocation114_spill] sm:$0xff] }
 0x1e8   :  { %10497 = vst [vmem:[#allocation162_spill] sm:$0xff] %v7576_v17  ;;  %v7586_v51 = vpop.eup %4049  ;;  %4075 = vpow2.f32 %v1909_v44  ;;  %v2086_v10 = vadd.f32 %v7572_v34, %v2085_v37  ;;  %v2491_v36 = vmul.f32 %v4234_v60, %v6994_v25  ;;  %v2492_v52 = vmul.f32 %v4235_v29, %v7000_v57  ;;  %v10509_v29 = vld [vmem:[#allocation99_spill] sm:$0xff] }
 0x1e9   :  { %10499 = vst [vmem:[#allocation164_spill] sm:$0xff] %v7586_v51  ;;  %v7594_v24 = vpop.eup %4051  ;;  %4077 = vpow2.f32 %v1899_v18  ;;  %v2097_v58 = vadd.f32 %v7586_v51, %v7576_v17  ;;  %v1917_v44 = vmul.f32 1.442695, %v1647_v27  ;;  %v1919_v33 = vmul.f32 1.442695, %v1648_v11 }
 0x1ea   :  { %10501 = vst [vmem:[#allocation96_spill] sm:$0xff] %v7594_v24  ;;  %v7603_v12 = vpop.eup %4053  ;;  %4079 = vpow2.f32 %v1901_v56  ;;  %v1921_v46 = vmul.f32 1.442695, %v1649_v32  ;;  %v1911_v18 = vmul.f32 1.442695, %v1644_v63  ;;  %2087 = vadd.xlane.f32.xlu0 %v2086_v10  ;;  %v7614_v11 = vpop.xlane.xlu0 %1503  ;;  %v10507_v32 = vld [vmem:[#allocation97_spill] sm:$0xff] }
 0x1eb   :  { %10502 = vst [vmem:[#allocation165_spill] sm:$0xff] %v7603_v12  ;;  %v7605_v59 = vpop.eup %4055  ;;  %4081 = vpow2.f32 %v1903_v39  ;;  %v2098_v37 = vadd.f32 %v7594_v24, %v2097_v58  ;;  %v1913_v56 = vmul.f32 1.442695, %v1645_v55  ;;  %v1915_v27 = vmul.f32 1.442695, %v1646_v20  ;;  %10505 = vst [vmem:[#allocation168_spill] sm:$0xff] %v7614_v11 }
 0x1ec   :  { %10503 = vst [vmem:[#allocation166_spill] sm:$0xff] %v7605_v59  ;;  %v7612_v60 = vpop.eup %4057  ;;  %4083 = vpow2.f32 %v1917_v44  ;;  %v2093_v39 = vadd.f32 %v7605_v59, %v7603_v12  ;;  %v1650_v10 = vsub.f32 %v10507_v32, %v7614_v11  ;;  %v10508_v58 = vld [vmem:[#allocation98_spill] sm:$0xff]  ;;  %v1652_v51 = vsub.f32 %v10509_v29, %v7614_v11  ;;  %v10511_v59 = vld [vmem:[#allocation24_spill] sm:$0xff]  ;;  %v10513_v29 = vld [vmem:[#allocation19_spill] sm:$0xff] }
 0x1ed   :  { %10504 = vst [vmem:[#allocation167_spill] sm:$0xff] %v7612_v60  ;;  %v7618_v63 = vpop.eup %4059  ;;  %4085 = vpow2.f32 %v1919_v33  ;;  %v1651_v24 = vsub.f32 %v10508_v58, %v7614_v11  ;;  %2099 = vadd.xlane.f32.xlu1 %v2098_v37  ;;  %v2637_v44 = vadd.f32 %v2491_v36, %v2490_v19  ;;  %v4236_v33 = vld [vmem:[%s9676_s2 + $0x90] sm:$0xff]  ;;  %v4237_v37 = vld [vmem:[%s9676_s2 + $0x98] sm:$0xff] }
 0x1ee   :  { %10506 = vst [vmem:[#allocation169_spill] sm:$0xff] %v7618_v63  ;;  %v7626_v55 = vpop.eup %4061  ;;  %4087 = vpow2.f32 %v1921_v46  ;;  %v2094_v20 = vadd.f32 %v7612_v60, %v2093_v39  ;;  %v2499_v12 = vmul.f32 %v4236_v33, %v10511_v59  ;;  %v1923_v58 = vmul.f32 1.442695, %v1650_v10  ;;  %v7641_v19 = vpop.xlane.xlu1 %1507  ;;  %v10519_v60 = vld [vmem:[#allocation101_spill] sm:$0xff] }
 0x1ef   :  { %10510 = vst [vmem:[#allocation97_spill] sm:$0xff] %v7626_v55  ;;  %v7633_v32 = vpop.eup %4063  ;;  %4089 = vpow2.f32 %v1911_v18  ;;  %v1925_v17 = vmul.f32 1.442695, %v1651_v24  ;;  %v2500_v46 = vmul.f32 %v4237_v37, %v10513_v29  ;;  %10515 = vst [vmem:[#allocation170_spill] sm:$0xff] %v7641_v19  ;;  %v1927_v36 = vmul.f32 1.442695, %v1652_v51 }
 0x1f0   :  { %10512 = vst [vmem:[#allocation98_spill] sm:$0xff] %v7633_v32  ;;  %v7639_v11 = vpop.eup %4065  ;;  %4091 = vpow2.f32 %v1913_v56  ;;  %2095 = vadd.xlane.f32.xlu0 %v2094_v20  ;;  %v2105_v39 = vadd.f32 %v7626_v55, %v7618_v63  ;;  %v4238_v24 = vld [vmem:[%s9676_s2 + $0xa0] sm:$0xff]  ;;  %v10516_v18 = vld [vmem:[#allocation21_spill] sm:$0xff]  ;;  %v10518_v37 = vld [vmem:[#allocation100_spill] sm:$0xff]  ;;  %v1654_v51 = vsub.f32 %v10519_v60, %v7641_v19 }
 0x1f1   :  { %10514 = vst [vmem:[#allocation99_spill] sm:$0xff] %v7639_v11  ;;  %v7649_v10 = vmul.f32 %v4238_v24, %v10516_v18  ;;  %v7651_v33 = vpop.eup %4067  ;;  %4093 = vpow2.f32 %v1915_v27  ;;  %v1653_v56 = vsub.f32 %v10518_v37, %v7641_v19  ;;  %v10520_v20 = vld [vmem:[#allocation102_spill] sm:$0xff]  ;;  %v4239_v27 = vld [vmem:[%s9676_s2 + $0x78] sm:$0xff]  ;;  %v10522_v18 = vld [vmem:[#allocation123_spill] sm:$0xff] }
 0x1f2   :  { %10517 = vst [vmem:[#allocation171_spill] sm:$0xff] %v7651_v33  ;;  %v1655_v29 = vsub.f32 %v10520_v20, %v7641_v19  ;;  %v7659_v55 = vpop.eup %4069  ;;  %4095 = vpow2.f32 %v1923_v58  ;;  %v2106_v63 = vadd.f32 %v7633_v32, %v2105_v39  ;;  %v2101_v24 = vadd.f32 %v7651_v33, %v7639_v11  ;;  %v4240_v58 = vld [vmem:[%s9676_s2 + $0x80] sm:$0xff]  ;;  %v10524_v20 = vld [vmem:[#allocation28_spill] sm:$0xff]  ;;  %v7676_v33 = vpop.xlane.xlu0 %1511 }
 0x1f3   :  { %10521 = vst [vmem:[#allocation100_spill] sm:$0xff] %v7659_v55  ;;  %v2496_v37 = vmul.f32 %v4239_v27, %v10522_v18  ;;  %v7668_v59 = vpop.eup %4071  ;;  %v1929_v60 = vmul.f32 1.442695, %v1653_v56  ;;  %v1931_v57 = vmul.f32 1.442695, %v1654_v51  ;;  %4097 = vpow2.f32 %v1925_v17  ;;  %10526 = vst [vmem:[#allocation172_spill] sm:$0xff] %v7676_v33 }
 0x1f4   :  { %10523 = vst [vmem:[#allocation101_spill] sm:$0xff] %v7668_v59  ;;  %v2497_v39 = vmul.f32 %v4240_v58, %v10524_v20  ;;  %v7674_v19 = vpop.eup %4073  ;;  %v1933_v32 = vmul.f32 1.442695, %v1655_v29  ;;  %4099 = vpow2.f32 %v1927_v36  ;;  %2107 = vadd.xlane.f32.xlu1 %v2106_v63  ;;  %v2102_v27 = vadd.f32 %v7659_v55, %v2101_v24  ;;  %v10528_v17 = vld [vmem:[#allocation105_spill] sm:$0xff]  ;;  %v10529_v18 = vld [vmem:[#allocation106_spill] sm:$0xff]  ;;  %v10530_v20 = vld [vmem:[#allocation107_spill] sm:$0xff] }
 0x1f5   :  { %10525 = vst [vmem:[#allocation102_spill] sm:$0xff] %v7674_v19  ;;  %v7679_v11 = vadd.f32 %v2637_v44, %v2492_v52  ;;  %v7681_v56 = vpop.eup %4075  ;;  %4101 = vpow2.f32 %v1929_v60  ;;  %v1656_v51 = vsub.f32 %v10528_v17, %v7676_v33  ;;  %v1657_v58 = vsub.f32 %v10529_v18, %v7676_v33  ;;  %v4241_v44 = vld [vmem:[%s9676_s2 + $0x88] sm:$0xff] }
 0x1f6   :  { %10527 = vst [vmem:[#allocation173_spill] sm:$0xff] %v7681_v56  ;;  %v1658_v29 = vsub.f32 %v10530_v20, %v7676_v33  ;;  %v7689_v36 = vpop.eup %4077  ;;  %4103 = vpow2.f32 %v1931_v57  ;;  %2103 = vadd.xlane.f32.xlu0 %v2102_v27  ;;  %v2113_v52 = vadd.f32 %v7674_v19, %v7668_v59  ;;  %v7693_v63 = vadd.f32 %v2500_v46, %v2499_v12  ;;  %v4242_v57 = vld [vmem:[%s9676_s2 + $0xc0] sm:$0xff] }
 0x1f7   :  { %10531 = vst [vmem:[#allocation105_spill] sm:$0xff] %v7689_v36  ;;  %v7699_v24 = vmul.f32 %v4241_v44, %v7034_v53  ;;  %v7701_v18 = vpop.eup %4079  ;;  %v1935_v60 = vmul.f32 1.442695, %v1656_v51  ;;  %v1937_v20 = vmul.f32 1.442695, %v1657_v58  ;;  %v7703_v17 = vadd.f32 %v2497_v39, %v2496_v37  ;;  %v10533_v27 = vld [vmem:[#allocation30_spill] sm:$0xff]  ;;  %v7720_v55 = vpop.xlane.xlu1 %1515 }
 0x1f8   :  { %10532 = vst [vmem:[#allocation106_spill] sm:$0xff] %v7701_v18  ;;  %v2505_v12 = vmul.f32 %v4242_v57, %v10533_v27  ;;  %v7709_v46 = vpop.eup %4081  ;;  %4105 = vpow2.f32 %v1933_v32  ;;  %v2114_v33 = vadd.f32 %v7681_v56, %v2113_v52  ;;  %v2109_v44 = vadd.f32 %v7701_v18, %v7689_v36  ;;  %v4243_v51 = vld [vmem:[%s9676_s2 + $0xc8] sm:$0xff]  ;;  %v10535_v37 = vld [vmem:[#allocation25_spill] sm:$0xff]  ;;  %10537 = vst [vmem:[#allocation175_spill] sm:$0xff] %v7720_v55 }
 0x1f9   :  { %10534 = vst [vmem:[#allocation107_spill] sm:$0xff] %v7709_v46  ;;  %v2506_v39 = vmul.f32 %v4243_v51, %v10535_v37  ;;  %v7718_v58 = vpop.eup %4083  ;;  %4107 = vpow2.f32 %v1935_v60  ;;  %v1939_v57 = vmul.f32 1.442695, %v1658_v29  ;;  %v4244_v32 = vld [vmem:[%s9676_s2 + $0xa8] sm:$0xff]  ;;  %v10538_v52 = vld [vmem:[#allocation125_spill] sm:$0xff]  ;;  %v4245_v18 = vld [vmem:[%s9676_s2 + $0xb0] sm:$0xff] }
 0x1fa   :  { %10536 = vst [vmem:[#allocation174_spill] sm:$0xff] %v7718_v58  ;;  %v2502_v56 = vmul.f32 %v4244_v32, %v10538_v52  ;;  %v10539_v36 = vld [vmem:[#allocation34_spill] sm:$0xff]  ;;  %v7730_v59 = vpop.eup %4085  ;;  %v10541_v51 = vld [vmem:[#allocation108_spill] sm:$0xff]  ;;  %v10543_v27 = vld [vmem:[#allocation111_spill] sm:$0xff]  ;;  %2115 = vadd.xlane.f32.xlu1 %v2114_v33  ;;  %4109 = vpow2.f32 %v1937_v20 }
 0x1fb   :  { %v2503_v19 = vmul.f32 %v4245_v18, %v10539_v36  ;;  %10540 = vst [vmem:[#allocation176_spill] sm:$0xff] %v7730_v59  ;;  %v1659_v37 = vsub.f32 %v10541_v51, %v7720_v55  ;;  %v10542_v60 = vld [vmem:[#allocation110_spill] sm:$0xff]  ;;  %v1661_v53 = vsub.f32 %v10543_v27, %v7720_v55  ;;  %v4246_v32 = vld [vmem:[%s9676_s2 + $0xf0] sm:$0xff]  ;;  %v7742_v5 = vpop.eup %4087  ;;  %v2110_v18 = vadd.f32 %v7709_v46, %v2109_v44  ;;  %v10546_v27 = vld [vmem:[#allocation31_spill] sm:$0xff] }
 0x1fc   :  { %v1660_v29 = vsub.f32 %v10542_v60, %v7720_v55  ;;  %v10544_v52 = vld [vmem:[#allocation36_spill] sm:$0xff]  ;;  %10545 = vst [vmem:[#allocation108_spill] sm:$0xff] %v7742_v5  ;;  %v2121_v51 = vadd.f32 %v7730_v59, %v7718_v58  ;;  %v4247_v60 = vld [vmem:[%s9676_s2 + $0xf8] sm:$0xff]  ;;  %v7751_v55 = vpop.eup %4089  ;;  %v2657_v44 = vadd.f32 %v2506_v39, %v2505_v12  ;;  %4111 = vpow2.f32 %v1939_v57  ;;  %v7759_v58 = vpop.xlane.xlu0 %1519  ;;  %v10554_v12 = vld [vmem:[#allocation115_spill] sm:$0xff] }
 0x1fd   :  { %v2511_v25 = vmul.f32 %v4246_v32, %v10544_v52  ;;  %v2512_v33 = vmul.f32 %v4247_v60, %v10546_v27  ;;  %10547 = vst [vmem:[#allocation110_spill] sm:$0xff] %v7751_v55  ;;  %v1941_v36 = vmul.f32 1.442695, %v1659_v37  ;;  %v4248_v32 = vld [vmem:[%s9676_s2 + $0xd0] sm:$0xff]  ;;  %v7757_v46 = vpop.eup %4091  ;;  %v1945_v59 = vmul.f32 1.442695, %v1661_v53  ;;  %2111 = vadd.xlane.f32.xlu0 %v2110_v18 }
 0x1fe   :  { %v1943_v40 = vmul.f32 1.442695, %v1660_v29  ;;  %v10548_v20 = vld [vmem:[#allocation124_spill] sm:$0xff]  ;;  %10549 = vst [vmem:[#allocation111_spill] sm:$0xff] %v7757_v46  ;;  %v2122_v60 = vadd.f32 %v7742_v5, %v2121_v51  ;;  %v2653_v27 = vadd.f32 %v2503_v19, %v2502_v56  ;;  %v7762_v34 = vpop.eup %4093  ;;  %v10552_v37 = vld [vmem:[#allocation113_spill] sm:$0xff]  ;;  %v1664_v39 = vsub.f32 %v10554_v12, %v7759_v58 }
 0x1ff   :  { %v2507_v52 = vmul.f32 %v4248_v32, %v10548_v20  ;;  %10550 = vst [vmem:[#allocation124_spill] sm:$0xff] %v7759_v58  ;;  %10551 = vst [vmem:[#allocation177_spill] sm:$0xff] %v7762_v34  ;;  %4113 = vpow2.f32 %v1941_v36  ;;  %v1662_v29 = vsub.f32 %v10552_v37, %v7759_v58  ;;  %v1663_v32 = vsub.f32 %v10553_v26, %v7759_v58  ;;  %v7770_v53 = vpop.eup %4095  ;;  %v4249_v56 = vld [vmem:[%s9676_s2 + $0xd8] sm:$0xff]  ;;  %v4250_v37 = vld [vmem:[%s9676_s2 + $0xe0] sm:$0xff] }
 0x200   :  { %10555 = vst [vmem:[#allocation113_spill] sm:$0xff] %v7770_v53  ;;  %4115 = vpow2.f32 %v1943_v40  ;;  %2123 = vadd.xlane.f32.xlu1 %v2122_v60  ;;  %v2117_v57 = vadd.f32 %v7757_v46, %v7751_v55  ;;  %v2665_v19 = vadd.f32 %v2512_v33, %v2511_v25  ;;  %v2508_v36 = vmul.f32 %v4249_v56, %v7094_v7  ;;  %v7778_v18 = vpop.eup %4097  ;;  %v10557_v40 = vld [vmem:[#allocation40_spill] sm:$0xff]  ;;  %v4251_v25 = vld [vmem:[%s9676_s2 + $0x120] sm:$0xff]  ;;  %v10561_v55 = vld [vmem:[#allocation37_spill] sm:$0xff] }
 0x201   :  { %10556 = vst [vmem:[#allocation114_spill] sm:$0xff] %v7778_v18  ;;  %v1947_v26 = vmul.f32 1.442695, %v1662_v29  ;;  %v1949_v51 = vmul.f32 1.442695, %v1663_v32  ;;  %v2509_v60 = vmul.f32 %v4250_v37, %v10557_v40  ;;  %v10558_v33 = vld [vmem:[#allocation42_spill] sm:$0xff]  ;;  %v7788_v58 = vpop.eup %4099  ;;  %4117 = vpow2.f32 %v1945_v59 }
 0x202   :  { %v2517_v12 = vmul.f32 %v4251_v25, %v10558_v33  ;;  %10559 = vst [vmem:[#allocation115_spill] sm:$0xff] %v7788_v58  ;;  %v1951_v56 = vmul.f32 1.442695, %v1664_v39  ;;  %v2118_v46 = vadd.f32 %v7762_v34, %v2117_v57  ;;  %v2125_v29 = vadd.f32 %v7778_v18, %v7770_v53  ;;  %v7793_v32 = vpop.eup %4101  ;;  %v4252_v37 = vld [vmem:[%s9676_s2 + $0x128] sm:$0xff]  ;;  %v10562_v59 = vld [vmem:[#allocation129_spill] sm:$0xff]  ;;  %v4254_v57 = vld [vmem:[%s9676_s2 + $0x110] sm:$0xff] }
 0x203   :  { %10560 = vst [vmem:[#allocation178_spill] sm:$0xff] %v7793_v32  ;;  %4119 = vpow2.f32 %v1947_v26  ;;  %v2518_v5 = vmul.f32 %v4252_v37, %v10561_v55  ;;  %v4253_v25 = vld [vmem:[%s9676_s2 + $0x108] sm:$0xff]  ;;  %v10563_v18 = vld [vmem:[#allocation46_spill] sm:$0xff]  ;;  %v7807_v34 = vpop.eup %4103  ;;  %v4255_v37 = vld [vmem:[%s9676_s2 + $0xb8] sm:$0xff] }
 0x204   :  { %v2514_v39 = vmul.f32 %v4253_v25, %v10562_v59  ;;  %v2515_v53 = vmul.f32 %v4254_v57, %v10563_v18  ;;  %10564 = vst [vmem:[#allocation179_spill] sm:$0xff] %v7807_v34  ;;  %4121 = vpow2.f32 %v1949_v51  ;;  %2119 = vadd.xlane.f32.xlu0 %v2118_v46  ;;  %v2126_v26 = vadd.f32 %v7788_v58, %v2125_v29  ;;  %v10565_v55 = vld [vmem:[#allocation35_spill] sm:$0xff]  ;;  %v4256_v25 = vld [vmem:[%s9676_s2 + $0x100] sm:$0xff] }
 0x205   :  { %v2504_v33 = vmul.f32 %v4255_v37, %v10565_v55  ;;  %v10566_v59 = vld [vmem:[#allocation126_spill] sm:$0xff]  ;;  %v2129_v57 = vadd.f32 %v7807_v34, %v7793_v32  ;;  %v7822_v46 = vadd.f32 %v7693_v63, %v7649_v10  ;;  %v7826_v51 = vadd.f32 %v7703_v17, %v7699_v24  ;;  %v7830_v37 = vpop.eup %4105  ;;  %v4257_v10 = vld [vmem:[%s9676_s2 + $0xe8] sm:$0xff]  ;;  %v10569_v63 = vld [vmem:[#allocation41_spill] sm:$0xff] }
 0x206   :  { %v2513_v40 = vmul.f32 %v4256_v25, %v10566_v59  ;;  %v7828_v29 = vadd.f32 %v2657_v44, %v2507_v52  ;;  %10567 = vst [vmem:[#allocation180_spill] sm:$0xff] %v7830_v37  ;;  %4123 = vpow2.f32 %v1951_v56  ;;  %v2661_v25 = vadd.f32 %v2509_v60, %v2508_v36  ;;  %v7836_v7 = vpop.eup %4107  ;;  %v10570_v36 = vld [vmem:[#allocation43_spill] sm:$0xff]  ;;  %v4260_v60 = vld [vmem:[%s9676_s2 + $0x138] sm:$0xff] }
 0x207   :  { %v7832_v58 = vadd.f32 %v2653_v27, %v2504_v33  ;;  %10568 = vst [vmem:[#allocation181_spill] sm:$0xff] %v7836_v7  ;;  %v2130_v34 = vadd.f32 %v7830_v37, %v2129_v57  ;;  %v2510_v24 = vmul.f32 %v4257_v10, %v10569_v63  ;;  %v2673_v17 = vadd.f32 %v2518_v5, %v2517_v12  ;;  %v4258_v27 = vld [vmem:[%s9676_s2 + $0x150] sm:$0xff]  ;;  %v10571_v33 = vld [vmem:[#allocation131_spill] sm:$0xff]  ;;  %v4264_v37 = vld [vmem:[%s9676_s2 + $0x180] sm:$0xff] }
 0x208   :  { %v7834_v18 = vadd.f32 %v2665_v19, %v2513_v40  ;;  %v2669_v52 = vadd.f32 %v2515_v53, %v2514_v39  ;;  %2127 = vadd.xlane.f32.xlu0 %v2126_v26  ;;  %v2523_v44 = vmul.f32 %v4258_v27, %v7144_v50  ;;  %v4259_v19 = vld [vmem:[%s9676_s2 + $0x158] sm:$0xff]  ;;  %v2520_v5 = vmul.f32 %v4260_v60, %v10571_v33  ;;  %v4261_v53 = vld [vmem:[%s9676_s2 + $0x140] sm:$0xff]  ;;  %v10572_v12 = vld [vmem:[#allocation132_spill] sm:$0xff]  ;;  %v7859_v39 = vpop.eup %4109 }
 0x209   :  { %v2524_v40 = vmul.f32 %v4259_v19, %v10570_v36  ;;  %v2521_v56 = vmul.f32 %v4261_v53, %v10572_v12  ;;  %10573 = vst [vmem:[#allocation182_spill] sm:$0xff] %v7859_v39  ;;  %2131 = vadd.xlane.f32.xlu1 %v2130_v34  ;;  %v4262_v26 = vld [vmem:[%s9676_s2 + $0x130] sm:$0xff]  ;;  %v10574_v57 = vld [vmem:[#allocation39_spill] sm:$0xff]  ;;  %v4263_v27 = vld [vmem:[%s9676_s2 + $0x118] sm:$0xff]  ;;  %v7879_v36 = vadd.f32 %v2661_v25, %v2510_v24 }
 0x20a   :  { %v2519_v10 = vmul.f32 %v4262_v26, %v10574_v57  ;;  %v10575_v19 = vld [vmem:[#allocation47_spill] sm:$0xff]  ;;  %v10576_v53 = vld [vmem:[#allocation53_spill] sm:$0xff]  ;;  %v2133_v26 = vadd.f32 %v7859_v39, %v7836_v7  ;;  %v7889_v57 = vpop.eup %4111  ;;  %v4268_v25 = vld [vmem:[%s9676_s2 + $0x1b0] sm:$0xff] }
 0x20b   :  { %v2516_v60 = vmul.f32 %v4263_v27, %v10575_v19  ;;  %v2529_v32 = vmul.f32 %v4264_v37, %v10576_v53  ;;  %v4265_v34 = vld [vmem:[%s9676_s2 + $0x188] sm:$0xff]  ;;  %v10577_v12 = vld [vmem:[#allocation49_spill] sm:$0xff]  ;;  %v4267_v37 = vld [vmem:[%s9676_s2 + $0x170] sm:$0xff]  ;;  %10579 = vst [vmem:[#allocation183_spill] sm:$0xff] %v7889_v57  ;;  %v2535_v24 = vmul.f32 %v4268_v25, %v7215_v6 }
 0x20c   :  { %v2530_v33 = vmul.f32 %v4265_v34, %v10577_v12  ;;  %v4266_v27 = vld [vmem:[%s9676_s2 + $0x168] sm:$0xff]  ;;  %v10578_v53 = vld [vmem:[#allocation57_spill] sm:$0xff]  ;;  %v7891_v34 = vadd.f32 %v2673_v17, %v2519_v10  ;;  %v7903_v7 = vpop.eup %4113  ;;  %v4270_v17 = vld [vmem:[%s9676_s2 + $0x160] sm:$0xff] }
 0x20d   :  { %v2526_v50 = vmul.f32 %v4266_v27, %v7198_v38  ;;  %v2527_v19 = vmul.f32 %v4267_v37, %v10578_v53  ;;  %v7893_v12 = vadd.f32 %v2669_v52, %v2516_v60  ;;  %v4269_v27 = vld [vmem:[%s9676_s2 + $0x1b8] sm:$0xff]  ;;  %10580 = vst [vmem:[#allocation184_spill] sm:$0xff] %v7903_v7  ;;  %v2134_v37 = vadd.f32 %v7889_v57, %v2133_v26  ;;  %v10581_v52 = vld [vmem:[#allocation130_spill] sm:$0xff]  ;;  %v7910_v38 = vpop.eup %4115  ;;  %v4271_v25 = vld [vmem:[%s9676_s2 + $0x148] sm:$0xff] }
 0x20e   :  { %v2536_v39 = vmul.f32 %v4269_v27, %v7221_v31  ;;  %v2525_v10 = vmul.f32 %v4270_v17, %v10581_v52  ;;  %v2681_v60 = vadd.f32 %v2524_v40, %v2523_v44  ;;  %v2677_v53 = vadd.f32 %v2521_v56, %v2520_v5  ;;  %10582 = vst [vmem:[#allocation185_spill] sm:$0xff] %v7910_v38  ;;  %v10583_v6 = vld [vmem:[#allocation52_spill] sm:$0xff]  ;;  %v4272_v26 = vld [vmem:[%s9676_s2 + $0x198] sm:$0xff]  ;;  %v4273_v44 = vld [vmem:[%s9676_s2 + $0x1a0] sm:$0xff] }
 0x20f   :  { %v2522_v27 = vmul.f32 %v4271_v25, %v10583_v6  ;;  %v2689_v31 = vadd.f32 %v2530_v33, %v2529_v32  ;;  %v2532_v57 = vmul.f32 %v4272_v26, %v7234_v45  ;;  %v2533_v40 = vmul.f32 %v4273_v44, %v7240_v8  ;;  %2135 = vadd.xlane.f32.xlu0 %v2134_v37  ;;  %v4274_v32 = vld [vmem:[%s9676_s2 + $0x1e0] sm:$0xff]  ;;  %v10584_v33 = vld [vmem:[#allocation139_spill] sm:$0xff]  ;;  %v10585_v26 = vld [vmem:[#allocation140_spill] sm:$0xff]  ;;  %v7934_v6 = vpop.eup %4117 }
 0x210   :  { %v2137_v5 = vadd.f32 %v7910_v38, %v7903_v7  ;;  %v2685_v56 = vadd.f32 %v2527_v19, %v2526_v50  ;;  %v2541_v17 = vmul.f32 %v4274_v32, %v10584_v33  ;;  %v4275_v25 = vld [vmem:[%s9676_s2 + $0x1e8] sm:$0xff]  ;;  %10586 = vst [vmem:[#allocation186_spill] sm:$0xff] %v7934_v6  ;;  %v4276_v44 = vld [vmem:[%s9676_s2 + $0x190] sm:$0xff]  ;;  %v10587_v37 = vld [vmem:[#allocation133_spill] sm:$0xff]  ;;  %v2697_v19 = vadd.f32 %v2536_v39, %v2535_v24  ;;  %v7948_v8 = vpop.eup %4119 }
 0x211   :  { %v2542_v45 = vmul.f32 %v4275_v25, %v10585_v26  ;;  %v2531_v50 = vmul.f32 %v4276_v44, %v10587_v37  ;;  %v4277_v38 = vld [vmem:[%s9676_s2 + $0x1c8] sm:$0xff]  ;;  %v10588_v32 = vld [vmem:[#allocation144_spill] sm:$0xff]  ;;  %10590 = vst [vmem:[#allocation187_spill] sm:$0xff] %v7948_v8  ;;  %v7951_v63 = vadd.f32 %v2681_v60, %v2525_v10  ;;  %v7953_v44 = vadd.f32 %v2677_v53, %v2522_v27  ;;  %v4279_v39 = vld [vmem:[%s9676_s2 + $0x178] sm:$0xff] }
 0x212   :  { %v2538_v33 = vmul.f32 %v4277_v38, %v10588_v32  ;;  %v4278_v7 = vld [vmem:[%s9676_s2 + $0x1d0] sm:$0xff]  ;;  %v2138_v52 = vadd.f32 %v7934_v6, %v2137_v5  ;;  %v10591_v24 = vld [vmem:[#allocation58_spill] sm:$0xff]  ;;  %v7959_v32 = vpop.eup %4121  ;;  %v4281_v53 = vld [vmem:[%s9676_s2 + $0x1a8] sm:$0xff]  ;;  %v2693_v27 = vadd.f32 %v2533_v40, %v2532_v57 }
 0x213   :  { %v10589_v25 = vld [vmem:[#allocation60_spill] sm:$0xff]  ;;  %v2528_v38 = vmul.f32 %v4279_v39, %v10591_v24  ;;  %10592 = vst [vmem:[#allocation188_spill] sm:$0xff] %v7959_v32  ;;  %v7961_v37 = vadd.f32 %v2689_v31, %v2531_v50  ;;  %v10594_v10 = vld [vmem:[#allocation138_spill] sm:$0xff]  ;;  %v2141_v39 = vadd.f32 %v7959_v32, %v7948_v8  ;;  %v7981_v59 = vpop.eup %4123  ;;  %v10597_v40 = vld [vmem:[#allocation61_spill] sm:$0xff] }
 0x214   :  { %v2539_v26 = vmul.f32 %v4278_v7, %v10589_v25  ;;  %v4280_v7 = vld [vmem:[%s9676_s2 + $0x1c0] sm:$0xff]  ;;  %v10593_v25 = vld [vmem:[#allocation56_spill] sm:$0xff]  ;;  %v2534_v60 = vmul.f32 %v4281_v53, %v10594_v10  ;;  %2139 = vadd.xlane.f32.xlu1 %v2138_v52  ;;  %10596 = vst [vmem:[#allocation189_spill] sm:$0xff] %v7981_v59  ;;  %v10603_v32 = vld [vmem:[#allocation73_spill] sm:$0xff] }
 0x215   :  { %v2537_v5 = vmul.f32 %v4280_v7, %v10593_v25  ;;  %v7973_v6 = vadd.f32 %v2685_v56, %v2528_v38  ;;  %v4282_v31 = vld [vmem:[%s9676_s2 + $0x1f0] sm:$0xff]  ;;  %v10595_v50 = vld [vmem:[#allocation142_spill] sm:$0xff]  ;;  %v2705_v7 = vadd.f32 %v2542_v45, %v2541_v17  ;;  %v7979_v25 = vpop.xlane.xlu1 %1955  ;;  %v2142_v38 = vadd.f32 %v7981_v59, %v2141_v39  ;;  %v4284_v45 = vld [vmem:[%s9676_s2 + $0x218] sm:$0xff] }
 0x216   :  { %v2543_v24 = vmul.f32 %v4282_v31, %v10595_v50  ;;  %v2701_v57 = vadd.f32 %v2539_v26, %v2538_v33  ;;  %4125 = vrcp.f32 %v7979_v25  ;;  %v4283_v52 = vld [vmem:[%s9676_s2 + $0x210] sm:$0xff]  ;;  %v10598_v17 = vld [vmem:[#allocation62_spill] sm:$0xff]  ;;  %v4285_v33 = vld [vmem:[%s9676_s2 + $0x1f8] sm:$0xff] }
 0x217   :  { %v7983_v55 = vadd.f32 %v2697_v19, %v2537_v5  ;;  %v2547_v56 = vmul.f32 %v4283_v52, %v10597_v40  ;;  %v2548_v53 = vmul.f32 %v4284_v45, %v10598_v17  ;;  %v10599_v26 = vld [vmem:[#allocation63_spill] sm:$0xff]  ;;  %v4286_v5 = vld [vmem:[%s9676_s2 + $0x200] sm:$0xff]  ;;  %v10600_v31 = vld [vmem:[#allocation64_spill] sm:$0xff]  ;;  %v8003_v40 = vadd.f32 %v2693_v27, %v2534_v60  ;;  %2143 = vadd.xlane.f32.xlu0 %v2142_v38 }
 0x218   :  { %v2544_v19 = vmul.f32 %v4285_v33, %v10599_v26  ;;  %v2545_v52 = vmul.f32 %v4286_v5, %v10600_v31  ;;  %v4287_v39 = vld [vmem:[%s9676_s2 + $0x1d8] sm:$0xff]  ;;  %v4288_v17 = vld [vmem:[%s9676_s2 + $0x240] sm:$0xff]  ;;  %v10602_v50 = vld [vmem:[#allocation72_spill] sm:$0xff]  ;;  %2627 = vadd.xlane.f32.xlu1 %v7451_v0  ;;  %v8018_v60 = vadd.f32 %v2705_v7, %v2543_v24 }
 0x219   :  { %v10601_v59 = vld [vmem:[#allocation145_spill] sm:$0xff]  ;;  %v2553_v33 = vmul.f32 %v4288_v17, %v10602_v50  ;;  %v4289_v26 = vld [vmem:[%s9676_s2 + $0x248] sm:$0xff]  ;;  %v4291_v17 = vld [vmem:[%s9676_s2 + $0x230] sm:$0xff]  ;;  %v8034_v38 = vpop.xlane.xlu1 %1963 }
 0x21a   :  { %v2540_v45 = vmul.f32 %v4287_v39, %v10601_v59  ;;  %v2554_v5 = vmul.f32 %v4289_v26, %v10603_v32  ;;  %v4290_v27 = vld [vmem:[%s9676_s2 + $0x228] sm:$0xff]  ;;  %v4292_v0 = vld [vmem:[%s9676_s2 + $0x220] sm:$0xff]  ;;  %v8036_v26 = vpop.xlane.xlu0 %1959  ;;  %4127 = vrcp.f32 %v8034_v38 }
 0x21b   :  { %v2550_v39 = vmul.f32 %v4290_v27, %v7344_v43  ;;  %v10604_v50 = vld [vmem:[#allocation147_spill] sm:$0xff]  ;;  %v4293_v27 = vld [vmem:[%s9676_s2 + $0x270] sm:$0xff]  ;;  %4129 = vrcp.f32 %v8036_v26  ;;  %2631 = vadd.xlane.f32.xlu0 %v7561_v49  ;;  %v10609_v49 = vld [vmem:[#allocation149_spill] sm:$0xff] }
 0x21c   :  { %v2551_v31 = vmul.f32 %v4291_v17, %v10604_v50  ;;  %v8028_v59 = vadd.f32 %v2701_v57, %v2540_v45  ;;  %v10605_v24 = vld [vmem:[#allocation67_spill] sm:$0xff]  ;;  %v2559_v43 = vmul.f32 %v4293_v27, %v7361_v22  ;;  %v4294_v57 = vld [vmem:[%s9676_s2 + $0x278] sm:$0xff]  ;;  %v2713_v17 = vadd.f32 %v2548_v53, %v2547_v56  ;;  %v4296_v27 = vld [vmem:[%s9676_s2 + $0x250] sm:$0xff]  ;;  %2635 = vadd.xlane.f32.xlu1 %v7476_v35 }
 0x21d   :  { %v2549_v7 = vmul.f32 %v4292_v0, %v10605_v24  ;;  %v2560_v45 = vmul.f32 %v4294_v57, %v7363_v2  ;;  %v4295_v0 = vld [vmem:[%s9676_s2 + $0x208] sm:$0xff]  ;;  %v10606_v50 = vld [vmem:[#allocation65_spill] sm:$0xff]  ;;  %v2709_v24 = vadd.f32 %v2545_v52, %v2544_v19  ;;  %v10607_v22 = vld [vmem:[#allocation146_spill] sm:$0xff]  ;;  %v2721_v10 = vadd.f32 %v2554_v5, %v2553_v33 }
 0x21e   :  { %v2546_v32 = vmul.f32 %v4295_v0, %v10606_v50  ;;  %v2555_v8 = vmul.f32 %v4296_v27, %v10607_v22  ;;  %v4297_v56 = vld [vmem:[%s9676_s2 + $0x238] sm:$0xff]  ;;  %v2717_v19 = vadd.f32 %v2551_v31, %v2550_v39  ;;  %v4299_v33 = vld [vmem:[%s9676_s2 + $0x260] sm:$0xff]  ;;  %v8070_v27 = vpop.xlane.xlu1 %1971  ;;  %v4301_v39 = vld [vmem:[%s9676_s2 + $0x2a8] sm:$0xff] }
 0x21f   :  { %v2552_v53 = vmul.f32 %v4297_v56, %v7353_v4  ;;  %v4298_v52 = vld [vmem:[%s9676_s2 + $0x258] sm:$0xff]  ;;  %v2729_v56 = vadd.f32 %v2560_v45, %v2559_v43  ;;  %v4300_v35 = vld [vmem:[%s9676_s2 + $0x2a0] sm:$0xff]  ;;  %v4302_v2 = vld [vmem:[%s9676_s2 + $0x288] sm:$0xff]  ;;  %4131 = vrcp.f32 %v8070_v27  ;;  %v8085_v43 = vpop.xlane.xlu0 %1967  ;;  %2639 = vadd.xlane.f32.xlu0 %v7679_v11 }
 0x220   :  { %v2556_v57 = vmul.f32 %v4298_v52, %v7376_v54  ;;  %v10608_v5 = vld [vmem:[#allocation77_spill] sm:$0xff]  ;;  %v2565_v31 = vmul.f32 %v4300_v35, %v10609_v49  ;;  %v4303_v45 = vld [vmem:[%s9676_s2 + $0x290] sm:$0xff]  ;;  %v8099_v49 = vadd.f32 %v2713_v17, %v2549_v7  ;;  %4133 = vrcp.f32 %v8085_v43  ;;  %2643 = vadd.xlane.f32.xlu1 %v7570_v9 }
 0x221   :  { %v2557_v0 = vmul.f32 %v4299_v33, %v10608_v5  ;;  %v10610_v52 = vld [vmem:[#allocation81_spill] sm:$0xff]  ;;  %v2562_v33 = vmul.f32 %v4302_v2, %v7424_v48  ;;  %v2563_v35 = vmul.f32 %v4303_v45, %v7436_v30  ;;  %v8101_v5 = vadd.f32 %v2709_v24, %v2546_v32  ;;  %v4306_v45 = vld [vmem:[%s9676_s2 + $0x280] sm:$0xff]  ;;  %v10611_v30 = vld [vmem:[#allocation76_spill] sm:$0xff] }
 0x222   :  { %v2566_v54 = vmul.f32 %v4301_v39, %v10610_v52  ;;  %v4304_v39 = vld [vmem:[%s9676_s2 + $0x2d0] sm:$0xff]  ;;  %v4305_v2 = vld [vmem:[%s9676_s2 + $0x2d8] sm:$0xff]  ;;  %v2561_v4 = vmul.f32 %v4306_v45, %v10611_v30  ;;  %v8113_v7 = vadd.f32 %v2717_v19, %v2552_v53  ;;  %v4307_v32 = vld [vmem:[%s9676_s2 + $0x268] sm:$0xff] }
 0x223   :  { %v2571_v52 = vmul.f32 %v4304_v39, %v7445_v28  ;;  %v2572_v48 = vmul.f32 %v4305_v2, %v7453_v3  ;;  %v10612_v39 = vld [vmem:[#allocation95_spill] sm:$0xff]  ;;  %v8111_v28 = vadd.f32 %v2721_v10, %v2555_v8  ;;  %v10613_v24 = vld [vmem:[#allocation148_spill] sm:$0xff]  ;;  %v2725_v3 = vadd.f32 %v2557_v0, %v2556_v57  ;;  %v4126_v8 = vpop.eup %4125  ;;  %v4309_v19 = vld [vmem:[%s9676_s2 + $0x2b8] sm:$0xff]  ;;  %2647 = vadd.xlane.f32.xlu0 %v7826_v51 }
 0x224   :  { %vm2337_vm6 = vcmp.gt.f32.partialorder %v10612_v39, -1e+29  ;;  %v2558_v17 = vmul.f32 %v4307_v32, %v10613_v24  ;;  %v8119_v2 = vadd.f32 %v2729_v56, %v2561_v4  ;;  %v4308_v9 = vld [vmem:[%s9676_s2 + $0x2b0] sm:$0xff]  ;;  %v2737_v45 = vadd.f32 %v2566_v54, %v2565_v31  ;;  %v4310_v4 = vld [vmem:[%s9676_s2 + $0x2c0] sm:$0xff]  ;;  %v8134_v56 = vpop.xlane.xlu1 %1979  ;;  %v4311_v54 = vld [vmem:[%s9676_s2 + $0x298] sm:$0xff]  ;;  %2651 = vadd.xlane.f32.xlu1 %v7822_v46 }
 0x225   :  { %v2567_v11 = vmul.f32 %v4308_v9, %v7418_v47  ;;  %v2733_v10 = vadd.f32 %v2563_v35, %v2562_v33  ;;  %v2745_v53 = vadd.f32 %v2572_v48, %v2571_v52  ;;  %v2568_v30 = vmul.f32 %v4309_v19, %v7471_v61  ;;  %v4312_v31 = vld [vmem:[%s9676_s2 + $0x300] sm:$0xff]  ;;  %v10614_v52 = vld [vmem:[#allocation92_spill] sm:$0xff]  ;;  %v4313_v35 = vld [vmem:[%s9676_s2 + $0x308] sm:$0xff]  ;;  %v8151_v9 = vpop.xlane.xlu0 %1975 }
 0x226   :  { %v2569_v57 = vmul.f32 %v4310_v4, %v7478_v15  ;;  %v2193_v0 = vmul.f32 %v4126_v8, %v7979_v25  ;;  %v2564_v48 = vmul.f32 %v4311_v54, %v7441_v41  ;;  %v2577_v33 = vmul.f32 %v4312_v31, %v10614_v52  ;;  %v10615_v32 = vld [vmem:[#allocation87_spill] sm:$0xff]  ;;  %v4314_v19 = vld [vmem:[%s9676_s2 + $0x2e0] sm:$0xff]  ;;  %v10616_v4 = vld [vmem:[#allocation152_spill] sm:$0xff] }
 0x227   :  { %v2578_v25 = vmul.f32 %v4313_v35, %v10615_v32  ;;  %4135 = vrcp.f32 %v8134_v56  ;;  %v2573_v54 = vmul.f32 %v4314_v19, %v10616_v4  ;;  %v4315_v31 = vld [vmem:[%s9676_s2 + $0x2e8] sm:$0xff]  ;;  %v4316_v46 = vld [vmem:[%s9676_s2 + $0x2f0] sm:$0xff]  ;;  %v8166_v15 = vadd.f32 %v2725_v3, %v2558_v17  ;;  %2655 = vadd.xlane.f32.xlu0 %v7832_v58 }
 0x228   :  { %v2574_v35 = vmul.f32 %v4315_v31, %v7522_v14  ;;  %v2575_v51 = vmul.f32 %v4316_v46, %v7530_v62  ;;  %v2241_v32 = vsub.f32 2.0, %v2193_v0  ;;  %v10617_v52 = vld [vmem:[#allocation103_spill] sm:$0xff]  ;;  %4137 = vrcp.f32 %v8151_v9  ;;  %v4128_v0 = vpop.eup %4127  ;;  %v4318_v3 = vld [vmem:[%s9676_s2 + $0x310] sm:$0xff]  ;;  %2659 = vadd.xlane.f32.xlu1 %v7828_v29 }
 0x229   :  { %vm2339_vm0 = vcmp.gt.f32.partialorder %v10617_v52, -1e+29  ;;  %v8169_v19 = vadd.f32 %v2737_v45, %v2567_v11  ;;  %v8171_v61 = vadd.f32 %v2733_v10, %v2564_v48  ;;  %v8173_v4 = vadd.f32 %v2745_v53, %v2573_v54  ;;  %v4317_v31 = vld [vmem:[%s9676_s2 + $0x2c8] sm:$0xff]  ;;  %v4319_v45 = vld [vmem:[%s9676_s2 + $0x2f8] sm:$0xff]  ;;  %v4130_v53 = vpop.eup %4129  ;;  %v8203_v58 = vpop.xlane.xlu0 %1983 }
 0x22a   :  { %v10618_v14 = vld [vmem:[#allocation91_spill] sm:$0xff]  ;;  %v2741_v46 = vadd.f32 %v2569_v57, %v2568_v30  ;;  %v2289_v62 = vmul.f32 %v4126_v8, %v2241_v32  ;;  %v2579_v17 = vmul.f32 %v4318_v3, %v7513_v21  ;;  %v2753_v11 = vadd.f32 %v2578_v25, %v2577_v33  ;;  %v10619_v8 = vld [vmem:[#allocation104_spill] sm:$0xff]  ;;  %v8191_v57 = vpop.xlane.xlu1 %1987  ;;  %v10630_v52 = vld [vmem:[#allocation117_spill] sm:$0xff] }
 0x22b   :  { %v2570_v41 = vmul.f32 %v4317_v31, %v10618_v14  ;;  %v2576_v10 = vmul.f32 %v4319_v45, %v7535_v16  ;;  %v2195_v30 = vmul.f32 %v4128_v0, %v8034_v38  ;;  %vm2338_vm3 = vcmp.gt.f32.partialorder %v10619_v8, -1e+29  ;;  %v4320_v33 = vld [vmem:[%s9676_s2 + $0x330] sm:$0xff]  ;;  %v4321_v38 = vld [vmem:[%s9676_s2 + $0x338] sm:$0xff]  ;;  %v10622_v31 = vld [vmem:[#allocation3_spill] sm:$0xff]  ;;  %2663 = vadd.xlane.f32.xlu0 %v7879_v36 }
 0x22c   :  { %v2749_v48 = vadd.f32 %v2575_v51, %v2574_v35  ;;  %v2583_v32 = vmul.f32 %v4320_v33, %v7539_v1  ;;  %v8199_v25 = vsel %vm2337_vm6, %v2289_v62, 0.0  ;;  %v2194_v29 = vmul.f32 %v4130_v53, %v8036_v26  ;;  %v10621_v35 = vld [vmem:[#allocation5_spill] sm:$0xff]  ;;  %v10623_v62 = vld [vmem:[#allocation4_spill] sm:$0xff]  ;;  %v4132_v45 = vpop.eup %4131  ;;  %2667 = vadd.xlane.f32.xlu1 %v7834_v18 }
 0x22d   :  { %10620 = vst [vmem:[#allocation65_spill] sm:$0xff] %v8199_v25  ;;  %4139 = vrcp.f32 %v8191_v57  ;;  %v2584_v54 = vmul.f32 %v4321_v38, %v7545_v42  ;;  %v2914_v51 = vmul.f32 %v10621_v35, %v8199_v25  ;;  %v2915_v39 = vmul.f32 %v10622_v31, %v8199_v25  ;;  %v10624_v1 = vld [vmem:[#allocation112_spill] sm:$0xff]  ;;  %v4134_v38 = vpop.eup %4133 }
 0x22e   :  { %v2916_v3 = vmul.f32 %v10623_v62, %v8199_v25  ;;  %v2243_v26 = vsub.f32 2.0, %v2195_v30  ;;  %v2242_v33 = vsub.f32 2.0, %v2194_v29  ;;  %vm2341_vm1 = vcmp.gt.f32.partialorder %v10624_v1, -1e+29  ;;  %v10625_v62 = vld [vmem:[#allocation109_spill] sm:$0xff]  ;;  %v8226_v14 = vpop.xlane.xlu1 %1995 }
 0x22f   :  { %4141 = vrcp.f32 %v8203_v58  ;;  %v8217_v16 = vadd.f32 %v2741_v46, %v2570_v41  ;;  %v8219_v21 = vadd.f32 %v2753_v11, %v2579_v17  ;;  %v3738_v35 = vpack.c.bf16 %v2915_v39, %v2914_v51  ;;  %v4322_v41 = vld [vmem:[%s9676_s2 + $0x340] sm:$0xff]  ;;  %v10627_v11 = vld [vmem:[#allocation16_spill] sm:$0xff]  ;;  %v10628_v51 = vld [vmem:[#allocation17_spill] sm:$0xff]  ;;  %2671 = vadd.xlane.f32.xlu0 %v7893_v12 }
 0x230   :  { %v3739_v31 = vpack.c.bf16 %v2916_v3, %v2916_v3  ;;  %v2291_v42 = vmul.f32 %v4128_v0, %v2243_v26  ;;  %vm2340_vm11 = vcmp.gt.f32.partialorder %v10625_v62, -1e+29  ;;  %v2290_v30 = vmul.f32 %v4130_v53, %v2242_v33  ;;  %v10626_v0 = vld [vmem:[#allocation9_spill] sm:$0xff]  ;;  %2675 = vadd.xlane.f32.xlu1 %v7891_v34  ;;  %v10633_v3 = vld [vmem:[#allocation7_spill] sm:$0xff] }
 0x231   :  { %v2197_v29 = vmul.f32 %v4132_v45, %v8070_v27  ;;  %v2196_v25 = vmul.f32 %v4134_v38, %v8085_v43  ;;  %v8232_v18 = vmul.f32 %v4322_v41, %v7551_v13  ;;  %3538 = vst [vmem:[%s9677_s3] sm:$0xff] %v3738_v35  ;;  %4143 = vrcp.f32 %v8226_v14  ;;  %v8245_v27 = vpop.xlane.xlu0 %1991 }
 0x232   :  { %3539 = vst [vmem:[%s9677_s3 + $0x8] sm:$0xf] %v3739_v31  ;;  %v8242_v36 = vsel %vm2339_vm0, %v2291_v42, 0.0  ;;  %v8247_v43 = vadd.f32 %v2749_v48, %v2576_v10  ;;  %v8249_v46 = vadd.f32 %v2584_v54, %v2583_v32  ;;  %v8259_v42 = vsel %vm2338_vm3, %v2290_v30, 0.0  ;;  %v10631_v10 = vld [vmem:[#allocation10_spill] sm:$0xff]  ;;  %v10632_v32 = vld [vmem:[#allocation11_spill] sm:$0xff] }
 0x233   :  { %v2920_v17 = vmul.f32 %v10626_v0, %v8242_v36  ;;  %v2921_v53 = vmul.f32 %v10627_v11, %v8242_v36  ;;  %v2922_v39 = vmul.f32 %v10628_v51, %v8242_v36  ;;  %10629 = vst [vmem:[#allocation146_spill] sm:$0xff] %v8259_v42  ;;  %vm2343_vm13 = vcmp.gt.f32.partialorder %v10630_v52, -1e+29  ;;  %v10634_v51 = vld [vmem:[#allocation116_spill] sm:$0xff]  ;;  %2679 = vadd.xlane.f32.xlu0 %v7953_v44  ;;  %v10637_v44 = vld [vmem:[#allocation161_spill] sm:$0xff] }
 0x234   :  { %v2917_v48 = vmul.f32 %v10631_v10, %v8259_v42  ;;  %v2918_v54 = vmul.f32 %v10632_v32, %v8259_v42  ;;  %v2919_v26 = vmul.f32 %v10633_v3, %v8259_v42  ;;  %v2245_v33 = vsub.f32 2.0, %v2197_v29  ;;  %v4136_v35 = vpop.eup %4135  ;;  %2683 = vadd.xlane.f32.xlu1 %v7951_v63  ;;  %v4325_v63 = vld [vmem:[%s9676_s2 + $0x328] sm:$0xff] }
 0x235   :  { %v3742_v8 = vpack.c.bf16 %v2921_v53, %v2920_v17  ;;  %v3743_v31 = vpack.c.bf16 %v2922_v39, %v2922_v39  ;;  %v2244_v30 = vsub.f32 2.0, %v2196_v25  ;;  %4145 = vrcp.f32 %v8245_v27  ;;  %v4138_v41 = vpop.eup %4137  ;;  %v8280_v17 = vpop.xlane.xlu1 %2003  ;;  %v4324_v53 = vld [vmem:[%s9676_s2 + $0x320] sm:$0xff]  ;;  %v10635_v39 = vld [vmem:[#allocation160_spill] sm:$0xff] }
 0x236   :  { %v3740_v34 = vpack.c.bf16 %v2918_v54, %v2917_v48  ;;  %v3741_v0 = vpack.c.bf16 %v2919_v26, %v2919_v26  ;;  %v2293_v12 = vmul.f32 %v4132_v45, %v2245_v33  ;;  %v2199_v11 = vmul.f32 %v4136_v35, %v8134_v56  ;;  %v4323_v45 = vld [vmem:[%s9676_s2 + $0x318] sm:$0xff]  ;;  %v8303_v48 = vpop.xlane.xlu0 %1999  ;;  %v10638_v54 = vld [vmem:[#allocation18_spill] sm:$0xff]  ;;  %v10640_v33 = vld [vmem:[#allocation15_spill] sm:$0xff] }
 0x237   :  { %vm2342_vm2 = vcmp.gt.f32.partialorder %v10634_v51, -1e+29  ;;  %3542 = vst [vmem:[%s9677_s3 + $0x18] sm:$0xff] %v3742_v8  ;;  %3543 = vst [vmem:[%s9677_s3 + $0x20] sm:$0xf] %v3743_v31  ;;  %v2292_v29 = vmul.f32 %v4134_v38, %v2244_v30  ;;  %v2198_v25 = vmul.f32 %v4138_v41, %v8151_v9  ;;  %v2580_v56 = vmul.f32 %v4323_v45, %v7558_v23  ;;  %v10639_v26 = vld [vmem:[#allocation13_spill] sm:$0xff] }
 0x238   :  { %v2581_v10 = vmul.f32 %v4324_v53, %v10635_v39  ;;  %3540 = vst [vmem:[%s9677_s3 + $0xc] sm:$0xff] %v3740_v34  ;;  %3541 = vst [vmem:[%s9677_s3 + $0x14] sm:$0xf] %v3741_v0  ;;  %v8300_v9 = vsel %vm2341_vm1, %v2293_v12, 0.0  ;;  %v2247_v38 = vsub.f32 2.0, %v2199_v11  ;;  %4147 = vrcp.f32 %v8280_v17  ;;  %v10642_v34 = vld [vmem:[#allocation121_spill] sm:$0xff]  ;;  %2691 = vadd.xlane.f32.xlu1 %v7961_v37  ;;  %2687 = vadd.xlane.f32.xlu0 %v7973_v6 }
 0x239   :  { %10636 = vst [vmem:[#allocation95_spill] sm:$0xff] %v8300_v9  ;;  %v8309_v32 = vmul.f32 %v4325_v63, %v10637_v44  ;;  %v2926_v3 = vmul.f32 %v10638_v54, %v8300_v9  ;;  %v2927_v1 = vmul.f32 %v10639_v26, %v8300_v9  ;;  %v2928_v8 = vmul.f32 %v10640_v33, %v8300_v9  ;;  %v10643_v12 = vld [vmem:[#allocation22_spill] sm:$0xff]  ;;  %v10644_v45 = vld [vmem:[#allocation23_spill] sm:$0xff]  ;;  %v10648_v6 = vld [vmem:[#allocation24_spill] sm:$0xff] }
 0x23a   :  { %v8319_v31 = vsel %vm2340_vm11, %v2292_v29, 0.0  ;;  %v4140_v30 = vpop.eup %4139  ;;  %v2295_v63 = vmul.f32 %v4136_v35, %v2247_v38  ;;  %v10645_v54 = vld [vmem:[#allocation119_spill] sm:$0xff]  ;;  %v2246_v33 = vsub.f32 2.0, %v2198_v25  ;;  %v10646_v29 = vld [vmem:[#allocation118_spill] sm:$0xff]  ;;  %4149 = vrcp.f32 %v8303_v48  ;;  %v8337_v35 = vpop.xlane.xlu1 %2011  ;;  %v10650_v25 = vld [vmem:[#allocation21_spill] sm:$0xff] }
 0x23b   :  { %10641 = vst [vmem:[#allocation148_spill] sm:$0xff] %v8319_v31  ;;  %v2923_v0 = vmul.f32 %v10642_v34, %v8319_v31  ;;  %v2924_v11 = vmul.f32 %v10643_v12, %v8319_v31  ;;  %v2925_v53 = vmul.f32 %v10644_v45, %v8319_v31  ;;  %vm2345_vm15 = vcmp.gt.f32.partialorder %v10645_v54, -1e+29  ;;  %v10661_v54 = vld [vmem:[#allocation25_spill] sm:$0xff] }
 0x23c   :  { %v3746_v26 = vpack.c.bf16 %v2927_v1, %v2926_v3  ;;  %v3747_v42 = vpack.c.bf16 %v2928_v8, %v2928_v8  ;;  %v2201_v62 = vmul.f32 %v4140_v30, %v8191_v57  ;;  %vm2344_vm8 = vcmp.gt.f32.partialorder %v10646_v29, -1e+29  ;;  %v4142_v9 = vpop.eup %4141  ;;  %v10649_v57 = vld [vmem:[#allocation19_spill] sm:$0xff]  ;;  %v10651_v8 = vld [vmem:[#allocation2_spill] sm:$0xff]  ;;  %2699 = vadd.xlane.f32.xlu1 %v7983_v55  ;;  %2695 = vadd.xlane.f32.xlu0 %v8003_v40 }
 0x23d   :  { %v3744_v34 = vpack.c.bf16 %v2924_v11, %v2923_v0  ;;  %v3745_v12 = vpack.c.bf16 %v2925_v53, %v2925_v53  ;;  %v8334_v45 = vsel %vm2343_vm13, %v2295_v63, 0.0  ;;  %v2294_v3 = vmul.f32 %v4138_v41, %v2246_v33  ;;  %v8360_v11 = vpop.xlane.xlu0 %2007 }
 0x23e   :  { %10647 = vst [vmem:[#allocation103_spill] sm:$0xff] %v8334_v45  ;;  %3546 = vst [vmem:[%s9677_s3 + $0x30] sm:$0xff] %v3746_v26  ;;  %v2932_v37 = vmul.f32 %v10648_v6, %v8334_v45  ;;  %v2933_v52 = vmul.f32 %v10649_v57, %v8334_v45  ;;  %v2934_v38 = vmul.f32 %v10650_v25, %v8334_v45  ;;  %v2249_v1 = vsub.f32 2.0, %v2201_v62  ;;  %v4144_v53 = vpop.eup %4143  ;;  %v10655_v62 = vld [vmem:[#allocation29_spill] sm:$0xff]  ;;  %v4326_v6 = vld [vmem:[%s9676_s2 + $0x360] sm:$0xff] }
 0x23f   :  { %3547 = vst [vmem:[%s9677_s3 + $0x38] sm:$0xf] %v3747_v42  ;;  %3544 = vst [vmem:[%s9677_s3 + $0x24] sm:$0xff] %v3744_v34  ;;  %v2200_v42 = vmul.f32 %v4142_v9, %v8203_v58  ;;  %vm2347_vm12 = vcmp.gt.f32.partialorder %v10651_v8, -1e+29  ;;  %v2757_v0 = vadd.f32 %v2581_v10, %v2580_v56  ;;  %4151 = vrcp.f32 %v8337_v35  ;;  %v10653_v58 = vld [vmem:[#allocation123_spill] sm:$0xff] }
 0x240   :  { %3545 = vst [vmem:[%s9677_s3 + $0x2c] sm:$0xf] %v3745_v12  ;;  %v3750_v41 = vpack.c.bf16 %v2933_v52, %v2932_v37  ;;  %v3751_v63 = vpack.c.bf16 %v2934_v38, %v2934_v38  ;;  %v8364_v26 = vsel %vm2342_vm2, %v2294_v3, 0.0  ;;  %4153 = vrcp.f32 %v8360_v11  ;;  %v10654_v10 = vld [vmem:[#allocation28_spill] sm:$0xff]  ;;  %v10656_v37 = vld [vmem:[#allocation162_spill] sm:$0xff]  ;;  %v8392_v52 = vpop.xlane.xlu1 %2019  ;;  %2707 = vadd.xlane.f32.xlu1 %v8018_v60  ;;  %2703 = vadd.xlane.f32.xlu0 %v8028_v59  ;;  %v10668_v8 = vld [vmem:[#allocation31_spill] sm:$0xff] }
 0x241   :  { %10652 = vst [vmem:[#allocation104_spill] sm:$0xff] %v8364_v26  ;;  %v2929_v56 = vmul.f32 %v10653_v58, %v8364_v26  ;;  %v2930_v33 = vmul.f32 %v10654_v10, %v8364_v26  ;;  %v2931_v34 = vmul.f32 %v10655_v62, %v8364_v26  ;;  %v2248_v12 = vsub.f32 2.0, %v2200_v42  ;;  %v8423_v60 = vpop.xlane.xlu0 %2015  ;;  %v10663_v58 = vld [vmem:[#allocation125_spill] sm:$0xff]  ;;  %v10664_v10 = vld [vmem:[#allocation34_spill] sm:$0xff]  ;;  %v10665_v62 = vld [vmem:[#allocation35_spill] sm:$0xff] }
 0x242   :  { %3550 = vst [vmem:[%s9677_s3 + $0x48] sm:$0xff] %v3750_v41  ;;  %3551 = vst [vmem:[%s9677_s3 + $0x50] sm:$0xf] %v3751_v63  ;;  %v2297_v55 = vmul.f32 %v4140_v30, %v2249_v1  ;;  %v2203_v40 = vmul.f32 %v4144_v53, %v8226_v14  ;;  %v8384_v51 = vadd.f32 %v8249_v46, %v8232_v18  ;;  %v4146_v25 = vpop.eup %4145  ;;  %v10657_v30 = vld [vmem:[#allocation6_spill] sm:$0xff]  ;;  %4155 = vrcp.f32 %v8392_v52  ;;  %v10659_v1 = vld [vmem:[#allocation8_spill] sm:$0xff] }
 0x243   :  { %v8390_v57 = vmul.f32 %v4326_v6, %v10656_v37  ;;  %v3748_v38 = vpack.c.bf16 %v2930_v33, %v2929_v56  ;;  %v3749_v3 = vpack.c.bf16 %v2931_v34, %v2931_v34  ;;  %v2296_v42 = vmul.f32 %v4142_v9, %v2248_v12  ;;  %v10660_v9 = vld [vmem:[#allocation30_spill] sm:$0xff] }
 0x244   :  { %vm2346_vm9 = vcmp.gt.f32.partialorder %v10657_v30, -1e+29  ;;  %v8398_v14 = vsel %vm2345_vm15, %v2297_v55, 0.0  ;;  %v2251_v18 = vsub.f32 2.0, %v2203_v40  ;;  %v2202_v46 = vmul.f32 %v4146_v25, %v8245_v27  ;;  %2715 = vadd.xlane.f32.xlu1 %v8099_v49  ;;  %2711 = vadd.xlane.f32.xlu0 %v8101_v5  ;;  %v4332_v30 = vld [vmem:[%s9676_s2 + $0x398] sm:$0xff] }
 0x245   :  { %10658 = vst [vmem:[#allocation5_spill] sm:$0xff] %v8398_v14  ;;  %vm2349_vm7 = vcmp.gt.f32.partialorder %v10659_v1, -1e+29  ;;  %v8403_v41 = vadd.f32 %v2757_v0, %v8309_v32  ;;  %3548 = vst [vmem:[%s9677_s3 + $0x3c] sm:$0xff] %v3748_v38  ;;  %v2938_v27 = vmul.f32 %v10660_v9, %v8398_v14  ;;  %v2939_v63 = vmul.f32 %v10661_v54, %v8398_v14  ;;  %v4148_v0 = vpop.eup %4147  ;;  %v10670_v9 = vld [vmem:[#allocation12_spill] sm:$0xff]  ;;  %v4327_v54 = vld [vmem:[%s9676_s2 + $0x368] sm:$0xff] }
 0x246   :  { %3549 = vst [vmem:[%s9677_s3 + $0x44] sm:$0xf] %v3749_v3  ;;  %v2940_v32 = vmul.f32 %v10548_v20, %v8398_v14  ;;  %v8421_v59 = vsel %vm2344_vm8, %v2296_v42, 0.0  ;;  %v2299_v12 = vmul.f32 %v4144_v53, %v2251_v18  ;;  %v2250_v20 = vsub.f32 2.0, %v2202_v46  ;;  %v10669_v18 = vld [vmem:[#allocation126_spill] sm:$0xff] }
 0x247   :  { %10662 = vst [vmem:[#allocation3_spill] sm:$0xff] %v8421_v59  ;;  %v2935_v56 = vmul.f32 %v10663_v58, %v8421_v59  ;;  %v2936_v33 = vmul.f32 %v10664_v10, %v8421_v59  ;;  %v2937_v34 = vmul.f32 %v10665_v62, %v8421_v59  ;;  %v3754_v55 = vpack.c.bf16 %v2939_v63, %v2938_v27  ;;  %v4150_v5 = vpop.eup %4149  ;;  %v10671_v63 = vld [vmem:[#allocation164_spill] sm:$0xff]  ;;  %v10673_v62 = vld [vmem:[#allocation165_spill] sm:$0xff] }
 0x248   :  { %v3755_v40 = vpack.c.bf16 %v2940_v32, %v2940_v32  ;;  %v2205_v29 = vmul.f32 %v4148_v0, %v8280_v17  ;;  %v8434_v3 = vsel %vm2347_vm12, %v2299_v12, 0.0  ;;  %4157 = vrcp.f32 %v8423_v60  ;;  %v10667_v17 = vld [vmem:[#allocation36_spill] sm:$0xff]  ;;  %2723 = vadd.xlane.f32.xlu1 %v8111_v28  ;;  %2719 = vadd.xlane.f32.xlu0 %v8113_v7  ;;  %v10683_v7 = vld [vmem:[#allocation14_spill] sm:$0xff] }
 0x249   :  { %v3752_v6 = vpack.c.bf16 %v2936_v33, %v2935_v56  ;;  %v3753_v38 = vpack.c.bf16 %v2937_v34, %v2937_v34  ;;  %10666 = vst [vmem:[#allocation4_spill] sm:$0xff] %v8434_v3  ;;  %3554 = vst [vmem:[%s9677_s3 + $0x60] sm:$0xff] %v3754_v55  ;;  %v2944_v53 = vmul.f32 %v10667_v17, %v8434_v3  ;;  %vm2348_vm5 = vcmp.gt.f32.partialorder %v10670_v9, -1e+29  ;;  %v4328_v58 = vld [vmem:[%s9676_s2 + $0x370] sm:$0xff]  ;;  %v4329_v33 = vld [vmem:[%s9676_s2 + $0x348] sm:$0xff] }
 0x24a   :  { %3555 = vst [vmem:[%s9677_s3 + $0x68] sm:$0xf] %v3755_v40  ;;  %v2945_v42 = vmul.f32 %v10668_v8, %v8434_v3  ;;  %v2946_v46 = vmul.f32 %v10669_v18, %v8434_v3  ;;  %v2253_v49 = vsub.f32 2.0, %v2205_v29  ;;  %v2298_v27 = vmul.f32 %v4146_v25, %v2250_v20  ;;  %v10672_v56 = vld [vmem:[#allocation96_spill] sm:$0xff]  ;;  %v8473_v20 = vpop.xlane.xlu1 %2027  ;;  %v10676_v8 = vld [vmem:[#allocation166_spill] sm:$0xff] }
 0x24b   :  { %3552 = vst [vmem:[%s9677_s3 + $0x54] sm:$0xff] %v3752_v6  ;;  %3553 = vst [vmem:[%s9677_s3 + $0x5c] sm:$0xf] %v3753_v38  ;;  %v2590_v32 = vmul.f32 %v4327_v54, %v10671_v63  ;;  %v8466_v10 = vmul.f32 %v4328_v58, %v10672_v56  ;;  %v2586_v34 = vmul.f32 %v4329_v33, %v10673_v62  ;;  %v10675_v38 = vld [vmem:[#allocation120_spill] sm:$0xff]  ;;  %v10679_v54 = vld [vmem:[#allocation127_spill] sm:$0xff]  ;;  %4159 = vrcp.f32 %v8473_v20 }
 0x24c   :  { %v3758_v25 = vpack.c.bf16 %v2945_v42, %v2944_v53  ;;  %v3759_v12 = vpack.c.bf16 %v2946_v46, %v2946_v46  ;;  %v2301_v55 = vmul.f32 %v4148_v0, %v2253_v49  ;;  %v2204_v40 = vmul.f32 %v4150_v5, %v8303_v48  ;;  %v4152_v29 = vpop.eup %4151  ;;  %v4330_v17 = vld [vmem:[%s9676_s2 + $0x350] sm:$0xff]  ;;  %v10677_v48 = vld [vmem:[#allocation169_spill] sm:$0xff]  ;;  %v8492_v49 = vpop.xlane.xlu0 %2023  ;;  %2731 = vadd.xlane.f32.xlu1 %v8119_v2 }
 0x24d   :  { %v8477_v6 = vsel %vm2346_vm9, %v2298_v27, 0.0  ;;  %vm2351_vm10 = vcmp.gt.f32.partialorder %v10675_v38, -1e+29  ;;  %v2587_v18 = vmul.f32 %v4330_v17, %v10676_v8  ;;  %v4331_v0 = vld [vmem:[%s9676_s2 + $0x390] sm:$0xff]  ;;  %v10678_v42 = vld [vmem:[#allocation97_spill] sm:$0xff]  ;;  %v4154_v27 = vpop.eup %4153  ;;  %2727 = vadd.xlane.f32.xlu0 %v8166_v15  ;;  %4161 = vrcp.f32 %v8492_v49 }
 0x24e   :  { %10674 = vst [vmem:[#allocation112_spill] sm:$0xff] %v8477_v6  ;;  %v2595_v53 = vmul.f32 %v4331_v0, %v10677_v48  ;;  %v2596_v46 = vmul.f32 %v4332_v30, %v10678_v42  ;;  %3558 = vst [vmem:[%s9677_s3 + $0x78] sm:$0xff] %v3758_v25  ;;  %v2941_v58 = vmul.f32 %v10679_v54, %v8477_v6  ;;  %v10680_v33 = vld [vmem:[#allocation40_spill] sm:$0xff]  ;;  %v10681_v0 = vld [vmem:[#allocation41_spill] sm:$0xff]  ;;  %v8510_v28 = vsel %vm2349_vm7, %v2301_v55, 0.0  ;;  %v8540_v15 = vpop.xlane.xlu1 %2035 }
 0x24f   :  { %3559 = vst [vmem:[%s9677_s3 + $0x80] sm:$0xf] %v3759_v12  ;;  %v2942_v17 = vmul.f32 %v10680_v33, %v8477_v6  ;;  %v2943_v30 = vmul.f32 %v10681_v0, %v8477_v6  ;;  %10682 = vst [vmem:[#allocation109_spill] sm:$0xff] %v8510_v28  ;;  %vm2350_vm4 = vcmp.gt.f32.partialorder %v10683_v7, -1e+29  ;;  %v10684_v25 = vld [vmem:[#allocation42_spill] sm:$0xff]  ;;  %v2207_v0 = vmul.f32 %v4152_v29, %v8337_v35  ;;  %v4156_v55 = vpop.eup %4155 }
 0x250   :  { %v2950_v3 = vmul.f32 %v10684_v25, %v8510_v28  ;;  %v10685_v12 = vld [vmem:[#allocation37_spill] sm:$0xff]  ;;  %v10686_v54 = vld [vmem:[#allocation39_spill] sm:$0xff]  ;;  %v2252_v26 = vsub.f32 2.0, %v2204_v40  ;;  %v2206_v1 = vmul.f32 %v4154_v27, %v8360_v11  ;;  %v8522_v48 = vadd.f32 %v2590_v32, %v8390_v57  ;;  %v10687_v25 = vld [vmem:[#allocation122_spill] sm:$0xff]  ;;  %2739 = vadd.xlane.f32.xlu1 %v8169_v19 }
 0x251   :  { %v2951_v59 = vmul.f32 %v10685_v12, %v8510_v28  ;;  %v2952_v14 = vmul.f32 %v10686_v54, %v8510_v28  ;;  %v3756_v33 = vpack.c.bf16 %v2942_v17, %v2941_v58  ;;  %v3757_v45 = vpack.c.bf16 %v2943_v30, %v2943_v30  ;;  %v10688_v57 = vld [vmem:[#allocation167_spill] sm:$0xff]  ;;  %v10691_v40 = vld [vmem:[#allocation46_spill] sm:$0xff]  ;;  %2735 = vadd.xlane.f32.xlu0 %v8171_v61 }
 0x252   :  { %v2300_v42 = vmul.f32 %v4150_v5, %v2252_v26  ;;  %vm2353_vm14 = vcmp.gt.f32.partialorder %v10687_v25, -1e+29  ;;  %v2255_v35 = vsub.f32 2.0, %v2207_v0  ;;  %v2254_v11 = vsub.f32 2.0, %v2206_v1  ;;  %v4333_v26 = vld [vmem:[%s9676_s2 + $0x358] sm:$0xff]  ;;  %v10692_v58 = vld [vmem:[#allocation47_spill] sm:$0xff] }
 0x253   :  { %v3762_v6 = vpack.c.bf16 %v2951_v59, %v2950_v3  ;;  %v3763_v31 = vpack.c.bf16 %v2952_v14, %v2952_v14  ;;  %3556 = vst [vmem:[%s9677_s3 + $0x6c] sm:$0xff] %v3756_v33  ;;  %3557 = vst [vmem:[%s9677_s3 + $0x74] sm:$0xf] %v3757_v45  ;;  %v8537_v14 = vmul.f32 %v4333_v26, %v10688_v57  ;;  %v10690_v5 = vld [vmem:[#allocation129_spill] sm:$0xff]  ;;  %v4335_v54 = vld [vmem:[%s9676_s2 + $0x380] sm:$0xff]  ;;  %4163 = vrcp.f32 %v8540_v15 }
 0x254   :  { %v2209_v2 = vmul.f32 %v4156_v55, %v8392_v52  ;;  %v8550_v45 = vsel %vm2348_vm5, %v2300_v42, 0.0  ;;  %v2765_v59 = vadd.f32 %v2587_v18, %v2586_v34  ;;  %v8552_v3 = vadd.f32 %v2596_v46, %v2595_v53  ;;  %v8555_v52 = vpop.xlane.xlu0 %2031  ;;  %v4334_v34 = vld [vmem:[%s9676_s2 + $0x378] sm:$0xff]  ;;  %v10693_v18 = vld [vmem:[#allocation99_spill] sm:$0xff]  ;;  %v10697_v1 = vld [vmem:[#allocation48_spill] sm:$0xff]  ;;  %2747 = vadd.xlane.f32.xlu1 %v8173_v4 }
 0x255   :  { %3562 = vst [vmem:[%s9677_s3 + $0x90] sm:$0xff] %v3762_v6  ;;  %3563 = vst [vmem:[%s9677_s3 + $0x98] sm:$0xf] %v3763_v31  ;;  %v2947_v32 = vmul.f32 %v10690_v5, %v8550_v45  ;;  %v2948_v6 = vmul.f32 %v10691_v40, %v8550_v45  ;;  %v2949_v31 = vmul.f32 %v10692_v58, %v8550_v45  ;;  %v4158_v46 = vpop.eup %4157  ;;  %v10696_v33 = vld [vmem:[#allocation171_spill] sm:$0xff]  ;;  %2743 = vadd.xlane.f32.xlu0 %v8217_v16  ;;  %v10707_v16 = vld [vmem:[#allocation53_spill] sm:$0xff] }
 0x256   :  { %10689 = vst [vmem:[#allocation9_spill] sm:$0xff] %v8550_v45  ;;  %v2303_v17 = vmul.f32 %v4152_v29, %v2255_v35  ;;  %v2302_v9 = vmul.f32 %v4154_v27, %v2254_v11  ;;  %v2257_v42 = vsub.f32 2.0, %v2209_v2  ;;  %v2592_v53 = vmul.f32 %v4334_v34, %v10693_v18  ;;  %v10695_v27 = vld [vmem:[#allocation20_spill] sm:$0xff]  ;;  %v10698_v19 = vld [vmem:[#allocation43_spill] sm:$0xff]  ;;  %v10699_v11 = vld [vmem:[#allocation130_spill] sm:$0xff] }
 0x257   :  { %v3760_v30 = vpack.c.bf16 %v2948_v6, %v2947_v32  ;;  %v3761_v12 = vpack.c.bf16 %v2949_v31, %v2949_v31  ;;  %vm2352_vm6 = vcmp.gt.f32.partialorder %v10695_v27, -1e+29  ;;  %v2593_v0 = vmul.f32 %v4335_v54, %v10696_v33  ;;  %v10701_v2 = vld [vmem:[#allocation131_spill] sm:$0xff]  ;;  %v10702_v32 = vld [vmem:[#allocation132_spill] sm:$0xff]  ;;  %v8601_v31 = vpop.xlane.xlu1 %2043  ;;  %v10708_v25 = vld [vmem:[#allocation49_spill] sm:$0xff] }
 0x258   :  { %v8572_v29 = vsel %vm2351_vm10, %v2303_v17, 0.0  ;;  %v8587_v38 = vsel %vm2350_vm4, %v2302_v9, 0.0  ;;  %v10703_v6 = vld [vmem:[#allocation52_spill] sm:$0xff]  ;;  %v2305_v7 = vmul.f32 %v4156_v55, %v2257_v42  ;;  %v2208_v34 = vmul.f32 %v4158_v46, %v8423_v60  ;;  %v4337_v60 = vld [vmem:[%s9676_s2 + $0x3c8] sm:$0xff]  ;;  %2755 = vadd.xlane.f32.xlu1 %v8219_v21 }
 0x259   :  { %10694 = vst [vmem:[#allocation16_spill] sm:$0xff] %v8572_v29  ;;  %v2956_v35 = vmul.f32 %v10697_v1, %v8572_v29  ;;  %v2957_v61 = vmul.f32 %v10698_v19, %v8572_v29  ;;  %v2958_v26 = vmul.f32 %v10699_v11, %v8572_v29  ;;  %10700 = vst [vmem:[#allocation17_spill] sm:$0xff] %v8587_v38  ;;  %v8608_v1 = vpop.xlane.xlu0 %2039  ;;  %2751 = vadd.xlane.f32.xlu0 %v8247_v43  ;;  %v10732_v28 = vld [vmem:[#allocation59_spill] sm:$0xff] }
 0x25a   :  { %3560 = vst [vmem:[%s9677_s3 + $0x84] sm:$0xff] %v3760_v30  ;;  %3561 = vst [vmem:[%s9677_s3 + $0x8c] sm:$0xf] %v3761_v12  ;;  %v2953_v5 = vmul.f32 %v10701_v2, %v8587_v38  ;;  %v2954_v40 = vmul.f32 %v10702_v32, %v8587_v38  ;;  %v2955_v58 = vmul.f32 %v10703_v6, %v8587_v38  ;;  %v4336_v30 = vld [vmem:[%s9676_s2 + $0x3c0] sm:$0xff]  ;;  %v10704_v12 = vld [vmem:[#allocation101_spill] sm:$0xff]  ;;  %v8614_v42 = vsel %vm2353_vm14, %v2305_v7, 0.0 }
 0x25b   :  { %v3766_v17 = vpack.c.bf16 %v2957_v61, %v2956_v35  ;;  %v3767_v9 = vpack.c.bf16 %v2958_v26, %v2958_v26  ;;  %v2601_v54 = vmul.f32 %v4336_v30, %v10704_v12  ;;  %10705 = vst [vmem:[#allocation117_spill] sm:$0xff] %v8614_v42  ;;  %v10706_v35 = vld [vmem:[#allocation102_spill] sm:$0xff]  ;;  %v2962_v4 = vmul.f32 %v10707_v16, %v8614_v42  ;;  %v10709_v26 = vld [vmem:[#allocation133_spill] sm:$0xff]  ;;  %v4339_v7 = vld [vmem:[%s9676_s2 + $0x3a8] sm:$0xff] }
 0x25c   :  { %v3764_v19 = vpack.c.bf16 %v2954_v40, %v2953_v5  ;;  %v3765_v55 = vpack.c.bf16 %v2955_v58, %v2955_v58  ;;  %v2602_v61 = vmul.f32 %v4337_v60, %v10706_v35  ;;  %v2963_v11 = vmul.f32 %v10708_v25, %v8614_v42  ;;  %v4338_v40 = vld [vmem:[%s9676_s2 + $0x3a0] sm:$0xff]  ;;  %2763 = vadd.xlane.f32.xlu1 %v8384_v51 }
 0x25d   :  { %3566 = vst [vmem:[%s9677_s3 + $0xa8] sm:$0xff] %v3766_v17  ;;  %3567 = vst [vmem:[%s9677_s3 + $0xb0] sm:$0xf] %v3767_v9  ;;  %v2964_v2 = vmul.f32 %v10709_v26, %v8614_v42  ;;  %v2256_v5 = vsub.f32 2.0, %v2208_v34  ;;  %v8640_v32 = vadd.f32 %v8522_v48, %v8466_v10  ;;  %v10710_v6 = vld [vmem:[#allocation98_spill] sm:$0xff]  ;;  %v10711_v17 = vld [vmem:[#allocation105_spill] sm:$0xff]  ;;  %v2766_v10 = vadd.f32 %v2765_v59, %v8537_v14  ;;  %v8665_v14 = vpop.xlane.xlu1 %2051 }
 0x25e   :  { %3564 = vst [vmem:[%s9677_s3 + $0x9c] sm:$0xff] %v3764_v19  ;;  %3565 = vst [vmem:[%s9677_s3 + $0xa4] sm:$0xf] %v3765_v55  ;;  %v2597_v58 = vmul.f32 %v4338_v40, %v10710_v6  ;;  %v2598_v9 = vmul.f32 %v4339_v7, %v10711_v17  ;;  %v4340_v34 = vld [vmem:[%s9676_s2 + $0x3b0] sm:$0xff]  ;;  %v10712_v30 = vld [vmem:[#allocation106_spill] sm:$0xff]  ;;  %v3770_v48 = vpack.c.bf16 %v2963_v11, %v2962_v4  ;;  %4165 = vrcp.f32 %v8555_v52 }
 0x25f   :  { %v2599_v19 = vmul.f32 %v4340_v34, %v10712_v30  ;;  %v3771_v55 = vpack.c.bf16 %v2964_v2, %v2964_v2  ;;  %v2304_v60 = vmul.f32 %v4158_v46, %v2256_v5  ;;  %v2773_v25 = vadd.f32 %v2593_v0, %v2592_v53  ;;  %v4341_v26 = vld [vmem:[%s9676_s2 + $0x3f0] sm:$0xff]  ;;  %v10713_v40 = vld [vmem:[#allocation174_spill] sm:$0xff]  ;;  %v4342_v59 = vld [vmem:[%s9676_s2 + $0x3f8] sm:$0xff]  ;;  %v8682_v46 = vpop.xlane.xlu0 %2047  ;;  %v4160_v0 = vpop.eup %4159  ;;  %2759 = vadd.xlane.f32.xlu0 %v8403_v41 }
 0x260   :  { %v8658_v16 = vadd.f32 %v8552_v3, %v2597_v58  ;;  %v2607_v7 = vmul.f32 %v4341_v26, %v10713_v40  ;;  %3570 = vst [vmem:[%s9677_s3 + $0xc0] sm:$0xff] %v3770_v48  ;;  %v2785_v43 = vadd.f32 %v2602_v61, %v2601_v54  ;;  %v10715_v3 = vld [vmem:[#allocation176_spill] sm:$0xff]  ;;  %v10716_v4 = vld [vmem:[#allocation134_spill] sm:$0xff]  ;;  %v10717_v2 = vld [vmem:[#allocation57_spill] sm:$0xff]  ;;  %4167 = vrcp.f32 %v8601_v31  ;;  %2771 = vadd.xlane.f32.xlu1 %v8640_v32 }
 0x261   :  { %3571 = vst [vmem:[%s9677_s3 + $0xc8] sm:$0xf] %v3771_v55  ;;  %v8675_v21 = vsel %vm2352_vm6, %v2304_v60, 0.0  ;;  %v2608_v53 = vmul.f32 %v4342_v59, %v10715_v3  ;;  %v10718_v5 = vld [vmem:[#allocation58_spill] sm:$0xff]  ;;  %v2781_v61 = vadd.f32 %v2599_v19, %v2598_v9  ;;  %v4343_v58 = vld [vmem:[%s9676_s2 + $0x388] sm:$0xff]  ;;  %v10719_v34 = vld [vmem:[#allocation100_spill] sm:$0xff]  ;;  %v2211_v55 = vmul.f32 %v4160_v0, %v8473_v20  ;;  %v4162_v19 = vpop.eup %4161 }
 0x262   :  { %10714 = vst [vmem:[#allocation10_spill] sm:$0xff] %v8675_v21  ;;  %v2959_v11 = vmul.f32 %v10716_v4, %v8675_v21  ;;  %v2960_v27 = vmul.f32 %v10717_v2, %v8675_v21  ;;  %v2961_v54 = vmul.f32 %v10718_v5, %v8675_v21  ;;  %v2594_v48 = vmul.f32 %v4343_v58, %v10719_v34  ;;  %v4344_v60 = vld [vmem:[%s9676_s2 + $0x3d0] sm:$0xff]  ;;  %v10720_v26 = vld [vmem:[#allocation173_spill] sm:$0xff]  ;;  %v10721_v2 = vld [vmem:[#allocation107_spill] sm:$0xff] }
 0x263   :  { %v2603_v59 = vmul.f32 %v4344_v60, %v10720_v26  ;;  %v4345_v4 = vld [vmem:[%s9676_s2 + $0x3b8] sm:$0xff]  ;;  %v10722_v20 = vld [vmem:[#allocation27_spill] sm:$0xff]  ;;  %v2793_v21 = vadd.f32 %v2608_v53, %v2607_v7  ;;  %v2259_v38 = vsub.f32 2.0, %v2211_v55  ;;  %v2210_v60 = vmul.f32 %v4162_v19, %v8492_v49  ;;  %v4346_v41 = vld [vmem:[%s9676_s2 + $0x400] sm:$0xff]  ;;  %2767 = vadd.xlane.f32.xlu0 %v2766_v10 }
 0x264   :  { %v2600_v9 = vmul.f32 %v4345_v4, %v10721_v2  ;;  %v3768_v5 = vpack.c.bf16 %v2960_v27, %v2959_v11  ;;  %v3769_v58 = vpack.c.bf16 %v2961_v54, %v2961_v54  ;;  %vm2355_vm0 = vcmp.gt.f32.partialorder %v10722_v20, -1e+29  ;;  %v4347_v49 = vld [vmem:[%s9676_s2 + $0x3d8] sm:$0xff]  ;;  %v8726_v11 = vpop.xlane.xlu1 %2059  ;;  %v10726_v4 = vld [vmem:[#allocation26_spill] sm:$0xff]  ;;  %2779 = vadd.xlane.f32.xlu1 %v8658_v16 }
 0x265   :  { %v2774_v42 = vadd.f32 %v2773_v25, %v2594_v48  ;;  %v8707_v29 = vadd.f32 %v2785_v43, %v2603_v59  ;;  %v10723_v25 = vld [vmem:[#allocation108_spill] sm:$0xff]  ;;  %v10724_v43 = vld [vmem:[#allocation110_spill] sm:$0xff]  ;;  %v2307_v27 = vmul.f32 %v4160_v0, %v2259_v38  ;;  %v2258_v54 = vsub.f32 2.0, %v2210_v60  ;;  %v10725_v48 = vld [vmem:[#allocation111_spill] sm:$0xff]  ;;  %v8733_v59 = vpop.xlane.xlu0 %2055 }
 0x266   :  { %3568 = vst [vmem:[%s9677_s3 + $0xb4] sm:$0xff] %v3768_v5  ;;  %3569 = vst [vmem:[%s9677_s3 + $0xbc] sm:$0xf] %v3769_v58  ;;  %v8715_v51 = vadd.f32 %v2781_v61, %v2600_v9  ;;  %v2609_v7 = vmul.f32 %v4346_v41, %v10723_v25  ;;  %v2604_v53 = vmul.f32 %v4347_v49, %v10724_v43  ;;  %v4348_v61 = vld [vmem:[%s9676_s2 + $0x3e0] sm:$0xff]  ;;  %4169 = vrcp.f32 %v8608_v1  ;;  %v4349_v38 = vld [vmem:[%s9676_s2 + $0x3e8] sm:$0xff] }
 0x267   :  { %v2605_v55 = vmul.f32 %v4348_v61, %v10725_v48  ;;  %vm2354_vm3 = vcmp.gt.f32.partialorder %v10726_v4, -1e+29  ;;  %v10727_v0 = vld [vmem:[#allocation177_spill] sm:$0xff]  ;;  %v4350_v58 = vld [vmem:[%s9676_s2 + $0x420] sm:$0xff]  ;;  %v8749_v32 = vsel %vm2355_vm0, %v2307_v27, 0.0  ;;  %v2306_v10 = vmul.f32 %v4162_v19, %v2258_v54  ;;  %v4352_v61 = vld [vmem:[%s9676_s2 + $0x408] sm:$0xff]  ;;  %2775 = vadd.xlane.f32.xlu0 %v2774_v42 }
 0x268   :  { %v8737_v9 = vadd.f32 %v2793_v21, %v2609_v7  ;;  %v2606_v5 = vmul.f32 %v4349_v38, %v10727_v0  ;;  %v10728_v60 = vld [vmem:[#allocation178_spill] sm:$0xff]  ;;  %10729 = vst [vmem:[#allocation11_spill] sm:$0xff] %v8749_v32  ;;  %v4351_v21 = vld [vmem:[%s9676_s2 + $0x428] sm:$0xff]  ;;  %v10731_v38 = vld [vmem:[#allocation113_spill] sm:$0xff]  ;;  %4171 = vrcp.f32 %v8665_v14  ;;  %2787 = vadd.xlane.f32.xlu1 %v8707_v29 }
 0x269   :  { %v2613_v41 = vmul.f32 %v4350_v58, %v10728_v60  ;;  %v10730_v7 = vld [vmem:[#allocation179_spill] sm:$0xff]  ;;  %v2610_v45 = vmul.f32 %v4352_v61, %v10731_v38  ;;  %v2968_v58 = vmul.f32 %v10732_v28, %v8749_v32  ;;  %v10733_v20 = vld [vmem:[#allocation54_spill] sm:$0xff]  ;;  %v10734_v19 = vld [vmem:[#allocation56_spill] sm:$0xff]  ;;  %v8771_v0 = vsel %vm2354_vm3, %v2306_v10, 0.0 }
 0x26a   :  { %v2614_v49 = vmul.f32 %v4351_v21, %v10730_v7  ;;  %v2969_v27 = vmul.f32 %v10733_v20, %v8749_v32  ;;  %v2970_v54 = vmul.f32 %v10734_v19, %v8749_v32  ;;  %v4353_v60 = vld [vmem:[%s9676_s2 + $0x410] sm:$0xff]  ;;  %v10735_v21 = vld [vmem:[#allocation114_spill] sm:$0xff]  ;;  %10736 = vst [vmem:[#allocation7_spill] sm:$0xff] %v8771_v0  ;;  %v10737_v61 = vld [vmem:[#allocation33_spill] sm:$0xff]  ;;  %v2789_v38 = vadd.f32 %v2605_v55, %v2604_v53  ;;  %v8784_v53 = vpop.xlane.xlu1 %2067  ;;  %v4164_v55 = vpop.eup %4163 }
 0x26b   :  { %v2611_v7 = vmul.f32 %v4353_v60, %v10735_v21  ;;  %vm2357_vm1 = vcmp.gt.f32.partialorder %v10737_v61, -1e+29  ;;  %v4354_v28 = vld [vmem:[%s9676_s2 + $0x430] sm:$0xff]  ;;  %4173 = vrcp.f32 %v8682_v46  ;;  %v10741_v21 = vld [vmem:[#allocation137_spill] sm:$0xff]  ;;  %2783 = vadd.xlane.f32.xlu0 %v8715_v51 }
 0x26c   :  { %v10738_v20 = vld [vmem:[#allocation180_spill] sm:$0xff]  ;;  %v3774_v19 = vpack.c.bf16 %v2969_v27, %v2968_v58  ;;  %v3775_v60 = vpack.c.bf16 %v2970_v54, %v2970_v54  ;;  %v2801_v16 = vadd.f32 %v2614_v49, %v2613_v41  ;;  %v8794_v54 = vpop.xlane.xlu0 %2063  ;;  %v4356_v49 = vld [vmem:[%s9676_s2 + $0x458] sm:$0xff]  ;;  %4175 = vrcp.f32 %v8726_v11  ;;  %2795 = vadd.xlane.f32.xlu1 %v8737_v9  ;;  %v10757_v9 = vld [vmem:[#allocation142_spill] sm:$0xff] }
 0x26d   :  { %v2615_v48 = vmul.f32 %v4354_v28, %v10738_v20  ;;  %v10739_v4 = vld [vmem:[#allocation136_spill] sm:$0xff]  ;;  %v2966_v28 = vmul.f32 %v10741_v21, %v8771_v0  ;;  %v10742_v20 = vld [vmem:[#allocation138_spill] sm:$0xff]  ;;  %v2213_v21 = vmul.f32 %v4164_v55, %v8540_v15  ;;  %v2797_v41 = vadd.f32 %v2611_v7, %v2610_v45  ;;  %v10761_v30 = vld [vmem:[#allocation45_spill] sm:$0xff] }
 0x26e   :  { %v2965_v10 = vmul.f32 %v10739_v4, %v8771_v0  ;;  %v10740_v32 = vld [vmem:[#allocation32_spill] sm:$0xff]  ;;  %v2967_v43 = vmul.f32 %v10742_v20, %v8771_v0  ;;  %v4166_v4 = vpop.eup %4165  ;;  %3574 = vst [vmem:[%s9677_s3 + $0xd8] sm:$0xff] %v3774_v19  ;;  %3575 = vst [vmem:[%s9677_s3 + $0xe0] sm:$0xf] %v3775_v60  ;;  %v10744_v20 = vld [vmem:[#allocation185_spill] sm:$0xff]  ;;  %4177 = vrcp.f32 %v8733_v59 }
 0x26f   :  { %vm2356_vm11 = vcmp.gt.f32.partialorder %v10740_v32, -1e+29  ;;  %v4355_v42 = vld [vmem:[%s9676_s2 + $0x450] sm:$0xff]  ;;  %v4357_v0 = vld [vmem:[%s9676_s2 + $0x438] sm:$0xff]  ;;  %v2212_v40 = vmul.f32 %v4166_v4, %v8555_v52  ;;  %v4358_v15 = vld [vmem:[%s9676_s2 + $0x440] sm:$0xff]  ;;  %v2261_v60 = vsub.f32 2.0, %v2213_v21  ;;  %v2802_v51 = vadd.f32 %v2801_v16, %v2615_v48  ;;  %v4168_v48 = vpop.eup %4167 }
 0x270   :  { %v10743_v58 = vld [vmem:[#allocation184_spill] sm:$0xff]  ;;  %v3772_v19 = vpack.c.bf16 %v2966_v28, %v2965_v10  ;;  %v3773_v3 = vpack.c.bf16 %v2967_v43, %v2967_v43  ;;  %v10746_v45 = vld [vmem:[#allocation182_spill] sm:$0xff]  ;;  %v10747_v10 = vld [vmem:[#allocation115_spill] sm:$0xff]  ;;  %4179 = vrcp.f32 %v8784_v53  ;;  %vm2361_vm15 = vcmp.gt.f32.partialorder %v10761_v30, -1e+29 }
 0x271   :  { %v2619_v27 = vmul.f32 %v4355_v42, %v10743_v58  ;;  %v2620_v42 = vmul.f32 %v4356_v49, %v10744_v20  ;;  %v10745_v58 = vld [vmem:[#allocation181_spill] sm:$0xff]  ;;  %v2617_v7 = vmul.f32 %v4358_v15, %v10746_v45  ;;  %v2790_v49 = vadd.f32 %v2789_v38, %v2606_v5  ;;  %v10748_v29 = vld [vmem:[#allocation128_spill] sm:$0xff]  ;;  %v4360_v5 = vld [vmem:[%s9676_s2 + $0x460] sm:$0xff]  ;;  %2803 = vadd.xlane.f32.xlu1 %v2802_v51 }
 0x272   :  { %v2616_v25 = vmul.f32 %v4357_v0, %v10745_v58  ;;  %v4359_v0 = vld [vmem:[%s9676_s2 + $0x418] sm:$0xff]  ;;  %3572 = vst [vmem:[%s9677_s3 + $0xcc] sm:$0xff] %v3772_v19  ;;  %3573 = vst [vmem:[%s9677_s3 + $0xd4] sm:$0xf] %v3773_v3  ;;  %v2260_v52 = vsub.f32 2.0, %v2212_v40  ;;  %v10749_v38 = vld [vmem:[#allocation186_spill] sm:$0xff]  ;;  %v8839_v40 = vpop.xlane.xlu1 %2075  ;;  %4181 = vrcp.f32 %v8794_v54 }
 0x273   :  { %v2612_v43 = vmul.f32 %v4359_v0, %v10747_v10  ;;  %v2809_v28 = vadd.f32 %v2620_v42, %v2619_v27  ;;  %vm2359_vm13 = vcmp.gt.f32.partialorder %v10748_v29, -1e+29  ;;  %v2621_v21 = vmul.f32 %v4360_v5, %v10749_v38  ;;  %v4361_v19 = vld [vmem:[%s9676_s2 + $0x448] sm:$0xff]  ;;  %2791 = vadd.xlane.f32.xlu0 %v2790_v49  ;;  %v10772_v30 = vld [vmem:[#allocation70_spill] sm:$0xff] }
 0x274   :  { %v2309_v27 = vmul.f32 %v4164_v55, %v2261_v60  ;;  %v10750_v15 = vld [vmem:[#allocation183_spill] sm:$0xff]  ;;  %v2308_v16 = vmul.f32 %v4166_v4, %v2260_v52  ;;  %v2805_v20 = vadd.f32 %v2617_v7, %v2616_v25  ;;  %v8845_v60 = vpop.xlane.xlu0 %2071  ;;  %v2215_v4 = vmul.f32 %v4168_v48, %v8601_v31  ;;  %v4363_v25 = vld [vmem:[%s9676_s2 + $0x470] sm:$0xff] }
 0x275   :  { %v2798_v42 = vadd.f32 %v2797_v41, %v2612_v43  ;;  %v2618_v3 = vmul.f32 %v4361_v19, %v10750_v15  ;;  %v2810_v0 = vadd.f32 %v2809_v28, %v2621_v21  ;;  %v4362_v5 = vld [vmem:[%s9676_s2 + $0x468] sm:$0xff]  ;;  %v4170_v43 = vpop.eup %4169  ;;  %v10753_v28 = vld [vmem:[#allocation38_spill] sm:$0xff]  ;;  %v10754_v7 = vld [vmem:[#allocation188_spill] sm:$0xff]  ;;  %4183 = vrcp.f32 %v8839_v40 }
 0x276   :  { %v10751_v55 = vld [vmem:[#allocation187_spill] sm:$0xff]  ;;  %v8849_v19 = vsel %vm2357_vm1, %v2309_v27, 0.0  ;;  %vm2358_vm2 = vcmp.gt.f32.partialorder %v10753_v28, -1e+29  ;;  %v2623_v52 = vmul.f32 %v4363_v25, %v10754_v7  ;;  %v10756_v27 = vld [vmem:[#allocation140_spill] sm:$0xff]  ;;  %v8867_v31 = vsel %vm2356_vm11, %v2308_v16, 0.0 }
 0x277   :  { %v2622_v41 = vmul.f32 %v4362_v5, %v10751_v55  ;;  %10752 = vst [vmem:[#allocation116_spill] sm:$0xff] %v8849_v19  ;;  %v10755_v21 = vld [vmem:[#allocation139_spill] sm:$0xff]  ;;  %v2975_v5 = vmul.f32 %v10756_v27, %v8849_v19  ;;  %v2976_v49 = vmul.f32 %v10757_v9, %v8849_v19  ;;  %v10758_v55 = vld [vmem:[#allocation144_spill] sm:$0xff]  ;;  %v10760_v15 = vld [vmem:[#allocation145_spill] sm:$0xff]  ;;  %v2214_v27 = vmul.f32 %v4170_v43, %v8608_v1  ;;  %v4172_v9 = vpop.eup %4171 }
 0x278   :  { %v2974_v61 = vmul.f32 %v10755_v21, %v8849_v19  ;;  %v2971_v38 = vmul.f32 %v10758_v55, %v8867_v31  ;;  %v10759_v25 = vld [vmem:[#allocation60_spill] sm:$0xff]  ;;  %v2973_v45 = vmul.f32 %v10760_v15, %v8867_v31  ;;  %v2263_v21 = vsub.f32 2.0, %v2215_v4  ;;  %2799 = vadd.xlane.f32.xlu0 %v2798_v42  ;;  %v8877_v55 = vpop.xlane.xlu1 %2083  ;;  %v8887_v51 = vpop.xlane.xlu0 %2079  ;;  %v10763_v15 = vld [vmem:[#allocation61_spill] sm:$0xff]  ;;  %v10765_v29 = vld [vmem:[#allocation67_spill] sm:$0xff]  ;;  %2811 = vadd.xlane.f32.xlu1 %v2810_v0 }
 0x279   :  { %v2972_v7 = vmul.f32 %v10759_v25, %v8867_v31  ;;  %v3779_v10 = vpack.c.bf16 %v2976_v49, %v2976_v49  ;;  %v2806_v2 = vadd.f32 %v2805_v20, %v2618_v3  ;;  %v4174_v25 = vpop.eup %4173  ;;  %v2262_v1 = vsub.f32 2.0, %v2214_v27 }
 0x27a   :  { %v3778_v58 = vpack.c.bf16 %v2975_v5, %v2974_v61  ;;  %v3777_v32 = vpack.c.bf16 %v2973_v45, %v2973_v45  ;;  %v2311_v16 = vmul.f32 %v4168_v48, %v2263_v21  ;;  %v2217_v20 = vmul.f32 %v4172_v9, %v8665_v14  ;;  %v4364_v14 = vld [vmem:[%s9676_s2 + $0x478] sm:$0xff]  ;;  %v10764_v48 = vld [vmem:[#allocation62_spill] sm:$0xff]  ;;  %v4176_v27 = vpop.eup %4175 }
 0x27b   :  { %v3776_v19 = vpack.c.bf16 %v2972_v7, %v2971_v38  ;;  %3579 = vst [vmem:[%s9677_s3 + $0xf8] sm:$0xf] %v3779_v10  ;;  %v2813_v45 = vadd.f32 %v2623_v52, %v2622_v41  ;;  %v2216_v10 = vmul.f32 %v4174_v25, %v8682_v46  ;;  %v10762_v38 = vld [vmem:[#allocation189_spill] sm:$0xff]  ;;  %v2310_v4 = vmul.f32 %v4170_v43, %v2262_v1  ;;  %v10766_v46 = vld [vmem:[#allocation44_spill] sm:$0xff] }
 0x27c   :  { %3578 = vst [vmem:[%s9677_s3 + $0xf0] sm:$0xff] %v3778_v58  ;;  %3577 = vst [vmem:[%s9677_s3 + $0xec] sm:$0xf] %v3777_v32  ;;  %v8897_v58 = vsel %vm2359_vm13, %v2311_v16, 0.0  ;;  %v2624_v42 = vmul.f32 %v4364_v14, %v10762_v38  ;;  %v2265_v7 = vsub.f32 2.0, %v2217_v20  ;;  %2807 = vadd.xlane.f32.xlu0 %v2806_v2  ;;  %4185 = vrcp.f32 %v8845_v60  ;;  %v10767_v32 = vld [vmem:[#allocation63_spill] sm:$0xff]  ;;  %v8923_v20 = vpop.xlane.xlu1 %2091 }
 0x27d   :  { %3576 = vst [vmem:[%s9677_s3 + $0xe4] sm:$0xff] %v3776_v19  ;;  %v2980_v3 = vmul.f32 %v10763_v15, %v8897_v58  ;;  %v2981_v41 = vmul.f32 %v10764_v48, %v8897_v58  ;;  %v2982_v19 = vmul.f32 %v10765_v29, %v8897_v58  ;;  %vm2360_vm8 = vcmp.gt.f32.partialorder %v10766_v46, -1e+29  ;;  %v10768_v43 = vld [vmem:[#allocation64_spill] sm:$0xff]  ;;  %v10771_v29 = vld [vmem:[#allocation73_spill] sm:$0xff] }
 0x27e   :  { %v2264_v52 = vsub.f32 2.0, %v2216_v10  ;;  %v8915_v49 = vsel %vm2358_vm2, %v2310_v4, 0.0  ;;  %v2814_v21 = vadd.f32 %v2813_v45, %v2624_v42  ;;  %v2313_v2 = vmul.f32 %v4172_v9, %v2265_v7  ;;  %v4178_v10 = vpop.eup %4177  ;;  %v10769_v45 = vld [vmem:[#allocation51_spill] sm:$0xff] }
 0x27f   :  { %v3782_v61 = vpack.c.bf16 %v2981_v41, %v2980_v3  ;;  %v3783_v5 = vpack.c.bf16 %v2982_v19, %v2982_v19  ;;  %v2977_v16 = vmul.f32 %v10767_v32, %v8915_v49  ;;  %v2978_v1 = vmul.f32 %v10768_v43, %v8915_v49  ;;  %v4180_v48 = vpop.eup %4179  ;;  %v10773_v7 = vld [vmem:[#allocation147_spill] sm:$0xff] }
 0x280   :  { %v2979_v0 = vmul.f32 %v10606_v50, %v8915_v49  ;;  %v2312_v28 = vmul.f32 %v4174_v25, %v2264_v52  ;;  %vm2363_vm12 = vcmp.gt.f32.partialorder %v10769_v45, -1e+29  ;;  %v2219_v14 = vmul.f32 %v4176_v27, %v8726_v11  ;;  %v8934_v50 = vpop.xlane.xlu0 %2087  ;;  %2815 = vadd.xlane.f32.xlu0 %v2814_v21  ;;  %v10770_v25 = vld [vmem:[#allocation72_spill] sm:$0xff] }
 0x281   :  { %3582 = vst [vmem:[%s9677_s3 + $0x108] sm:$0xff] %v3782_v61  ;;  %3583 = vst [vmem:[%s9677_s3 + $0x110] sm:$0xf] %v3783_v5  ;;  %4187 = vrcp.f32 %v8877_v55  ;;  %v3780_v9 = vpack.c.bf16 %v2978_v1, %v2977_v16  ;;  %v8938_v15 = vsel %vm2361_vm15, %v2313_v2, 0.0  ;;  %v2218_v3 = vmul.f32 %v4178_v10, %v8733_v59  ;;  %v8965_v2 = vpop.xlane.xlu1 %2099 }
 0x282   :  { %v3781_v42 = vpack.c.bf16 %v2979_v0, %v2979_v0  ;;  %v2986_v41 = vmul.f32 %v10770_v25, %v8938_v15  ;;  %v2987_v11 = vmul.f32 %v10771_v29, %v8938_v15  ;;  %v2988_v19 = vmul.f32 %v10607_v22, %v8938_v15  ;;  %v10774_v22 = vld [vmem:[#allocation71_spill] sm:$0xff] }
 0x283   :  { %v8949_v4 = vsel %vm2360_vm8, %v2312_v28, 0.0  ;;  %3580 = vst [vmem:[%s9677_s3 + $0xfc] sm:$0xff] %v3780_v9  ;;  %v2267_v46 = vsub.f32 2.0, %v2219_v14  ;;  %v2266_v32 = vsub.f32 2.0, %v2218_v3  ;;  %v2221_v16 = vmul.f32 %v4180_v48, %v8784_v53  ;;  %v10775_v28 = vld [vmem:[#allocation50_spill] sm:$0xff]  ;;  %v10776_v3 = vld [vmem:[#allocation135_spill] sm:$0xff] }
 0x284   :  { %3581 = vst [vmem:[%s9677_s3 + $0x104] sm:$0xf] %v3781_v42  ;;  %v2983_v59 = vmul.f32 %v10772_v30, %v8949_v4  ;;  %v2984_v52 = vmul.f32 %v10773_v7, %v8949_v4  ;;  %v2985_v61 = vmul.f32 %v10774_v22, %v8949_v4  ;;  %v3786_v5 = vpack.c.bf16 %v2987_v11, %v2986_v41  ;;  %v8975_v53 = vpop.xlane.xlu0 %2095  ;;  %v10778_v41 = vld [vmem:[#allocation75_spill] sm:$0xff]  ;;  %v10779_v11 = vld [vmem:[#allocation78_spill] sm:$0xff]  ;;  %v10780_v30 = vld [vmem:[#allocation76_spill] sm:$0xff] }
 0x285   :  { %v3787_v21 = vpack.c.bf16 %v2988_v19, %v2988_v19  ;;  %v2315_v0 = vmul.f32 %v4176_v27, %v2267_v46  ;;  %4189 = vrcp.f32 %v8887_v51  ;;  %vm2362_vm9 = vcmp.gt.f32.partialorder %v10775_v28, -1e+29  ;;  %v4182_v27 = vpop.eup %4181  ;;  %v10781_v7 = vld [vmem:[#allocation79_spill] sm:$0xff]  ;;  %v10782_v22 = vld [vmem:[#allocation77_spill] sm:$0xff] }
 0x286   :  { %v3784_v43 = vpack.c.bf16 %v2984_v52, %v2983_v59  ;;  %v3785_v1 = vpack.c.bf16 %v2985_v61, %v2985_v61  ;;  %3586 = vst [vmem:[%s9677_s3 + $0x120] sm:$0xff] %v3786_v5  ;;  %v2314_v14 = vmul.f32 %v4178_v10, %v2266_v32  ;;  %v2269_v9 = vsub.f32 2.0, %v2221_v16  ;;  %v10777_v10 = vld [vmem:[#allocation55_spill] sm:$0xff]  ;;  %v4184_v25 = vpop.eup %4183 }
 0x287   :  { %3587 = vst [vmem:[%s9677_s3 + $0x128] sm:$0xf] %v3787_v21  ;;  %4191 = vrcp.f32 %v8923_v20  ;;  %v8985_v42 = vsel %vm2363_vm12, %v2315_v0, 0.0  ;;  %vm2365_vm7 = vcmp.gt.f32.partialorder %v10776_v3, -1e+29  ;;  %vm2865_vm15 = vcmask 7168  }
 0x288   :  { %3584 = vst [vmem:[%s9677_s3 + $0x114] sm:$0xff] %v3784_v43  ;;  %3585 = vst [vmem:[%s9677_s3 + $0x11c] sm:$0xf] %v3785_v1  ;;  %vm2364_vm5 = vcmp.gt.f32.partialorder %v10777_v10, -1e+29  ;;  %4193 = vrcp.f32 %v8934_v50  ;;  %v2992_v29 = vmul.f32 %v10778_v41, %v8985_v42  ;;  %v2993_v19 = vmul.f32 %v10779_v11, %v8985_v42  ;;  %v9013_v11 = vpop.xlane.xlu1 %2107  ;;  %v9027_v3 = vpop.xlane.xlu0 %2103 }
 0x289   :  { %v2994_v59 = vmul.f32 %v10780_v30, %v8985_v42  ;;  %v8998_v45 = vsel %vm2362_vm9, %v2314_v14, 0.0  ;;  %v2317_v5 = vmul.f32 %v4180_v48, %v2269_v9  ;;  %v4186_v21 = vpop.eup %4185  ;;  %v2220_v43 = vmul.f32 %v4182_v27, %v8794_v54 }
 0x28a   :  { %v2989_v52 = vmul.f32 %v10781_v7, %v8998_v45  ;;  %v2990_v61 = vmul.f32 %v10782_v22, %v8998_v45  ;;  %v2991_v46 = vmul.f32 %v10613_v24, %v8998_v45  ;;  %v3790_v32 = vpack.c.bf16 %v2993_v19, %v2992_v29  ;;  %v10783_v24 = vld [vmem:[#allocation149_spill] sm:$0xff]  ;;  %v10785_v19 = vld [vmem:[#allocation143_spill] sm:$0xff] }
 0x28b   :  { %v3791_v16 = vpack.c.bf16 %v2994_v59, %v2994_v59  ;;  %v2223_v1 = vmul.f32 %v4184_v25, %v8839_v40  ;;  %v9010_v14 = vsel %vm2365_vm7, %v2317_v5, 0.0  ;;  %v2222_v41 = vmul.f32 %v4186_v21, %v8845_v60  ;;  %v10784_v40 = vld [vmem:[#allocation81_spill] sm:$0xff] }
 0x28c   :  { %v3788_v0 = vpack.c.bf16 %v2990_v61, %v2989_v52  ;;  %v3789_v28 = vpack.c.bf16 %v2991_v46, %v2991_v46  ;;  %3590 = vst [vmem:[%s9677_s3 + $0x138] sm:$0xff] %v3790_v32  ;;  %v2998_v54 = vmul.f32 %v10783_v24, %v9010_v14  ;;  %v2999_v48 = vmul.f32 %v10784_v40, %v9010_v14  ;;  %v10786_v46 = vld [vmem:[#allocation141_spill] sm:$0xff]  ;;  %v9062_v10 = vpop.xlane.xlu1 %2115  ;;  %v10792_v40 = vld [vmem:[#allocation151_spill] sm:$0xff] }
 0x28d   :  { %3591 = vst [vmem:[%s9677_s3 + $0x140] sm:$0xf] %v3791_v16  ;;  %v3000_v9 = vmul.f32 %v7418_v47, %v9010_v14  ;;  %v2268_v60 = vsub.f32 2.0, %v2220_v43  ;;  %vm2367_vm10 = vcmp.gt.f32.partialorder %v10785_v19, -1e+29  ;;  %v2271_v30 = vsub.f32 2.0, %v2223_v1 }
 0x28e   :  { %v4188_v29 = vpop.eup %4187  ;;  %3588 = vst [vmem:[%s9677_s3 + $0x12c] sm:$0xff] %v3788_v0  ;;  %3589 = vst [vmem:[%s9677_s3 + $0x134] sm:$0xf] %v3789_v28  ;;  %v2270_v59 = vsub.f32 2.0, %v2222_v41  ;;  %4195 = vrcp.f32 %v8965_v2  ;;  %v3794_v7 = vpack.c.bf16 %v2999_v48, %v2998_v54  ;;  %vm2366_vm4 = vcmp.gt.f32.partialorder %v10786_v46, -1e+29 }
 0x28f   :  { %v3795_v47 = vpack.c.bf16 %v3000_v9, %v3000_v9  ;;  %v2316_v52 = vmul.f32 %v4182_v27, %v2268_v60  ;;  %v2225_v22 = vmul.f32 %v4188_v29, %v8877_v55  ;;  %v2319_v61 = vmul.f32 %v4184_v25, %v2271_v30  ;;  %v10787_v27 = vld [vmem:[#allocation68_spill] sm:$0xff]  ;;  %v10788_v25 = vld [vmem:[#allocation82_spill] sm:$0xff]  ;;  %v10789_v16 = vld [vmem:[#allocation83_spill] sm:$0xff] }
 0x290   :  { %v2318_v5 = vmul.f32 %v4186_v21, %v2270_v59  ;;  %4197 = vrcp.f32 %v8975_v53  ;;  %3594 = vst [vmem:[%s9677_s3 + $0x150] sm:$0xff] %v3794_v7  ;;  %vm2369_vm14 = vcmp.gt.f32.partialorder %v10787_v27, -1e+29  ;;  %v10790_v1 = vld [vmem:[#allocation84_spill] sm:$0xff]  ;;  %v10791_v24 = vld [vmem:[#allocation85_spill] sm:$0xff]  ;;  %v9074_v59 = vpop.xlane.xlu0 %2111  ;;  %v10800_v27 = vld [vmem:[#allocation66_spill] sm:$0xff] }
 0x291   :  { %3595 = vst [vmem:[%s9677_s3 + $0x158] sm:$0xf] %v3795_v47  ;;  %v9048_v32 = vsel %vm2364_vm5, %v2316_v52, 0.0  ;;  %v2273_v55 = vsub.f32 2.0, %v2225_v22  ;;  %4199 = vrcp.f32 %v9013_v11  ;;  %v9060_v28 = vsel %vm2367_vm10, %v2319_v61, 0.0  ;;  %v10793_v9 = vld [vmem:[#allocation152_spill] sm:$0xff] }
 0x292   :  { %v2995_v21 = vmul.f32 %v10788_v25, %v9048_v32  ;;  %v2996_v43 = vmul.f32 %v10789_v16, %v9048_v32  ;;  %v2997_v0 = vmul.f32 %v10790_v1, %v9048_v32  ;;  %v4190_v41 = vpop.eup %4189  ;;  %v3004_v54 = vmul.f32 %v10791_v24, %v9060_v28  ;;  %v10794_v52 = vld [vmem:[#allocation154_spill] sm:$0xff] }
 0x293   :  { %v3005_v48 = vmul.f32 %v10792_v40, %v9060_v28  ;;  %v3006_v60 = vmul.f32 %v10793_v9, %v9060_v28  ;;  %v9072_v30 = vsel %vm2366_vm4, %v2318_v5, 0.0  ;;  %v10795_v61 = vld [vmem:[#allocation90_spill] sm:$0xff]  ;;  %v10796_v40 = vld [vmem:[#allocation91_spill] sm:$0xff]  ;;  %v2321_v46 = vmul.f32 %v4188_v29, %v2273_v55 }
 0x294   :  { %v4192_v19 = vpop.eup %4191  ;;  %v3792_v7 = vpack.c.bf16 %v2996_v43, %v2995_v21  ;;  %v3793_v47 = vpack.c.bf16 %v2997_v0, %v2997_v0  ;;  %v3001_v22 = vmul.f32 %v10794_v52, %v9072_v30  ;;  %v3002_v25 = vmul.f32 %v10795_v61, %v9072_v30  ;;  %v9118_v61 = vpop.xlane.xlu0 %2119 }
 0x295   :  { %v4194_v16 = vpop.eup %4193  ;;  %v3798_v1 = vpack.c.bf16 %v3005_v48, %v3004_v54  ;;  %v3799_v24 = vpack.c.bf16 %v3006_v60, %v3006_v60  ;;  %v3003_v9 = vmul.f32 %v10796_v40, %v9072_v30  ;;  %v2224_v21 = vmul.f32 %v4190_v41, %v8887_v51  ;;  %v10797_v51 = vld [vmem:[#allocation92_spill] sm:$0xff] }
 0x296   :  { %3592 = vst [vmem:[%s9677_s3 + $0x144] sm:$0xff] %v3792_v7  ;;  %3593 = vst [vmem:[%s9677_s3 + $0x14c] sm:$0xf] %v3793_v47  ;;  %v3796_v5 = vpack.c.bf16 %v3002_v25, %v3001_v22  ;;  %v2227_v43 = vmul.f32 %v4192_v19, %v8923_v20  ;;  %v2226_v0 = vmul.f32 %v4194_v16, %v8934_v50  ;;  %v9099_v55 = vsel %vm2369_vm14, %v2321_v46, 0.0  ;;  %v10798_v50 = vld [vmem:[#allocation87_spill] sm:$0xff]  ;;  %v10799_v48 = vld [vmem:[#allocation88_spill] sm:$0xff]  ;;  %v9111_v47 = vpop.xlane.xlu1 %2123 }
 0x297   :  { %3598 = vst [vmem:[%s9677_s3 + $0x168] sm:$0xff] %v3798_v1  ;;  %3599 = vst [vmem:[%s9677_s3 + $0x170] sm:$0xf] %v3799_v24  ;;  %v3797_v29 = vpack.c.bf16 %v3003_v9, %v3003_v9  ;;  %4201 = vrcp.f32 %v9027_v3  ;;  %v3010_v20 = vmul.f32 %v10797_v51, %v9099_v55  ;;  %v3011_v54 = vmul.f32 %v10798_v50, %v9099_v55  ;;  %v10801_v9 = vld [vmem:[#allocation69_spill] sm:$0xff] }
 0x298   :  { %3596 = vst [vmem:[%s9677_s3 + $0x15c] sm:$0xff] %v3796_v5  ;;  %v3012_v60 = vmul.f32 %v10799_v48, %v9099_v55  ;;  %v2272_v7 = vsub.f32 2.0, %v2224_v21  ;;  %vm2368_vm6 = vcmp.gt.f32.partialorder %v10800_v27, -1e+29  ;;  %v2275_v52 = vsub.f32 2.0, %v2227_v43  ;;  %v10802_v21 = vld [vmem:[#allocation74_spill] sm:$0xff]  ;;  %v9144_v48 = vpop.xlane.xlu0 %2127 }
 0x299   :  { %3597 = vst [vmem:[%s9677_s3 + $0x164] sm:$0xf] %v3797_v29  ;;  %v2274_v22 = vsub.f32 2.0, %v2226_v0  ;;  %4203 = vrcp.f32 %v9062_v10  ;;  %v3802_v25 = vpack.c.bf16 %v3011_v54, %v3010_v20  ;;  %vm2371_vm0 = vcmp.gt.f32.partialorder %v10801_v9, -1e+29  ;;  %v10804_v29 = vld [vmem:[#allocation157_spill] sm:$0xff] }
 0x29a   :  { %v3803_v1 = vpack.c.bf16 %v3012_v60, %v3012_v60  ;;  %v2320_v24 = vmul.f32 %v4190_v41, %v2272_v7  ;;  %4205 = vrcp.f32 %v9074_v59  ;;  %v2323_v46 = vmul.f32 %v4192_v19, %v2275_v52  ;;  %v10805_v20 = vld [vmem:[#allocation158_spill] sm:$0xff]  ;;  %v10806_v7 = vld [vmem:[#allocation159_spill] sm:$0xff]  ;;  %v10807_v27 = vld [vmem:[#allocation93_spill] sm:$0xff] }
 0x29b   :  { %v4196_v40 = vpop.eup %4195  ;;  %v2322_v5 = vmul.f32 %v4194_v16, %v2274_v22  ;;  %4207 = vrcp.f32 %v9111_v47  ;;  %3602 = vst [vmem:[%s9677_s3 + $0x180] sm:$0xff] %v3802_v25  ;;  %vm2370_vm3 = vcmp.gt.f32.partialorder %v10802_v21, -1e+29  ;;  %v10803_v16 = vld [vmem:[#allocation156_spill] sm:$0xff]  ;;  %v9158_v21 = vpop.xlane.xlu1 %2131 }
 0x29c   :  { %3603 = vst [vmem:[%s9677_s3 + $0x188] sm:$0xf] %v3803_v1  ;;  %v9131_v41 = vsel %vm2368_vm6, %v2320_v24, 0.0  ;;  %v2229_v43 = vmul.f32 %v4196_v40, %v8965_v2  ;;  %4209 = vrcp.f32 %v9118_v61  ;;  %v9142_v54 = vsel %vm2371_vm0, %v2323_v46, 0.0 }
 0x29d   :  { %v4198_v19 = vpop.eup %4197  ;;  %v3007_v0 = vmul.f32 %v10803_v16, %v9131_v41  ;;  %v3008_v51 = vmul.f32 %v10804_v29, %v9131_v41  ;;  %v3009_v50 = vmul.f32 %v10805_v20, %v9131_v41  ;;  %v3016_v2 = vmul.f32 %v10806_v7, %v9142_v54 }
 0x29e   :  { %v4200_v60 = vpop.eup %4199  ;;  %v3017_v52 = vmul.f32 %v10807_v27, %v9142_v54  ;;  %v3018_v22 = vmul.f32 %v7551_v13, %v9142_v54  ;;  %v9152_v25 = vsel %vm2370_vm3, %v2322_v5, 0.0  ;;  %v2277_v7 = vsub.f32 2.0, %v2229_v43  ;;  %v10812_v27 = vld [vmem:[#allocation153_spill] sm:$0xff] }
 0x29f   :  { %v3800_v1 = vpack.c.bf16 %v3008_v51, %v3007_v0  ;;  %v3801_v24 = vpack.c.bf16 %v3009_v50, %v3009_v50  ;;  %v3013_v9 = vmul.f32 %v7558_v23, %v9152_v25  ;;  %v3014_v46 = vmul.f32 %v10635_v39, %v9152_v25  ;;  %v10808_v23 = vld [vmem:[#allocation150_spill] sm:$0xff]  ;;  %v10809_v0 = vld [vmem:[#allocation80_spill] sm:$0xff]  ;;  %v9184_v50 = vpop.xlane.xlu0 %2135 }
 0x2a0   :  { %v3806_v16 = vpack.c.bf16 %v3017_v52, %v3016_v2  ;;  %v3807_v29 = vpack.c.bf16 %v3018_v22, %v3018_v22  ;;  %v3015_v20 = vmul.f32 %v10637_v44, %v9152_v25  ;;  %vm2373_vm1 = vcmp.gt.f32.partialorder %v10808_v23, -1e+29  ;;  %v10813_v52 = vld [vmem:[#allocation65_spill] sm:$0xff]  ;;  %v10815_v23 = vld [vmem:[#allocation146_spill] sm:$0xff] }
 0x2a1   :  { %3600 = vst [vmem:[%s9677_s3 + $0x174] sm:$0xff] %v3800_v1  ;;  %3601 = vst [vmem:[%s9677_s3 + $0x17c] sm:$0xf] %v3801_v24  ;;  %v3804_v13 = vpack.c.bf16 %v3014_v46, %v3013_v9  ;;  %v2228_v39 = vmul.f32 %v4198_v19, %v8975_v53  ;;  %v2231_v5 = vmul.f32 %v4200_v60, %v9013_v11  ;;  %vm2372_vm11 = vcmp.gt.f32.partialorder %v10809_v0, -1e+29  ;;  %v10810_v11 = vld [vmem:[#allocation86_spill] sm:$0xff] }
 0x2a2   :  { %3606 = vst [vmem:[%s9677_s3 + $0x198] sm:$0xff] %v3806_v16  ;;  %3607 = vst [vmem:[%s9677_s3 + $0x1a0] sm:$0xf] %v3807_v29  ;;  %v3805_v44 = vpack.c.bf16 %v3015_v20, %v3015_v20  ;;  %v2325_v43 = vmul.f32 %v4196_v40, %v2277_v7  ;;  %4211 = vrcp.f32 %v9158_v21  ;;  %vm2375_vm13 = vcmp.gt.f32.partialorder %v10810_v11, -1e+29  ;;  %v10814_v16 = vld [vmem:[#allocation89_spill] sm:$0xff] }
 0x2a3   :  { %3604 = vst [vmem:[%s9677_s3 + $0x18c] sm:$0xff] %v3804_v13  ;;  %v2276_v53 = vsub.f32 2.0, %v2228_v39  ;;  %v2279_v51 = vsub.f32 2.0, %v2231_v5  ;;  %4213 = vrcp.f32 %v9144_v48  ;;  %vm2374_vm2 = vcmp.gt.f32.partialorder %v10812_v27, -1e+29  ;;  %v10817_v0 = vld [vmem:[#allocation155_spill] sm:$0xff] }
 0x2a4   :  { %v4202_v2 = vpop.eup %4201  ;;  %3605 = vst [vmem:[%s9677_s3 + $0x194] sm:$0xf] %v3805_v44  ;;  %v9191_v40 = vsel %vm2373_vm1, %v2325_v43, 0.0  ;;  %4215 = vrcp.f32 %v9184_v50  ;;  %v2433_v22 = vmul.f32 0.5, %v10813_v52  ;;  %vm2377_vm8 = vcmp.gt.f32.partialorder %v10814_v16, -1e+29 }
 0x2a5   :  { %10811 = vst [vmem:[#allocation160_spill] sm:$0xff] %v9191_v40  ;;  %v3022_v1 = vmul.f32 %v10656_v37, %v9191_v40  ;;  %v3023_v24 = vmul.f32 %v10671_v63, %v9191_v40  ;;  %v3024_v9 = vmul.f32 %v10672_v56, %v9191_v40  ;;  %v2324_v46 = vmul.f32 %v4198_v19, %v2276_v53  ;;  %v9215_v19 = vpop.xlane.xlu1 %2139  ;;  %v9245_v40 = vpop.xlane.xlu0 %2143 }
 0x2a6   :  { %v4204_v29 = vpop.eup %4203  ;;  %v2327_v20 = vmul.f32 %v4200_v60, %v2279_v51  ;;  %v2230_v7 = vmul.f32 %v4202_v2, %v9027_v3  ;;  %v9205_v13 = vmul.f32 0.5, %v8242_v36  ;;  %v9208_v39 = vmul.f32 0.5, %v10815_v23 }
 0x2a7   :  { %v4206_v37 = vpop.eup %4205  ;;  %v3810_v5 = vpack.c.bf16 %v3023_v24, %v3022_v1  ;;  %v3811_v44 = vpack.c.bf16 %v3024_v9, %v3024_v9  ;;  %v9212_v63 = vsel %vm2372_vm11, %v2324_v46, 0.0  ;;  %v2233_v56 = vmul.f32 %v4204_v29, %v9062_v10  ;;  %v10820_v1 = vld [vmem:[#allocation163_spill] sm:$0xff] }
 0x2a8   :  { %10816 = vst [vmem:[#allocation161_spill] sm:$0xff] %v9212_v63  ;;  %v4208_v60 = vpop.eup %4207  ;;  %v3019_v3 = vmul.f32 %v10673_v62, %v9212_v63  ;;  %v3020_v36 = vmul.f32 %v10676_v8, %v9212_v63  ;;  %v3021_v43 = vmul.f32 %v10688_v57, %v9212_v63  ;;  %v9225_v53 = vsel %vm2375_vm13, %v2327_v20, 0.0  ;;  %v10818_v62 = vld [vmem:[#allocation169_spill] sm:$0xff] }
 0x2a9   :  { %vm2376_vm12 = vcmp.gt.f32.partialorder %v10817_v0, -1e+29  ;;  %v9228_v51 = vpop.eup %4209  ;;  %3610 = vst [vmem:[%s9677_s3 + $0x1b0] sm:$0xff] %v3810_v5  ;;  %3611 = vst [vmem:[%s9677_s3 + $0x1b8] sm:$0xf] %v3811_v44  ;;  %v3028_v8 = vmul.f32 %v10818_v62, %v9225_v53  ;;  %v10819_v57 = vld [vmem:[#allocation97_spill] sm:$0xff]  ;;  %v3030_v11 = vmul.f32 %v10710_v6, %v9225_v53  ;;  %v2232_v20 = vmul.f32 %v4206_v37, %v9074_v59  ;;  %v2628_v62 = vpop.xlane.xlu1 %2627 }
 0x2aa   :  { %v3029_v10 = vmul.f32 %v10819_v57, %v9225_v53  ;;  %v2278_v52 = vsub.f32 2.0, %v2230_v7  ;;  %vm2379_vm9 = vcmp.gt.f32.partialorder %v10820_v1, -1e+29  ;;  %v3808_v24 = vpack.c.bf16 %v3020_v36, %v3019_v3  ;;  %v10822_v57 = vld [vmem:[#allocation170_spill] sm:$0xff]  ;;  %v10824_v0 = vld [vmem:[#allocation107_spill] sm:$0xff]  ;;  %v10828_v1 = vld [vmem:[#allocation108_spill] sm:$0xff] }
 0x2ab   :  { %v3809_v9 = vpack.c.bf16 %v3021_v43, %v3021_v43  ;;  %v2281_v46 = vsub.f32 2.0, %v2233_v56  ;;  %v3815_v5 = vpack.c.bf16 %v3030_v11, %v3030_v11  ;;  %v2235_v63 = vmul.f32 %v4208_v60, %v9111_v47  ;;  %v10821_v56 = vld [vmem:[#allocation94_spill] sm:$0xff] }
 0x2ac   :  { %v3814_v23 = vpack.c.bf16 %v3029_v10, %v3028_v8  ;;  %v2326_v44 = vmul.f32 %v4202_v2, %v2278_v52  ;;  %3608 = vst [vmem:[%s9677_s3 + $0x1a4] sm:$0xff] %v3808_v24  ;;  %v2280_v7 = vsub.f32 2.0, %v2232_v20  ;;  %vm2378_vm7 = vcmp.gt.f32.partialorder %v10821_v56, -1e+29  ;;  %v10832_v56 = vld [vmem:[#allocation177_spill] sm:$0xff] }
 0x2ad   :  { %3609 = vst [vmem:[%s9677_s3 + $0x1ac] sm:$0xf] %v3809_v9  ;;  %v2329_v6 = vmul.f32 %v4204_v29, %v2281_v46  ;;  %v2234_v59 = vmul.f32 %v9228_v51, %v9118_v61  ;;  %4217 = vrcp.f32 %v9215_v19  ;;  %3615 = vst [vmem:[%s9677_s3 + $0x1d0] sm:$0xf] %v3815_v5  ;;  %v2283_v2 = vsub.f32 2.0, %v2235_v63  ;;  %v10823_v46 = vld [vmem:[#allocation106_spill] sm:$0xff] }
 0x2ae   :  { %3614 = vst [vmem:[%s9677_s3 + $0x1c8] sm:$0xff] %v3814_v23  ;;  %v9265_v47 = vsel %vm2374_vm2, %v2326_v44, 0.0  ;;  %v2817_v29 = vmul.f32 %v2628_v62, %v2433_v22  ;;  %4219 = vrcp.f32 %v9245_v40  ;;  %v2328_v8 = vmul.f32 %v4206_v37, %v2280_v7  ;;  %v10825_v5 = vld [vmem:[#allocation168_spill] sm:$0xff] }
 0x2af   :  { %v3025_v61 = vmul.f32 %v10693_v18, %v9265_v47  ;;  %v3026_v3 = vmul.f32 %v10696_v33, %v9265_v47  ;;  %v3027_v36 = vmul.f32 %v10719_v34, %v9265_v47  ;;  %v9276_v43 = vsel %vm2377_vm8, %v2329_v6, 0.0  ;;  %v4212_v27 = vpop.eup %4211  ;;  %v2636_v33 = vpop.xlane.xlu1 %2635  ;;  %v10827_v62 = vld [vmem:[#allocation176_spill] sm:$0xff] }
 0x2b0   :  { %v3034_v63 = vmul.f32 %v10704_v12, %v9276_v43  ;;  %v3035_v22 = vmul.f32 %v10706_v35, %v9276_v43  ;;  %v3036_v18 = vmul.f32 %v10720_v26, %v9276_v43  ;;  %vm2381_vm5 = vcmp.gt.f32.partialorder %v10822_v57, -1e+29  ;;  %2866 = vst.msk [vmem:[%s9678_s4] sm:$0xff] %vm2865_vm15, %v2817_v29  ;;  %v2632_v34 = vpop.xlane.xlu0 %2631  ;;  %v4214_v16 = vpop.eup %4213 }
 0x2b1   :  { %v3812_v10 = vpack.c.bf16 %v3026_v3, %v3025_v61  ;;  %v3813_v11 = vpack.c.bf16 %v3027_v36, %v3027_v36  ;;  %v2331_v12 = vmul.f32 %v4208_v60, %v2283_v2  ;;  %v2282_v52 = vsub.f32 2.0, %v2234_v59  ;;  %v4216_v24 = vpop.eup %4215 }
 0x2b2   :  { %v3818_v35 = vpack.c.bf16 %v3035_v22, %v3034_v63  ;;  %v3819_v9 = vpack.c.bf16 %v3036_v18, %v3036_v18  ;;  %v9291_v26 = vsel %vm2376_vm12, %v2328_v8, 0.0  ;;  %v2237_v37 = vmul.f32 %v4212_v27, %v9158_v21  ;;  %v10829_v22 = vld [vmem:[#allocation172_spill] sm:$0xff] }
 0x2b3   :  { %3612 = vst [vmem:[%s9677_s3 + $0x1bc] sm:$0xff] %v3812_v10  ;;  %3613 = vst [vmem:[%s9677_s3 + $0x1c4] sm:$0xf] %v3813_v11  ;;  %v3031_v60 = vmul.f32 %v10711_v17, %v9291_v26  ;;  %v3032_v20 = vmul.f32 %v10823_v46, %v9291_v26  ;;  %v3033_v23 = vmul.f32 %v10824_v0, %v9291_v26  ;;  %v9308_v21 = vsel %vm2379_vm9, %v2331_v12, 0.0  ;;  %v10826_v17 = vld [vmem:[#allocation174_spill] sm:$0xff]  ;;  %v2644_v2 = vpop.xlane.xlu1 %2643  ;;  %v10831_v12 = vld [vmem:[#allocation111_spill] sm:$0xff] }
 0x2b4   :  { %vm2380_vm10 = vcmp.gt.f32.partialorder %v10825_v5, -1e+29  ;;  %3618 = vst [vmem:[%s9677_s3 + $0x1e0] sm:$0xff] %v3818_v35  ;;  %3619 = vst [vmem:[%s9677_s3 + $0x1e8] sm:$0xf] %v3819_v9  ;;  %v3040_v44 = vmul.f32 %v10826_v17, %v9308_v21  ;;  %v3041_v6 = vmul.f32 %v10827_v62, %v9308_v21  ;;  %v3042_v7 = vmul.f32 %v10828_v1, %v9308_v21  ;;  %v2640_v29 = vpop.xlane.xlu0 %2639  ;;  %v10834_v62 = vld [vmem:[#allocation95_spill] sm:$0xff] }
 0x2b5   :  { %v2330_v59 = vmul.f32 %v9228_v51, %v2282_v52  ;;  %v3816_v61 = vpack.c.bf16 %v3032_v20, %v3031_v60  ;;  %v3817_v3 = vpack.c.bf16 %v3033_v23, %v3033_v23  ;;  %v2285_v36 = vsub.f32 2.0, %v2237_v37  ;;  %v10833_v37 = vld [vmem:[#allocation175_spill] sm:$0xff] }
 0x2b6   :  { %v2236_v63 = vmul.f32 %v4214_v16, %v9144_v48  ;;  %vm2382_vm4 = vcmp.gt.f32.partialorder %v10829_v22, -1e+29  ;;  %v3822_v18 = vpack.c.bf16 %v3041_v6, %v3040_v44  ;;  %v3823_v8 = vpack.c.bf16 %v3042_v7, %v3042_v7  ;;  %v10830_v48 = vld [vmem:[#allocation110_spill] sm:$0xff]  ;;  %v10835_v7 = vld [vmem:[#allocation124_spill] sm:$0xff] }
 0x2b7   :  { %v9328_v10 = vsel %vm2378_vm7, %v2330_v59, 0.0  ;;  %v2238_v11 = vmul.f32 %v4216_v24, %v9184_v50  ;;  %3616 = vst [vmem:[%s9677_s3 + $0x1d4] sm:$0xff] %v3816_v61  ;;  %3617 = vst [vmem:[%s9677_s3 + $0x1dc] sm:$0xf] %v3817_v3  ;;  %v2333_v9 = vmul.f32 %v4212_v27, %v2285_v36  ;;  %vm2383_vm14 = vcmp.gt.f32.partialorder %v10833_v37, -1e+29  ;;  %v2652_v0 = vpop.xlane.xlu1 %2651 }
 0x2b8   :  { %v3037_v51 = vmul.f32 %v10830_v48, %v9328_v10  ;;  %v3038_v52 = vmul.f32 %v10831_v12, %v9328_v10  ;;  %v3039_v35 = vmul.f32 %v10832_v56, %v9328_v10  ;;  %3622 = vst [vmem:[%s9677_s3 + $0x1f8] sm:$0xff] %v3822_v18  ;;  %3623 = vst [vmem:[%s9677_s3 + $0x200] sm:$0xf] %v3823_v8  ;;  %v2284_v50 = vsub.f32 2.0, %v2236_v63  ;;  %v2648_v23 = vpop.xlane.xlu0 %2647  ;;  %v10836_v59 = vld [vmem:[#allocation178_spill] sm:$0xff]  ;;  %v10839_v18 = vld [vmem:[#allocation148_spill] sm:$0xff] }
 0x2b9   :  { %v2286_v60 = vsub.f32 2.0, %v2238_v11  ;;  %v2819_v46 = vmul.f32 %v2636_v33, %v9205_v13  ;;  %v2818_v20 = vmul.f32 %v2632_v34, %v9208_v39  ;;  %v9354_v44 = vsel %vm2381_vm5, %v2333_v9, 0.0  ;;  %v10837_v13 = vld [vmem:[#allocation179_spill] sm:$0xff]  ;;  %v10838_v39 = vld [vmem:[#allocation180_spill] sm:$0xff] }
 0x2ba   :  { %v3820_v17 = vpack.c.bf16 %v3038_v52, %v3037_v51  ;;  %v3821_v27 = vpack.c.bf16 %v3039_v35, %v3039_v35  ;;  %v2437_v6 = vmul.f32 0.5, %v10834_v62  ;;  %v4218_v1 = vpop.eup %4217  ;;  %vm2384_vm6 = vcmp.gt.f32.partialorder %v10835_v7, -1e+29  ;;  %v10840_v35 = vld [vmem:[#allocation113_spill] sm:$0xff] }
 0x2bb   :  { %v3046_v61 = vmul.f32 %v10836_v59, %v9354_v44  ;;  %v3047_v33 = vmul.f32 %v10837_v13, %v9354_v44  ;;  %v3048_v34 = vmul.f32 %v10838_v39, %v9354_v44  ;;  %v2332_v3 = vmul.f32 %v4214_v16, %v2284_v50  ;;  %2868 = vst.msk [vmem:[%s9678_s4 + $0x10] sm:$0xff] %vm2865_vm15, %v2819_v46  ;;  %v4220_v57 = vpop.eup %4219  ;;  %v2660_v52 = vpop.xlane.xlu1 %2659  ;;  %v10841_v50 = vld [vmem:[#allocation114_spill] sm:$0xff]  ;;  %v10844_v59 = vld [vmem:[#allocation181_spill] sm:$0xff]  ;;  %v10846_v39 = vld [vmem:[#allocation183_spill] sm:$0xff] }
 0x2bc   :  { %2867 = vst.msk [vmem:[%s9678_s4 + $0x8] sm:$0xff] %vm2865_vm15, %v2818_v20  ;;  %3620 = vst [vmem:[%s9677_s3 + $0x1ec] sm:$0xff] %v3820_v17  ;;  %v2239_v16 = vmul.f32 %v4218_v1, %v9215_v19  ;;  %v2334_v36 = vmul.f32 %v4216_v24, %v2286_v60  ;;  %v2821_v63 = vmul.f32 %v2644_v2, %v2437_v6  ;;  %v2436_v8 = vmul.f32 0.5, %v10839_v18  ;;  %v2656_v56 = vpop.xlane.xlu0 %2655  ;;  %v10842_v24 = vld [vmem:[#allocation115_spill] sm:$0xff]  ;;  %v10845_v13 = vld [vmem:[#allocation182_spill] sm:$0xff] }
 0x2bd   :  { %3621 = vst [vmem:[%s9677_s3 + $0x1f4] sm:$0xf] %v3821_v27  ;;  %v3826_v11 = vpack.c.bf16 %v3047_v33, %v3046_v61  ;;  %v3827_v48 = vpack.c.bf16 %v3048_v34, %v3048_v34  ;;  %v9382_v51 = vsel %vm2380_vm10, %v2332_v3, 0.0  ;;  %v2240_v12 = vmul.f32 %v4220_v57, %v9245_v40  ;;  %v10843_v20 = vld [vmem:[#allocation103_spill] sm:$0xff] }
 0x2be   :  { %v3043_v9 = vmul.f32 %v10840_v35, %v9382_v51  ;;  %v3044_v19 = vmul.f32 %v10841_v50, %v9382_v51  ;;  %v3045_v2 = vmul.f32 %v10842_v24, %v9382_v51  ;;  %v2287_v60 = vsub.f32 2.0, %v2239_v16  ;;  %2870 = vst.msk [vmem:[%s9678_s4 + $0x20] sm:$0xff] %vm2865_vm15, %v2821_v63  ;;  %v10848_v63 = vld [vmem:[#allocation5_spill] sm:$0xff] }
 0x2bf   :  { %3626 = vst [vmem:[%s9677_s3 + $0x210] sm:$0xff] %v3826_v11  ;;  %3627 = vst [vmem:[%s9677_s3 + $0x218] sm:$0xf] %v3827_v48  ;;  %v9403_v40 = vsel %vm2382_vm4, %v2334_v36, 0.0  ;;  %v2288_v5 = vsub.f32 2.0, %v2240_v12  ;;  %v2820_v46 = vmul.f32 %v2640_v29, %v2436_v8  ;;  %v2439_v17 = vmul.f32 0.5, %v10843_v20  ;;  %v2668_v22 = vpop.xlane.xlu1 %2667 }
 0x2c0   :  { %v3824_v27 = vpack.c.bf16 %v3044_v19, %v3043_v9  ;;  %v3825_v62 = vpack.c.bf16 %v3045_v2, %v3045_v2  ;;  %v2335_v6 = vmul.f32 %v4218_v1, %v2287_v60  ;;  %v3049_v61 = vmul.f32 %v10844_v59, %v9403_v40  ;;  %v2664_v16 = vpop.xlane.xlu0 %2663  ;;  %v10849_v8 = vld [vmem:[#allocation3_spill] sm:$0xff]  ;;  %v10850_v11 = vld [vmem:[#allocation184_spill] sm:$0xff]  ;;  %v10851_v12 = vld [vmem:[#allocation185_spill] sm:$0xff] }
 0x2c1   :  { %v3050_v33 = vmul.f32 %v10845_v13, %v9403_v40  ;;  %v3051_v34 = vmul.f32 %v10846_v39, %v9403_v40  ;;  %v2336_v3 = vmul.f32 %v4220_v57, %v2288_v5  ;;  %2869 = vst.msk [vmem:[%s9678_s4 + $0x18] sm:$0xff] %vm2865_vm15, %v2820_v46  ;;  %v2823_v29 = vmul.f32 %v2652_v0, %v2439_v17  ;;  %v10847_v57 = vld [vmem:[#allocation104_spill] sm:$0xff]  ;;  %v10852_v9 = vld [vmem:[#allocation186_spill] sm:$0xff]  ;;  %v10853_v20 = vld [vmem:[#allocation187_spill] sm:$0xff] }
 0x2c2   :  { %3624 = vst [vmem:[%s9677_s3 + $0x204] sm:$0xff] %v3824_v27  ;;  %3625 = vst [vmem:[%s9677_s3 + $0x20c] sm:$0xf] %v3825_v62  ;;  %v9424_v1 = vsel %vm2383_vm14, %v2335_v6, 0.0  ;;  %v2438_v36 = vmul.f32 0.5, %v10847_v57  ;;  %v2441_v18 = vmul.f32 0.5, %v10848_v63 }
 0x2c3   :  { %v2440_v0 = vmul.f32 0.5, %v10849_v8  ;;  %v3052_v48 = vmul.f32 %v10850_v11, %v9424_v1  ;;  %v3053_v35 = vmul.f32 %v10851_v12, %v9424_v1  ;;  %v3054_v50 = vmul.f32 %v10852_v9, %v9424_v1  ;;  %2872 = vst.msk [vmem:[%s9678_s4 + $0x30] sm:$0xff] %vm2865_vm15, %v2823_v29  ;;  %v10854_v27 = vld [vmem:[#allocation188_spill] sm:$0xff]  ;;  %v2676_v6 = vpop.xlane.xlu1 %2675  ;;  %v10857_v39 = vld [vmem:[#allocation109_spill] sm:$0xff] }
 0x2c4   :  { %v3828_v19 = vpack.c.bf16 %v3050_v33, %v3049_v61  ;;  %v3829_v37 = vpack.c.bf16 %v3051_v34, %v3051_v34  ;;  %v9441_v24 = vsel %vm2384_vm6, %v2336_v3, 0.0  ;;  %v2822_v2 = vmul.f32 %v2648_v23, %v2438_v36  ;;  %v2672_v59 = vpop.xlane.xlu0 %2671  ;;  %v10856_v13 = vld [vmem:[#allocation112_spill] sm:$0xff]  ;;  %v10858_v3 = vld [vmem:[#allocation9_spill] sm:$0xff] }
 0x2c5   :  { %v2825_v60 = vmul.f32 %v2660_v52, %v2441_v18  ;;  %v3830_v5 = vpack.c.bf16 %v3053_v35, %v3052_v48  ;;  %v3831_v46 = vpack.c.bf16 %v3054_v50, %v3054_v50  ;;  %v3055_v17 = vmul.f32 %v10853_v20, %v9441_v24  ;;  %v10855_v52 = vld [vmem:[#allocation4_spill] sm:$0xff]  ;;  %v10860_v8 = vld [vmem:[#allocation17_spill] sm:$0xff]  ;;  %v10863_v20 = vld [vmem:[#allocation11_spill] sm:$0xff] }
 0x2c6   :  { %3628 = vst [vmem:[%s9677_s3 + $0x21c] sm:$0xff] %v3828_v19  ;;  %v3056_v62 = vmul.f32 %v10854_v27, %v9441_v24  ;;  %3629 = vst [vmem:[%s9677_s3 + $0x224] sm:$0xf] %v3829_v37  ;;  %v3057_v23 = vmul.f32 %v10762_v38, %v9441_v24  ;;  %v2824_v7 = vmul.f32 %v2656_v56, %v2440_v0  ;;  %v2443_v61 = vmul.f32 0.5, %v10855_v52  ;;  %v10859_v57 = vld [vmem:[#allocation16_spill] sm:$0xff]  ;;  %v10861_v9 = vld [vmem:[#allocation117_spill] sm:$0xff] }
 0x2c7   :  { %2871 = vst.msk [vmem:[%s9678_s4 + $0x28] sm:$0xff] %vm2865_vm15, %v2822_v2  ;;  %2874 = vst.msk [vmem:[%s9678_s4 + $0x40] sm:$0xff] %vm2865_vm15, %v2825_v60  ;;  %v2442_v33 = vmul.f32 0.5, %v10856_v13  ;;  %v2445_v34 = vmul.f32 0.5, %v10857_v39  ;;  %v2444_v29 = vmul.f32 0.5, %v10858_v3  ;;  %v2447_v36 = vmul.f32 0.5, %v10859_v57  ;;  %v2684_v12 = vpop.xlane.xlu1 %2683 }
 0x2c8   :  { %3630 = vst [vmem:[%s9677_s3 + $0x228] sm:$0xff] %v3830_v5  ;;  %3631 = vst [vmem:[%s9677_s3 + $0x230] sm:$0xf] %v3831_v46  ;;  %v3832_v38 = vpack.c.bf16 %v3056_v62, %v3055_v17  ;;  %v3833_v56 = vpack.c.bf16 %v3057_v23, %v3057_v23  ;;  %v2827_v63 = vmul.f32 %v2668_v22, %v2443_v61  ;;  %v2446_v0 = vmul.f32 0.5, %v10860_v8  ;;  %v2680_v35 = vpop.xlane.xlu0 %2679  ;;  %v10862_v19 = vld [vmem:[#allocation10_spill] sm:$0xff]  ;;  %v10864_v27 = vld [vmem:[#allocation7_spill] sm:$0xff] }
 0x2c9   :  { %2873 = vst.msk [vmem:[%s9678_s4 + $0x38] sm:$0xff] %vm2865_vm15, %v2824_v7  ;;  %v2826_v18 = vmul.f32 %v2664_v16, %v2442_v33  ;;  %v2829_v11 = vmul.f32 %v2676_v6, %v2445_v34  ;;  %v2828_v48 = vmul.f32 %v2672_v59, %v2444_v29  ;;  %v2831_v22 = vmul.f32 %v2684_v12, %v2447_v36  ;;  %v10865_v52 = vld [vmem:[#allocation116_spill] sm:$0xff] }
 0x2ca   :  { %3632 = vst [vmem:[%s9677_s3 + $0x234] sm:$0xff] %v3832_v38  ;;  %3633 = vst [vmem:[%s9677_s3 + $0x23c] sm:$0xf] %v3833_v56  ;;  %v2830_v16 = vmul.f32 %v2680_v35, %v2446_v0  ;;  %v2449_v50 = vmul.f32 0.5, %v10861_v9  ;;  %v2448_v37 = vmul.f32 0.5, %v10862_v19  ;;  %v2451_v17 = vmul.f32 0.5, %v10863_v20 }
 0x2cb   :  { %2876 = vst.msk [vmem:[%s9678_s4 + $0x50] sm:$0xff] %vm2865_vm15, %v2827_v63  ;;  %2875 = vst.msk [vmem:[%s9678_s4 + $0x48] sm:$0xff] %vm2865_vm15, %v2826_v18  ;;  %v2692_v2 = vpop.xlane.xlu1 %2691  ;;  %v2450_v62 = vmul.f32 0.5, %v10864_v27  ;;  %v2453_v61 = vmul.f32 0.5, %v10865_v52  ;;  %v2452_v13 = vmul.f32 0.5, %v8867_v31  ;;  %v2455_v3 = vmul.f32 0.5, %v8897_v58 }
 0x2cc   :  { %2878 = vst.msk [vmem:[%s9678_s4 + $0x60] sm:$0xff] %vm2865_vm15, %v2829_v11  ;;  %2877 = vst.msk [vmem:[%s9678_s4 + $0x58] sm:$0xff] %vm2865_vm15, %v2828_v48  ;;  %v2688_v60 = vpop.xlane.xlu0 %2687  ;;  %v2833_v5 = vmul.f32 %v2692_v2, %v2449_v50  ;;  %v2454_v29 = vmul.f32 0.5, %v8915_v49  ;;  %v2457_v63 = vmul.f32 0.5, %v8938_v15  ;;  %v2456_v58 = vmul.f32 0.5, %v8949_v4  ;;  %v10867_v52 = vld [vmem:[#allocation161_spill] sm:$0xff] }
 0x2cd   :  { %2880 = vst.msk [vmem:[%s9678_s4 + $0x70] sm:$0xff] %vm2865_vm15, %v2831_v22  ;;  %2879 = vst.msk [vmem:[%s9678_s4 + $0x68] sm:$0xff] %vm2865_vm15, %v2830_v16  ;;  %v2832_v46 = vmul.f32 %v2688_v60, %v2448_v37  ;;  %v2459_v11 = vmul.f32 0.5, %v8985_v42  ;;  %v2458_v15 = vmul.f32 0.5, %v8998_v45  ;;  %v2461_v22 = vmul.f32 0.5, %v9010_v14 }
 0x2ce   :  { %2882 = vst.msk [vmem:[%s9678_s4 + $0x80] sm:$0xff] %vm2865_vm15, %v2833_v5  ;;  %v2460_v42 = vmul.f32 0.5, %v9048_v32  ;;  %v2463_v19 = vmul.f32 0.5, %v9060_v28  ;;  %v2462_v14 = vmul.f32 0.5, %v9072_v30  ;;  %v2465_v5 = vmul.f32 0.5, %v9099_v55 }
 0x2cf   :  { %2881 = vst.msk [vmem:[%s9678_s4 + $0x78] sm:$0xff] %vm2865_vm15, %v2832_v46  ;;  %v2700_v6 = vpop.xlane.xlu1 %2699  ;;  %v2464_v28 = vmul.f32 0.5, %v9131_v41  ;;  %v2467_v27 = vmul.f32 0.5, %v9142_v54  ;;  %v2466_v55 = vmul.f32 0.5, %v9152_v25  ;;  %v2468_v54 = vmul.f32 0.5, %v10867_v52 }
 0x2d0   :  { %v2696_v59 = vpop.xlane.xlu0 %2695  ;;  %v2835_v23 = vmul.f32 %v2700_v6, %v2451_v17 }
 0x2d1   :  { %v2834_v7 = vmul.f32 %v2696_v59, %v2450_v62 }
 0x2d2   :  { %2884 = vst.msk [vmem:[%s9678_s4 + $0x90] sm:$0xff] %vm2865_vm15, %v2835_v23  ;;  %v10866_v23 = vld [vmem:[#allocation160_spill] sm:$0xff] }
 0x2d3   :  { %2883 = vst.msk [vmem:[%s9678_s4 + $0x88] sm:$0xff] %vm2865_vm15, %v2834_v7  ;;  %v2708_v33 = vpop.xlane.xlu1 %2707  ;;  %v2469_v7 = vmul.f32 0.5, %v10866_v23 }
 0x2d4   :  { %v2704_v38 = vpop.xlane.xlu0 %2703  ;;  %v2837_v39 = vmul.f32 %v2708_v33, %v2453_v61 }
 0x2d5   :  { %v2836_v34 = vmul.f32 %v2704_v38, %v2452_v13  ;;  %v2471_v38 = vmul.f32 0.5, %v9225_v53  ;;  %v2472_v53 = vmul.f32 0.5, %v9291_v26 }
 0x2d6   :  { %2886 = vst.msk [vmem:[%s9678_s4 + $0xa0] sm:$0xff] %vm2865_vm15, %v2837_v39  ;;  %v2470_v39 = vmul.f32 0.5, %v9265_v47 }
 0x2d7   :  { %2885 = vst.msk [vmem:[%s9678_s4 + $0x98] sm:$0xff] %vm2865_vm15, %v2836_v34  ;;  %v2716_v57 = vpop.xlane.xlu1 %2715 }
 0x2d8   :  { %v2712_v31 = vpop.xlane.xlu0 %2711  ;;  %v2839_v36 = vmul.f32 %v2716_v57, %v2455_v3 }
 0x2d9   :  { %v2838_v56 = vmul.f32 %v2712_v31, %v2454_v29  ;;  %v2473_v31 = vmul.f32 0.5, %v9276_v43  ;;  %v2474_v43 = vmul.f32 0.5, %v9328_v10 }
 0x2da   :  { %2888 = vst.msk [vmem:[%s9678_s4 + $0xb0] sm:$0xff] %vm2865_vm15, %v2839_v36 }
 0x2db   :  { %2887 = vst.msk [vmem:[%s9678_s4 + $0xa8] sm:$0xff] %vm2865_vm15, %v2838_v56  ;;  %v2724_v18 = vpop.xlane.xlu1 %2723 }
 0x2dc   :  { %v2720_v49 = vpop.xlane.xlu0 %2719  ;;  %v2841_v8 = vmul.f32 %v2724_v18, %v2457_v63 }
 0x2dd   :  { %v2840_v0 = vmul.f32 %v2720_v49, %v2456_v58  ;;  %v2475_v58 = vmul.f32 0.5, %v9308_v21  ;;  %v2476_v21 = vmul.f32 0.5, %v9382_v51 }
 0x2de   :  { %2890 = vst.msk [vmem:[%s9678_s4 + $0xc0] sm:$0xff] %vm2865_vm15, %v2841_v8 }
 0x2df   :  { %2889 = vst.msk [vmem:[%s9678_s4 + $0xb8] sm:$0xff] %vm2865_vm15, %v2840_v0  ;;  %v2732_v48 = vpop.xlane.xlu1 %2731  ;;  %v2477_v0 = vmul.f32 0.5, %v9354_v44  ;;  %v2478_v44 = vmul.f32 0.5, %v9403_v40 }
 0x2e0   :  { %v2728_v4 = vpop.xlane.xlu0 %2727  ;;  %v2843_v12 = vmul.f32 %v2732_v48, %v2459_v11 }
 0x2e1   :  { %v2842_v35 = vmul.f32 %v2728_v4, %v2458_v15  ;;  %v2479_v4 = vmul.f32 0.5, %v9424_v1 }
 0x2e2   :  { %2892 = vst.msk [vmem:[%s9678_s4 + $0xd0] sm:$0xff] %vm2865_vm15, %v2843_v12 }
 0x2e3   :  { %2891 = vst.msk [vmem:[%s9678_s4 + $0xc8] sm:$0xff] %vm2865_vm15, %v2842_v35  ;;  %v2740_v16 = vpop.xlane.xlu1 %2739 }
 0x2e4   :  { %v2736_v45 = vpop.xlane.xlu0 %2735  ;;  %v2845_v9 = vmul.f32 %v2740_v16, %v2461_v22 }
 0x2e5   :  { %v2844_v50 = vmul.f32 %v2736_v45, %v2460_v42  ;;  %v2480_v42 = vmul.f32 0.5, %v9441_v24 }
 0x2e6   :  { %2894 = vst.msk [vmem:[%s9678_s4 + $0xe0] sm:$0xff] %vm2865_vm15, %v2845_v9 }
 0x2e7   :  { %2893 = vst.msk [vmem:[%s9678_s4 + $0xd8] sm:$0xff] %vm2865_vm15, %v2844_v50  ;;  %v2748_v37 = vpop.xlane.xlu1 %2747 }
 0x2e8   :  { %v2744_v32 = vpop.xlane.xlu0 %2743  ;;  %v2847_v2 = vmul.f32 %v2748_v37, %v2463_v19 }
 0x2e9   :  { %v2846_v60 = vmul.f32 %v2744_v32, %v2462_v14 }
 0x2ea   :  { %2896 = vst.msk [vmem:[%s9678_s4 + $0xf0] sm:$0xff] %vm2865_vm15, %v2847_v2 }
 0x2eb   :  { %2895 = vst.msk [vmem:[%s9678_s4 + $0xe8] sm:$0xff] %vm2865_vm15, %v2846_v60  ;;  %v2756_v46 = vpop.xlane.xlu1 %2755 }
 0x2ec   :  { %v2752_v30 = vpop.xlane.xlu0 %2751  ;;  %v2849_v20 = vmul.f32 %v2756_v46, %v2465_v5 }
 0x2ed   :  { %v2848_v17 = vmul.f32 %v2752_v30, %v2464_v28 }
 0x2ee   :  { %2898 = vst.msk [vmem:[%s9678_s4 + $0x100] sm:$0xff] %vm2865_vm15, %v2849_v20 }
 0x2ef   :  { %2897 = vst.msk [vmem:[%s9678_s4 + $0xf8] sm:$0xff] %vm2865_vm15, %v2848_v17  ;;  %v2764_v62 = vpop.xlane.xlu1 %2763 }
 0x2f0   :  { %v2760_v41 = vpop.xlane.xlu0 %2759  ;;  %v2851_v6 = vmul.f32 %v2764_v62, %v2467_v27 }
 0x2f1   :  { %v2850_v59 = vmul.f32 %v2760_v41, %v2466_v55 }
 0x2f2   :  { %2900 = vst.msk [vmem:[%s9678_s4 + $0x110] sm:$0xff] %vm2865_vm15, %v2851_v6 }
 0x2f3   :  { %2899 = vst.msk [vmem:[%s9678_s4 + $0x108] sm:$0xff] %vm2865_vm15, %v2850_v59  ;;  %v2772_v61 = vpop.xlane.xlu1 %2771 }
 0x2f4   :  { %v2768_v25 = vpop.xlane.xlu0 %2767  ;;  %v2853_v13 = vmul.f32 %v2772_v61, %v2469_v7 }
 0x2f5   :  { %v2852_v33 = vmul.f32 %v2768_v25, %v2468_v54 }
 0x2f6   :  { %2902 = vst.msk [vmem:[%s9678_s4 + $0x120] sm:$0xff] %vm2865_vm15, %v2853_v13 }
 0x2f7   :  { %2901 = vst.msk [vmem:[%s9678_s4 + $0x118] sm:$0xff] %vm2865_vm15, %v2852_v33  ;;  %v2780_v34 = vpop.xlane.xlu1 %2779 }
 0x2f8   :  { %v2776_v3 = vpop.xlane.xlu0 %2775  ;;  %v2855_v29 = vmul.f32 %v2780_v34, %v2471_v38 }
 0x2f9   :  { %v2854_v57 = vmul.f32 %v2776_v3, %v2470_v39 }
 0x2fa   :  { %2904 = vst.msk [vmem:[%s9678_s4 + $0x130] sm:$0xff] %vm2865_vm15, %v2855_v29 }
 0x2fb   :  { %2903 = vst.msk [vmem:[%s9678_s4 + $0x128] sm:$0xff] %vm2865_vm15, %v2854_v57  ;;  %v2788_v36 = vpop.xlane.xlu1 %2787 }
 0x2fc   :  { %v2784_v47 = vpop.xlane.xlu0 %2783  ;;  %v2857_v56 = vmul.f32 %v2788_v36, %v2473_v31 }
 0x2fd   :  { %v2856_v63 = vmul.f32 %v2784_v47, %v2472_v53 }
 0x2fe   :  { %2906 = vst.msk [vmem:[%s9678_s4 + $0x140] sm:$0xff] %vm2865_vm15, %v2857_v56 }
 0x2ff   :  { %2905 = vst.msk [vmem:[%s9678_s4 + $0x138] sm:$0xff] %vm2865_vm15, %v2856_v63  ;;  %v2796_v18 = vpop.xlane.xlu1 %2795 }
 0x300   :  { %v2792_v26 = vpop.xlane.xlu0 %2791  ;;  %v2859_v49 = vmul.f32 %v2796_v18, %v2475_v58 }
 0x301   :  { %v2858_v8 = vmul.f32 %v2792_v26, %v2474_v43 }
 0x302   :  { %2908 = vst.msk [vmem:[%s9678_s4 + $0x150] sm:$0xff] %vm2865_vm15, %v2859_v49 }
 0x303   :  { %2907 = vst.msk [vmem:[%s9678_s4 + $0x148] sm:$0xff] %vm2865_vm15, %v2858_v8  ;;  %v2804_v11 = vpop.xlane.xlu1 %2803 }
 0x304   :  { %v2800_v10 = vpop.xlane.xlu0 %2799  ;;  %v2861_v15 = vmul.f32 %v2804_v11, %v2477_v0 }
 0x305   :  { %v2860_v48 = vmul.f32 %v2800_v10, %v2476_v21 }
 0x306   :  { %2910 = vst.msk [vmem:[%s9678_s4 + $0x160] sm:$0xff] %vm2865_vm15, %v2861_v15 }
 0x307   :  { %2909 = vst.msk [vmem:[%s9678_s4 + $0x158] sm:$0xff] %vm2865_vm15, %v2860_v48  ;;  %v2812_v12 = vpop.xlane.xlu1 %2811 }
 0x308   :  { %v2808_v51 = vpop.xlane.xlu0 %2807  ;;  %v2863_v35 = vmul.f32 %v2812_v12, %v2479_v4 }
 0x309   :  { %v2862_v22 = vmul.f32 %v2808_v51, %v2478_v44 }
 0x30a   :  { %2912 = vst.msk [vmem:[%s9678_s4 + $0x170] sm:$0xff] %vm2865_vm15, %v2863_v35 }
 0x30b   :  { %2911 = vst.msk [vmem:[%s9678_s4 + $0x168] sm:$0xff] %vm2865_vm15, %v2862_v22 }
 0x30c   :  { %v2816_v16 = vpop.xlane.xlu0 %2815 }
 0x30d   :  { %v2864_v1 = vmul.f32 %v2816_v16, %v2480_v42 }
 0x30f   :  { %2913 = vst.msk [vmem:[%s9678_s4 + $0x178] sm:$0xff] %vm2865_vm15, %v2864_v1 }

</bundles_post_ra>
